<compile_context>
chip_gen: v5e
topology: v5e:2x2
jax: 0.10.0
libtpu: 0.0.40
codegen_flags: <defaults>
</compile_context>

<pallas_src>
import numpy as np
import jax
import jax.numpy as jnp
from jax.experimental import pallas as pl
from jax.experimental.pallas import tpu as pltpu

KSIZES = (1, 3, 5, 10)
KMAX = 10
PAD_L, PAD_R = 4, 5          # PyTorch 'same' padding for the even kernel K=10
C_CONV = 22                  # channels of each conv branch
C_TD = 30                    # channels after the time-distributed Conv2d
H_GRU = 32
N_BLOCKS = 4
N_GRU = 3

# MXU-native operand dtype for every matmul (accumulation stays f32 via
# preferred_element_type).  Set to jnp.float32 for bit-accurate f32 matmuls.
MATMUL_DTYPE = jnp.bfloat16


# ----------------------------------------------------------------------------
# Fused encoder kernel (whole lane-packed batch shard per grid step)
# ----------------------------------------------------------------------------
def _encoder_kernel(x_ref, *refs):
    """refs = [8 pooling selectors] + [30 packed weights] + [out] + [y1, y2]."""
    sels = refs[:2 * N_BLOCKS]
    w = refs[2 * N_BLOCKS:-3]
    out_ref = refs[-3]
    y1_ref, y2_ref = refs[-2], refs[-1]

    Bs = x_ref.shape[0]
    T = x_ref.shape[2]

    # Batch-major activation matrix: cur[:, b*T + s] = x[b, :, s]   -> (6, Bs*T)
    cur = jnp.concatenate([x_ref[b] for b in range(Bs)], axis=1)

    # ---- 4 conv blocks ------------------------------------------------------
    t = T
    for blk in range(N_BLOCKS):
        wf = w[4 * blk][...]           # (88, KMAX*cin)  all 4 branches, taps fused
        bbig = w[4 * blk + 1][...]     # (88, 1)
        wtd = w[4 * blk + 2][...]      # (30, 88)
        btd = w[4 * blk + 3][...]      # (30, 1)
        cin = cur.shape[0]
        tp = t + KMAX - 1

        # 'same' halo (left 4 / right 5) per batch element: zero-concat, no matmul
        zl = jnp.zeros((cin, PAD_L), cur.dtype)
        zr = jnp.zeros((cin, PAD_R), cur.dtype)
        pieces = []
        for b in range(Bs):
            pieces += [zl, cur[:, b * t:(b + 1) * t], zr]
        xp = jnp.concatenate(pieces, axis=1)                  # (cin, Bs*tp)

        # im2col stack: row (off*cin + c), column (b*t + s) = xp[c, b*tp + off + s]
        col = jnp.concatenate(
            [jnp.concatenate([xp[:, b * tp + off:b * tp + off + t]
                              for b in range(Bs)], axis=1)
             for off in range(KMAX)], axis=0)                 # (KMAX*cin, Bs*t)

        # All four 'same' convs (K = 1,3,5,10) in ONE matmul, contraction 10*cin
        conv = jnp.dot(wf, col.astype(wf.dtype),
                       preferred_element_type=jnp.float32) + bbig
        a = jnp.maximum(conv, 0.0)                            # (88, Bs*t)  ReLU

        # MaxPool1d(2) = max of two exact 0/1 gather matmuls (block-diag over batch)
        se = sels[2 * blk][...]
        so = sels[2 * blk + 1][...]
        ab = a.astype(se.dtype)
        pooled = jnp.maximum(
            jnp.dot(ab, se, preferred_element_type=jnp.float32),
            jnp.dot(ab, so, preferred_element_type=jnp.float32))   # (88, Bs*t//2)

        # time-distributed Conv2d(1, 30, (88, 1)) == matmul over the 88 channels
        cur = jnp.maximum(
            jnp.dot(wtd, pooled.astype(wtd.dtype),
                    preferred_element_type=jnp.float32) + btd, 0.0)  # (30, Bs*t//2)
        t //= 2

    tf = t                                                    # == T // 16

    # batch-major -> time-major columns for the GRUs: x_tm[:, s*Bs + b]
    # (tf*Bs is tiny here; for large T replace with one host-built permutation matmul)
    x_tm = jnp.concatenate(
        [cur[:, b * tf + s:b * tf + s + 1]
         for s in range(tf) for b in range(Bs)], axis=1)      # (30, Bs*tf)

    # ---- 3 GRU layers (PyTorch [r, z, n] gate order) ------------------------
    gw = w[4 * N_BLOCKS:4 * N_BLOCKS + 4 * N_GRU]

    def gru_layer(X, wih, whh, bih, bhh, y_ref):
        H = whh.shape[1]
        # input->hidden for ALL timesteps hoisted out of the recurrence
        gi_all = jnp.dot(wih, X.astype(wih.dtype),
                         preferred_element_type=jnp.float32) + bih    # (3H, Bs*tf)
        h = jnp.zeros((H, Bs), jnp.float32)
        for s in range(tf):          # tiny static trip count (T // 16)
            gi = gi_all[:, s * Bs:(s + 1) * Bs]
            gh = jnp.dot(whh, h.astype(whh.dtype),
                         preferred_element_type=jnp.float32) + bhh    # (3H, Bs)
            r = jax.nn.sigmoid(gi[0:H] + gh[0:H])
            z = jax.nn.sigmoid(gi[H:2 * H] + gh[H:2 * H])
            n = jnp.tanh(gi[2 * H:3 * H] + r * gh[2 * H:3 * H])
            h = (1.0 - z) * n + z * h
            if y_ref is not None:
                y_ref[:, s * Bs:(s + 1) * Bs] = h             # layer output -> VMEM scratch
        return h

    gru_layer(x_tm, gw[0][...], gw[1][...], gw[2][...], gw[3][...], y1_ref)
    gru_layer(y1_ref[...], gw[4][...], gw[5][...], gw[6][...], gw[7][...], y2_ref)
    h_last = gru_layer(y2_ref[...], gw[8][...], gw[9][...], gw[10][...], gw[11][...], None)

    # ---- merged dense heads (mean ++ log_var in one matmul) -----------------
    wmv = w[-2][...]                  # (2*latent, H)
    bmv = w[-1][...]                  # (2*latent, 1)
    out_ref[0] = jnp.dot(wmv, h_last.astype(wmv.dtype),
                         preferred_element_type=jnp.float32) + bmv


def _const_spec(a):
    return pl.BlockSpec(a.shape, lambda i, _nd=a.ndim: (0,) * _nd)


def _pool_selectors(Bs, T, dtype):
    """Host-built block-diagonal even/odd MaxPool1d(2) selectors, one pair per block."""
    sels = []
    t = T
    for _ in range(N_BLOCKS):
        se = np.zeros((Bs * t, Bs * (t // 2)), np.float32)
        so = np.zeros_like(se)
        for b in range(Bs):
            for j in range(t // 2):
                se[b * t + 2 * j, b * (t // 2) + j] = 1.0
                so[b * t + 2 * j + 1, b * (t // 2) + j] = 1.0
        sels += [jnp.asarray(se, dtype=dtype), jnp.asarray(so, dtype=dtype)]
        t //= 2
    return sels


def encoder_forward(packed, x, num_shards=1):
    """packed: tuple of 30 pre-packed weight arrays; x: (B, 6, T), T % 16 == 0.

    num_shards=1 runs the whole lane-packed batch in a single grid step —
    optimal on single-TensorCore chips (v5e/v6e).  On v7x pass num_shards=2 to
    shard the batch across the two TensorCores ("parallel" grid axis), each
    core still processing B/2 lane-packed elements.
    """
    B, c0, T = x.shape
    assert T % 16 == 0 and B % num_shards == 0
    Bs = B // num_shards
    tf = T // 16
    two_latent = packed[-2].shape[0]
    latent = two_latent // 2
    mat_dtype = packed[0].dtype

    sels = _pool_selectors(Bs, T, mat_dtype)
    args = sels + list(packed)

    out = pl.pallas_call(
        _encoder_kernel,
        out_shape=jax.ShapeDtypeStruct((num_shards, two_latent, Bs), jnp.float32),
        grid=(num_shards,),
        in_specs=([pl.BlockSpec((Bs, c0, T), lambda i: (i, 0, 0))]
                  + [_const_spec(a) for a in args]),
        out_specs=pl.BlockSpec((1, two_latent, Bs), lambda i: (i, 0, 0)),
        scratch_shapes=[pltpu.VMEM((H_GRU, Bs * tf), jnp.float32),
                        pltpu.VMEM((H_GRU, Bs * tf), jnp.float32)],
        compiler_params=pltpu.CompilerParams(
            dimension_semantics=("parallel",)),
    )(x, *args)

    flat = jnp.transpose(out, (0, 2, 1)).reshape(B, two_latent)   # (B, 2*latent)
    z_mean = flat[:, :latent]
    z_log_var = flat[:, latent:]
    z = z_mean                                    # Sampling() returns z_mean
    return z_mean, z_log_var, z


# ----------------------------------------------------------------------------
# Parameter init (raw, PyTorch-like layout) and host-side packing for the kernel
# ----------------------------------------------------------------------------
def _uniform(key, shape, fan_in):
    bound = 1.0 / (float(fan_in) ** 0.5)
    return jax.random.uniform(key, shape, jnp.float32, -bound, bound)


def init_encoder_params(key, latent_dim):
    params = {'blocks': [], 'gru': [], 'dense': {}}
    keys = iter(jax.random.split(key, 128))
    nxt = lambda: next(keys)

    for cin in [6, 30, 30, 30]:
        convs = {}
        for K in KSIZES:
            fan_in = cin * K
            convs[K] = (_uniform(nxt(), (C_CONV, cin, K), fan_in),   # torch Conv1d
                        _uniform(nxt(), (C_CONV,), fan_in))
        wtd = _uniform(nxt(), (C_TD, 1, 4 * C_CONV, 1), 4 * C_CONV).reshape(C_TD, 4 * C_CONV)
        btd = _uniform(nxt(), (C_TD,), 4 * C_CONV)
        params['blocks'].append({'convs': convs, 'wtd': wtd, 'btd': btd})

    h_last = max(H_GRU, latent_dim)
    for din, h in [(C_TD, H_GRU), (H_GRU, H_GRU), (H_GRU, h_last)]:
        params['gru'].append({
            'w_ih': _uniform(nxt(), (3 * h, din), h),   # torch [r, z, n] stacking
            'w_hh': _uniform(nxt(), (3 * h, h), h),
            'b_ih': _uniform(nxt(), (3 * h,), h),
            'b_hh': _uniform(nxt(), (3 * h,), h),
        })

    params['dense'] = {
        'wm': _uniform(nxt(), (latent_dim, h_last), h_last),
        'bm': _uniform(nxt(), (latent_dim,), h_last),
        'wv': _uniform(nxt(), (latent_dim, h_last), h_last),
        'bv': _uniform(nxt(), (latent_dim,), h_last),
    }
    return params


def pack_encoder_params(params, dtype=MATMUL_DTYPE):
    """Pack raw (torch-layout) params into the kernel's argument list."""
    args = []
    for blk in params['blocks']:
        cin = blk['convs'][KSIZES[0]][0].shape[1]
        wtaps = jnp.zeros((KMAX, 4 * C_CONV, cin), jnp.float32)
        biases = []
        for bi, K in enumerate(KSIZES):
            wK, bK = blk['convs'][K]                   # (22, cin, K), (22,)
            L = (K - 1) // 2
            for k in range(K):
                off = PAD_L - L + k                    # tap position in the K=10 halo
                wtaps = wtaps.at[off, bi * C_CONV:(bi + 1) * C_CONV, :].set(wK[:, :, k])
            biases.append(bK)
        # fuse the 10 taps into ONE contraction: row layout of im2col is off*cin + c
        w_fused = jnp.transpose(wtaps, (1, 0, 2)).reshape(4 * C_CONV, KMAX * cin)
        bbig = jnp.concatenate(biases).reshape(4 * C_CONV, 1)
        args += [w_fused.astype(dtype), bbig,
                 blk['wtd'].astype(dtype), blk['btd'].reshape(C_TD, 1)]

    for p in params['gru']:
        h = p['w_hh'].shape[1]
        args += [p['w_ih'].astype(dtype), p['w_hh'].astype(dtype),
                 p['b_ih'].reshape(3 * h, 1), p['b_hh'].reshape(3 * h, 1)]

    d = params['dense']
    wmv = jnp.concatenate([d['wm'], d['wv']], axis=0).astype(dtype)   # (2*latent, H)
    bmv = jnp.concatenate([d['bm'], d['bv']]).reshape(-1, 1)          # (2*latent, 1)
    args += [wmv, bmv]
    return tuple(args)


# ----------------------------------------------------------------------------
# Pure-JAX f32 reference (numerical sanity check against the kernel)
# ----------------------------------------------------------------------------
def _ref_forward(params, x):
    def conv1d_same(x, w, b, K):
        L = (K - 1) // 2
        out = jax.lax.conv_general_dilated(
            x, w, window_strides=(1,), padding=[(L, K - 1 - L)],
            dimension_numbers=('NCH', 'OIH', 'NCH'))
        return out + b.reshape(1, -1, 1)

    def block(x, blk):
        pooled = []
        for K in KSIZES:
            w, b = blk['convs'][K]
            a = jax.nn.relu(conv1d_same(x, w, b, K))
            a = jnp.max(a.reshape(a.shape[0], a.shape[1], a.shape[2] // 2, 2), axis=-1)
            pooled.append(a)
        cat = jnp.concatenate(pooled, axis=1)                        # (B, 88, t//2)
        td = jnp.einsum('oc,bct->bot', blk['wtd'], cat) + blk['btd'].reshape(1, C_TD, 1)
        return jax.nn.relu(td)

    for blk in params['blocks']:
        x = block(x, blk)
    x = jnp.transpose(x, (0, 2, 1))

    def gru(x, p):
        B, L, _ = x.shape
        H = p['w_hh'].shape[1]
        h = jnp.zeros((B, H), jnp.float32)
        outs = []
        for t in range(L):
            xt = x[:, t, :]
            gi = xt @ p['w_ih'].T + p['b_ih']
            gh = h @ p['w_hh'].T + p['b_hh']
            r = jax.nn.sigmoid(gi[:, :H] + gh[:, :H])
            z = jax.nn.sigmoid(gi[:, H:2 * H] + gh[:, H:2 * H])
            n = jnp.tanh(gi[:, 2 * H:] + r * gh[:, 2 * H:])
            h = (1.0 - z) * n + z * h
            outs.append(h)
        return jnp.stack(outs, axis=1)

    for p in params['gru']:
        x = gru(x, p)
    h = x[:, -1, :]
    d = params['dense']
    return h @ d['wm'].T + d['bm'], h @ d['wv'].T + d['bv']


# ----------------------------------------------------------------------------
if __name__ == "__main__":
    latent_dim = 8
    B, C0, T = 2, 6, 32          # T must be divisible by 16 (four maxpool stages)

    key = jax.random.PRNGKey(0)
    pkey, xkey = jax.random.split(key)
    params = init_encoder_params(pkey, latent_dim)
    packed = pack_encoder_params(params)
    x = jax.random.normal(xkey, (B, C0, T), jnp.float32)

    fwd = jax.jit(encoder_forward, static_argnames=("num_shards",))
    z_mean, z_log_var, z = fwd(packed, x)        # num_shards=1: single-TC optimal
    jax.block_until_ready((z_mean, z_log_var, z))

    assert z_mean.shape == (B, latent_dim)
    assert z_log_var.shape == (B, latent_dim)
    assert z.shape == (B, latent_dim)
    assert bool(jnp.all(jnp.isfinite(z_mean))) and bool(jnp.all(jnp.isfinite(z_log_var)))

    with jax.default_matmul_precision('float32'):
        ref_mean, ref_logvar = _ref_forward(params, x)
    # bf16 MXU operands (with f32 accumulation) -> slightly looser tolerance than f32
    tol = 5e-2 if MATMUL_DTYPE == jnp.bfloat16 else 1e-2
    assert bool(jnp.allclose(z_mean, ref_mean, atol=tol, rtol=tol))
    assert bool(jnp.allclose(z_log_var, ref_logvar, atol=tol, rtol=tol))
    assert bool(jnp.allclose(z, z_mean))

    print("KERNEL_OK")
</pallas_src>

<mosaic_0001>
module attributes {stable_mosaic.version = 11 : i64} {
  func.func @_encoder_kernel(%arg0: i32, %arg1: memref<2x6x32xf32, #tpu.memory_space<vmem>>, %arg2: memref<64x32xbf16, #tpu.memory_space<vmem>>, %arg3: memref<64x32xbf16, #tpu.memory_space<vmem>>, %arg4: memref<32x16xbf16, #tpu.memory_space<vmem>>, %arg5: memref<32x16xbf16, #tpu.memory_space<vmem>>, %arg6: memref<16x8xbf16, #tpu.memory_space<vmem>>, %arg7: memref<16x8xbf16, #tpu.memory_space<vmem>>, %arg8: memref<8x4xbf16, #tpu.memory_space<vmem>>, %arg9: memref<8x4xbf16, #tpu.memory_space<vmem>>, %arg10: memref<88x60xbf16, #tpu.memory_space<vmem>>, %arg11: memref<88x1xf32, #tpu.memory_space<vmem>>, %arg12: memref<30x88xbf16, #tpu.memory_space<vmem>>, %arg13: memref<30x1xf32, #tpu.memory_space<vmem>>, %arg14: memref<88x300xbf16, #tpu.memory_space<vmem>>, %arg15: memref<88x1xf32, #tpu.memory_space<vmem>>, %arg16: memref<30x88xbf16, #tpu.memory_space<vmem>>, %arg17: memref<30x1xf32, #tpu.memory_space<vmem>>, %arg18: memref<88x300xbf16, #tpu.memory_space<vmem>>, %arg19: memref<88x1xf32, #tpu.memory_space<vmem>>, %arg20: memref<30x88xbf16, #tpu.memory_space<vmem>>, %arg21: memref<30x1xf32, #tpu.memory_space<vmem>>, %arg22: memref<88x300xbf16, #tpu.memory_space<vmem>>, %arg23: memref<88x1xf32, #tpu.memory_space<vmem>>, %arg24: memref<30x88xbf16, #tpu.memory_space<vmem>>, %arg25: memref<30x1xf32, #tpu.memory_space<vmem>>, %arg26: memref<96x30xbf16, #tpu.memory_space<vmem>>, %arg27: memref<96x32xbf16, #tpu.memory_space<vmem>>, %arg28: memref<96x1xf32, #tpu.memory_space<vmem>>, %arg29: memref<96x1xf32, #tpu.memory_space<vmem>>, %arg30: memref<96x32xbf16, #tpu.memory_space<vmem>>, %arg31: memref<96x32xbf16, #tpu.memory_space<vmem>>, %arg32: memref<96x1xf32, #tpu.memory_space<vmem>>, %arg33: memref<96x1xf32, #tpu.memory_space<vmem>>, %arg34: memref<96x32xbf16, #tpu.memory_space<vmem>>, %arg35: memref<96x32xbf16, #tpu.memory_space<vmem>>, %arg36: memref<96x1xf32, #tpu.memory_space<vmem>>, %arg37: memref<96x1xf32, #tpu.memory_space<vmem>>, %arg38: memref<16x32xbf16, #tpu.memory_space<vmem>>, %arg39: memref<16x1xf32, #tpu.memory_space<vmem>>, %arg40: memref<1x16x2xf32, #tpu.memory_space<vmem>>, %arg41: memref<32x4xf32, #tpu.memory_space<vmem>>, %arg42: memref<32x4xf32, #tpu.memory_space<vmem>>) attributes {dimension_semantics = [#tpu.dimension_semantics<parallel>], iteration_bounds = array<i64: 1>, scalar_prefetch = 0 : i64, scratch_operands = 2 : i64, tpu.core_type = #tpu.core_type<tc>, window_params = [{transform_indices = @transform_0, window_bounds = array<i64: 2, 6, 32>}, {pipeline_mode = #tpu.pipeline_mode<synchronous>, transform_indices = @transform_1, window_bounds = array<i64: 64, 32>}, {pipeline_mode = #tpu.pipeline_mode<synchronous>, transform_indices = @transform_2, window_bounds = array<i64: 64, 32>}, {pipeline_mode = #tpu.pipeline_mode<synchronous>, transform_indices = @transform_3, window_bounds = array<i64: 32, 16>}, {pipeline_mode = #tpu.pipeline_mode<synchronous>, transform_indices = @transform_4, window_bounds = array<i64: 32, 16>}, {pipeline_mode = #tpu.pipeline_mode<synchronous>, transform_indices = @transform_5, window_bounds = array<i64: 16, 8>}, {pipeline_mode = #tpu.pipeline_mode<synchronous>, transform_indices = @transform_6, window_bounds = array<i64: 16, 8>}, {pipeline_mode = #tpu.pipeline_mode<synchronous>, transform_indices = @transform_7, window_bounds = array<i64: 8, 4>}, {pipeline_mode = #tpu.pipeline_mode<synchronous>, transform_indices = @transform_8, window_bounds = array<i64: 8, 4>}, {pipeline_mode = #tpu.pipeline_mode<synchronous>, transform_indices = @transform_9, window_bounds = array<i64: 88, 60>}, {pipeline_mode = #tpu.pipeline_mode<synchronous>, transform_indices = @transform_10, window_bounds = array<i64: 88, 1>}, {pipeline_mode = #tpu.pipeline_mode<synchronous>, transform_indices = @transform_11, window_bounds = array<i64: 30, 88>}, {pipeline_mode = #tpu.pipeline_mode<synchronous>, transform_indices = @transform_12, window_bounds = array<i64: 30, 1>}, {pipeline_mode = #tpu.pipeline_mode<synchronous>, transform_indices = @transform_13, window_bounds = array<i64: 88, 300>}, {pipeline_mode = #tpu.pipeline_mode<synchronous>, transform_indices = @transform_14, window_bounds = array<i64: 88, 1>}, {pipeline_mode = #tpu.pipeline_mode<synchronous>, transform_indices = @transform_15, window_bounds = array<i64: 30, 88>}, {pipeline_mode = #tpu.pipeline_mode<synchronous>, transform_indices = @transform_16, window_bounds = array<i64: 30, 1>}, {pipeline_mode = #tpu.pipeline_mode<synchronous>, transform_indices = @transform_17, window_bounds = array<i64: 88, 300>}, {pipeline_mode = #tpu.pipeline_mode<synchronous>, transform_indices = @transform_18, window_bounds = array<i64: 88, 1>}, {pipeline_mode = #tpu.pipeline_mode<synchronous>, transform_indices = @transform_19, window_bounds = array<i64: 30, 88>}, {pipeline_mode = #tpu.pipeline_mode<synchronous>, transform_indices = @transform_20, window_bounds = array<i64: 30, 1>}, {pipeline_mode = #tpu.pipeline_mode<synchronous>, transform_indices = @transform_21, window_bounds = array<i64: 88, 300>}, {pipeline_mode = #tpu.pipeline_mode<synchronous>, transform_indices = @transform_22, window_bounds = array<i64: 88, 1>}, {pipeline_mode = #tpu.pipeline_mode<synchronous>, transform_indices = @transform_23, window_bounds = array<i64: 30, 88>}, {pipeline_mode = #tpu.pipeline_mode<synchronous>, transform_indices = @transform_24, window_bounds = array<i64: 30, 1>}, {pipeline_mode = #tpu.pipeline_mode<synchronous>, transform_indices = @transform_25, window_bounds = array<i64: 96, 30>}, {pipeline_mode = #tpu.pipeline_mode<synchronous>, transform_indices = @transform_26, window_bounds = array<i64: 96, 32>}, {pipeline_mode = #tpu.pipeline_mode<synchronous>, transform_indices = @transform_27, window_bounds = array<i64: 96, 1>}, {pipeline_mode = #tpu.pipeline_mode<synchronous>, transform_indices = @transform_28, window_bounds = array<i64: 96, 1>}, {pipeline_mode = #tpu.pipeline_mode<synchronous>, transform_indices = @transform_29, window_bounds = array<i64: 96, 32>}, {pipeline_mode = #tpu.pipeline_mode<synchronous>, transform_indices = @transform_30, window_bounds = array<i64: 96, 32>}, {pipeline_mode = #tpu.pipeline_mode<synchronous>, transform_indices = @transform_31, window_bounds = array<i64: 96, 1>}, {pipeline_mode = #tpu.pipeline_mode<synchronous>, transform_indices = @transform_32, window_bounds = array<i64: 96, 1>}, {pipeline_mode = #tpu.pipeline_mode<synchronous>, transform_indices = @transform_33, window_bounds = array<i64: 96, 32>}, {pipeline_mode = #tpu.pipeline_mode<synchronous>, transform_indices = @transform_34, window_bounds = array<i64: 96, 32>}, {pipeline_mode = #tpu.pipeline_mode<synchronous>, transform_indices = @transform_35, window_bounds = array<i64: 96, 1>}, {pipeline_mode = #tpu.pipeline_mode<synchronous>, transform_indices = @transform_36, window_bounds = array<i64: 96, 1>}, {pipeline_mode = #tpu.pipeline_mode<synchronous>, transform_indices = @transform_37, window_bounds = array<i64: 16, 32>}, {pipeline_mode = #tpu.pipeline_mode<synchronous>, transform_indices = @transform_38, window_bounds = array<i64: 16, 1>}, {transform_indices = @transform_39, window_bounds = array<i64: 1, 16, 2>}]} {
    %c0 = arith.constant 0 : index
    %c0_0 = arith.constant 0 : index
    %c0_1 = arith.constant 0 : index
    %0 = vector.load %arg1[%c0, %c0_0, %c0_1] : memref<2x6x32xf32, #tpu.memory_space<vmem>>, vector<1x6x32xf32>
    %1 = vector.shape_cast %0 : vector<1x6x32xf32> to vector<6x32xf32>
    %c1 = arith.constant 1 : index
    %c0_2 = arith.constant 0 : index
    %c0_3 = arith.constant 0 : index
    %2 = vector.load %arg1[%c1, %c0_2, %c0_3] : memref<2x6x32xf32, #tpu.memory_space<vmem>>, vector<1x6x32xf32>
    %3 = vector.shape_cast %2 : vector<1x6x32xf32> to vector<6x32xf32>
    %4 = tpu.concatenate %1, %3 in 1 : vector<6x32xf32>, vector<6x32xf32> -> vector<6x64xf32>
    %c0_4 = arith.constant 0 : index
    %c0_5 = arith.constant 0 : index
    %5 = vector.load %arg10[%c0_4, %c0_5] : memref<88x60xbf16, #tpu.memory_space<vmem>>, vector<88x60xbf16>
    %c0_6 = arith.constant 0 : index
    %c0_7 = arith.constant 0 : index
    %6 = vector.load %arg11[%c0_6, %c0_7] : memref<88x1xf32, #tpu.memory_space<vmem>>, vector<88x1xf32>
    %c0_8 = arith.constant 0 : index
    %c0_9 = arith.constant 0 : index
    %7 = vector.load %arg12[%c0_8, %c0_9] : memref<30x88xbf16, #tpu.memory_space<vmem>>, vector<30x88xbf16>
    %c0_10 = arith.constant 0 : index
    %c0_11 = arith.constant 0 : index
    %8 = vector.load %arg13[%c0_10, %c0_11] : memref<30x1xf32, #tpu.memory_space<vmem>>, vector<30x1xf32>
    %cst = arith.constant 0.000000e+00 : f32
    %9 = vector.broadcast %cst : f32 to vector<6x4xf32>
    %cst_12 = arith.constant 0.000000e+00 : f32
    %10 = vector.broadcast %cst_12 : f32 to vector<6x5xf32>
    %11 = vector.extract_strided_slice %4 {offsets = [0, 0], sizes = [6, 32], strides = [1, 1]} : vector<6x64xf32> to vector<6x32xf32>
    %12 = vector.extract_strided_slice %4 {offsets = [0, 32], sizes = [6, 32], strides = [1, 1]} : vector<6x64xf32> to vector<6x32xf32>
    %13 = tpu.concatenate %9, %11, %10, %9, %12, %10 in 1 : vector<6x4xf32>, vector<6x32xf32>, vector<6x5xf32>, vector<6x4xf32>, vector<6x32xf32>, vector<6x5xf32> -> vector<6x82xf32>
    %14 = vector.extract_strided_slice %13 {offsets = [0, 0], sizes = [6, 32], strides = [1, 1]} : vector<6x82xf32> to vector<6x32xf32>
    %15 = vector.extract_strided_slice %13 {offsets = [0, 41], sizes = [6, 32], strides = [1, 1]} : vector<6x82xf32> to vector<6x32xf32>
    %16 = tpu.concatenate %14, %15 in 1 : vector<6x32xf32>, vector<6x32xf32> -> vector<6x64xf32>
    %17 = vector.extract_strided_slice %13 {offsets = [0, 1], sizes = [6, 32], strides = [1, 1]} : vector<6x82xf32> to vector<6x32xf32>
    %18 = vector.extract_strided_slice %13 {offsets = [0, 42], sizes = [6, 32], strides = [1, 1]} : vector<6x82xf32> to vector<6x32xf32>
    %19 = tpu.concatenate %17, %18 in 1 : vector<6x32xf32>, vector<6x32xf32> -> vector<6x64xf32>
    %20 = vector.extract_strided_slice %13 {offsets = [0, 2], sizes = [6, 32], strides = [1, 1]} : vector<6x82xf32> to vector<6x32xf32>
    %21 = vector.extract_strided_slice %13 {offsets = [0, 43], sizes = [6, 32], strides = [1, 1]} : vector<6x82xf32> to vector<6x32xf32>
    %22 = tpu.concatenate %20, %21 in 1 : vector<6x32xf32>, vector<6x32xf32> -> vector<6x64xf32>
    %23 = vector.extract_strided_slice %13 {offsets = [0, 3], sizes = [6, 32], strides = [1, 1]} : vector<6x82xf32> to vector<6x32xf32>
    %24 = vector.extract_strided_slice %13 {offsets = [0, 44], sizes = [6, 32], strides = [1, 1]} : vector<6x82xf32> to vector<6x32xf32>
    %25 = tpu.concatenate %23, %24 in 1 : vector<6x32xf32>, vector<6x32xf32> -> vector<6x64xf32>
    %26 = vector.extract_strided_slice %13 {offsets = [0, 4], sizes = [6, 32], strides = [1, 1]} : vector<6x82xf32> to vector<6x32xf32>
    %27 = vector.extract_strided_slice %13 {offsets = [0, 45], sizes = [6, 32], strides = [1, 1]} : vector<6x82xf32> to vector<6x32xf32>
    %28 = tpu.concatenate %26, %27 in 1 : vector<6x32xf32>, vector<6x32xf32> -> vector<6x64xf32>
    %29 = vector.extract_strided_slice %13 {offsets = [0, 5], sizes = [6, 32], strides = [1, 1]} : vector<6x82xf32> to vector<6x32xf32>
    %30 = vector.extract_strided_slice %13 {offsets = [0, 46], sizes = [6, 32], strides = [1, 1]} : vector<6x82xf32> to vector<6x32xf32>
    %31 = tpu.concatenate %29, %30 in 1 : vector<6x32xf32>, vector<6x32xf32> -> vector<6x64xf32>
    %32 = vector.extract_strided_slice %13 {offsets = [0, 6], sizes = [6, 32], strides = [1, 1]} : vector<6x82xf32> to vector<6x32xf32>
    %33 = vector.extract_strided_slice %13 {offsets = [0, 47], sizes = [6, 32], strides = [1, 1]} : vector<6x82xf32> to vector<6x32xf32>
    %34 = tpu.concatenate %32, %33 in 1 : vector<6x32xf32>, vector<6x32xf32> -> vector<6x64xf32>
    %35 = vector.extract_strided_slice %13 {offsets = [0, 7], sizes = [6, 32], strides = [1, 1]} : vector<6x82xf32> to vector<6x32xf32>
    %36 = vector.extract_strided_slice %13 {offsets = [0, 48], sizes = [6, 32], strides = [1, 1]} : vector<6x82xf32> to vector<6x32xf32>
    %37 = tpu.concatenate %35, %36 in 1 : vector<6x32xf32>, vector<6x32xf32> -> vector<6x64xf32>
    %38 = vector.extract_strided_slice %13 {offsets = [0, 8], sizes = [6, 32], strides = [1, 1]} : vector<6x82xf32> to vector<6x32xf32>
    %39 = vector.extract_strided_slice %13 {offsets = [0, 49], sizes = [6, 32], strides = [1, 1]} : vector<6x82xf32> to vector<6x32xf32>
    %40 = tpu.concatenate %38, %39 in 1 : vector<6x32xf32>, vector<6x32xf32> -> vector<6x64xf32>
    %41 = vector.extract_strided_slice %13 {offsets = [0, 9], sizes = [6, 32], strides = [1, 1]} : vector<6x82xf32> to vector<6x32xf32>
    %42 = vector.extract_strided_slice %13 {offsets = [0, 50], sizes = [6, 32], strides = [1, 1]} : vector<6x82xf32> to vector<6x32xf32>
    %43 = tpu.concatenate %41, %42 in 1 : vector<6x32xf32>, vector<6x32xf32> -> vector<6x64xf32>
    %44 = tpu.concatenate %16, %19, %22, %25, %28, %31, %34, %37, %40, %43 in 0 : vector<6x64xf32>, vector<6x64xf32>, vector<6x64xf32>, vector<6x64xf32>, vector<6x64xf32>, vector<6x64xf32>, vector<6x64xf32>, vector<6x64xf32>, vector<6x64xf32>, vector<6x64xf32> -> vector<60x64xf32>
    %45 = arith.truncf %44 : vector<60x64xf32> to vector<60x64xbf16>
    %cst_13 = arith.constant dense<0.000000e+00> : vector<88x64xf32>
    %46 = tpu.matmul %5, %45, %cst_13 {dimension_numbers = #tpu.dot_dimension_numbers<[1], [0], [0], [1], [0, 0, 1, 1], [], []>} : vector<88x60xbf16>, vector<60x64xbf16>, vector<88x64xf32> -> vector<88x64xf32>
    %47 = vector.broadcast %6 : vector<88x1xf32> to vector<88x64xf32>
    %48 = arith.addf %46, %47 : vector<88x64xf32>
    %cst_14 = arith.constant 0.000000e+00 : f32
    %49 = vector.broadcast %cst_14 : f32 to vector<88x64xf32>
    %50 = arith.maximumf %48, %49 : vector<88x64xf32>
    %c0_15 = arith.constant 0 : index
    %c0_16 = arith.constant 0 : index
    %51 = vector.load %arg2[%c0_15, %c0_16] : memref<64x32xbf16, #tpu.memory_space<vmem>>, vector<64x32xbf16>
    %c0_17 = arith.constant 0 : index
    %c0_18 = arith.constant 0 : index
    %52 = vector.load %arg3[%c0_17, %c0_18] : memref<64x32xbf16, #tpu.memory_space<vmem>>, vector<64x32xbf16>
    %53 = arith.truncf %50 : vector<88x64xf32> to vector<88x64xbf16>
    %cst_19 = arith.constant dense<0.000000e+00> : vector<88x32xf32>
    %54 = tpu.matmul %53, %51, %cst_19 {dimension_numbers = #tpu.dot_dimension_numbers<[1], [0], [0], [1], [0, 0, 1, 1], [], []>} : vector<88x64xbf16>, vector<64x32xbf16>, vector<88x32xf32> -> vector<88x32xf32>
    %cst_20 = arith.constant dense<0.000000e+00> : vector<88x32xf32>
    %55 = tpu.matmul %53, %52, %cst_20 {dimension_numbers = #tpu.dot_dimension_numbers<[1], [0], [0], [1], [0, 0, 1, 1], [], []>} : vector<88x64xbf16>, vector<64x32xbf16>, vector<88x32xf32> -> vector<88x32xf32>
    %56 = arith.maximumf %54, %55 : vector<88x32xf32>
    %57 = arith.truncf %56 : vector<88x32xf32> to vector<88x32xbf16>
    %cst_21 = arith.constant dense<0.000000e+00> : vector<30x32xf32>
    %58 = tpu.matmul %7, %57, %cst_21 {dimension_numbers = #tpu.dot_dimension_numbers<[1], [0], [0], [1], [0, 0, 1, 1], [], []>} : vector<30x88xbf16>, vector<88x32xbf16>, vector<30x32xf32> -> vector<30x32xf32>
    %59 = vector.broadcast %8 : vector<30x1xf32> to vector<30x32xf32>
    %60 = arith.addf %58, %59 : vector<30x32xf32>
    %cst_22 = arith.constant 0.000000e+00 : f32
    %61 = vector.broadcast %cst_22 : f32 to vector<30x32xf32>
    %62 = arith.maximumf %60, %61 : vector<30x32xf32>
    %c0_23 = arith.constant 0 : index
    %c0_24 = arith.constant 0 : index
    %63 = vector.load %arg14[%c0_23, %c0_24] : memref<88x300xbf16, #tpu.memory_space<vmem>>, vector<88x300xbf16>
    %c0_25 = arith.constant 0 : index
    %c0_26 = arith.constant 0 : index
    %64 = vector.load %arg15[%c0_25, %c0_26] : memref<88x1xf32, #tpu.memory_space<vmem>>, vector<88x1xf32>
    %c0_27 = arith.constant 0 : index
    %c0_28 = arith.constant 0 : index
    %65 = vector.load %arg16[%c0_27, %c0_28] : memref<30x88xbf16, #tpu.memory_space<vmem>>, vector<30x88xbf16>
    %c0_29 = arith.constant 0 : index
    %c0_30 = arith.constant 0 : index
    %66 = vector.load %arg17[%c0_29, %c0_30] : memref<30x1xf32, #tpu.memory_space<vmem>>, vector<30x1xf32>
    %cst_31 = arith.constant 0.000000e+00 : f32
    %67 = vector.broadcast %cst_31 : f32 to vector<30x4xf32>
    %cst_32 = arith.constant 0.000000e+00 : f32
    %68 = vector.broadcast %cst_32 : f32 to vector<30x5xf32>
    %69 = vector.extract_strided_slice %62 {offsets = [0, 0], sizes = [30, 16], strides = [1, 1]} : vector<30x32xf32> to vector<30x16xf32>
    %70 = vector.extract_strided_slice %62 {offsets = [0, 16], sizes = [30, 16], strides = [1, 1]} : vector<30x32xf32> to vector<30x16xf32>
    %71 = tpu.concatenate %67, %69, %68, %67, %70, %68 in 1 : vector<30x4xf32>, vector<30x16xf32>, vector<30x5xf32>, vector<30x4xf32>, vector<30x16xf32>, vector<30x5xf32> -> vector<30x50xf32>
    %72 = vector.extract_strided_slice %71 {offsets = [0, 0], sizes = [30, 16], strides = [1, 1]} : vector<30x50xf32> to vector<30x16xf32>
    %73 = vector.extract_strided_slice %71 {offsets = [0, 25], sizes = [30, 16], strides = [1, 1]} : vector<30x50xf32> to vector<30x16xf32>
    %74 = tpu.concatenate %72, %73 in 1 : vector<30x16xf32>, vector<30x16xf32> -> vector<30x32xf32>
    %75 = vector.extract_strided_slice %71 {offsets = [0, 1], sizes = [30, 16], strides = [1, 1]} : vector<30x50xf32> to vector<30x16xf32>
    %76 = vector.extract_strided_slice %71 {offsets = [0, 26], sizes = [30, 16], strides = [1, 1]} : vector<30x50xf32> to vector<30x16xf32>
    %77 = tpu.concatenate %75, %76 in 1 : vector<30x16xf32>, vector<30x16xf32> -> vector<30x32xf32>
    %78 = vector.extract_strided_slice %71 {offsets = [0, 2], sizes = [30, 16], strides = [1, 1]} : vector<30x50xf32> to vector<30x16xf32>
    %79 = vector.extract_strided_slice %71 {offsets = [0, 27], sizes = [30, 16], strides = [1, 1]} : vector<30x50xf32> to vector<30x16xf32>
    %80 = tpu.concatenate %78, %79 in 1 : vector<30x16xf32>, vector<30x16xf32> -> vector<30x32xf32>
    %81 = vector.extract_strided_slice %71 {offsets = [0, 3], sizes = [30, 16], strides = [1, 1]} : vector<30x50xf32> to vector<30x16xf32>
    %82 = vector.extract_strided_slice %71 {offsets = [0, 28], sizes = [30, 16], strides = [1, 1]} : vector<30x50xf32> to vector<30x16xf32>
    %83 = tpu.concatenate %81, %82 in 1 : vector<30x16xf32>, vector<30x16xf32> -> vector<30x32xf32>
    %84 = vector.extract_strided_slice %71 {offsets = [0, 4], sizes = [30, 16], strides = [1, 1]} : vector<30x50xf32> to vector<30x16xf32>
    %85 = vector.extract_strided_slice %71 {offsets = [0, 29], sizes = [30, 16], strides = [1, 1]} : vector<30x50xf32> to vector<30x16xf32>
    %86 = tpu.concatenate %84, %85 in 1 : vector<30x16xf32>, vector<30x16xf32> -> vector<30x32xf32>
    %87 = vector.extract_strided_slice %71 {offsets = [0, 5], sizes = [30, 16], strides = [1, 1]} : vector<30x50xf32> to vector<30x16xf32>
    %88 = vector.extract_strided_slice %71 {offsets = [0, 30], sizes = [30, 16], strides = [1, 1]} : vector<30x50xf32> to vector<30x16xf32>
    %89 = tpu.concatenate %87, %88 in 1 : vector<30x16xf32>, vector<30x16xf32> -> vector<30x32xf32>
    %90 = vector.extract_strided_slice %71 {offsets = [0, 6], sizes = [30, 16], strides = [1, 1]} : vector<30x50xf32> to vector<30x16xf32>
    %91 = vector.extract_strided_slice %71 {offsets = [0, 31], sizes = [30, 16], strides = [1, 1]} : vector<30x50xf32> to vector<30x16xf32>
    %92 = tpu.concatenate %90, %91 in 1 : vector<30x16xf32>, vector<30x16xf32> -> vector<30x32xf32>
    %93 = vector.extract_strided_slice %71 {offsets = [0, 7], sizes = [30, 16], strides = [1, 1]} : vector<30x50xf32> to vector<30x16xf32>
    %94 = vector.extract_strided_slice %71 {offsets = [0, 32], sizes = [30, 16], strides = [1, 1]} : vector<30x50xf32> to vector<30x16xf32>
    %95 = tpu.concatenate %93, %94 in 1 : vector<30x16xf32>, vector<30x16xf32> -> vector<30x32xf32>
    %96 = vector.extract_strided_slice %71 {offsets = [0, 8], sizes = [30, 16], strides = [1, 1]} : vector<30x50xf32> to vector<30x16xf32>
    %97 = vector.extract_strided_slice %71 {offsets = [0, 33], sizes = [30, 16], strides = [1, 1]} : vector<30x50xf32> to vector<30x16xf32>
    %98 = tpu.concatenate %96, %97 in 1 : vector<30x16xf32>, vector<30x16xf32> -> vector<30x32xf32>
    %99 = vector.extract_strided_slice %71 {offsets = [0, 9], sizes = [30, 16], strides = [1, 1]} : vector<30x50xf32> to vector<30x16xf32>
    %100 = vector.extract_strided_slice %71 {offsets = [0, 34], sizes = [30, 16], strides = [1, 1]} : vector<30x50xf32> to vector<30x16xf32>
    %101 = tpu.concatenate %99, %100 in 1 : vector<30x16xf32>, vector<30x16xf32> -> vector<30x32xf32>
    %102 = tpu.concatenate %74, %77, %80, %83, %86, %89, %92, %95, %98, %101 in 0 : vector<30x32xf32>, vector<30x32xf32>, vector<30x32xf32>, vector<30x32xf32>, vector<30x32xf32>, vector<30x32xf32>, vector<30x32xf32>, vector<30x32xf32>, vector<30x32xf32>, vector<30x32xf32> -> vector<300x32xf32>
    %103 = arith.truncf %102 : vector<300x32xf32> to vector<300x32xbf16>
    %cst_33 = arith.constant dense<0.000000e+00> : vector<88x32xf32>
    %104 = tpu.matmul %63, %103, %cst_33 {dimension_numbers = #tpu.dot_dimension_numbers<[1], [0], [0], [1], [0, 0, 1, 1], [], []>} : vector<88x300xbf16>, vector<300x32xbf16>, vector<88x32xf32> -> vector<88x32xf32>
    %105 = vector.broadcast %64 : vector<88x1xf32> to vector<88x32xf32>
    %106 = arith.addf %104, %105 : vector<88x32xf32>
    %cst_34 = arith.constant 0.000000e+00 : f32
    %107 = vector.broadcast %cst_34 : f32 to vector<88x32xf32>
    %108 = arith.maximumf %106, %107 : vector<88x32xf32>
    %c0_35 = arith.constant 0 : index
    %c0_36 = arith.constant 0 : index
    %109 = vector.load %arg4[%c0_35, %c0_36] : memref<32x16xbf16, #tpu.memory_space<vmem>>, vector<32x16xbf16>
    %c0_37 = arith.constant 0 : index
    %c0_38 = arith.constant 0 : index
    %110 = vector.load %arg5[%c0_37, %c0_38] : memref<32x16xbf16, #tpu.memory_space<vmem>>, vector<32x16xbf16>
    %111 = arith.truncf %108 : vector<88x32xf32> to vector<88x32xbf16>
    %cst_39 = arith.constant dense<0.000000e+00> : vector<88x16xf32>
    %112 = tpu.matmul %111, %109, %cst_39 {dimension_numbers = #tpu.dot_dimension_numbers<[1], [0], [0], [1], [0, 0, 1, 1], [], []>} : vector<88x32xbf16>, vector<32x16xbf16>, vector<88x16xf32> -> vector<88x16xf32>
    %cst_40 = arith.constant dense<0.000000e+00> : vector<88x16xf32>
    %113 = tpu.matmul %111, %110, %cst_40 {dimension_numbers = #tpu.dot_dimension_numbers<[1], [0], [0], [1], [0, 0, 1, 1], [], []>} : vector<88x32xbf16>, vector<32x16xbf16>, vector<88x16xf32> -> vector<88x16xf32>
    %114 = arith.maximumf %112, %113 : vector<88x16xf32>
    %115 = arith.truncf %114 : vector<88x16xf32> to vector<88x16xbf16>
    %cst_41 = arith.constant dense<0.000000e+00> : vector<30x16xf32>
    %116 = tpu.matmul %65, %115, %cst_41 {dimension_numbers = #tpu.dot_dimension_numbers<[1], [0], [0], [1], [0, 0, 1, 1], [], []>} : vector<30x88xbf16>, vector<88x16xbf16>, vector<30x16xf32> -> vector<30x16xf32>
    %117 = vector.broadcast %66 : vector<30x1xf32> to vector<30x16xf32>
    %118 = arith.addf %116, %117 : vector<30x16xf32>
    %cst_42 = arith.constant 0.000000e+00 : f32
    %119 = vector.broadcast %cst_42 : f32 to vector<30x16xf32>
    %120 = arith.maximumf %118, %119 : vector<30x16xf32>
    %c0_43 = arith.constant 0 : index
    %c0_44 = arith.constant 0 : index
    %121 = vector.load %arg18[%c0_43, %c0_44] : memref<88x300xbf16, #tpu.memory_space<vmem>>, vector<88x300xbf16>
    %c0_45 = arith.constant 0 : index
    %c0_46 = arith.constant 0 : index
    %122 = vector.load %arg19[%c0_45, %c0_46] : memref<88x1xf32, #tpu.memory_space<vmem>>, vector<88x1xf32>
    %c0_47 = arith.constant 0 : index
    %c0_48 = arith.constant 0 : index
    %123 = vector.load %arg20[%c0_47, %c0_48] : memref<30x88xbf16, #tpu.memory_space<vmem>>, vector<30x88xbf16>
    %c0_49 = arith.constant 0 : index
    %c0_50 = arith.constant 0 : index
    %124 = vector.load %arg21[%c0_49, %c0_50] : memref<30x1xf32, #tpu.memory_space<vmem>>, vector<30x1xf32>
    %cst_51 = arith.constant 0.000000e+00 : f32
    %125 = vector.broadcast %cst_51 : f32 to vector<30x4xf32>
    %cst_52 = arith.constant 0.000000e+00 : f32
    %126 = vector.broadcast %cst_52 : f32 to vector<30x5xf32>
    %127 = vector.extract_strided_slice %120 {offsets = [0, 0], sizes = [30, 8], strides = [1, 1]} : vector<30x16xf32> to vector<30x8xf32>
    %128 = vector.extract_strided_slice %120 {offsets = [0, 8], sizes = [30, 8], strides = [1, 1]} : vector<30x16xf32> to vector<30x8xf32>
    %129 = tpu.concatenate %125, %127, %126, %125, %128, %126 in 1 : vector<30x4xf32>, vector<30x8xf32>, vector<30x5xf32>, vector<30x4xf32>, vector<30x8xf32>, vector<30x5xf32> -> vector<30x34xf32>
    %130 = vector.extract_strided_slice %129 {offsets = [0, 0], sizes = [30, 8], strides = [1, 1]} : vector<30x34xf32> to vector<30x8xf32>
    %131 = vector.extract_strided_slice %129 {offsets = [0, 17], sizes = [30, 8], strides = [1, 1]} : vector<30x34xf32> to vector<30x8xf32>
    %132 = tpu.concatenate %130, %131 in 1 : vector<30x8xf32>, vector<30x8xf32> -> vector<30x16xf32>
    %133 = vector.extract_strided_slice %129 {offsets = [0, 1], sizes = [30, 8], strides = [1, 1]} : vector<30x34xf32> to vector<30x8xf32>
    %134 = vector.extract_strided_slice %129 {offsets = [0, 18], sizes = [30, 8], strides = [1, 1]} : vector<30x34xf32> to vector<30x8xf32>
    %135 = tpu.concatenate %133, %134 in 1 : vector<30x8xf32>, vector<30x8xf32> -> vector<30x16xf32>
    %136 = vector.extract_strided_slice %129 {offsets = [0, 2], sizes = [30, 8], strides = [1, 1]} : vector<30x34xf32> to vector<30x8xf32>
    %137 = vector.extract_strided_slice %129 {offsets = [0, 19], sizes = [30, 8], strides = [1, 1]} : vector<30x34xf32> to vector<30x8xf32>
    %138 = tpu.concatenate %136, %137 in 1 : vector<30x8xf32>, vector<30x8xf32> -> vector<30x16xf32>
    %139 = vector.extract_strided_slice %129 {offsets = [0, 3], sizes = [30, 8], strides = [1, 1]} : vector<30x34xf32> to vector<30x8xf32>
    %140 = vector.extract_strided_slice %129 {offsets = [0, 20], sizes = [30, 8], strides = [1, 1]} : vector<30x34xf32> to vector<30x8xf32>
    %141 = tpu.concatenate %139, %140 in 1 : vector<30x8xf32>, vector<30x8xf32> -> vector<30x16xf32>
    %142 = vector.extract_strided_slice %129 {offsets = [0, 4], sizes = [30, 8], strides = [1, 1]} : vector<30x34xf32> to vector<30x8xf32>
    %143 = vector.extract_strided_slice %129 {offsets = [0, 21], sizes = [30, 8], strides = [1, 1]} : vector<30x34xf32> to vector<30x8xf32>
    %144 = tpu.concatenate %142, %143 in 1 : vector<30x8xf32>, vector<30x8xf32> -> vector<30x16xf32>
    %145 = vector.extract_strided_slice %129 {offsets = [0, 5], sizes = [30, 8], strides = [1, 1]} : vector<30x34xf32> to vector<30x8xf32>
    %146 = vector.extract_strided_slice %129 {offsets = [0, 22], sizes = [30, 8], strides = [1, 1]} : vector<30x34xf32> to vector<30x8xf32>
    %147 = tpu.concatenate %145, %146 in 1 : vector<30x8xf32>, vector<30x8xf32> -> vector<30x16xf32>
    %148 = vector.extract_strided_slice %129 {offsets = [0, 6], sizes = [30, 8], strides = [1, 1]} : vector<30x34xf32> to vector<30x8xf32>
    %149 = vector.extract_strided_slice %129 {offsets = [0, 23], sizes = [30, 8], strides = [1, 1]} : vector<30x34xf32> to vector<30x8xf32>
    %150 = tpu.concatenate %148, %149 in 1 : vector<30x8xf32>, vector<30x8xf32> -> vector<30x16xf32>
    %151 = vector.extract_strided_slice %129 {offsets = [0, 7], sizes = [30, 8], strides = [1, 1]} : vector<30x34xf32> to vector<30x8xf32>
    %152 = vector.extract_strided_slice %129 {offsets = [0, 24], sizes = [30, 8], strides = [1, 1]} : vector<30x34xf32> to vector<30x8xf32>
    %153 = tpu.concatenate %151, %152 in 1 : vector<30x8xf32>, vector<30x8xf32> -> vector<30x16xf32>
    %154 = vector.extract_strided_slice %129 {offsets = [0, 8], sizes = [30, 8], strides = [1, 1]} : vector<30x34xf32> to vector<30x8xf32>
    %155 = vector.extract_strided_slice %129 {offsets = [0, 25], sizes = [30, 8], strides = [1, 1]} : vector<30x34xf32> to vector<30x8xf32>
    %156 = tpu.concatenate %154, %155 in 1 : vector<30x8xf32>, vector<30x8xf32> -> vector<30x16xf32>
    %157 = vector.extract_strided_slice %129 {offsets = [0, 9], sizes = [30, 8], strides = [1, 1]} : vector<30x34xf32> to vector<30x8xf32>
    %158 = vector.extract_strided_slice %129 {offsets = [0, 26], sizes = [30, 8], strides = [1, 1]} : vector<30x34xf32> to vector<30x8xf32>
    %159 = tpu.concatenate %157, %158 in 1 : vector<30x8xf32>, vector<30x8xf32> -> vector<30x16xf32>
    %160 = tpu.concatenate %132, %135, %138, %141, %144, %147, %150, %153, %156, %159 in 0 : vector<30x16xf32>, vector<30x16xf32>, vector<30x16xf32>, vector<30x16xf32>, vector<30x16xf32>, vector<30x16xf32>, vector<30x16xf32>, vector<30x16xf32>, vector<30x16xf32>, vector<30x16xf32> -> vector<300x16xf32>
    %161 = arith.truncf %160 : vector<300x16xf32> to vector<300x16xbf16>
    %cst_53 = arith.constant dense<0.000000e+00> : vector<88x16xf32>
    %162 = tpu.matmul %121, %161, %cst_53 {dimension_numbers = #tpu.dot_dimension_numbers<[1], [0], [0], [1], [0, 0, 1, 1], [], []>} : vector<88x300xbf16>, vector<300x16xbf16>, vector<88x16xf32> -> vector<88x16xf32>
    %163 = vector.broadcast %122 : vector<88x1xf32> to vector<88x16xf32>
    %164 = arith.addf %162, %163 : vector<88x16xf32>
    %cst_54 = arith.constant 0.000000e+00 : f32
    %165 = vector.broadcast %cst_54 : f32 to vector<88x16xf32>
    %166 = arith.maximumf %164, %165 : vector<88x16xf32>
    %c0_55 = arith.constant 0 : index
    %c0_56 = arith.constant 0 : index
    %167 = vector.load %arg6[%c0_55, %c0_56] : memref<16x8xbf16, #tpu.memory_space<vmem>>, vector<16x8xbf16>
    %c0_57 = arith.constant 0 : index
    %c0_58 = arith.constant 0 : index
    %168 = vector.load %arg7[%c0_57, %c0_58] : memref<16x8xbf16, #tpu.memory_space<vmem>>, vector<16x8xbf16>
    %169 = arith.truncf %166 : vector<88x16xf32> to vector<88x16xbf16>
    %cst_59 = arith.constant dense<0.000000e+00> : vector<88x8xf32>
    %170 = tpu.matmul %169, %167, %cst_59 {dimension_numbers = #tpu.dot_dimension_numbers<[1], [0], [0], [1], [0, 0, 1, 1], [], []>} : vector<88x16xbf16>, vector<16x8xbf16>, vector<88x8xf32> -> vector<88x8xf32>
    %cst_60 = arith.constant dense<0.000000e+00> : vector<88x8xf32>
    %171 = tpu.matmul %169, %168, %cst_60 {dimension_numbers = #tpu.dot_dimension_numbers<[1], [0], [0], [1], [0, 0, 1, 1], [], []>} : vector<88x16xbf16>, vector<16x8xbf16>, vector<88x8xf32> -> vector<88x8xf32>
    %172 = arith.maximumf %170, %171 : vector<88x8xf32>
    %173 = arith.truncf %172 : vector<88x8xf32> to vector<88x8xbf16>
    %cst_61 = arith.constant dense<0.000000e+00> : vector<30x8xf32>
    %174 = tpu.matmul %123, %173, %cst_61 {dimension_numbers = #tpu.dot_dimension_numbers<[1], [0], [0], [1], [0, 0, 1, 1], [], []>} : vector<30x88xbf16>, vector<88x8xbf16>, vector<30x8xf32> -> vector<30x8xf32>
    %175 = vector.broadcast %124 : vector<30x1xf32> to vector<30x8xf32>
    %176 = arith.addf %174, %175 : vector<30x8xf32>
    %cst_62 = arith.constant 0.000000e+00 : f32
    %177 = vector.broadcast %cst_62 : f32 to vector<30x8xf32>
    %178 = arith.maximumf %176, %177 : vector<30x8xf32>
    %c0_63 = arith.constant 0 : index
    %c0_64 = arith.constant 0 : index
    %179 = vector.load %arg22[%c0_63, %c0_64] : memref<88x300xbf16, #tpu.memory_space<vmem>>, vector<88x300xbf16>
    %c0_65 = arith.constant 0 : index
    %c0_66 = arith.constant 0 : index
    %180 = vector.load %arg23[%c0_65, %c0_66] : memref<88x1xf32, #tpu.memory_space<vmem>>, vector<88x1xf32>
    %c0_67 = arith.constant 0 : index
    %c0_68 = arith.constant 0 : index
    %181 = vector.load %arg24[%c0_67, %c0_68] : memref<30x88xbf16, #tpu.memory_space<vmem>>, vector<30x88xbf16>
    %c0_69 = arith.constant 0 : index
    %c0_70 = arith.constant 0 : index
    %182 = vector.load %arg25[%c0_69, %c0_70] : memref<30x1xf32, #tpu.memory_space<vmem>>, vector<30x1xf32>
    %cst_71 = arith.constant 0.000000e+00 : f32
    %183 = vector.broadcast %cst_71 : f32 to vector<30x4xf32>
    %cst_72 = arith.constant 0.000000e+00 : f32
    %184 = vector.broadcast %cst_72 : f32 to vector<30x5xf32>
    %185 = vector.extract_strided_slice %178 {offsets = [0, 0], sizes = [30, 4], strides = [1, 1]} : vector<30x8xf32> to vector<30x4xf32>
    %186 = vector.extract_strided_slice %178 {offsets = [0, 4], sizes = [30, 4], strides = [1, 1]} : vector<30x8xf32> to vector<30x4xf32>
    %187 = tpu.concatenate %183, %185, %184, %183, %186, %184 in 1 : vector<30x4xf32>, vector<30x4xf32>, vector<30x5xf32>, vector<30x4xf32>, vector<30x4xf32>, vector<30x5xf32> -> vector<30x26xf32>
    %188 = vector.extract_strided_slice %187 {offsets = [0, 0], sizes = [30, 4], strides = [1, 1]} : vector<30x26xf32> to vector<30x4xf32>
    %189 = vector.extract_strided_slice %187 {offsets = [0, 13], sizes = [30, 4], strides = [1, 1]} : vector<30x26xf32> to vector<30x4xf32>
    %190 = tpu.concatenate %188, %189 in 1 : vector<30x4xf32>, vector<30x4xf32> -> vector<30x8xf32>
    %191 = vector.extract_strided_slice %187 {offsets = [0, 1], sizes = [30, 4], strides = [1, 1]} : vector<30x26xf32> to vector<30x4xf32>
    %192 = vector.extract_strided_slice %187 {offsets = [0, 14], sizes = [30, 4], strides = [1, 1]} : vector<30x26xf32> to vector<30x4xf32>
    %193 = tpu.concatenate %191, %192 in 1 : vector<30x4xf32>, vector<30x4xf32> -> vector<30x8xf32>
    %194 = vector.extract_strided_slice %187 {offsets = [0, 2], sizes = [30, 4], strides = [1, 1]} : vector<30x26xf32> to vector<30x4xf32>
    %195 = vector.extract_strided_slice %187 {offsets = [0, 15], sizes = [30, 4], strides = [1, 1]} : vector<30x26xf32> to vector<30x4xf32>
    %196 = tpu.concatenate %194, %195 in 1 : vector<30x4xf32>, vector<30x4xf32> -> vector<30x8xf32>
    %197 = vector.extract_strided_slice %187 {offsets = [0, 3], sizes = [30, 4], strides = [1, 1]} : vector<30x26xf32> to vector<30x4xf32>
    %198 = vector.extract_strided_slice %187 {offsets = [0, 16], sizes = [30, 4], strides = [1, 1]} : vector<30x26xf32> to vector<30x4xf32>
    %199 = tpu.concatenate %197, %198 in 1 : vector<30x4xf32>, vector<30x4xf32> -> vector<30x8xf32>
    %200 = vector.extract_strided_slice %187 {offsets = [0, 4], sizes = [30, 4], strides = [1, 1]} : vector<30x26xf32> to vector<30x4xf32>
    %201 = vector.extract_strided_slice %187 {offsets = [0, 17], sizes = [30, 4], strides = [1, 1]} : vector<30x26xf32> to vector<30x4xf32>
    %202 = tpu.concatenate %200, %201 in 1 : vector<30x4xf32>, vector<30x4xf32> -> vector<30x8xf32>
    %203 = vector.extract_strided_slice %187 {offsets = [0, 5], sizes = [30, 4], strides = [1, 1]} : vector<30x26xf32> to vector<30x4xf32>
    %204 = vector.extract_strided_slice %187 {offsets = [0, 18], sizes = [30, 4], strides = [1, 1]} : vector<30x26xf32> to vector<30x4xf32>
    %205 = tpu.concatenate %203, %204 in 1 : vector<30x4xf32>, vector<30x4xf32> -> vector<30x8xf32>
    %206 = vector.extract_strided_slice %187 {offsets = [0, 6], sizes = [30, 4], strides = [1, 1]} : vector<30x26xf32> to vector<30x4xf32>
    %207 = vector.extract_strided_slice %187 {offsets = [0, 19], sizes = [30, 4], strides = [1, 1]} : vector<30x26xf32> to vector<30x4xf32>
    %208 = tpu.concatenate %206, %207 in 1 : vector<30x4xf32>, vector<30x4xf32> -> vector<30x8xf32>
    %209 = vector.extract_strided_slice %187 {offsets = [0, 7], sizes = [30, 4], strides = [1, 1]} : vector<30x26xf32> to vector<30x4xf32>
    %210 = vector.extract_strided_slice %187 {offsets = [0, 20], sizes = [30, 4], strides = [1, 1]} : vector<30x26xf32> to vector<30x4xf32>
    %211 = tpu.concatenate %209, %210 in 1 : vector<30x4xf32>, vector<30x4xf32> -> vector<30x8xf32>
    %212 = vector.extract_strided_slice %187 {offsets = [0, 8], sizes = [30, 4], strides = [1, 1]} : vector<30x26xf32> to vector<30x4xf32>
    %213 = vector.extract_strided_slice %187 {offsets = [0, 21], sizes = [30, 4], strides = [1, 1]} : vector<30x26xf32> to vector<30x4xf32>
    %214 = tpu.concatenate %212, %213 in 1 : vector<30x4xf32>, vector<30x4xf32> -> vector<30x8xf32>
    %215 = vector.extract_strided_slice %187 {offsets = [0, 9], sizes = [30, 4], strides = [1, 1]} : vector<30x26xf32> to vector<30x4xf32>
    %216 = vector.extract_strided_slice %187 {offsets = [0, 22], sizes = [30, 4], strides = [1, 1]} : vector<30x26xf32> to vector<30x4xf32>
    %217 = tpu.concatenate %215, %216 in 1 : vector<30x4xf32>, vector<30x4xf32> -> vector<30x8xf32>
    %218 = tpu.concatenate %190, %193, %196, %199, %202, %205, %208, %211, %214, %217 in 0 : vector<30x8xf32>, vector<30x8xf32>, vector<30x8xf32>, vector<30x8xf32>, vector<30x8xf32>, vector<30x8xf32>, vector<30x8xf32>, vector<30x8xf32>, vector<30x8xf32>, vector<30x8xf32> -> vector<300x8xf32>
    %219 = arith.truncf %218 : vector<300x8xf32> to vector<300x8xbf16>
    %cst_73 = arith.constant dense<0.000000e+00> : vector<88x8xf32>
    %220 = tpu.matmul %179, %219, %cst_73 {dimension_numbers = #tpu.dot_dimension_numbers<[1], [0], [0], [1], [0, 0, 1, 1], [], []>} : vector<88x300xbf16>, vector<300x8xbf16>, vector<88x8xf32> -> vector<88x8xf32>
    %221 = vector.broadcast %180 : vector<88x1xf32> to vector<88x8xf32>
    %222 = arith.addf %220, %221 : vector<88x8xf32>
    %cst_74 = arith.constant 0.000000e+00 : f32
    %223 = vector.broadcast %cst_74 : f32 to vector<88x8xf32>
    %224 = arith.maximumf %222, %223 : vector<88x8xf32>
    %c0_75 = arith.constant 0 : index
    %c0_76 = arith.constant 0 : index
    %225 = vector.load %arg8[%c0_75, %c0_76] : memref<8x4xbf16, #tpu.memory_space<vmem>>, vector<8x4xbf16>
    %c0_77 = arith.constant 0 : index
    %c0_78 = arith.constant 0 : index
    %226 = vector.load %arg9[%c0_77, %c0_78] : memref<8x4xbf16, #tpu.memory_space<vmem>>, vector<8x4xbf16>
    %227 = arith.truncf %224 : vector<88x8xf32> to vector<88x8xbf16>
    %cst_79 = arith.constant dense<0.000000e+00> : vector<88x4xf32>
    %228 = tpu.matmul %227, %225, %cst_79 {dimension_numbers = #tpu.dot_dimension_numbers<[1], [0], [0], [1], [0, 0, 1, 1], [], []>} : vector<88x8xbf16>, vector<8x4xbf16>, vector<88x4xf32> -> vector<88x4xf32>
    %cst_80 = arith.constant dense<0.000000e+00> : vector<88x4xf32>
    %229 = tpu.matmul %227, %226, %cst_80 {dimension_numbers = #tpu.dot_dimension_numbers<[1], [0], [0], [1], [0, 0, 1, 1], [], []>} : vector<88x8xbf16>, vector<8x4xbf16>, vector<88x4xf32> -> vector<88x4xf32>
    %230 = arith.maximumf %228, %229 : vector<88x4xf32>
    %231 = arith.truncf %230 : vector<88x4xf32> to vector<88x4xbf16>
    %cst_81 = arith.constant dense<0.000000e+00> : vector<30x4xf32>
    %232 = tpu.matmul %181, %231, %cst_81 {dimension_numbers = #tpu.dot_dimension_numbers<[1], [0], [0], [1], [0, 0, 1, 1], [], []>} : vector<30x88xbf16>, vector<88x4xbf16>, vector<30x4xf32> -> vector<30x4xf32>
    %233 = vector.broadcast %182 : vector<30x1xf32> to vector<30x4xf32>
    %234 = arith.addf %232, %233 : vector<30x4xf32>
    %cst_82 = arith.constant 0.000000e+00 : f32
    %235 = vector.broadcast %cst_82 : f32 to vector<30x4xf32>
    %236 = arith.maximumf %234, %235 : vector<30x4xf32>
    %237 = vector.extract_strided_slice %236 {offsets = [0, 0], sizes = [30, 1], strides = [1, 1]} : vector<30x4xf32> to vector<30x1xf32>
    %238 = vector.extract_strided_slice %236 {offsets = [0, 2], sizes = [30, 1], strides = [1, 1]} : vector<30x4xf32> to vector<30x1xf32>
    %239 = vector.extract_strided_slice %236 {offsets = [0, 1], sizes = [30, 1], strides = [1, 1]} : vector<30x4xf32> to vector<30x1xf32>
    %240 = vector.extract_strided_slice %236 {offsets = [0, 3], sizes = [30, 1], strides = [1, 1]} : vector<30x4xf32> to vector<30x1xf32>
    %241 = tpu.concatenate %237, %238, %239, %240 in 1 : vector<30x1xf32>, vector<30x1xf32>, vector<30x1xf32>, vector<30x1xf32> -> vector<30x4xf32>
    %c0_83 = arith.constant 0 : index
    %c0_84 = arith.constant 0 : index
    %242 = vector.load %arg26[%c0_83, %c0_84] : memref<96x30xbf16, #tpu.memory_space<vmem>>, vector<96x30xbf16>
    %c0_85 = arith.constant 0 : index
    %c0_86 = arith.constant 0 : index
    %243 = vector.load %arg27[%c0_85, %c0_86] : memref<96x32xbf16, #tpu.memory_space<vmem>>, vector<96x32xbf16>
    %c0_87 = arith.constant 0 : index
    %c0_88 = arith.constant 0 : index
    %244 = vector.load %arg28[%c0_87, %c0_88] : memref<96x1xf32, #tpu.memory_space<vmem>>, vector<96x1xf32>
    %c0_89 = arith.constant 0 : index
    %c0_90 = arith.constant 0 : index
    %245 = vector.load %arg29[%c0_89, %c0_90] : memref<96x1xf32, #tpu.memory_space<vmem>>, vector<96x1xf32>
    %246 = arith.truncf %241 : vector<30x4xf32> to vector<30x4xbf16>
    %cst_91 = arith.constant dense<0.000000e+00> : vector<96x4xf32>
    %247 = tpu.matmul %242, %246, %cst_91 {dimension_numbers = #tpu.dot_dimension_numbers<[1], [0], [0], [1], [0, 0, 1, 1], [], []>} : vector<96x30xbf16>, vector<30x4xbf16>, vector<96x4xf32> -> vector<96x4xf32>
    %248 = vector.broadcast %244 : vector<96x1xf32> to vector<96x4xf32>
    %249 = arith.addf %247, %248 : vector<96x4xf32>
    %cst_92 = arith.constant 0.000000e+00 : f32
    %250 = vector.broadcast %cst_92 : f32 to vector<32x2xf32>
    %251 = vector.extract_strided_slice %249 {offsets = [0, 0], sizes = [96, 2], strides = [1, 1]} : vector<96x4xf32> to vector<96x2xf32>
    %252 = arith.truncf %250 : vector<32x2xf32> to vector<32x2xbf16>
    %cst_93 = arith.constant dense<0.000000e+00> : vector<96x2xf32>
    %253 = tpu.matmul %243, %252, %cst_93 {dimension_numbers = #tpu.dot_dimension_numbers<[1], [0], [0], [1], [0, 0, 1, 1], [], []>} : vector<96x32xbf16>, vector<32x2xbf16>, vector<96x2xf32> -> vector<96x2xf32>
    %254 = vector.broadcast %245 : vector<96x1xf32> to vector<96x2xf32>
    %255 = arith.addf %253, %254 : vector<96x2xf32>
    %256 = vector.extract_strided_slice %251 {offsets = [0, 0], sizes = [32, 2], strides = [1, 1]} : vector<96x2xf32> to vector<32x2xf32>
    %257 = vector.extract_strided_slice %255 {offsets = [0, 0], sizes = [32, 2], strides = [1, 1]} : vector<96x2xf32> to vector<32x2xf32>
    %258 = arith.addf %256, %257 : vector<32x2xf32>
    %259 = arith.negf %258 : vector<32x2xf32>
    %260 = math.exp %259 : vector<32x2xf32>
    %cst_94 = arith.constant 1.000000e+00 : f32
    %261 = vector.broadcast %cst_94 : f32 to vector<32x2xf32>
    %262 = arith.addf %261, %260 : vector<32x2xf32>
    %263 = arith.divf %261, %262 : vector<32x2xf32>
    %264 = vector.extract_strided_slice %251 {offsets = [32, 0], sizes = [32, 2], strides = [1, 1]} : vector<96x2xf32> to vector<32x2xf32>
    %265 = vector.extract_strided_slice %255 {offsets = [32, 0], sizes = [32, 2], strides = [1, 1]} : vector<96x2xf32> to vector<32x2xf32>
    %266 = arith.addf %264, %265 : vector<32x2xf32>
    %267 = arith.negf %266 : vector<32x2xf32>
    %268 = math.exp %267 : vector<32x2xf32>
    %cst_95 = arith.constant 1.000000e+00 : f32
    %269 = vector.broadcast %cst_95 : f32 to vector<32x2xf32>
    %270 = arith.addf %269, %268 : vector<32x2xf32>
    %271 = arith.divf %269, %270 : vector<32x2xf32>
    %272 = vector.extract_strided_slice %251 {offsets = [64, 0], sizes = [32, 2], strides = [1, 1]} : vector<96x2xf32> to vector<32x2xf32>
    %273 = vector.extract_strided_slice %255 {offsets = [64, 0], sizes = [32, 2], strides = [1, 1]} : vector<96x2xf32> to vector<32x2xf32>
    %274 = arith.mulf %263, %273 : vector<32x2xf32>
    %275 = arith.addf %272, %274 : vector<32x2xf32>
    %276 = math.tanh %275 : vector<32x2xf32>
    %cst_96 = arith.constant 1.000000e+00 : f32
    %277 = vector.broadcast %cst_96 : f32 to vector<32x2xf32>
    %278 = arith.subf %277, %271 : vector<32x2xf32>
    %279 = arith.mulf %278, %276 : vector<32x2xf32>
    %280 = arith.mulf %271, %250 : vector<32x2xf32>
    %281 = arith.addf %279, %280 : vector<32x2xf32>
    %c0_97 = arith.constant 0 : index
    %c0_98 = arith.constant 0 : index
    %282 = vector.load %arg41[%c0_97, %c0_98] : memref<32x4xf32, #tpu.memory_space<vmem>>, vector<32x2xf32>
    tpu.vector_store %arg41[%c0_97, %c0_98], %281 {strides = array<i32>} : memref<32x4xf32, #tpu.memory_space<vmem>>, vector<32x2xf32>,
    %283 = vector.extract_strided_slice %249 {offsets = [0, 2], sizes = [96, 2], strides = [1, 1]} : vector<96x4xf32> to vector<96x2xf32>
    %284 = arith.truncf %281 : vector<32x2xf32> to vector<32x2xbf16>
    %cst_99 = arith.constant dense<0.000000e+00> : vector<96x2xf32>
    %285 = tpu.matmul %243, %284, %cst_99 {dimension_numbers = #tpu.dot_dimension_numbers<[1], [0], [0], [1], [0, 0, 1, 1], [], []>} : vector<96x32xbf16>, vector<32x2xbf16>, vector<96x2xf32> -> vector<96x2xf32>
    %286 = vector.broadcast %245 : vector<96x1xf32> to vector<96x2xf32>
    %287 = arith.addf %285, %286 : vector<96x2xf32>
    %288 = vector.extract_strided_slice %283 {offsets = [0, 0], sizes = [32, 2], strides = [1, 1]} : vector<96x2xf32> to vector<32x2xf32>
    %289 = vector.extract_strided_slice %287 {offsets = [0, 0], sizes = [32, 2], strides = [1, 1]} : vector<96x2xf32> to vector<32x2xf32>
    %290 = arith.addf %288, %289 : vector<32x2xf32>
    %291 = arith.negf %290 : vector<32x2xf32>
    %292 = math.exp %291 : vector<32x2xf32>
    %cst_100 = arith.constant 1.000000e+00 : f32
    %293 = vector.broadcast %cst_100 : f32 to vector<32x2xf32>
    %294 = arith.addf %293, %292 : vector<32x2xf32>
    %295 = arith.divf %293, %294 : vector<32x2xf32>
    %296 = vector.extract_strided_slice %283 {offsets = [32, 0], sizes = [32, 2], strides = [1, 1]} : vector<96x2xf32> to vector<32x2xf32>
    %297 = vector.extract_strided_slice %287 {offsets = [32, 0], sizes = [32, 2], strides = [1, 1]} : vector<96x2xf32> to vector<32x2xf32>
    %298 = arith.addf %296, %297 : vector<32x2xf32>
    %299 = arith.negf %298 : vector<32x2xf32>
    %300 = math.exp %299 : vector<32x2xf32>
    %cst_101 = arith.constant 1.000000e+00 : f32
    %301 = vector.broadcast %cst_101 : f32 to vector<32x2xf32>
    %302 = arith.addf %301, %300 : vector<32x2xf32>
    %303 = arith.divf %301, %302 : vector<32x2xf32>
    %304 = vector.extract_strided_slice %283 {offsets = [64, 0], sizes = [32, 2], strides = [1, 1]} : vector<96x2xf32> to vector<32x2xf32>
    %305 = vector.extract_strided_slice %287 {offsets = [64, 0], sizes = [32, 2], strides = [1, 1]} : vector<96x2xf32> to vector<32x2xf32>
    %306 = arith.mulf %295, %305 : vector<32x2xf32>
    %307 = arith.addf %304, %306 : vector<32x2xf32>
    %308 = math.tanh %307 : vector<32x2xf32>
    %cst_102 = arith.constant 1.000000e+00 : f32
    %309 = vector.broadcast %cst_102 : f32 to vector<32x2xf32>
    %310 = arith.subf %309, %303 : vector<32x2xf32>
    %311 = arith.mulf %310, %308 : vector<32x2xf32>
    %312 = arith.mulf %303, %281 : vector<32x2xf32>
    %313 = arith.addf %311, %312 : vector<32x2xf32>
    %c0_103 = arith.constant 0 : index
    %c2 = arith.constant 2 : index
    %314 = vector.load %arg41[%c0_103, %c2] : memref<32x4xf32, #tpu.memory_space<vmem>>, vector<32x2xf32>
    tpu.vector_store %arg41[%c0_103, %c2], %313 {strides = array<i32>} : memref<32x4xf32, #tpu.memory_space<vmem>>, vector<32x2xf32>,
    %c0_104 = arith.constant 0 : index
    %c0_105 = arith.constant 0 : index
    %315 = vector.load %arg41[%c0_104, %c0_105] : memref<32x4xf32, #tpu.memory_space<vmem>>, vector<32x4xf32>
    %c0_106 = arith.constant 0 : index
    %c0_107 = arith.constant 0 : index
    %316 = vector.load %arg30[%c0_106, %c0_107] : memref<96x32xbf16, #tpu.memory_space<vmem>>, vector<96x32xbf16>
    %c0_108 = arith.constant 0 : index
    %c0_109 = arith.constant 0 : index
    %317 = vector.load %arg31[%c0_108, %c0_109] : memref<96x32xbf16, #tpu.memory_space<vmem>>, vector<96x32xbf16>
    %c0_110 = arith.constant 0 : index
    %c0_111 = arith.constant 0 : index
    %318 = vector.load %arg32[%c0_110, %c0_111] : memref<96x1xf32, #tpu.memory_space<vmem>>, vector<96x1xf32>
    %c0_112 = arith.constant 0 : index
    %c0_113 = arith.constant 0 : index
    %319 = vector.load %arg33[%c0_112, %c0_113] : memref<96x1xf32, #tpu.memory_space<vmem>>, vector<96x1xf32>
    %320 = arith.truncf %315 : vector<32x4xf32> to vector<32x4xbf16>
    %cst_114 = arith.constant dense<0.000000e+00> : vector<96x4xf32>
    %321 = tpu.matmul %316, %320, %cst_114 {dimension_numbers = #tpu.dot_dimension_numbers<[1], [0], [0], [1], [0, 0, 1, 1], [], []>} : vector<96x32xbf16>, vector<32x4xbf16>, vector<96x4xf32> -> vector<96x4xf32>
    %322 = vector.broadcast %318 : vector<96x1xf32> to vector<96x4xf32>
    %323 = arith.addf %321, %322 : vector<96x4xf32>
    %cst_115 = arith.constant 0.000000e+00 : f32
    %324 = vector.broadcast %cst_115 : f32 to vector<32x2xf32>
    %325 = vector.extract_strided_slice %323 {offsets = [0, 0], sizes = [96, 2], strides = [1, 1]} : vector<96x4xf32> to vector<96x2xf32>
    %326 = arith.truncf %324 : vector<32x2xf32> to vector<32x2xbf16>
    %cst_116 = arith.constant dense<0.000000e+00> : vector<96x2xf32>
    %327 = tpu.matmul %317, %326, %cst_116 {dimension_numbers = #tpu.dot_dimension_numbers<[1], [0], [0], [1], [0, 0, 1, 1], [], []>} : vector<96x32xbf16>, vector<32x2xbf16>, vector<96x2xf32> -> vector<96x2xf32>
    %328 = vector.broadcast %319 : vector<96x1xf32> to vector<96x2xf32>
    %329 = arith.addf %327, %328 : vector<96x2xf32>
    %330 = vector.extract_strided_slice %325 {offsets = [0, 0], sizes = [32, 2], strides = [1, 1]} : vector<96x2xf32> to vector<32x2xf32>
    %331 = vector.extract_strided_slice %329 {offsets = [0, 0], sizes = [32, 2], strides = [1, 1]} : vector<96x2xf32> to vector<32x2xf32>
    %332 = arith.addf %330, %331 : vector<32x2xf32>
    %333 = arith.negf %332 : vector<32x2xf32>
    %334 = math.exp %333 : vector<32x2xf32>
    %cst_117 = arith.constant 1.000000e+00 : f32
    %335 = vector.broadcast %cst_117 : f32 to vector<32x2xf32>
    %336 = arith.addf %335, %334 : vector<32x2xf32>
    %337 = arith.divf %335, %336 : vector<32x2xf32>
    %338 = vector.extract_strided_slice %325 {offsets = [32, 0], sizes = [32, 2], strides = [1, 1]} : vector<96x2xf32> to vector<32x2xf32>
    %339 = vector.extract_strided_slice %329 {offsets = [32, 0], sizes = [32, 2], strides = [1, 1]} : vector<96x2xf32> to vector<32x2xf32>
    %340 = arith.addf %338, %339 : vector<32x2xf32>
    %341 = arith.negf %340 : vector<32x2xf32>
    %342 = math.exp %341 : vector<32x2xf32>
    %cst_118 = arith.constant 1.000000e+00 : f32
    %343 = vector.broadcast %cst_118 : f32 to vector<32x2xf32>
    %344 = arith.addf %343, %342 : vector<32x2xf32>
    %345 = arith.divf %343, %344 : vector<32x2xf32>
    %346 = vector.extract_strided_slice %325 {offsets = [64, 0], sizes = [32, 2], strides = [1, 1]} : vector<96x2xf32> to vector<32x2xf32>
    %347 = vector.extract_strided_slice %329 {offsets = [64, 0], sizes = [32, 2], strides = [1, 1]} : vector<96x2xf32> to vector<32x2xf32>
    %348 = arith.mulf %337, %347 : vector<32x2xf32>
    %349 = arith.addf %346, %348 : vector<32x2xf32>
    %350 = math.tanh %349 : vector<32x2xf32>
    %cst_119 = arith.constant 1.000000e+00 : f32
    %351 = vector.broadcast %cst_119 : f32 to vector<32x2xf32>
    %352 = arith.subf %351, %345 : vector<32x2xf32>
    %353 = arith.mulf %352, %350 : vector<32x2xf32>
    %354 = arith.mulf %345, %324 : vector<32x2xf32>
    %355 = arith.addf %353, %354 : vector<32x2xf32>
    %c0_120 = arith.constant 0 : index
    %c0_121 = arith.constant 0 : index
    %356 = vector.load %arg42[%c0_120, %c0_121] : memref<32x4xf32, #tpu.memory_space<vmem>>, vector<32x2xf32>
    tpu.vector_store %arg42[%c0_120, %c0_121], %355 {strides = array<i32>} : memref<32x4xf32, #tpu.memory_space<vmem>>, vector<32x2xf32>,
    %357 = vector.extract_strided_slice %323 {offsets = [0, 2], sizes = [96, 2], strides = [1, 1]} : vector<96x4xf32> to vector<96x2xf32>
    %358 = arith.truncf %355 : vector<32x2xf32> to vector<32x2xbf16>
    %cst_122 = arith.constant dense<0.000000e+00> : vector<96x2xf32>
    %359 = tpu.matmul %317, %358, %cst_122 {dimension_numbers = #tpu.dot_dimension_numbers<[1], [0], [0], [1], [0, 0, 1, 1], [], []>} : vector<96x32xbf16>, vector<32x2xbf16>, vector<96x2xf32> -> vector<96x2xf32>
    %360 = vector.broadcast %319 : vector<96x1xf32> to vector<96x2xf32>
    %361 = arith.addf %359, %360 : vector<96x2xf32>
    %362 = vector.extract_strided_slice %357 {offsets = [0, 0], sizes = [32, 2], strides = [1, 1]} : vector<96x2xf32> to vector<32x2xf32>
    %363 = vector.extract_strided_slice %361 {offsets = [0, 0], sizes = [32, 2], strides = [1, 1]} : vector<96x2xf32> to vector<32x2xf32>
    %364 = arith.addf %362, %363 : vector<32x2xf32>
    %365 = arith.negf %364 : vector<32x2xf32>
    %366 = math.exp %365 : vector<32x2xf32>
    %cst_123 = arith.constant 1.000000e+00 : f32
    %367 = vector.broadcast %cst_123 : f32 to vector<32x2xf32>
    %368 = arith.addf %367, %366 : vector<32x2xf32>
    %369 = arith.divf %367, %368 : vector<32x2xf32>
    %370 = vector.extract_strided_slice %357 {offsets = [32, 0], sizes = [32, 2], strides = [1, 1]} : vector<96x2xf32> to vector<32x2xf32>
    %371 = vector.extract_strided_slice %361 {offsets = [32, 0], sizes = [32, 2], strides = [1, 1]} : vector<96x2xf32> to vector<32x2xf32>
    %372 = arith.addf %370, %371 : vector<32x2xf32>
    %373 = arith.negf %372 : vector<32x2xf32>
    %374 = math.exp %373 : vector<32x2xf32>
    %cst_124 = arith.constant 1.000000e+00 : f32
    %375 = vector.broadcast %cst_124 : f32 to vector<32x2xf32>
    %376 = arith.addf %375, %374 : vector<32x2xf32>
    %377 = arith.divf %375, %376 : vector<32x2xf32>
    %378 = vector.extract_strided_slice %357 {offsets = [64, 0], sizes = [32, 2], strides = [1, 1]} : vector<96x2xf32> to vector<32x2xf32>
    %379 = vector.extract_strided_slice %361 {offsets = [64, 0], sizes = [32, 2], strides = [1, 1]} : vector<96x2xf32> to vector<32x2xf32>
    %380 = arith.mulf %369, %379 : vector<32x2xf32>
    %381 = arith.addf %378, %380 : vector<32x2xf32>
    %382 = math.tanh %381 : vector<32x2xf32>
    %cst_125 = arith.constant 1.000000e+00 : f32
    %383 = vector.broadcast %cst_125 : f32 to vector<32x2xf32>
    %384 = arith.subf %383, %377 : vector<32x2xf32>
    %385 = arith.mulf %384, %382 : vector<32x2xf32>
    %386 = arith.mulf %377, %355 : vector<32x2xf32>
    %387 = arith.addf %385, %386 : vector<32x2xf32>
    %c0_126 = arith.constant 0 : index
    %c2_127 = arith.constant 2 : index
    %388 = vector.load %arg42[%c0_126, %c2_127] : memref<32x4xf32, #tpu.memory_space<vmem>>, vector<32x2xf32>
    tpu.vector_store %arg42[%c0_126, %c2_127], %387 {strides = array<i32>} : memref<32x4xf32, #tpu.memory_space<vmem>>, vector<32x2xf32>,
    %c0_128 = arith.constant 0 : index
    %c0_129 = arith.constant 0 : index
    %389 = vector.load %arg42[%c0_128, %c0_129] : memref<32x4xf32, #tpu.memory_space<vmem>>, vector<32x4xf32>
    %c0_130 = arith.constant 0 : index
    %c0_131 = arith.constant 0 : index
    %390 = vector.load %arg34[%c0_130, %c0_131] : memref<96x32xbf16, #tpu.memory_space<vmem>>, vector<96x32xbf16>
    %c0_132 = arith.constant 0 : index
    %c0_133 = arith.constant 0 : index
    %391 = vector.load %arg35[%c0_132, %c0_133] : memref<96x32xbf16, #tpu.memory_space<vmem>>, vector<96x32xbf16>
    %c0_134 = arith.constant 0 : index
    %c0_135 = arith.constant 0 : index
    %392 = vector.load %arg36[%c0_134, %c0_135] : memref<96x1xf32, #tpu.memory_space<vmem>>, vector<96x1xf32>
    %c0_136 = arith.constant 0 : index
    %c0_137 = arith.constant 0 : index
    %393 = vector.load %arg37[%c0_136, %c0_137] : memref<96x1xf32, #tpu.memory_space<vmem>>, vector<96x1xf32>
    %394 = arith.truncf %389 : vector<32x4xf32> to vector<32x4xbf16>
    %cst_138 = arith.constant dense<0.000000e+00> : vector<96x4xf32>
    %395 = tpu.matmul %390, %394, %cst_138 {dimension_numbers = #tpu.dot_dimension_numbers<[1], [0], [0], [1], [0, 0, 1, 1], [], []>} : vector<96x32xbf16>, vector<32x4xbf16>, vector<96x4xf32> -> vector<96x4xf32>
    %396 = vector.broadcast %392 : vector<96x1xf32> to vector<96x4xf32>
    %397 = arith.addf %395, %396 : vector<96x4xf32>
    %cst_139 = arith.constant 0.000000e+00 : f32
    %398 = vector.broadcast %cst_139 : f32 to vector<32x2xf32>
    %399 = vector.extract_strided_slice %397 {offsets = [0, 0], sizes = [96, 2], strides = [1, 1]} : vector<96x4xf32> to vector<96x2xf32>
    %400 = arith.truncf %398 : vector<32x2xf32> to vector<32x2xbf16>
    %cst_140 = arith.constant dense<0.000000e+00> : vector<96x2xf32>
    %401 = tpu.matmul %391, %400, %cst_140 {dimension_numbers = #tpu.dot_dimension_numbers<[1], [0], [0], [1], [0, 0, 1, 1], [], []>} : vector<96x32xbf16>, vector<32x2xbf16>, vector<96x2xf32> -> vector<96x2xf32>
    %402 = vector.broadcast %393 : vector<96x1xf32> to vector<96x2xf32>
    %403 = arith.addf %401, %402 : vector<96x2xf32>
    %404 = vector.extract_strided_slice %399 {offsets = [0, 0], sizes = [32, 2], strides = [1, 1]} : vector<96x2xf32> to vector<32x2xf32>
    %405 = vector.extract_strided_slice %403 {offsets = [0, 0], sizes = [32, 2], strides = [1, 1]} : vector<96x2xf32> to vector<32x2xf32>
    %406 = arith.addf %404, %405 : vector<32x2xf32>
    %407 = arith.negf %406 : vector<32x2xf32>
    %408 = math.exp %407 : vector<32x2xf32>
    %cst_141 = arith.constant 1.000000e+00 : f32
    %409 = vector.broadcast %cst_141 : f32 to vector<32x2xf32>
    %410 = arith.addf %409, %408 : vector<32x2xf32>
    %411 = arith.divf %409, %410 : vector<32x2xf32>
    %412 = vector.extract_strided_slice %399 {offsets = [32, 0], sizes = [32, 2], strides = [1, 1]} : vector<96x2xf32> to vector<32x2xf32>
    %413 = vector.extract_strided_slice %403 {offsets = [32, 0], sizes = [32, 2], strides = [1, 1]} : vector<96x2xf32> to vector<32x2xf32>
    %414 = arith.addf %412, %413 : vector<32x2xf32>
    %415 = arith.negf %414 : vector<32x2xf32>
    %416 = math.exp %415 : vector<32x2xf32>
    %cst_142 = arith.constant 1.000000e+00 : f32
    %417 = vector.broadcast %cst_142 : f32 to vector<32x2xf32>
    %418 = arith.addf %417, %416 : vector<32x2xf32>
    %419 = arith.divf %417, %418 : vector<32x2xf32>
    %420 = vector.extract_strided_slice %399 {offsets = [64, 0], sizes = [32, 2], strides = [1, 1]} : vector<96x2xf32> to vector<32x2xf32>
    %421 = vector.extract_strided_slice %403 {offsets = [64, 0], sizes = [32, 2], strides = [1, 1]} : vector<96x2xf32> to vector<32x2xf32>
    %422 = arith.mulf %411, %421 : vector<32x2xf32>
    %423 = arith.addf %420, %422 : vector<32x2xf32>
    %424 = math.tanh %423 : vector<32x2xf32>
    %cst_143 = arith.constant 1.000000e+00 : f32
    %425 = vector.broadcast %cst_143 : f32 to vector<32x2xf32>
    %426 = arith.subf %425, %419 : vector<32x2xf32>
    %427 = arith.mulf %426, %424 : vector<32x2xf32>
    %428 = arith.mulf %419, %398 : vector<32x2xf32>
    %429 = arith.addf %427, %428 : vector<32x2xf32>
    %430 = vector.extract_strided_slice %397 {offsets = [0, 2], sizes = [96, 2], strides = [1, 1]} : vector<96x4xf32> to vector<96x2xf32>
    %431 = arith.truncf %429 : vector<32x2xf32> to vector<32x2xbf16>
    %cst_144 = arith.constant dense<0.000000e+00> : vector<96x2xf32>
    %432 = tpu.matmul %391, %431, %cst_144 {dimension_numbers = #tpu.dot_dimension_numbers<[1], [0], [0], [1], [0, 0, 1, 1], [], []>} : vector<96x32xbf16>, vector<32x2xbf16>, vector<96x2xf32> -> vector<96x2xf32>
    %433 = vector.broadcast %393 : vector<96x1xf32> to vector<96x2xf32>
    %434 = arith.addf %432, %433 : vector<96x2xf32>
    %435 = vector.extract_strided_slice %430 {offsets = [0, 0], sizes = [32, 2], strides = [1, 1]} : vector<96x2xf32> to vector<32x2xf32>
    %436 = vector.extract_strided_slice %434 {offsets = [0, 0], sizes = [32, 2], strides = [1, 1]} : vector<96x2xf32> to vector<32x2xf32>
    %437 = arith.addf %435, %436 : vector<32x2xf32>
    %438 = arith.negf %437 : vector<32x2xf32>
    %439 = math.exp %438 : vector<32x2xf32>
    %cst_145 = arith.constant 1.000000e+00 : f32
    %440 = vector.broadcast %cst_145 : f32 to vector<32x2xf32>
    %441 = arith.addf %440, %439 : vector<32x2xf32>
    %442 = arith.divf %440, %441 : vector<32x2xf32>
    %443 = vector.extract_strided_slice %430 {offsets = [32, 0], sizes = [32, 2], strides = [1, 1]} : vector<96x2xf32> to vector<32x2xf32>
    %444 = vector.extract_strided_slice %434 {offsets = [32, 0], sizes = [32, 2], strides = [1, 1]} : vector<96x2xf32> to vector<32x2xf32>
    %445 = arith.addf %443, %444 : vector<32x2xf32>
    %446 = arith.negf %445 : vector<32x2xf32>
    %447 = math.exp %446 : vector<32x2xf32>
    %cst_146 = arith.constant 1.000000e+00 : f32
    %448 = vector.broadcast %cst_146 : f32 to vector<32x2xf32>
    %449 = arith.addf %448, %447 : vector<32x2xf32>
    %450 = arith.divf %448, %449 : vector<32x2xf32>
    %451 = vector.extract_strided_slice %430 {offsets = [64, 0], sizes = [32, 2], strides = [1, 1]} : vector<96x2xf32> to vector<32x2xf32>
    %452 = vector.extract_strided_slice %434 {offsets = [64, 0], sizes = [32, 2], strides = [1, 1]} : vector<96x2xf32> to vector<32x2xf32>
    %453 = arith.mulf %442, %452 : vector<32x2xf32>
    %454 = arith.addf %451, %453 : vector<32x2xf32>
    %455 = math.tanh %454 : vector<32x2xf32>
    %cst_147 = arith.constant 1.000000e+00 : f32
    %456 = vector.broadcast %cst_147 : f32 to vector<32x2xf32>
    %457 = arith.subf %456, %450 : vector<32x2xf32>
    %458 = arith.mulf %457, %455 : vector<32x2xf32>
    %459 = arith.mulf %450, %429 : vector<32x2xf32>
    %460 = arith.addf %458, %459 : vector<32x2xf32>
    %c0_148 = arith.constant 0 : index
    %c0_149 = arith.constant 0 : index
    %461 = vector.load %arg38[%c0_148, %c0_149] : memref<16x32xbf16, #tpu.memory_space<vmem>>, vector<16x32xbf16>
    %c0_150 = arith.constant 0 : index
    %c0_151 = arith.constant 0 : index
    %462 = vector.load %arg39[%c0_150, %c0_151] : memref<16x1xf32, #tpu.memory_space<vmem>>, vector<16x1xf32>
    %463 = arith.truncf %460 : vector<32x2xf32> to vector<32x2xbf16>
    %cst_152 = arith.constant dense<0.000000e+00> : vector<16x2xf32>
    %464 = tpu.matmul %461, %463, %cst_152 {dimension_numbers = #tpu.dot_dimension_numbers<[1], [0], [0], [1], [0, 0, 1, 1], [], []>} : vector<16x32xbf16>, vector<32x2xbf16>, vector<16x2xf32> -> vector<16x2xf32>
    %465 = vector.broadcast %462 : vector<16x1xf32> to vector<16x2xf32>
    %466 = arith.addf %464, %465 : vector<16x2xf32>
    %c0_153 = arith.constant 0 : index
    %c0_154 = arith.constant 0 : index
    %c0_155 = arith.constant 0 : index
    %467 = vector.load %arg40[%c0_153, %c0_154, %c0_155] : memref<1x16x2xf32, #tpu.memory_space<vmem>>, vector<1x16x2xf32>
    %468 = vector.shape_cast %467 : vector<1x16x2xf32> to vector<16x2xf32>
    %469 = vector.shape_cast %466 : vector<16x2xf32> to vector<1x16x2xf32>
    tpu.vector_store %arg40[%c0_153, %c0_154, %c0_155], %469 {strides = array<i32>} : memref<1x16x2xf32, #tpu.memory_space<vmem>>, vector<1x16x2xf32>,
    return
  }
  func.func @transform_0(%arg0: i32) -> (i32, i32, i32) {
    %c0_i32 = arith.constant 0 : i32
    %c0_i32_0 = arith.constant 0 : i32
    %c0_i32_1 = arith.constant 0 : i32
    return %arg0, %c0_i32, %c0_i32_0 : i32, i32, i32
  }
  func.func @transform_1(%arg0: i32) -> (i32, i32) {
    %c0_i32 = arith.constant 0 : i32
    %c0_i32_0 = arith.constant 0 : i32
    %c0_i32_1 = arith.constant 0 : i32
    return %c0_i32, %c0_i32_0 : i32, i32
  }
  func.func @transform_2(%arg0: i32) -> (i32, i32) {
    %c0_i32 = arith.constant 0 : i32
    %c0_i32_0 = arith.constant 0 : i32
    %c0_i32_1 = arith.constant 0 : i32
    return %c0_i32, %c0_i32_0 : i32, i32
  }
  func.func @transform_3(%arg0: i32) -> (i32, i32) {
    %c0_i32 = arith.constant 0 : i32
    %c0_i32_0 = arith.constant 0 : i32
    %c0_i32_1 = arith.constant 0 : i32
    return %c0_i32, %c0_i32_0 : i32, i32
  }
  func.func @transform_4(%arg0: i32) -> (i32, i32) {
    %c0_i32 = arith.constant 0 : i32
    %c0_i32_0 = arith.constant 0 : i32
    %c0_i32_1 = arith.constant 0 : i32
    return %c0_i32, %c0_i32_0 : i32, i32
  }
  func.func @transform_5(%arg0: i32) -> (i32, i32) {
    %c0_i32 = arith.constant 0 : i32
    %c0_i32_0 = arith.constant 0 : i32
    %c0_i32_1 = arith.constant 0 : i32
    return %c0_i32, %c0_i32_0 : i32, i32
  }
  func.func @transform_6(%arg0: i32) -> (i32, i32) {
    %c0_i32 = arith.constant 0 : i32
    %c0_i32_0 = arith.constant 0 : i32
    %c0_i32_1 = arith.constant 0 : i32
    return %c0_i32, %c0_i32_0 : i32, i32
  }
  func.func @transform_7(%arg0: i32) -> (i32, i32) {
    %c0_i32 = arith.constant 0 : i32
    %c0_i32_0 = arith.constant 0 : i32
    %c0_i32_1 = arith.constant 0 : i32
    return %c0_i32, %c0_i32_0 : i32, i32
  }
  func.func @transform_8(%arg0: i32) -> (i32, i32) {
    %c0_i32 = arith.constant 0 : i32
    %c0_i32_0 = arith.constant 0 : i32
    %c0_i32_1 = arith.constant 0 : i32
    return %c0_i32, %c0_i32_0 : i32, i32
  }
  func.func @transform_9(%arg0: i32) -> (i32, i32) {
    %c0_i32 = arith.constant 0 : i32
    %c0_i32_0 = arith.constant 0 : i32
    %c0_i32_1 = arith.constant 0 : i32
    return %c0_i32, %c0_i32_0 : i32, i32
  }
  func.func @transform_10(%arg0: i32) -> (i32, i32) {
    %c0_i32 = arith.constant 0 : i32
    %c0_i32_0 = arith.constant 0 : i32
    %c0_i32_1 = arith.constant 0 : i32
    return %c0_i32, %c0_i32_0 : i32, i32
  }
  func.func @transform_11(%arg0: i32) -> (i32, i32) {
    %c0_i32 = arith.constant 0 : i32
    %c0_i32_0 = arith.constant 0 : i32
    %c0_i32_1 = arith.constant 0 : i32
    return %c0_i32, %c0_i32_0 : i32, i32
  }
  func.func @transform_12(%arg0: i32) -> (i32, i32) {
    %c0_i32 = arith.constant 0 : i32
    %c0_i32_0 = arith.constant 0 : i32
    %c0_i32_1 = arith.constant 0 : i32
    return %c0_i32, %c0_i32_0 : i32, i32
  }
  func.func @transform_13(%arg0: i32) -> (i32, i32) {
    %c0_i32 = arith.constant 0 : i32
    %c0_i32_0 = arith.constant 0 : i32
    %c0_i32_1 = arith.constant 0 : i32
    return %c0_i32, %c0_i32_0 : i32, i32
  }
  func.func @transform_14(%arg0: i32) -> (i32, i32) {
    %c0_i32 = arith.constant 0 : i32
    %c0_i32_0 = arith.constant 0 : i32
    %c0_i32_1 = arith.constant 0 : i32
    return %c0_i32, %c0_i32_0 : i32, i32
  }
  func.func @transform_15(%arg0: i32) -> (i32, i32) {
    %c0_i32 = arith.constant 0 : i32
    %c0_i32_0 = arith.constant 0 : i32
    %c0_i32_1 = arith.constant 0 : i32
    return %c0_i32, %c0_i32_0 : i32, i32
  }
  func.func @transform_16(%arg0: i32) -> (i32, i32) {
    %c0_i32 = arith.constant 0 : i32
    %c0_i32_0 = arith.constant 0 : i32
    %c0_i32_1 = arith.constant 0 : i32
    return %c0_i32, %c0_i32_0 : i32, i32
  }
  func.func @transform_17(%arg0: i32) -> (i32, i32) {
    %c0_i32 = arith.constant 0 : i32
    %c0_i32_0 = arith.constant 0 : i32
    %c0_i32_1 = arith.constant 0 : i32
    return %c0_i32, %c0_i32_0 : i32, i32
  }
  func.func @transform_18(%arg0: i32) -> (i32, i32) {
    %c0_i32 = arith.constant 0 : i32
    %c0_i32_0 = arith.constant 0 : i32
    %c0_i32_1 = arith.constant 0 : i32
    return %c0_i32, %c0_i32_0 : i32, i32
  }
  func.func @transform_19(%arg0: i32) -> (i32, i32) {
    %c0_i32 = arith.constant 0 : i32
    %c0_i32_0 = arith.constant 0 : i32
    %c0_i32_1 = arith.constant 0 : i32
    return %c0_i32, %c0_i32_0 : i32, i32
  }
  func.func @transform_20(%arg0: i32) -> (i32, i32) {
    %c0_i32 = arith.constant 0 : i32
    %c0_i32_0 = arith.constant 0 : i32
    %c0_i32_1 = arith.constant 0 : i32
    return %c0_i32, %c0_i32_0 : i32, i32
  }
  func.func @transform_21(%arg0: i32) -> (i32, i32) {
    %c0_i32 = arith.constant 0 : i32
    %c0_i32_0 = arith.constant 0 : i32
    %c0_i32_1 = arith.constant 0 : i32
    return %c0_i32, %c0_i32_0 : i32, i32
  }
  func.func @transform_22(%arg0: i32) -> (i32, i32) {
    %c0_i32 = arith.constant 0 : i32
    %c0_i32_0 = arith.constant 0 : i32
    %c0_i32_1 = arith.constant 0 : i32
    return %c0_i32, %c0_i32_0 : i32, i32
  }
  func.func @transform_23(%arg0: i32) -> (i32, i32) {
    %c0_i32 = arith.constant 0 : i32
    %c0_i32_0 = arith.constant 0 : i32
    %c0_i32_1 = arith.constant 0 : i32
    return %c0_i32, %c0_i32_0 : i32, i32
  }
  func.func @transform_24(%arg0: i32) -> (i32, i32) {
    %c0_i32 = arith.constant 0 : i32
    %c0_i32_0 = arith.constant 0 : i32
    %c0_i32_1 = arith.constant 0 : i32
    return %c0_i32, %c0_i32_0 : i32, i32
  }
  func.func @transform_25(%arg0: i32) -> (i32, i32) {
    %c0_i32 = arith.constant 0 : i32
    %c0_i32_0 = arith.constant 0 : i32
    %c0_i32_1 = arith.constant 0 : i32
    return %c0_i32, %c0_i32_0 : i32, i32
  }
  func.func @transform_26(%arg0: i32) -> (i32, i32) {
    %c0_i32 = arith.constant 0 : i32
    %c0_i32_0 = arith.constant 0 : i32
    %c0_i32_1 = arith.constant 0 : i32
    return %c0_i32, %c0_i32_0 : i32, i32
  }
  func.func @transform_27(%arg0: i32) -> (i32, i32) {
    %c0_i32 = arith.constant 0 : i32
    %c0_i32_0 = arith.constant 0 : i32
    %c0_i32_1 = arith.constant 0 : i32
    return %c0_i32, %c0_i32_0 : i32, i32
  }
  func.func @transform_28(%arg0: i32) -> (i32, i32) {
    %c0_i32 = arith.constant 0 : i32
    %c0_i32_0 = arith.constant 0 : i32
    %c0_i32_1 = arith.constant 0 : i32
    return %c0_i32, %c0_i32_0 : i32, i32
  }
  func.func @transform_29(%arg0: i32) -> (i32, i32) {
    %c0_i32 = arith.constant 0 : i32
    %c0_i32_0 = arith.constant 0 : i32
    %c0_i32_1 = arith.constant 0 : i32
    return %c0_i32, %c0_i32_0 : i32, i32
  }
  func.func @transform_30(%arg0: i32) -> (i32, i32) {
    %c0_i32 = arith.constant 0 : i32
    %c0_i32_0 = arith.constant 0 : i32
    %c0_i32_1 = arith.constant 0 : i32
    return %c0_i32, %c0_i32_0 : i32, i32
  }
  func.func @transform_31(%arg0: i32) -> (i32, i32) {
    %c0_i32 = arith.constant 0 : i32
    %c0_i32_0 = arith.constant 0 : i32
    %c0_i32_1 = arith.constant 0 : i32
    return %c0_i32, %c0_i32_0 : i32, i32
  }
  func.func @transform_32(%arg0: i32) -> (i32, i32) {
    %c0_i32 = arith.constant 0 : i32
    %c0_i32_0 = arith.constant 0 : i32
    %c0_i32_1 = arith.constant 0 : i32
    return %c0_i32, %c0_i32_0 : i32, i32
  }
  func.func @transform_33(%arg0: i32) -> (i32, i32) {
    %c0_i32 = arith.constant 0 : i32
    %c0_i32_0 = arith.constant 0 : i32
    %c0_i32_1 = arith.constant 0 : i32
    return %c0_i32, %c0_i32_0 : i32, i32
  }
  func.func @transform_34(%arg0: i32) -> (i32, i32) {
    %c0_i32 = arith.constant 0 : i32
    %c0_i32_0 = arith.constant 0 : i32
    %c0_i32_1 = arith.constant 0 : i32
    return %c0_i32, %c0_i32_0 : i32, i32
  }
  func.func @transform_35(%arg0: i32) -> (i32, i32) {
    %c0_i32 = arith.constant 0 : i32
    %c0_i32_0 = arith.constant 0 : i32
    %c0_i32_1 = arith.constant 0 : i32
    return %c0_i32, %c0_i32_0 : i32, i32
  }
  func.func @transform_36(%arg0: i32) -> (i32, i32) {
    %c0_i32 = arith.constant 0 : i32
    %c0_i32_0 = arith.constant 0 : i32
    %c0_i32_1 = arith.constant 0 : i32
    return %c0_i32, %c0_i32_0 : i32, i32
  }
  func.func @transform_37(%arg0: i32) -> (i32, i32) {
    %c0_i32 = arith.constant 0 : i32
    %c0_i32_0 = arith.constant 0 : i32
    %c0_i32_1 = arith.constant 0 : i32
    return %c0_i32, %c0_i32_0 : i32, i32
  }
  func.func @transform_38(%arg0: i32) -> (i32, i32) {
    %c0_i32 = arith.constant 0 : i32
    %c0_i32_0 = arith.constant 0 : i32
    %c0_i32_1 = arith.constant 0 : i32
    return %c0_i32, %c0_i32_0 : i32, i32
  }
  func.func @transform_39(%arg0: i32) -> (i32, i32, i32) {
    %c0_i32 = arith.constant 0 : i32
    %c0_i32_0 = arith.constant 0 : i32
    %c0_i32_1 = arith.constant 0 : i32
    return %arg0, %c0_i32, %c0_i32_0 : i32, i32, i32
  }
}

</mosaic_0001>

<bundles_post_ra>
// kernel: encoder_forward.1
= control target key start
LH: loop header
LB: loop body
LE: loop exit
PB: predicated region body
PF: predicated region fallthrough
CT: control target
= control target key end

     0   :  { %s10815_s6 = smov 32   ;;  %vm170_vm0 = vcmask 261120   ;;  %s7930_s7 = smov 13   ;;  %vm209_vm1 = vcmask 31744   ;;  %vm211_vm2 = vcmask 293888   ;;  %vm213_vm3 = vcmask 334848   ;;  %s10814_s0 = inlined_call_operand.smem [shape: u32[40], index: -1, kind: input, shape index: {}] }
   0x1   :  { %s1_s5 = sld [smem:[%s10814_s0]]   ;;  %s7931_s8 = smov 4   ;;  %vm215_vm4 = vcmask 367616   ;;  %vm217_vm5 = vcmask 629760   ;;  %vm305_vm6 = vcmask 1045504   ;;  %v7951_v21 = vmov 0  }
   0x2   :  { %s7932_s9 = smov 111   ;;  %s7933_s10 = smov 110   ;;  %7065 = vset.pattern.permute.xlu1 %v7951_v21  ;;  %7064 = vset.pattern.permute.xlu0 %v7951_v21  ;;  %vm307_vm7 = vcmask 1043456   ;;  %vm309_vm8 = vcmask 1041408   ;;  %vm402_vm9 = vcmask 490496   ;;  %vm519_vm10 = vcmask 523264  }
   0x3   :  { %s7934_s11 = smov 119   ;;  %s7935_s12 = smov 122   ;;  %7066 = vset.pattern.permute.xlu2 %v7951_v21  ;;  %vm685_vm11 = vcmask 719872   ;;  %vm791_vm12 = vcmask 162816   ;;  %vm796_vm13 = vcmask 203776   ;;  %vm801_vm14 = vcmask 236544  }
   0x4   :  { %s7936_s13 = smov 120   ;;  %s7937_s14 = smov 123   ;;  %vm826_vm15 = vcmask 130048  }
   0x5   :  { %s7938_s15 = smov 112   ;;  %s7939_s16 = smov 114  }
   0x6   :  { %s7940_s17 = smov 113   ;;  %s7941_s18 = smov 125  }
   0x7   :  { %v6273_v0 = vld [vmem:[%s1_s5 + $0x8] sm:$0x3f]  ;;  %v163_v1 = vld [vmem:[%s1_s5] sm:$0x3f]  ;;  %s7942_s19 = smov 121   ;;  %s7943_s20 = smov 126  }
   0x8   :  { %167 = vrot.lane.b32.xlu0 %v6273_v0, %s10815_s6  ;;  %s7944_s21 = smov 115   ;;  %s7945_s22 = smov 117  }
   0x9   :  { %s7946_s23 = smov 116   ;;  %s7947_s24 = smov 124  }
   0xa   :  { %s7948_s25 = smov 127   ;;  %s7949_s26 = smov 118  }
   0xb   :  { %s7950_s27 = smov 10   ;;  %s7952_s1 = smov 12  }
   0xc   :  { %s8042_s30 = sld [smem:[%s10814_s0 + %s7950_s27]]   ;;  %s7953_s5 = smov 9  }
   0xd   :  { %s8064_s4 = sld [smem:[%s10814_s0 + %s7952_s1]]   ;;  %s10816_s1 = smov 2  }
   0xe   :  { %s8078_s29 = sld [smem:[%s10814_s0 + %s7953_s5]]   ;;  %s7958_s2 = smov 16  }
   0xf   :  { %s6235_s5 = sld [smem:[%s10814_s0 + %s10816_s1]]  }
  0x10   :  { %s6237_s6 = sld [smem:[%s10814_s0 + %s7931_s8]]  }
  0x12   :  { %v183_v18 = vld [vmem:[%s8042_s30] sm:$0xff]  ;;  %v184_v19 = vld [vmem:[%s8042_s30 + $0x8] sm:$0xff]  ;;  %v186_v29 = vld [vmem:[%s8042_s30 + $0x18] sm:$0xff] }
  0x13   :  { %v188_v28 = vld [vmem:[%s8042_s30 + $0x28] sm:$0xff]  ;;  %v191_v38 = vld [vmem:[%s8042_s30 + $0x40] sm:$0xff]  ;;  %v189_v39 = vld [vmem:[%s8042_s30 + $0x30] sm:$0xff] }
  0x14   :  { %v200_v46 = vld [vmem:[%s8064_s4 + $0x10] sm:$0xff]  ;;  %v192_v47 = vld [vmem:[%s8042_s30 + $0x48] sm:$0xff]  ;;  %v201_v57 = vld [vmem:[%s8064_s4 + $0x18] sm:$0x3f] }
  0x15   :  { %v199_v56 = vld [vmem:[%s8064_s4 + $0x8] sm:$0xff]  ;;  %v185_v58 = vld [vmem:[%s8042_s30 + $0x10] sm:$0xff] }
  0x16   :  { %v182_v62 = vld [vmem:[%s8078_s29 + $0x28] sm:$0xf] }
  0x7a   :  { %v168_v2 = vpop.permute.xlu0 %167 }
  0x7b   :  { %v171_v3 = vsel %vm170_vm0, %v163_v1, %v168_v2 }
  0x7c   :  { %206 = vrot.lane.b32.xlu1 %v171_v3, %s7930_s7  ;;  %203 = vrot.lane.b32.xlu0 %v171_v3, %s7931_s8  ;;  %v395_v3 = vunpack.c.l.b16 %v182_v62 }
  0xee   :  { %v204_v4 = vpop.permute.xlu0 %203  ;;  %v207_v7 = vpop.permute.xlu1 %206 }
  0xef   :  { %v210_v5 = vsel %vm209_vm1, 0.0, %v204_v4 }
  0xf0   :  { %v212_v6 = vsel %vm211_vm2, %v210_v5, 0.0  ;;  %vm1347_vm2 = vcmask 359424  }
  0xf1   :  { %v214_v8 = vsel %vm213_vm3, %v212_v6, 0.0  ;;  %vm1778_vm3 = vcmask 97280  }
  0xf2   :  { %v216_v9 = vsel %vm215_vm4, %v214_v8, %v207_v7  ;;  %v6893_v8 = vld [vmem:[%s8078_s29] sm:$0xff] }
  0xf3   :  { %v8001_v10 = vsel %vm217_vm5, %v216_v9, 0.0  ;;  %v401_v9 = vpack.c.b16 %v395_v3, %v395_v3  ;;  %vm1788_vm5 = vcmask 171008  }
  0xf4   :  { %276 = vrot.lane.b32.xlu0 %v8001_v10, %s7932_s9  ;;  %280 = vrot.lane.b32.xlu2 %v8001_v10, %s7933_s10 }
  0xf5   :  { %220 = vrot.lane.b32.xlu1 %v8001_v10, %s7934_s11 }
  0xfc   :  { %259 = vrot.lane.b32.xlu0 %v8001_v10, %s7935_s12  ;;  %273 = vrot.lane.b32.xlu2 %v8001_v10, %s7936_s13 }
  0xfd   :  { %252 = vrot.lane.b32.xlu1 %v8001_v10, %s7937_s14 }
 0x104   :  { %269 = vrot.lane.b32.xlu0 %v8001_v10, %s7938_s15  ;;  %255 = vrot.lane.b32.xlu2 %v8001_v10, %s7939_s16 }
 0x105   :  { %262 = vrot.lane.b32.xlu1 %v8001_v10, %s7940_s17 }
 0x10c   :  { %238 = vrot.lane.b32.xlu0 %v8001_v10, %s7941_s18  ;;  %266 = vrot.lane.b32.xlu2 %v8001_v10, %s7942_s19 }
 0x10d   :  { %231 = vrot.lane.b32.xlu1 %v8001_v10, %s7943_s20 }
 0x114   :  { %248 = vrot.lane.b32.xlu0 %v8001_v10, %s7944_s21  ;;  %234 = vrot.lane.b32.xlu2 %v8001_v10, %s7945_s22 }
 0x115   :  { %241 = vrot.lane.b32.xlu1 %v8001_v10, %s7946_s23 }
 0x11c   :  { %245 = vrot.lane.b32.xlu2 %v8001_v10, %s7947_s24  ;;  %321 = vperm.xlu0 %7064, %v183_v18   ;;  %v6897_v18 = vld [vmem:[%s8078_s29 + $0x20] sm:$0xff] }
 0x11d   :  { %224 = vrot.lane.b32.xlu1 %v8001_v10, %s7948_s25 }
 0x124   :  { %227 = vrot.lane.b32.xlu2 %v8001_v10, %s7949_s26  ;;  %346 = vperm.xlu0 %7064, %v188_v28  }
 0x125   :  { %326 = vperm.xlu1 %7065, %v184_v19  }
 0x12c   :  { %361 = vperm.xlu0 %7064, %v191_v38   ;;  %331 = vperm.xlu2 %7066, %v185_v58  }
 0x12d   :  { %336 = vperm.xlu1 %7065, %v186_v29  }
 0x134   :  { %667 = vperm.xlu0 %7064, %v200_v46  }
 0x135   :  { %351 = vperm.xlu1 %7065, %v189_v39  }
 0x13c   :  { %662 = vperm.xlu0 %7064, %v199_v56  }
 0x13d   :  { %366 = vperm.xlu1 %7065, %v192_v47  }
 0x145   :  { %672 = vperm.xlu1 %7065, %v201_v57  }
 0x14e   :  { %v281_v11 = vpop.permute.xlu2 %280 }
 0x156   :  { %v274_v12 = vpop.permute.xlu2 %273 }
 0x15e   :  { %v256_v14 = vpop.permute.xlu2 %255 }
 0x166   :  { %v277_v13 = vpop.permute.xlu0 %276  ;;  %v267_v27 = vpop.permute.xlu2 %266 }
 0x167   :  { %v8044_v15 = vpop.permute.xlu1 %220  ;;  %v279_v20 = vsel %vm170_vm0, %v274_v12, %v277_v13  ;;  %v6894_v12 = vld [vmem:[%s8078_s29 + $0x8] sm:$0xff]  ;;  %v193_v13 = vld [vmem:[%s8042_s30 + $0x50] sm:$0xff] }
 0x168   :  { %v283_v16 = vsel %vm170_vm0, %v8044_v15, %v281_v11  ;;  %v223_v4 = vsel %vm170_vm0, %v8001_v10, %v8044_v15  ;;  %v187_v11 = vld [vmem:[%s8042_s30 + $0x20] sm:$0xff]  ;;  %v190_v10 = vld [vmem:[%s8042_s30 + $0x38] sm:$0xff]  ;;  %v6895_v15 = vld [vmem:[%s8078_s29 + $0x10] sm:$0xff]  ;;  %s7955_s30 = smov 1  }
 0x169   :  { %v303_v17 = vrot.slane %v283_v16, 2  ;;  %341 = vperm.xlu2 %7066, %v187_v11   ;;  %v6896_v16 = vld [vmem:[%s8078_s29 + $0x18] sm:$0xff]  ;;  %s6234_s28 = sld [smem:[%s10814_s0 + %s7955_s30]]   ;;  %s7956_s29 = smov 11  }
 0x16b   :  { %v314_v22 = vsel %vm305_vm6, %v279_v20, %v303_v17 }
 0x16c   :  { %v318_v23 = vpack.c.bf16 %v303_v17, %v314_v22  ;;  %v6907_v17 = vld [vmem:[%s6235_s5 + $0x18] sm:$0xff]  ;;  %v6906_v22 = vld [vmem:[%s6235_s5 + $0x10] sm:$0xff] }
 0x16d   :  { %604 = vmatpush.bf16.msra.mxu2 %v6907_v17 }
 0x16e   :  { %v260_v24 = vpop.permute.xlu0 %259  ;;  %v422_v25 = vsel %vm305_vm6, %v318_v23, 0  ;;  %v235_v40 = vpop.permute.xlu2 %234  ;;  %v6905_v23 = vld [vmem:[%s6235_s5 + $0x8] sm:$0xff] }
 0x16f   :  { %428 = vmatpush.bf16.msra.mxu0 %v422_v25  ;;  %7002 = vmatpush.bf16.msra.mxu1 %v422_v25  ;;  %v253_v26 = vpop.permute.xlu1 %252  ;;  %v6903_v19 = vld [vmem:[%s6234_s28 + $0x18] sm:$0xff]  ;;  %v6902_v20 = vld [vmem:[%s6234_s28 + $0x10] sm:$0xff]  ;;  %v6900_v25 = vld [vmem:[%s6234_s28] sm:$0xff] }
 0x170   :  { %v258_v30 = vsel %vm170_vm0, %v253_v26, %v256_v14  ;;  %v198_v14 = vld [vmem:[%s8064_s4] sm:$0xff]  ;;  %s7957_s4 = smov 14  }
 0x171   :  { %v294_v36 = vrot.slane %v258_v30, 2  ;;  %356 = vperm.xlu2 %7066, %v190_v10   ;;  %605 = vmatpush.bf16.msra.mxu2 %v6906_v22  ;;  %v6904_v26 = vld [vmem:[%s6235_s5] sm:$0xff]  ;;  %s6244_s5 = sld [smem:[%s10814_s0 + %s7956_s29]]  }
 0x172   :  { %s8218_s29 = sld [smem:[%s10814_s0 + %s7957_s4]]  }
 0x173   :  { %s6249_s4 = sld [smem:[%s10814_s0 + %s7958_s2]]   ;;  %s7959_s2 = smov 3  }
 0x175   :  { %606 = vmatpush.bf16.msra.mxu2 %v6905_v23 }
 0x176   :  { %v270_v31 = vpop.permute.xlu0 %269  ;;  %v246_v48 = vpop.permute.xlu2 %245 }
 0x177   :  { %v272_v32 = vsel %vm170_vm0, %v267_v27, %v270_v31  ;;  %v263_v33 = vpop.permute.xlu1 %262 }
 0x178   :  { %v300_v34 = vrot.slane %v272_v32, 6  ;;  %v265_v35 = vsel %vm170_vm0, %v260_v24, %v263_v33  ;;  %v6901_v24 = vld [vmem:[%s6234_s28 + $0x8] sm:$0xff] }
 0x179   :  { %v297_v37 = vrot.slane %v265_v35, 4  ;;  %371 = vperm.xlu2 %7066, %v193_v13   ;;  %607 = vmatpush.bf16.msra.mxu2 %v6904_v26 }
 0x17b   :  { %v312_v41 = vsel %vm307_vm7, %v294_v36, %v297_v37  ;;  %v313_v42 = vsel %vm309_vm8, %v297_v37, %v300_v34 }
 0x17c   :  { %v317_v43 = vpack.c.bf16 %v313_v42, %v312_v41 }
 0x17e   :  { %429 = vmatpush.bf16.msra.mxu0 %v317_v43  ;;  %7003 = vmatpush.bf16.msra.mxu1 %v317_v43  ;;  %v239_v44 = vpop.permute.xlu0 %238  ;;  %v228_v63 = vpop.permute.xlu2 %227 }
 0x17f   :  { %v232_v45 = vpop.permute.xlu1 %231 }
 0x180   :  { %v237_v49 = vsel %vm170_vm0, %v232_v45, %v235_v40 }
 0x181   :  { %v288_v54 = vrot.slane %v237_v49, 4  ;;  %657 = vperm.xlu2 %7066, %v198_v14  }
 0x186   :  { %v249_v50 = vpop.permute.xlu0 %248  ;;  %v332_v39 = vpop.permute.xlu2 %331 }
 0x187   :  { %v242_v51 = vpop.permute.xlu1 %241  ;;  %v251_v52 = vsel %vm170_vm0, %v246_v48, %v249_v50 }
 0x188   :  { %v244_v53 = vsel %vm170_vm0, %v239_v44, %v242_v51  ;;  %v311_v60 = vsel %vm305_vm6, %v251_v52, %v294_v36 }
 0x189   :  { %v291_v55 = vrot.slane %v244_v53, 6 }
 0x18b   :  { %v310_v59 = vsel %vm309_vm8, %v288_v54, %v291_v55 }
 0x18c   :  { %v316_v61 = vpack.c.bf16 %v311_v60, %v310_v59 }
 0x18e   :  { %430 = vmatpush.bf16.msra.mxu0 %v316_v61  ;;  %7004 = vmatpush.bf16.msra.mxu1 %v316_v61  ;;  %v322_v29 = vpop.permute.xlu0 %321 }
 0x18f   :  { %v225_v0 = vpop.permute.xlu1 %224 }
 0x190   :  { %v230_v1 = vsel %vm170_vm0, %v225_v0, %v228_v63 }
 0x191   :  { %v285_v2 = vrot.slane %v230_v1, 2 }
 0x193   :  { %v306_v5 = vsel %vm305_vm6, %v223_v4, %v285_v2  ;;  %v308_v6 = vsel %vm307_vm7, %v285_v2, %v288_v54 }
 0x194   :  { %v315_v7 = vpack.c.bf16 %v308_v6, %v306_v5 }
 0x196   :  { %431 = vmatpush.bf16.msra.mxu0 %v315_v7  ;;  %7005 = vmatpush.bf16.msra.mxu1 %v315_v7  ;;  %v347_v50 = vpop.permute.xlu0 %346 }
 0x197   :  { %v327_v30 = vpop.permute.xlu1 %326 }
 0x199   :  { %6294 = vmatmul.msk.bf16.vlgmr.msra.gmra.mxu0 %vm402_vm9, %v6893_v8  ;;  %6299 = vmatmul.msk.bf16.vlgmr.msra.gmra.mxu1 %vm402_vm9, %v401_v9 }
 0x19a   :  { %542 = vmatpush.bf16.msrb.mxu1 %v6903_v19 }
 0x19e   :  { %543 = vmatpush.bf16.msrb.mxu1 %v6902_v20  ;;  %v362_v2 = vpop.permute.xlu0 %361 }
 0x19f   :  { %v337_v41 = vpop.permute.xlu1 %336 }
 0x1a2   :  { %544 = vmatpush.bf16.msrb.mxu1 %v6901_v24 }
 0x1a6   :  { %545 = vmatpush.bf16.msrb.mxu1 %v6900_v25 }
 0x1a7   :  { %v352_v57 = vpop.permute.xlu1 %351 }
 0x1a9   :  { %6295 = vmatmul.msk.bf16.gmra.mxu0 %vm402_vm9, %v6894_v12 }
 0x1af   :  { %v367_v4 = vpop.permute.xlu1 %366 }
 0x1b9   :  { %6296 = vmatmul.msk.bf16.gmra.mxu0 %vm402_vm9, %v6895_v15 }
 0x1c3   :  { %v342_v48 = vpop.permute.xlu2 %341 }
 0x1c9   :  { %6297 = vmatmul.msk.bf16.gmra.mxu0 %vm402_vm9, %v6896_v16 }
 0x1cb   :  { %v357_v59 = vpop.permute.xlu2 %356 }
 0x1d3   :  { %v372_v11 = vpop.permute.xlu2 %371 }
 0x1d9   :  { %6298 = vmatmul.msk.bf16.gmra.mxu0 %vm402_vm9, %v6897_v18  ;;  %vm1813_vm9 = vcmask 64512  }
 0x216   :  { %v433_v27 = vpop.f32.mrf.mxu0  ;;  %v458_v28 = vpop.f32.mrf.mxu1 }
 0x217   :  { %v434_v31 = vadd.f32 %v433_v27, %v322_v29  ;;  %v459_v10 = vadd.f32 %v458_v28, %v372_v11 }
 0x219   :  { %v462_v35 = vmax.f32 %v434_v31, 0.0  ;;  %v472_v12 = vmax.f32 %v459_v10, 0.0 }
 0x21b   :  { %v494_v13 = vpack.c.bf16 %v472_v12, %v472_v12 }
 0x21e   :  { %v435_v32 = vpop.f32.mrf.mxu0  ;;  %v460_v33 = vpop.f32.mrf.mxu1 }
 0x21f   :  { %v436_v34 = vadd.f32 %v435_v32, %v327_v30 }
 0x221   :  { %v463_v36 = vmax.f32 %v436_v34, 0.0 }
 0x223   :  { %v489_v37 = vpack.c.bf16 %v463_v36, %v462_v35 }
 0x225   :  { %6316 = vmatmul.msk.bf16.vlgmr.msrb.gmra.mxu1 %vm519_vm10, %v489_v37  ;;  %6338 = vmatmul.msk.bf16.vlgmr.msra.gmra.mxu2 %vm519_vm10, %v489_v37 }
 0x226   :  { %v438_v38 = vpop.f32.mrf.mxu0 }
 0x227   :  { %v439_v40 = vadd.f32 %v438_v38, %v332_v39 }
 0x229   :  { %v464_v44 = vmax.f32 %v439_v40, 0.0 }
 0x22e   :  { %v440_v42 = vpop.f32.mrf.mxu0 }
 0x22f   :  { %v441_v43 = vadd.f32 %v440_v42, %v337_v41 }
 0x231   :  { %v465_v45 = vmax.f32 %v441_v43, 0.0 }
 0x233   :  { %v490_v46 = vpack.c.bf16 %v465_v45, %v464_v44 }
 0x235   :  { %6317 = vmatmul.msk.bf16.gmra.mxu1 %vm519_vm10, %v490_v46  ;;  %6339 = vmatmul.msk.bf16.gmra.mxu2 %vm519_vm10, %v490_v46 }
 0x236   :  { %v443_v47 = vpop.f32.mrf.mxu0 }
 0x237   :  { %v444_v49 = vadd.f32 %v443_v47, %v342_v48 }
 0x239   :  { %v466_v53 = vmax.f32 %v444_v49, 0.0 }
 0x23e   :  { %v445_v51 = vpop.f32.mrf.mxu0 }
 0x23f   :  { %v446_v52 = vadd.f32 %v445_v51, %v347_v50 }
 0x241   :  { %v467_v54 = vmax.f32 %v446_v52, 0.0 }
 0x243   :  { %v491_v55 = vpack.c.bf16 %v467_v54, %v466_v53 }
 0x245   :  { %6318 = vmatmul.msk.bf16.gmra.mxu1 %vm519_vm10, %v491_v55  ;;  %6340 = vmatmul.msk.bf16.gmra.mxu2 %vm519_vm10, %v491_v55 }
 0x246   :  { %v448_v56 = vpop.f32.mrf.mxu0 }
 0x247   :  { %v449_v58 = vadd.f32 %v448_v56, %v352_v57  ;;  %v6898_v57 = vld [vmem:[%s6244_s5] sm:$0xff] }
 0x249   :  { %v468_v62 = vmax.f32 %v449_v58, 0.0  ;;  %v6350_v58 = vld [vmem:[%s6244_s5 + $0x8] sm:$0xf] }
 0x24e   :  { %v450_v60 = vpop.f32.mrf.mxu0 }
 0x24f   :  { %v451_v61 = vadd.f32 %v450_v60, %v357_v59  ;;  %v6899_v59 = vld [vmem:[%s6244_s5 + $0x8] sm:$0x70]  ;;  %s7961_s5 = smov 18  }
 0x250   :  { %v6351_v60 = vor.u32 %v6899_v59, %v6350_v58  ;;  %v741_v58 = vld [vmem:[%s8218_s29 + $0x8] sm:$0xff]  ;;  %v743_v59 = vld [vmem:[%s8218_s29 + $0x18] sm:$0xff]  ;;  %s8538_s28 = sld [smem:[%s10814_s0 + %s7961_s5]]   ;;  %s7963_s5 = smov 17  }
 0x251   :  { %v469_v63 = vmax.f32 %v451_v61, 0.0  ;;  %v668_v61 = vpop.permute.xlu0 %667 }
 0x253   :  { %v492_v0 = vpack.c.bf16 %v469_v63, %v468_v62  ;;  %v658_v63 = vpop.permute.xlu2 %657 }
 0x255   :  { %6319 = vmatmul.msk.bf16.gmra.mxu1 %vm519_vm10, %v492_v0  ;;  %6341 = vmatmul.msk.bf16.gmra.mxu2 %vm519_vm10, %v492_v0 }
 0x256   :  { %v453_v1 = vpop.f32.mrf.mxu0 }
 0x257   :  { %v454_v3 = vadd.f32 %v453_v1, %v362_v2 }
 0x259   :  { %v470_v7 = vmax.f32 %v454_v3, 0.0  ;;  %v663_v1 = vpop.permute.xlu0 %662 }
 0x25e   :  { %v455_v5 = vpop.f32.mrf.mxu0 }
 0x25f   :  { %v456_v6 = vadd.f32 %v455_v5, %v367_v4 }
 0x261   :  { %v471_v8 = vmax.f32 %v456_v6, 0.0 }
 0x263   :  { %v493_v9 = vpack.c.bf16 %v471_v8, %v470_v7 }
 0x265   :  { %6320 = vmatmul.msk.bf16.gmra.mxu1 %vm519_vm10, %v493_v9  ;;  %6342 = vmatmul.msk.bf16.gmra.mxu2 %vm519_vm10, %v493_v9  ;;  %v673_v9 = vpop.permute.xlu1 %672 }
 0x275   :  { %6321 = vmatmul.msk.bf16.gmra.mxu1 %vm519_vm10, %v494_v13  ;;  %6343 = vmatmul.msk.bf16.gmra.mxu2 %vm519_vm10, %v494_v13  ;;  %vm2752_vm10 = vcmask 105472  }
 0x2a2   :  { %v547_v14 = vpop.f32.mrf.mxu1 }
 0x2a8   :  { %v609_v15 = vpop.f32.mrf.mxu2 }
 0x2a9   :  { %v638_v16 = vmax.f32 %v547_v14, %v609_v15 }
 0x2aa   :  { %v549_v17 = vpop.f32.mrf.mxu1 }
 0x2b0   :  { %v611_v18 = vpop.f32.mrf.mxu2 }
 0x2b1   :  { %v639_v54 = vmax.f32 %v549_v17, %v611_v18 }
 0x2b2   :  { %v552_v19 = vpop.f32.mrf.mxu1 }
 0x2b3   :  { %v649_v56 = vpack.c.bf16 %v639_v54, %v638_v16 }
 0x2b8   :  { %v614_v20 = vpop.f32.mrf.mxu2 }
 0x2b9   :  { %v640_v22 = vmax.f32 %v552_v19, %v614_v20 }
 0x2ba   :  { %v554_v23 = vpop.f32.mrf.mxu1 }
 0x2c0   :  { %v616_v24 = vpop.f32.mrf.mxu2 }
 0x2c1   :  { %v641_v52 = vmax.f32 %v554_v23, %v616_v24 }
 0x2c2   :  { %v557_v25 = vpop.f32.mrf.mxu1 }
 0x2c3   :  { %v650_v55 = vpack.c.bf16 %v641_v52, %v640_v22 }
 0x2c8   :  { %v619_v26 = vpop.f32.mrf.mxu2 }
 0x2c9   :  { %v642_v51 = vmax.f32 %v557_v25, %v619_v26 }
 0x2ca   :  { %v559_v27 = vpop.f32.mrf.mxu1 }
 0x2d0   :  { %v621_v28 = vpop.f32.mrf.mxu2 }
 0x2d1   :  { %v643_v49 = vmax.f32 %v559_v27, %v621_v28 }
 0x2d2   :  { %v562_v29 = vpop.f32.mrf.mxu1 }
 0x2d3   :  { %v651_v53 = vpack.c.bf16 %v643_v49, %v642_v51 }
 0x2d8   :  { %v624_v30 = vpop.f32.mrf.mxu2 }
 0x2d9   :  { %v644_v48 = vmax.f32 %v562_v29, %v624_v30 }
 0x2da   :  { %v564_v31 = vpop.f32.mrf.mxu1 }
 0x2e0   :  { %v626_v32 = vpop.f32.mrf.mxu2 }
 0x2e1   :  { %v645_v45 = vmax.f32 %v564_v31, %v626_v32 }
 0x2e2   :  { %v567_v33 = vpop.f32.mrf.mxu1 }
 0x2e3   :  { %v652_v50 = vpack.c.bf16 %v645_v45, %v644_v48 }
 0x2e8   :  { %v629_v34 = vpop.f32.mrf.mxu2 }
 0x2e9   :  { %v646_v44 = vmax.f32 %v567_v33, %v629_v34 }
 0x2ea   :  { %v569_v35 = vpop.f32.mrf.mxu1 }
 0x2f0   :  { %v631_v36 = vpop.f32.mrf.mxu2 }
 0x2f1   :  { %v647_v42 = vmax.f32 %v569_v35, %v631_v36 }
 0x2f2   :  { %v572_v37 = vpop.f32.mrf.mxu1 }
 0x2f3   :  { %v653_v47 = vpack.c.bf16 %v647_v42, %v646_v44 }
 0x2f8   :  { %v634_v38 = vpop.f32.mrf.mxu2 }
 0x2f9   :  { %v648_v39 = vmax.f32 %v572_v37, %v634_v38 }
 0x2fa   :  { %v574_v40 = vpop.f32.mrf.mxu1 }
 0x2fb   :  { %v654_v41 = vpack.c.bf16 %v648_v39, %v648_v39 }
 0x2fd   :  { %v693_v43 = vsel %vm307_vm7, %v654_v41, 0 }
 0x2fe   :  { %697 = vmatpush.bf16.msrb.mxu2 %v693_v43 }
 0x300   :  { %v636_v46 = vpop.f32.mrf.mxu2 }
 0x302   :  { %698 = vmatpush.bf16.msrb.mxu2 %v653_v47 }
 0x306   :  { %699 = vmatpush.bf16.msrb.mxu2 %v652_v50 }
 0x30a   :  { %700 = vmatpush.bf16.msrb.mxu2 %v651_v53 }
 0x30e   :  { %701 = vmatpush.bf16.msrb.mxu2 %v650_v55 }
 0x312   :  { %702 = vmatpush.bf16.msrb.mxu2 %v649_v56  ;;  %v740_v56 = vld [vmem:[%s8218_s29] sm:$0xff] }
 0x315   :  { %6352 = vmatmul.msk.bf16.vlgmr.msrb.gmra.mxu2 %vm685_vm11, %v6898_v57 }
 0x325   :  { %6353 = vmatmul.msk.bf16.gmra.mxu2 %vm685_vm11, %v6351_v60 }
 0x398   :  { %v704_v62 = vpop.f32.mrf.mxu2 }
 0x399   :  { %v705_v0 = vadd.f32 %v704_v62, %v658_v63  ;;  %v744_v62 = vld [vmem:[%s8218_s29 + $0x20] sm:$0xff]  ;;  %v746_v63 = vld [vmem:[%s8218_s29 + $0x30] sm:$0xff] }
 0x39b   :  { %v714_v4 = vmax.f32 %v705_v0, 0.0 }
 0x3a0   :  { %v706_v2 = vpop.f32.mrf.mxu2 }
 0x3a1   :  { %v707_v3 = vadd.f32 %v706_v2, %v663_v1  ;;  %v745_v2 = vld [vmem:[%s8218_s29 + $0x28] sm:$0xff] }
 0x3a3   :  { %v715_v5 = vmax.f32 %v707_v3, 0.0 }
 0x3a5   :  { %v7072_v6 = vpack.i.bf16 %v715_v5, %v714_v4  ;;  %v747_v4 = vld [vmem:[%s8218_s29 + $0x38] sm:$0xff]  ;;  %v749_v5 = vld [vmem:[%s8218_s29 + $0x48] sm:$0xff] }
 0x3a7   :  { %7073 = vrot.lane.b32.xlu1 %v7072_v6, %s7930_s7  ;;  %7068 = vrot.lane.b32.xlu2 %v7072_v6, %s7931_s8 }
 0x3a8   :  { %v709_v7 = vpop.f32.mrf.mxu2 }
 0x3a9   :  { %v710_v8 = vadd.f32 %v709_v7, %v668_v61  ;;  %v742_v61 = vld [vmem:[%s8218_s29 + $0x10] sm:$0xff] }
 0x3ab   :  { %v716_v12 = vmax.f32 %v710_v8, 0.0  ;;  %v748_v8 = vld [vmem:[%s8218_s29 + $0x40] sm:$0xff] }
 0x3b0   :  { %v711_v11 = vpop.f32.mrf.mxu2 }
 0x3b1   :  { %v712_v10 = vadd.f32 %v711_v11, %v673_v9  ;;  %v750_v9 = vld [vmem:[%s8218_s29 + $0x50] sm:$0xff]  ;;  %v756_v11 = vld [vmem:[%s6249_s4 + $0x8] sm:$0xff]  ;;  %s8325_s29 = sld [smem:[%s10814_s0 + %s7930_s7]]  }
 0x3b3   :  { %v717_v13 = vmax.f32 %v712_v10, 0.0 }
 0x3b5   :  { %v7082_v14 = vpack.i.bf16 %v717_v13, %v716_v12 }
 0x3b7   :  { %7083 = vrot.lane.b32.xlu0 %v7082_v14, %s7930_s7  ;;  %7078 = vrot.lane.b32.xlu1 %v7082_v14, %s7931_s8  ;;  %v755_v14 = vld [vmem:[%s6249_s4] sm:$0xff] }
 0x401   :  { %v7069_v15 = vpop.permute.xlu2 %7068 }
 0x402   :  { %v7071_v16 = vunpack.i.h.bf16 %v7069_v15  ;;  %v7070_v17 = vunpack.i.l.bf16 %v7069_v15 }
 0x404   :  { %v788_v18 = vsel %vm209_vm1, 0.0, %v7071_v16  ;;  %v787_v19 = vsel %vm209_vm1, 0.0, %v7070_v17 }
 0x405   :  { %v793_v20 = vsel %vm791_vm12, %v788_v18, 0.0  ;;  %v792_v22 = vsel %vm791_vm12, %v787_v19, 0.0  ;;  %v757_v19 = vld [vmem:[%s6249_s4 + $0x10] sm:$0xff] }
 0x406   :  { %v798_v26 = vsel %vm796_vm13, %v793_v20, 0.0  ;;  %v797_v27 = vsel %vm796_vm13, %v792_v22, 0.0 }
 0x419   :  { %v7074_v23 = vpop.permute.xlu1 %7073 }
 0x41a   :  { %v7076_v24 = vunpack.i.h.bf16 %v7074_v23  ;;  %v7075_v25 = vunpack.i.l.bf16 %v7074_v23 }
 0x41c   :  { %v803_v28 = vsel %vm801_vm14, %v798_v26, %v7076_v24  ;;  %v802_v29 = vsel %vm801_vm14, %v797_v27, %v7075_v25  ;;  %v758_v27 = vld [vmem:[%s6249_s4 + $0x18] sm:$0x3f]  ;;  %s6236_s4 = sld [smem:[%s10814_s0 + %s7959_s2]]  }
 0x41d   :  { %v8146_v30 = vsel %vm215_vm4, %v803_v28, 0.0  ;;  %v8149_v31 = vsel %vm215_vm4, %v802_v29, 0.0 }
 0x41e   :  { %927 = vrot.lane.b32.xlu2 %v8149_v31, %s7944_s21  ;;  %915 = vrot.lane.b32.xlu1 %v8149_v31, %s7947_s24  ;;  %v7087_v32 = vpack.i.bf16 %v8146_v30, %v8149_v31 }
 0x420   :  { %7088 = vrot.lane.b32.xlu0 %v7087_v32, %s7941_s18 }
 0x426   :  { %7103 = vrot.lane.b32.xlu2 %v7087_v32, %s7932_s9  ;;  %7093 = vrot.lane.b32.xlu1 %v7087_v32, %s7946_s23 }
 0x428   :  { %7108 = vrot.lane.b32.xlu0 %v7087_v32, %s7943_s20 }
 0x429   :  { %v7079_v33 = vpop.permute.xlu1 %7078  ;;  %v7084_v34 = vpop.permute.xlu0 %7083 }
 0x42a   :  { %v7080_v35 = vunpack.i.l.bf16 %v7079_v33  ;;  %v7085_v37 = vunpack.i.l.bf16 %v7084_v34  ;;  %v7081_v39 = vunpack.i.h.bf16 %v7079_v33  ;;  %v7086_v47 = vunpack.i.h.bf16 %v7084_v34 }
 0x42c   :  { %v789_v36 = vsel %vm209_vm1, 0.0, %v7080_v35  ;;  %v790_v44 = vsel %vm209_vm1, 0.0, %v7081_v39 }
 0x42d   :  { %v794_v38 = vsel %vm791_vm12, %v789_v36, 0.0  ;;  %v795_v45 = vsel %vm791_vm12, %v790_v44, 0.0 }
 0x42e   :  { %v799_v40 = vsel %vm796_vm13, %v794_v38, 0.0  ;;  %7123 = vrot.lane.b32.xlu2 %v7087_v32, %s7949_s26  ;;  %7098 = vrot.lane.b32.xlu1 %v7087_v32, %s7936_s13  ;;  %v800_v46 = vsel %vm796_vm13, %v795_v45, 0.0 }
 0x42f   :  { %v804_v41 = vsel %vm801_vm14, %v799_v40, %v7085_v37  ;;  %v805_v48 = vsel %vm801_vm14, %v800_v46, %v7086_v47 }
 0x430   :  { %v8168_v42 = vsel %vm215_vm4, %v804_v41, 0.0  ;;  %v8183_v50 = vsel %vm215_vm4, %v805_v48, 0.0  ;;  %vm1783_vm4 = vcmask 138240  }
 0x431   :  { %v7142_v43 = vpack.i.bf16 %v8149_v31, %v8168_v42  ;;  %v7132_v49 = vpack.i.bf16 %v8168_v42, %v8146_v30  ;;  %v7167_v51 = vpack.i.bf16 %v8183_v50, %v8168_v42  ;;  %v7182_v52 = vpack.i.bf16 %v8149_v31, %v8183_v50 }
 0x432   :  { %v7227_v53 = vpack.i.bf16 %v8168_v42, %v8183_v50  ;;  %v7207_v54 = vpack.i.bf16 %v8146_v30, %v8183_v50 }
 0x433   :  { %7143 = vrot.lane.b32.xlu0 %v7142_v43, %s7935_s12 }
 0x436   :  { %7128 = vrot.lane.b32.xlu2 %v7087_v32, %s7934_s11  ;;  %7113 = vrot.lane.b32.xlu1 %v7087_v32, %s7945_s22 }
 0x43b   :  { %7158 = vrot.lane.b32.xlu0 %v7142_v43, %s7939_s16 }
 0x43e   :  { %7133 = vrot.lane.b32.xlu2 %v7132_v49, %s7942_s19  ;;  %7118 = vrot.lane.b32.xlu1 %v7087_v32, %s7948_s25 }
 0x443   :  { %7168 = vrot.lane.b32.xlu0 %v7167_v51, %s7946_s23 }
 0x446   :  { %7153 = vrot.lane.b32.xlu2 %v7142_v43, %s7937_s14  ;;  %7138 = vrot.lane.b32.xlu1 %v7132_v49, %s7938_s15 }
 0x44b   :  { %7178 = vrot.lane.b32.xlu0 %v7167_v51, %s7945_s22 }
 0x44e   :  { %7163 = vrot.lane.b32.xlu2 %v7167_v51, %s7941_s18  ;;  %7148 = vrot.lane.b32.xlu1 %v7142_v43, %s7940_s17 }
 0x453   :  { %7183 = vrot.lane.b32.xlu0 %v7182_v52, %s7942_s19 }
 0x456   :  { %7173 = vrot.lane.b32.xlu2 %v7167_v51, %s7943_s20  ;;  %7198 = vrot.lane.b32.xlu1 %v7167_v51, %s7949_s26 }
 0x45b   :  { %7193 = vrot.lane.b32.xlu0 %v7167_v51, %s7948_s25 }
 0x45e   :  { %7188 = vrot.lane.b32.xlu2 %v7182_v52, %s7938_s15  ;;  %7228 = vrot.lane.b32.xlu1 %v7227_v53, %s7934_s11 }
 0x463   :  { %7208 = vrot.lane.b32.xlu0 %v7207_v54, %s7940_s17 }
 0x466   :  { %7203 = vrot.lane.b32.xlu2 %v7207_v54, %s7935_s12  ;;  %7233 = vrot.lane.b32.xlu1 %v7167_v51, %s7933_s10 }
 0x46b   :  { %919 = vrot.lane.b32.xlu0 %v8168_v42, %s7947_s24 }
 0x46e   :  { %7213 = vrot.lane.b32.xlu2 %v7207_v54, %s7937_s14  ;;  %7243 = vrot.lane.b32.xlu1 %v7207_v54, %s7944_s21 }
 0x473   :  { %7223 = vrot.lane.b32.xlu0 %v7207_v54, %s7939_s16 }
 0x476   :  { %7218 = vrot.lane.b32.xlu2 %v7087_v32, %s7933_s10  ;;  %931 = vrot.lane.b32.xlu1 %v8168_v42, %s7944_s21 }
 0x478   :  { %v8223_v55 = vpop.permute.xlu2 %927 }
 0x47b   :  { %7238 = vrot.lane.b32.xlu0 %v7207_v54, %s7947_s24 }
 0x47e   :  { %7248 = vrot.lane.b32.xlu2 %v7227_v53, %s7936_s13  ;;  %1209 = vperm.xlu1 %7065, %v740_v56  }
 0x480   :  { %v7104_v57 = vpop.permute.xlu2 %7103 }
 0x481   :  { %v7106_v15 = vunpack.i.h.bf16 %v7104_v57  ;;  %v7105_v16 = vunpack.i.l.bf16 %v7104_v57 }
 0x483   :  { %7253 = vrot.lane.b32.xlu0 %v7227_v53, %s7932_s9 }
 0x486   :  { %1214 = vperm.xlu2 %7066, %v741_v58   ;;  %1224 = vperm.xlu1 %7065, %v743_v59  }
 0x488   :  { %v8231_v60 = vpop.permute.xlu2 %7123 }
 0x48b   :  { %1219 = vperm.xlu0 %7064, %v742_v61  }
 0x48e   :  { %1229 = vperm.xlu2 %7066, %v744_v62   ;;  %1239 = vperm.xlu1 %7065, %v746_v63  }
 0x490   :  { %v8236_v0 = vpop.permute.xlu2 %7128  ;;  %v916_v1 = vpop.permute.xlu1 %915 }
 0x491   :  { %v939_v52 = vsel %vm826_vm15, %v916_v1, %v8223_v55 }
 0x492   :  { %v7089_v3 = vpop.permute.xlu0 %7088 }
 0x493   :  { %1234 = vperm.xlu0 %7064, %v745_v2   ;;  %v7091_v40 = vunpack.i.h.bf16 %v7089_v3  ;;  %v7090_v41 = vunpack.i.l.bf16 %v7089_v3 }
 0x496   :  { %1244 = vperm.xlu2 %7066, %v747_v4   ;;  %1254 = vperm.xlu1 %7065, %v749_v5  }
 0x498   :  { %v8244_v6 = vpop.permute.xlu2 %7133  ;;  %v7094_v7 = vpop.permute.xlu1 %7093 }
 0x499   :  { %v7096_v33 = vunpack.i.h.bf16 %v7094_v7  ;;  %v7095_v34 = vunpack.i.l.bf16 %v7094_v7 }
 0x49a   :  { %v8248_v10 = vpop.permute.xlu0 %7108 }
 0x49b   :  { %1249 = vperm.xlu0 %7064, %v748_v8   ;;  %v911_v47 = vsel %vm826_vm15, %v7090_v41, %v7095_v34  ;;  %v912_v48 = vsel %vm826_vm15, %v7091_v40, %v7096_v33  ;;  %v7110_v58 = vunpack.i.l.bf16 %v8248_v10  ;;  %v7111_v7 = vunpack.i.h.bf16 %v8248_v10 }
 0x49c   :  { %v1107_v56 = vrot.slane %v911_v47, 6  ;;  %v1108_v57 = vrot.slane %v912_v48, 6 }
 0x49e   :  { %1259 = vperm.xlu2 %7066, %v750_v9   ;;  %1650 = vperm.xlu1 %7065, %v756_v11   ;;  %v1109_v1 = vsel %vm309_vm8, %v1107_v56, %v1108_v57 }
 0x4a0   :  { %v8250_v12 = vpop.permute.xlu2 %7153  ;;  %v7099_v13 = vpop.permute.xlu1 %7098 }
 0x4a1   :  { %v7101_v17 = vunpack.i.h.bf16 %v7099_v13  ;;  %v7100_v18 = vunpack.i.l.bf16 %v7099_v13 }
 0x4a3   :  { %1645 = vperm.xlu0 %7064, %v755_v14   ;;  %v1051_v20 = vsel %vm826_vm15, %v7100_v18, %v7105_v16  ;;  %v1052_v22 = vsel %vm826_vm15, %v7101_v17, %v7106_v15 }
 0x4a4   :  { %v1203_v23 = vpack.c.bf16 %v1052_v22, %v1051_v20  ;;  %v7135_v20 = vunpack.i.l.bf16 %v8244_v6 }
 0x4a5   :  { %v8254_v24 = vpop.permute.xlu0 %7143 }
 0x4a6   :  { %1655 = vperm.xlu2 %7066, %v757_v19   ;;  %1407 = vmatpush.bf16.msrb.mxu0 %v1203_v23  ;;  %v7136_v19 = vunpack.i.h.bf16 %v8244_v6 }
 0x4a8   :  { %v7164_v25 = vpop.permute.xlu2 %7163  ;;  %v7114_v26 = vpop.permute.xlu1 %7113 }
 0x4a9   :  { %v7166_v36 = vunpack.i.h.bf16 %v7164_v25  ;;  %v7165_v37 = vunpack.i.l.bf16 %v7164_v25  ;;  %v7115_v53 = vunpack.i.l.bf16 %v7114_v26  ;;  %v7116_v59 = vunpack.i.h.bf16 %v7114_v26 }
 0x4ab   :  { %1660 = vperm.xlu0 %7064, %v758_v27   ;;  %v8278_v11 = vsel %vm826_vm15, %v7110_v58, %v7115_v53  ;;  %v884_v17 = vsel %vm826_vm15, %v7111_v7, %v7116_v59  ;;  %v7125_v53 = vunpack.i.l.bf16 %v8231_v60 }
 0x4ac   :  { %v1091_v25 = vrot.slane %v8278_v11, 4  ;;  %v1092_v26 = vrot.slane %v884_v17, 4 }
 0x4ad   :  { %v8256_v28 = vpop.permute.xlu0 %7158 }
 0x4b0   :  { %v7174_v29 = vpop.permute.xlu2 %7173  ;;  %v8258_v32 = vpop.permute.xlu1 %7118 }
 0x4b1   :  { %v7176_v61 = vunpack.i.h.bf16 %v7174_v29  ;;  %v7175_v2 = vunpack.i.l.bf16 %v7174_v29  ;;  %v7121_v48 = vunpack.i.h.bf16 %v8258_v32 }
 0x4b5   :  { %v7169_v35 = vpop.permute.xlu0 %7168 }
 0x4b6   :  { %v7171_v38 = vunpack.i.h.bf16 %v7169_v35  ;;  %v7170_v39 = vunpack.i.l.bf16 %v7169_v35 }
 0x4b8   :  { %v8260_v43 = vpop.permute.xlu2 %7188  ;;  %v7139_v44 = vpop.permute.xlu1 %7138  ;;  %v913_v45 = vsel %vm826_vm15, %v7165_v37, %v7170_v39  ;;  %v914_v46 = vsel %vm826_vm15, %v7166_v36, %v7171_v38  ;;  %v1093_v38 = vsel %vm307_vm7, %v1091_v25, %v1092_v26 }
 0x4b9   :  { %v1110_v49 = vrot.slane %v913_v45, 6  ;;  %v1112_v51 = vrot.slane %v914_v46, 6  ;;  %v7141_v13 = vunpack.i.h.bf16 %v7139_v44  ;;  %v7140_v14 = vunpack.i.l.bf16 %v7139_v44 }
 0x4ba   :  { %v7190_v35 = vunpack.i.l.bf16 %v8260_v43  ;;  %v7120_v46 = vunpack.i.l.bf16 %v8258_v32 }
 0x4bb   :  { %v1113_v54 = vsel %vm309_vm8, %v1110_v49, %v1112_v51  ;;  %v1111_v5 = vsel %vm309_vm8, %v1108_v57, %v1110_v49  ;;  %v8289_v33 = vsel %vm826_vm15, %v7135_v20, %v7140_v14  ;;  %v1025_v34 = vsel %vm826_vm15, %v7136_v19, %v7141_v13 }
 0x4bc   :  { %v1195_v63 = vpack.c.bf16 %v939_v52, %v1113_v54  ;;  %v1194_v16 = vpack.c.bf16 %v1111_v5, %v1109_v1  ;;  %v1155_v40 = vrot.slane %v8289_v33, 6  ;;  %v1157_v41 = vrot.slane %v1025_v34, 6 }
 0x4bd   :  { %v7179_v62 = vpop.permute.xlu0 %7178  ;;  %v7126_v52 = vunpack.i.h.bf16 %v8231_v60  ;;  %v7191_v1 = vunpack.i.h.bf16 %v8260_v43  ;;  %v7131_v13 = vunpack.i.h.bf16 %v8236_v0  ;;  %v7145_v14 = vunpack.i.l.bf16 %v8254_v24 }
 0x4be   :  { %v7181_v3 = vunpack.i.h.bf16 %v7179_v62  ;;  %v7180_v4 = vunpack.i.l.bf16 %v7179_v62  ;;  %1369 = vmatpush.bf16.msra.mxu3 %v1195_v63  ;;  %v1158_v49 = vsel %vm309_vm8, %v1155_v40, %v1157_v41  ;;  %v855_v62 = vsel %vm826_vm15, %v7120_v46, %v7125_v53 }
 0x4bf   :  { %v1075_v60 = vrot.slane %v855_v62, 2  ;;  %v828_v62 = vsel %vm826_vm15, %v8146_v30, %v7131_v13 }
 0x4c0   :  { %v8272_v55 = vpop.permute.xlu1 %7148  ;;  %v885_v8 = vsel %vm826_vm15, %v7175_v2, %v7180_v4  ;;  %v886_v9 = vsel %vm826_vm15, %v7176_v61, %v7181_v3  ;;  %v8280_v15 = vpop.permute.xlu2 %7203  ;;  %v856_v3 = vsel %vm826_vm15, %v7121_v48, %v7126_v52 }
 0x4c1   :  { %v1094_v10 = vrot.slane %v885_v8, 4  ;;  %v1096_v18 = vrot.slane %v886_v9, 4  ;;  %v7150_v8 = vunpack.i.l.bf16 %v8272_v55  ;;  %v1076_v11 = vrot.slane %v856_v3, 2  ;;  %v6356_v3 = vld [vmem:[%s8325_s29] sm:$0xf] }
 0x4c2   :  { %1370 = vmatpush.bf16.msra.mxu3 %v1194_v16  ;;  %v7151_v30 = vunpack.i.h.bf16 %v8272_v55 }
 0x4c3   :  { %v1097_v22 = vsel %vm307_vm7, %v1094_v10, %v1096_v18  ;;  %v1183_v23 = vsel %vm309_vm8, %v1096_v18, %v1107_v56  ;;  %v1095_v6 = vsel %vm307_vm7, %v1092_v26, %v1094_v10  ;;  %v7206_v10 = vunpack.i.h.bf16 %v8280_v15 }
 0x4c4   :  { %v1193_v29 = vpack.c.bf16 %v1183_v23, %v1097_v22  ;;  %v1192_v44 = vpack.c.bf16 %v1095_v6, %v1093_v38  ;;  %v7205_v18 = vunpack.i.l.bf16 %v8280_v15  ;;  %v1077_v15 = vsel %vm305_vm6, %v1075_v60, %v1076_v11 }
 0x4c5   :  { %v7184_v27 = vpop.permute.xlu0 %7183 }
 0x4c6   :  { %v7185_v36 = vunpack.i.l.bf16 %v7184_v27  ;;  %1371 = vmatpush.bf16.msra.mxu3 %v1193_v29  ;;  %v7186_v4 = vunpack.i.h.bf16 %v7184_v27 }
 0x4c8   :  { %v7199_v37 = vpop.permute.xlu1 %7198  ;;  %v1026_v39 = vsel %vm826_vm15, %v7185_v36, %v7190_v35  ;;  %v8298_v47 = vpop.permute.xlu2 %7213  ;;  %v1023_v43 = vsel %vm826_vm15, %v7186_v4, %v7191_v1  ;;  %v997_v35 = vsel %vm826_vm15, %v7145_v14, %v7150_v8  ;;  %v6909_v4 = vld [vmem:[%s8325_s29 + $0x8] sm:$0xf0] }
 0x4c9   :  { %v1159_v45 = vrot.slane %v1026_v39, 6  ;;  %v7201_v57 = vunpack.i.h.bf16 %v7199_v37  ;;  %v7200_v58 = vunpack.i.l.bf16 %v7199_v37  ;;  %v1154_v38 = vrot.slane %v1023_v43, 6 }
 0x4ca   :  { %1372 = vmatpush.bf16.msra.mxu3 %v1192_v44  ;;  %v7216_v55 = vunpack.i.h.bf16 %v8298_v47 }
 0x4cb   :  { %v1160_v51 = vsel %vm309_vm8, %v1157_v41, %v1159_v45 }
 0x4cc   :  { %v1202_v56 = vpack.c.bf16 %v1160_v51, %v1158_v49 }
 0x4cd   :  { %v7194_v54 = vpop.permute.xlu0 %7193 }
 0x4ce   :  { %v7196_v59 = vunpack.i.h.bf16 %v7194_v54  ;;  %v7195_v61 = vunpack.i.l.bf16 %v7194_v54  ;;  %1408 = vmatpush.bf16.msrb.mxu0 %v1202_v56  ;;  %v1156_v56 = vsel %vm309_vm8, %v1154_v38, %v1155_v40 }
 0x4d0   :  { %v7229_v32 = vpop.permute.xlu1 %7228  ;;  %v857_v63 = vsel %vm826_vm15, %v7195_v61, %v7200_v58  ;;  %v858_v2 = vsel %vm826_vm15, %v7196_v59, %v7201_v57  ;;  %v7219_v19 = vpop.permute.xlu2 %7218  ;;  %v1141_v57 = vrot.slane %v997_v35, 4 }
 0x4d1   :  { %v1078_v5 = vrot.slane %v857_v63, 2  ;;  %v1080_v7 = vrot.slane %v858_v2, 2  ;;  %v7230_v9 = vunpack.i.l.bf16 %v7229_v32  ;;  %v7231_v23 = vunpack.i.h.bf16 %v7229_v32 }
 0x4d2   :  { %v7221_v36 = vunpack.i.h.bf16 %v7219_v19  ;;  %v7220_v41 = vunpack.i.l.bf16 %v7219_v19 }
 0x4d3   :  { %v1081_v16 = vsel %vm305_vm6, %v1078_v5, %v1080_v7  ;;  %v1182_v17 = vsel %vm307_vm7, %v1080_v7, %v1091_v25  ;;  %v1079_v29 = vsel %vm305_vm6, %v1076_v11, %v1078_v5  ;;  %v7130_v25 = vunpack.i.l.bf16 %v8236_v0 }
 0x4d4   :  { %v1191_v22 = vpack.c.bf16 %v1182_v17, %v1081_v16  ;;  %v830_v34 = vsel %vm826_vm15, %v8183_v50, %v7230_v9  ;;  %v1190_v0 = vpack.c.bf16 %v1079_v29, %v1077_v15  ;;  %v829_v46 = vsel %vm826_vm15, %v8168_v42, %v7231_v23 }
 0x4d5   :  { %v7209_v20 = vpop.permute.xlu0 %7208  ;;  %v1181_v48 = vsel %vm305_vm6, %v830_v34, %v1075_v60  ;;  %v827_v52 = vsel %vm826_vm15, %v8149_v31, %v7130_v25  ;;  %v8353_v32 = vsel %vm826_vm15, %v7130_v25, %v7220_v41  ;;  %v1068_v33 = vsel %vm826_vm15, %v7131_v13, %v7221_v36 }
 0x4d6   :  { %v7211_v26 = vunpack.i.h.bf16 %v7209_v20  ;;  %v7210_v27 = vunpack.i.l.bf16 %v7209_v20  ;;  %1373 = vmatpush.bf16.msra.mxu3 %v1191_v22  ;;  %v1189_v59 = vpack.c.bf16 %v1181_v48, %v829_v46  ;;  %v1188_v5 = vpack.c.bf16 %v828_v62, %v827_v52  ;;  %v6368_v46 = vld [vmem:[%s8325_s29 + $0x18] sm:$0xf]  ;;  %v6912_v48 = vld [vmem:[%s8325_s29 + $0x20] sm:$0xf0] }
 0x4d7   :  { %v1169_v60 = vrot.slane %v8353_v32, 2  ;;  %v1170_v1 = vrot.slane %v1068_v33, 2  ;;  %v6357_v11 = vor.u32 %v6909_v4, %v6356_v3  ;;  %v7146_v13 = vunpack.i.h.bf16 %v8254_v24  ;;  %v6358_v3 = vld [vmem:[%s8325_s29 + $0xc] sm:$0xf0] }
 0x4d8   :  { %v7234_v6 = vpop.permute.xlu1 %7233  ;;  %v998_v37 = vsel %vm826_vm15, %v7205_v18, %v7210_v27  ;;  %v8334_v39 = vsel %vm826_vm15, %v7206_v10, %v7211_v26  ;;  %v7160_v16 = vunpack.i.l.bf16 %v8256_v28  ;;  %v7155_v17 = vunpack.i.l.bf16 %v8250_v12 }
 0x4d9   :  { %v7236_v44 = vunpack.i.h.bf16 %v7234_v6  ;;  %v7235_v45 = vunpack.i.l.bf16 %v7234_v6  ;;  %v1143_v50 = vrot.slane %v998_v37, 4  ;;  %v1139_v49 = vrot.slane %v8334_v39, 4 }
 0x4da   :  { %1374 = vmatpush.bf16.msra.mxu3 %v1190_v0  ;;  %v1171_v18 = vsel %vm305_vm6, %v1169_v60, %v1170_v1  ;;  %v995_v19 = vsel %vm826_vm15, %v7146_v13, %v7151_v30  ;;  %v7215_v24 = vunpack.i.l.bf16 %v8298_v47  ;;  %v969_v29 = vsel %vm826_vm15, %v7155_v17, %v7160_v16  ;;  %v6915_v16 = vld [vmem:[%s8325_s29 + $0x38] sm:$0xf0]  ;;  %v6370_v17 = vld [vmem:[%s8325_s29 + $0x24] sm:$0xf0] }
 0x4db   :  { %v1069_v51 = vsel %vm826_vm15, %v7231_v23, %v7235_v45  ;;  %v1070_v53 = vsel %vm826_vm15, %v7230_v9, %v7236_v44  ;;  %v1186_v42 = vsel %vm309_vm8, %v1143_v50, %v1154_v38  ;;  %v1142_v63 = vsel %vm307_vm7, %v1139_v49, %v1141_v57 }
 0x4dc   :  { %v1172_v54 = vrot.slane %v1069_v51, 2  ;;  %v1201_v61 = vpack.c.bf16 %v1156_v56, %v1186_v42  ;;  %v1174_v31 = vrot.slane %v1070_v53, 2  ;;  %v1144_v40 = vsel %vm307_vm7, %v1141_v57, %v1143_v50 }
 0x4dd   :  { %v8348_v58 = vpop.permute.xlu0 %919  ;;  %v1200_v8 = vpack.c.bf16 %v1144_v40, %v1142_v63  ;;  %v7161_v23 = vunpack.i.h.bf16 %v8256_v28  ;;  %v1138_v15 = vrot.slane %v995_v19, 4  ;;  %v7156_v47 = vunpack.i.h.bf16 %v8250_v12 }
 0x4de   :  { %1375 = vmatpush.bf16.msra.mxu3 %v1189_v59  ;;  %1409 = vmatpush.bf16.msrb.mxu0 %v1201_v61  ;;  %v1175_v2 = vsel %vm305_vm6, %v1172_v54, %v1174_v31  ;;  %v1173_v14 = vsel %vm305_vm6, %v1170_v1, %v1172_v54  ;;  %v1125_v28 = vrot.slane %v969_v29, 2  ;;  %v6369_v53 = vor.u32 %v6912_v48, %v6368_v46  ;;  %v7249_v54 = vpop.permute.xlu2 %7248  ;;  %v6364_v1 = vld [vmem:[%s8325_s29 + $0x8] sm:$0xf]  ;;  %v6922_v48 = vld [vmem:[%s8325_s29 + $0x70] sm:$0xf0] }
 0x4df   :  { %v1206_v7 = vpack.c.bf16 %v1174_v31, %v1175_v2  ;;  %v1205_v43 = vpack.c.bf16 %v1173_v14, %v1171_v18  ;;  %v1140_v36 = vsel %vm307_vm7, %v1138_v15, %v1139_v49  ;;  %v967_v38 = vsel %vm826_vm15, %v7156_v47, %v7161_v23  ;;  %v6908_v2 = vld [vmem:[%s8325_s29 + $0x4] sm:$0xf]  ;;  %v6380_v14 = vld [vmem:[%s8325_s29 + $0x30] sm:$0xf]  ;;  %v6382_v23 = vld [vmem:[%s8325_s29 + $0x3c] sm:$0xf0] }
 0x4e0   :  { %v7244_v35 = vpop.permute.xlu1 %7243  ;;  %v1122_v12 = vrot.slane %v967_v38, 2  ;;  %v7251_v31 = vunpack.i.h.bf16 %v7249_v54  ;;  %v7250_v33 = vunpack.i.l.bf16 %v7249_v54  ;;  %v6381_v32 = vor.u32 %v6915_v16, %v6380_v14  ;;  %v6412_v46 = vld [vmem:[%s8325_s29 + $0x68] sm:$0xf] }
 0x4e1   :  { %v1367_v9 = vsel %vm305_vm6, %v1206_v7, 0  ;;  %v7245_v45 = vunpack.i.l.bf16 %v7244_v35  ;;  %v7246_v56 = vunpack.i.h.bf16 %v7244_v35  ;;  %v6917_v35 = vld [vmem:[%s8325_s29 + $0x4c] sm:$0xf] }
 0x4e2   :  { %1376 = vmatpush.bf16.msra.mxu3 %v1188_v5  ;;  %1410 = vmatpush.bf16.msrb.mxu0 %v1200_v8  ;;  %v6910_v8 = vld [vmem:[%s8325_s29 + $0x10] sm:$0xf0] }
 0x4e3   :  { %1450 = vmatpush.bf16.msra.mxu1 %v1367_v9 }
 0x4e5   :  { %v7224_v10 = vpop.permute.xlu0 %7223  ;;  %1377 = vmatmul.bf16.vlgmr.msra.gmra.mxu3 %v6357_v11  ;;  %v6361_v11 = vor.u32 %v6908_v2, %v6358_v3 }
 0x4e6   :  { %v7226_v20 = vunpack.i.h.bf16 %v7224_v10  ;;  %v7225_v22 = vunpack.i.l.bf16 %v7224_v10  ;;  %v6913_v10 = vld [vmem:[%s8325_s29 + $0x28] sm:$0xf0] }
 0x4e7   :  { %1451 = vmatpush.bf16.msra.mxu1 %v1205_v43  ;;  %v6914_v43 = vld [vmem:[%s8325_s29 + $0x34] sm:$0xf] }
 0x4e8   :  { %v970_v26 = vsel %vm826_vm15, %v7215_v24, %v7225_v22  ;;  %v968_v27 = vsel %vm826_vm15, %v7216_v55, %v7226_v20  ;;  %v932_v57 = vpop.permute.xlu1 %931  ;;  %v6376_v55 = vld [vmem:[%s8325_s29 + $0x20] sm:$0xf]  ;;  %v6392_v24 = vld [vmem:[%s8325_s29 + $0x48] sm:$0xf]  ;;  %v6918_v20 = vld [vmem:[%s8325_s29 + $0x50] sm:$0xf0]  ;;  %v6385_v29 = vor.u32 %v6914_v43, %v6382_v23 }
 0x4e9   :  { %v1127_v25 = vrot.slane %v970_v26, 2  ;;  %v1123_v34 = vrot.slane %v968_v27, 2  ;;  %v941_v4 = vsel %vm826_vm15, %v8348_v58, %v932_v57  ;;  %v6365_v58 = vor.u32 %v6910_v8, %v6364_v1  ;;  %v6388_v26 = vld [vmem:[%s8325_s29 + $0x38] sm:$0xf]  ;;  %v6916_v27 = vld [vmem:[%s8325_s29 + $0x40] sm:$0xf0] }
 0x4ea   :  { %v6377_v19 = vor.u32 %v6913_v10, %v6376_v55  ;;  %v6393_v22 = vor.u32 %v6918_v20, %v6392_v24 }
 0x4eb   :  { %v1185_v6 = vsel %vm307_vm7, %v1127_v25, %v1138_v15  ;;  %v1126_v41 = vsel %vm305_vm6, %v1123_v34, %v1125_v28  ;;  %v1128_v44 = vsel %vm305_vm6, %v1125_v28, %v1127_v25  ;;  %v1124_v42 = vsel %vm305_vm6, %v1122_v12, %v1123_v34  ;;  %v6404_v15 = vld [vmem:[%s8325_s29 + $0x60] sm:$0xf]  ;;  %v6921_v34 = vld [vmem:[%s8325_s29 + $0x68] sm:$0xf0]  ;;  %v6919_v28 = vld [vmem:[%s8325_s29 + $0x58] sm:$0xf0] }
 0x4ec   :  { %v1199_v37 = vpack.c.bf16 %v1140_v36, %v1185_v6  ;;  %v1198_v50 = vpack.c.bf16 %v1128_v44, %v1126_v41  ;;  %v6389_v25 = vor.u32 %v6916_v27, %v6388_v26  ;;  %v6405_v47 = vor.u32 %v6921_v34, %v6404_v15  ;;  %v6394_v36 = vld [vmem:[%s8325_s29 + $0x54] sm:$0xf0]  ;;  %v6400_v6 = vld [vmem:[%s8325_s29 + $0x50] sm:$0xf] }
 0x4ed   :  { %v7239_v39 = vpop.permute.xlu0 %7238  ;;  %v6401_v38 = vor.u32 %v6919_v28, %v6400_v6 }
 0x4ee   :  { %v7240_v0 = vunpack.i.l.bf16 %v7239_v39  ;;  %1411 = vmatpush.bf16.msrb.mxu0 %v1199_v37  ;;  %v7241_v51 = vunpack.i.h.bf16 %v7239_v39  ;;  %v6397_v37 = vor.u32 %v6917_v35, %v6394_v36  ;;  %v738_v39 = vld [vmem:[%s8325_s29 + $0x78] sm:$0xff] }
 0x4ef   :  { %v1314_v41 = vunpack.c.l.b16 %v738_v39 }
 0x4f0   :  { %v942_v49 = vsel %vm826_vm15, %v7240_v0, %v7245_v45  ;;  %v940_v62 = vsel %vm826_vm15, %v7241_v51, %v7246_v56  ;;  %v6920_v45 = vld [vmem:[%s8325_s29 + $0x64] sm:$0xf]  ;;  %v6406_v0 = vld [vmem:[%s8325_s29 + $0x6c] sm:$0xf0]  ;;  %v1315_v51 = vunpack.c.h.b16 %v738_v39  ;;  %v6926_v56 = vld [vmem:[%s6236_s4 + $0x8] sm:$0xff] }
 0x4f1   :  { %v1184_v52 = vsel %vm305_vm6, %v942_v49, %v1122_v12  ;;  %v1196_v5 = vpack.c.bf16 %v941_v4, %v940_v62  ;;  %v1332_v44 = vpack.c.b16 %v1314_v41, %v1314_v41  ;;  %v6409_v12 = vor.u32 %v6920_v45, %v6406_v0  ;;  %v739_v49 = vld [vmem:[%s8325_s29 + $0x80] sm:$0xf]  ;;  %1544 = vmatpush.bf16.msra.mxu2 %v6926_v56  ;;  %v1215_v4 = vpop.permute.xlu2 %1214 }
 0x4f2   :  { %1412 = vmatpush.bf16.msrb.mxu0 %v1198_v50  ;;  %v1197_v59 = vpack.c.bf16 %v1124_v42, %v1184_v52  ;;  %v6413_v50 = vor.u32 %v6922_v48, %v6412_v46  ;;  %v1316_v52 = vunpack.c.l.b16 %v739_v49  ;;  %v6928_v42 = vld [vmem:[%s6237_s6 + $0x8] sm:$0xff] }
 0x4f3   :  { %1594 = vmatpush.bf16.msrb.mxu3 %v6928_v42 }
 0x4f4   :  { %v1334_v54 = vpack.c.b16 %v1316_v52, %v1316_v52 }
 0x4f5   :  { %v7254_v61 = vpop.permute.xlu0 %7253  ;;  %1382 = vmatmul.bf16.gmra.mxu3 %v6369_v53  ;;  %v1333_v53 = vpack.c.b16 %v1315_v51, %v1315_v51 }
 0x4f6   :  { %v7256_v63 = vunpack.i.h.bf16 %v7254_v61  ;;  %v7255_v40 = vunpack.i.l.bf16 %v7254_v61  ;;  %1413 = vmatpush.bf16.msrb.mxu0 %v1197_v59  ;;  %v6925_v59 = vld [vmem:[%s6236_s4] sm:$0xff] }
 0x4f7   :  { %v6927_v61 = vld [vmem:[%s6237_s6] sm:$0xff]  ;;  %1545 = vmatpush.bf16.msra.mxu2 %v6925_v59  ;;  %s7960_s6 = smov 15  }
 0x4f8   :  { %v1053_v7 = vsel %vm826_vm15, %v7251_v31, %v7256_v63  ;;  %v1054_v30 = vsel %vm826_vm15, %v7250_v33, %v7255_v40  ;;  %1595 = vmatpush.bf16.msrb.mxu3 %v6927_v61  ;;  %v1210_v63 = vpop.permute.xlu1 %1209  ;;  %s6248_s3 = sld [smem:[%s10814_s0 + %s7960_s6]]   ;;  %s7962_s6 = smov 20  }
 0x4f9   :  { %v1187_v9 = vsel %vm305_vm6, %v1054_v30, %v1169_v60  ;;  %v6911_v60 = vld [vmem:[%s8325_s29 + $0x1c] sm:$0xf] }
 0x4fa   :  { %1414 = vmatpush.bf16.msrb.mxu0 %v1196_v5  ;;  %v1204_v13 = vpack.c.bf16 %v1187_v9, %v1053_v7  ;;  %v6373_v18 = vor.u32 %v6911_v60, %v6370_v17 }
 0x4fc   :  { %1452 = vmatpush.bf16.msra.mxu1 %v1204_v13 }
 0x4fd   :  { %1415 = vmatmul.bf16.vlgmr.msrb.gmra.mxu0 %v6361_v11  ;;  %v1220_v60 = vpop.permute.xlu0 %1219 }
 0x4ff   :  { %6414 = vmatmul.msk.bf16.vlgmr.msra.gmra.mxu1 %vm1347_vm2, %v6365_v58 }
 0x505   :  { %1387 = vmatmul.bf16.gmra.mxu3 %v6381_v32  ;;  %v1235_v28 = vpop.permute.xlu0 %1234 }
 0x50d   :  { %1420 = vmatmul.bf16.gmra.mxu0 %v6373_v18  ;;  %v1225_v18 = vpop.permute.xlu1 %1224 }
 0x50f   :  { %6415 = vmatmul.msk.bf16.gmra.mxu1 %vm1347_vm2, %v6377_v19 }
 0x515   :  { %1392 = vmatmul.bf16.gmra.mxu3 %v6393_v22  ;;  %v1240_v51 = vpop.permute.xlu1 %1239 }
 0x51d   :  { %1425 = vmatmul.bf16.gmra.mxu0 %v6385_v29 }
 0x51f   :  { %6416 = vmatmul.msk.bf16.gmra.mxu1 %vm1347_vm2, %v6389_v25 }
 0x525   :  { %1397 = vmatmul.bf16.gmra.mxu3 %v6405_v47  ;;  %v1230_v47 = vpop.permute.xlu2 %1229 }
 0x52d   :  { %1430 = vmatmul.bf16.gmra.mxu0 %v6397_v37  ;;  %v1245_v56 = vpop.permute.xlu2 %1244 }
 0x52f   :  { %6417 = vmatmul.msk.bf16.gmra.mxu1 %vm1347_vm2, %v6401_v38 }
 0x535   :  { %1402 = vmatmul.bf16.gmra.mxu3 %v1332_v44 }
 0x53d   :  { %1435 = vmatmul.bf16.gmra.mxu0 %v6409_v12 }
 0x53f   :  { %6418 = vmatmul.msk.bf16.gmra.mxu1 %vm1347_vm2, %v6413_v50 }
 0x54d   :  { %1440 = vmatmul.bf16.gmra.mxu0 %v1333_v53 }
 0x54f   :  { %6419 = vmatmul.msk.bf16.gmra.mxu1 %vm1347_vm2, %v1334_v54 }
 0x568   :  { %v1378_v57 = vpop.f32.mrf.mxu3 }
 0x569   :  { %v1379_v2 = vadd.f32 %v1378_v57, %v1210_v63 }
 0x570   :  { %v1380_v62 = vpop.f32.mrf.mxu3 }
 0x571   :  { %v1381_v5 = vadd.f32 %v1380_v62, %v1215_v4 }
 0x578   :  { %v1383_v31 = vpop.f32.mrf.mxu3 }
 0x579   :  { %v1384_v55 = vadd.f32 %v1383_v31, %v1220_v60 }
 0x57a   :  { %v1416_v33 = vpop.f32.mrf.mxu0 }
 0x57b   :  { %v1417_v3 = vadd.f32 %v1416_v33, %v1379_v2 }
 0x57c   :  { %v1454_v40 = vpop.f32.mrf.mxu1 }
 0x57d   :  { %v1455_v1 = vadd.f32 %v1454_v40, %v1417_v3 }
 0x57f   :  { %v1483_v13 = vmax.f32 %v1455_v1, 0.0 }
 0x580   :  { %v1385_v7 = vpop.f32.mrf.mxu3 }
 0x581   :  { %v1386_v19 = vadd.f32 %v1385_v7, %v1225_v18 }
 0x582   :  { %v1418_v30 = vpop.f32.mrf.mxu0 }
 0x583   :  { %v1419_v8 = vadd.f32 %v1418_v30, %v1381_v5  ;;  %v1250_v5 = vpop.permute.xlu0 %1249 }
 0x584   :  { %v1456_v9 = vpop.f32.mrf.mxu1 }
 0x585   :  { %v1457_v11 = vadd.f32 %v1456_v9, %v1419_v8  ;;  %v1255_v8 = vpop.permute.xlu1 %1254 }
 0x587   :  { %v1484_v58 = vmax.f32 %v1457_v11, 0.0 }
 0x588   :  { %v1388_v16 = vpop.f32.mrf.mxu3 }
 0x589   :  { %v1502_v14 = vpack.c.bf16 %v1484_v58, %v1483_v13  ;;  %v1389_v36 = vadd.f32 %v1388_v16, %v1230_v47 }
 0x58a   :  { %v1421_v32 = vpop.f32.mrf.mxu0 }
 0x58b   :  { %6428 = vmatmul.msk.bf16.vlgmr.msra.gmra.mxu2 %vm170_vm0, %v1502_v14  ;;  %6442 = vmatmul.msk.bf16.vlgmr.msrb.gmra.mxu3 %vm170_vm0, %v1502_v14  ;;  %v1422_v10 = vadd.f32 %v1421_v32, %v1384_v55 }
 0x58c   :  { %v1459_v17 = vpop.f32.mrf.mxu1 }
 0x58d   :  { %v1460_v22 = vadd.f32 %v1459_v17, %v1422_v10  ;;  %v1260_v10 = vpop.permute.xlu2 %1259 }
 0x58f   :  { %v1485_v27 = vmax.f32 %v1460_v22, 0.0 }
 0x590   :  { %v1390_v24 = vpop.f32.mrf.mxu3 }
 0x591   :  { %v1391_v37 = vadd.f32 %v1390_v24, %v1235_v28 }
 0x592   :  { %v1423_v20 = vpop.f32.mrf.mxu0 }
 0x593   :  { %v1424_v43 = vadd.f32 %v1423_v20, %v1386_v19 }
 0x594   :  { %v1461_v23 = vpop.f32.mrf.mxu1 }
 0x595   :  { %v1462_v26 = vadd.f32 %v1461_v23, %v1424_v43 }
 0x597   :  { %v1486_v29 = vmax.f32 %v1462_v26, 0.0 }
 0x598   :  { %v1393_v25 = vpop.f32.mrf.mxu3 }
 0x599   :  { %v1503_v15 = vpack.c.bf16 %v1486_v29, %v1485_v27  ;;  %v1394_v53 = vadd.f32 %v1393_v25, %v1240_v51 }
 0x59a   :  { %v1426_v34 = vpop.f32.mrf.mxu0 }
 0x59b   :  { %6429 = vmatmul.msk.bf16.gmra.mxu2 %vm170_vm0, %v1503_v15  ;;  %6443 = vmatmul.msk.bf16.gmra.mxu3 %vm170_vm0, %v1503_v15  ;;  %v1427_v6 = vadd.f32 %v1426_v34, %v1389_v36 }
 0x59c   :  { %v1464_v35 = vpop.f32.mrf.mxu1 }
 0x59d   :  { %v1465_v41 = vadd.f32 %v1464_v35, %v1427_v6 }
 0x59f   :  { %v1487_v46 = vmax.f32 %v1465_v41, 0.0 }
 0x5a0   :  { %v1395_v38 = vpop.f32.mrf.mxu3 }
 0x5a1   :  { %v1396_v42 = vadd.f32 %v1395_v38, %v1245_v56 }
 0x5a2   :  { %v1428_v39 = vpop.f32.mrf.mxu0 }
 0x5a3   :  { %v1429_v44 = vadd.f32 %v1428_v39, %v1391_v37 }
 0x5a4   :  { %v1466_v45 = vpop.f32.mrf.mxu1 }
 0x5a5   :  { %v1467_v0 = vadd.f32 %v1466_v45, %v1429_v44 }
 0x5a7   :  { %v1488_v48 = vmax.f32 %v1467_v0, 0.0 }
 0x5a8   :  { %v1398_v12 = vpop.f32.mrf.mxu3 }
 0x5a9   :  { %v1504_v50 = vpack.c.bf16 %v1488_v48, %v1487_v46  ;;  %v1399_v30 = vadd.f32 %v1398_v12, %v1250_v5 }
 0x5aa   :  { %v1431_v49 = vpop.f32.mrf.mxu0 }
 0x5ab   :  { %6430 = vmatmul.msk.bf16.gmra.mxu2 %vm170_vm0, %v1504_v50  ;;  %6444 = vmatmul.msk.bf16.gmra.mxu3 %vm170_vm0, %v1504_v50  ;;  %v1432_v54 = vadd.f32 %v1431_v49, %v1394_v53 }
 0x5ac   :  { %v1469_v52 = vpop.f32.mrf.mxu1 }
 0x5ad   :  { %v1470_v61 = vadd.f32 %v1469_v52, %v1432_v54 }
 0x5af   :  { %v1489_v63 = vmax.f32 %v1470_v61, 0.0 }
 0x5b0   :  { %v1400_v57 = vpop.f32.mrf.mxu3 }
 0x5b1   :  { %v1401_v9 = vadd.f32 %v1400_v57, %v1255_v8  ;;  %v6923_v8 = vld [vmem:[%s6248_s3] sm:$0xff] }
 0x5b2   :  { %v1433_v59 = vpop.f32.mrf.mxu0 }
 0x5b3   :  { %v1434_v62 = vadd.f32 %v1433_v59, %v1396_v42 }
 0x5b4   :  { %v1471_v31 = vpop.f32.mrf.mxu1 }
 0x5b5   :  { %v1472_v33 = vadd.f32 %v1471_v31, %v1434_v62 }
 0x5b7   :  { %v1490_v40 = vmax.f32 %v1472_v33, 0.0 }
 0x5b8   :  { %v1403_v2 = vpop.f32.mrf.mxu3 }
 0x5b9   :  { %v1505_v3 = vpack.c.bf16 %v1490_v40, %v1489_v63  ;;  %v1404_v19 = vadd.f32 %v1403_v2, %v1260_v10 }
 0x5ba   :  { %v1436_v4 = vpop.f32.mrf.mxu0 }
 0x5bb   :  { %6431 = vmatmul.msk.bf16.gmra.mxu2 %vm170_vm0, %v1505_v3  ;;  %6445 = vmatmul.msk.bf16.gmra.mxu3 %vm170_vm0, %v1505_v3  ;;  %v1437_v1 = vadd.f32 %v1436_v4, %v1399_v30 }
 0x5bc   :  { %v1474_v7 = vpop.f32.mrf.mxu1 }
 0x5bd   :  { %v1475_v58 = vadd.f32 %v1474_v7, %v1437_v1 }
 0x5bf   :  { %v1491_v60 = vmax.f32 %v1475_v58, 0.0 }
 0x5c0   :  { %v1405_v11 = vpop.f32.mrf.mxu3 }
 0x5c1   :  { %v6924_v11 = vld [vmem:[%s6248_s3 + $0x8] sm:$0x70] }
 0x5c2   :  { %v1438_v13 = vpop.f32.mrf.mxu0 }
 0x5c3   :  { %v1439_v14 = vadd.f32 %v1438_v13, %v1401_v9  ;;  %v6454_v9 = vld [vmem:[%s6248_s3 + $0x8] sm:$0xf]  ;;  %s6253_s3 = sld [smem:[%s10814_s0 + %s7962_s6]]   ;;  %s7964_s6 = smov 5  }
 0x5c4   :  { %v1476_v16 = vpop.f32.mrf.mxu1  ;;  %v6455_v13 = vor.u32 %v6924_v11, %v6454_v9  ;;  %v1728_v9 = vld [vmem:[%s8538_s28 + $0x8] sm:$0xff]  ;;  %v1727_v11 = vld [vmem:[%s8538_s28] sm:$0xff] }
 0x5c5   :  { %v1477_v32 = vadd.f32 %v1476_v16, %v1439_v14  ;;  %v1646_v14 = vpop.permute.xlu0 %1645 }
 0x5c7   :  { %v1492_v17 = vmax.f32 %v1477_v32, 0.0  ;;  %v1651_v32 = vpop.permute.xlu1 %1650 }
 0x5c9   :  { %v1506_v55 = vpack.c.bf16 %v1492_v17, %v1491_v60 }
 0x5ca   :  { %v1441_v18 = vpop.f32.mrf.mxu0 }
 0x5cb   :  { %6432 = vmatmul.msk.bf16.gmra.mxu2 %vm170_vm0, %v1506_v55  ;;  %6446 = vmatmul.msk.bf16.gmra.mxu3 %vm170_vm0, %v1506_v55  ;;  %v1442_v20 = vadd.f32 %v1441_v18, %v1404_v19 }
 0x5cc   :  { %v1479_v24 = vpop.f32.mrf.mxu1 }
 0x5cd   :  { %v1480_v22 = vadd.f32 %v1479_v24, %v1442_v20  ;;  %v1656_v24 = vpop.permute.xlu2 %1655 }
 0x5cf   :  { %v1493_v26 = vmax.f32 %v1480_v22, 0.0  ;;  %v1661_v22 = vpop.permute.xlu0 %1660 }
 0x5d1   :  { %v1507_v27 = vpack.c.bf16 %v1493_v26, %v1493_v26 }
 0x5d2   :  { %v1443_v43 = vpop.f32.mrf.mxu0 }
 0x5d4   :  { %v1481_v23 = vpop.f32.mrf.mxu1 }
 0x5db   :  { %6433 = vmatmul.msk.bf16.gmra.mxu2 %vm170_vm0, %v1507_v27  ;;  %6447 = vmatmul.msk.bf16.gmra.mxu3 %vm170_vm0, %v1507_v27 }
 0x60e   :  { %v1547_v29 = vpop.f32.mrf.mxu2  ;;  %v1597_v25 = vpop.f32.mrf.mxu3 }
 0x60f   :  { %v1626_v15 = vmax.f32 %v1547_v29, %v1597_v25 }
 0x616   :  { %v1549_v34 = vpop.f32.mrf.mxu2  ;;  %v1599_v47 = vpop.f32.mrf.mxu3 }
 0x617   :  { %v1627_v7 = vmax.f32 %v1549_v34, %v1599_v47 }
 0x619   :  { %v1637_v1 = vpack.c.bf16 %v1627_v7, %v1626_v15 }
 0x61e   :  { %v1552_v35 = vpop.f32.mrf.mxu2  ;;  %v1602_v36 = vpop.f32.mrf.mxu3 }
 0x61f   :  { %v1628_v6 = vmax.f32 %v1552_v35, %v1602_v36 }
 0x626   :  { %v1554_v28 = vpop.f32.mrf.mxu2  ;;  %v1604_v37 = vpop.f32.mrf.mxu3 }
 0x627   :  { %v1629_v4 = vmax.f32 %v1554_v28, %v1604_v37 }
 0x629   :  { %v1638_v30 = vpack.c.bf16 %v1629_v4, %v1628_v6 }
 0x62e   :  { %v1557_v38 = vpop.f32.mrf.mxu2  ;;  %v1607_v39 = vpop.f32.mrf.mxu3 }
 0x62f   :  { %v1630_v3 = vmax.f32 %v1557_v38, %v1607_v39 }
 0x636   :  { %v1559_v41 = vpop.f32.mrf.mxu2  ;;  %v1609_v44 = vpop.f32.mrf.mxu3 }
 0x637   :  { %v1631_v40 = vmax.f32 %v1559_v41, %v1609_v44 }
 0x639   :  { %v1639_v5 = vpack.c.bf16 %v1631_v40, %v1630_v3 }
 0x63e   :  { %v1562_v45 = vpop.f32.mrf.mxu2  ;;  %v1612_v0 = vpop.f32.mrf.mxu3 }
 0x63f   :  { %v1632_v63 = vmax.f32 %v1562_v45, %v1612_v0 }
 0x646   :  { %v1564_v46 = vpop.f32.mrf.mxu2  ;;  %v1614_v48 = vpop.f32.mrf.mxu3 }
 0x647   :  { %v1633_v61 = vmax.f32 %v1564_v46, %v1614_v48 }
 0x649   :  { %v1640_v2 = vpack.c.bf16 %v1633_v61, %v1632_v63 }
 0x64e   :  { %v1567_v12 = vpop.f32.mrf.mxu2  ;;  %v1617_v50 = vpop.f32.mrf.mxu3 }
 0x64f   :  { %v1634_v59 = vmax.f32 %v1567_v12, %v1617_v50 }
 0x656   :  { %v1569_v49 = vpop.f32.mrf.mxu2  ;;  %v1619_v51 = vpop.f32.mrf.mxu3 }
 0x657   :  { %v1635_v42 = vmax.f32 %v1569_v49, %v1619_v51 }
 0x659   :  { %v1641_v62 = vpack.c.bf16 %v1635_v42, %v1634_v59 }
 0x65e   :  { %v1572_v52 = vpop.f32.mrf.mxu2  ;;  %v1622_v53 = vpop.f32.mrf.mxu3 }
 0x65f   :  { %v1636_v54 = vmax.f32 %v1572_v52, %v1622_v53 }
 0x661   :  { %v1642_v56 = vpack.c.bf16 %v1636_v54, %v1636_v54 }
 0x663   :  { %v1680_v57 = vsel %vm307_vm7, %v1642_v56, 0 }
 0x664   :  { %1684 = vmatpush.bf16.msra.mxu0 %v1680_v57 }
 0x666   :  { %v1574_v31 = vpop.f32.mrf.mxu2  ;;  %v1624_v33 = vpop.f32.mrf.mxu3 }
 0x668   :  { %1685 = vmatpush.bf16.msra.mxu0 %v1641_v62 }
 0x66c   :  { %1686 = vmatpush.bf16.msra.mxu0 %v1640_v2 }
 0x670   :  { %1687 = vmatpush.bf16.msra.mxu0 %v1639_v5 }
 0x674   :  { %1688 = vmatpush.bf16.msra.mxu0 %v1638_v30 }
 0x678   :  { %1689 = vmatpush.bf16.msra.mxu0 %v1637_v1 }
 0x67b   :  { %6456 = vmatmul.msk.bf16.vlgmr.msra.gmra.mxu0 %vm685_vm11, %v6923_v8  ;;  %v1729_v8 = vld [vmem:[%s8538_s28 + $0x10] sm:$0xff] }
 0x68b   :  { %6457 = vmatmul.msk.bf16.gmra.mxu0 %vm685_vm11, %v6455_v13 }
 0x6f8   :  { %v1691_v58 = vpop.f32.mrf.mxu0 }
 0x6f9   :  { %v1692_v16 = vadd.f32 %v1691_v58, %v1646_v14  ;;  %v1732_v58 = vld [vmem:[%s8538_s28 + $0x28] sm:$0xff]  ;;  %v1731_v14 = vld [vmem:[%s8538_s28 + $0x20] sm:$0xff] }
 0x6fb   :  { %v1701_v55 = vmax.f32 %v1692_v16, 0.0  ;;  %v1730_v16 = vld [vmem:[%s8538_s28 + $0x18] sm:$0xff] }
 0x700   :  { %v1693_v60 = vpop.f32.mrf.mxu0 }
 0x701   :  { %v1694_v17 = vadd.f32 %v1693_v60, %v1651_v32  ;;  %v1735_v60 = vld [vmem:[%s8538_s28 + $0x40] sm:$0xff] }
 0x703   :  { %v1702_v10 = vmax.f32 %v1694_v17, 0.0  ;;  %v1734_v17 = vld [vmem:[%s8538_s28 + $0x38] sm:$0xff] }
 0x705   :  { %v7262_v18 = vpack.i.bf16 %v1702_v10, %v1701_v55  ;;  %v1733_v55 = vld [vmem:[%s8538_s28 + $0x30] sm:$0xff] }
 0x707   :  { %7263 = vrot.lane.b32.xlu0 %v7262_v18, %s7930_s7  ;;  %7258 = vrot.lane.b32.xlu1 %v7262_v18, %s7931_s8 }
 0x708   :  { %v1696_v19 = vpop.f32.mrf.mxu0 }
 0x709   :  { %v1697_v20 = vadd.f32 %v1696_v19, %v1656_v24 }
 0x70b   :  { %v1703_v26 = vmax.f32 %v1697_v20, 0.0 }
 0x710   :  { %v1698_v43 = vpop.f32.mrf.mxu0 }
 0x711   :  { %v1699_v23 = vadd.f32 %v1698_v43, %v1661_v22 }
 0x713   :  { %v1704_v27 = vmax.f32 %v1699_v23, 0.0 }
 0x715   :  { %v7267_v29 = vpack.i.bf16 %v1704_v27, %v1703_v26  ;;  %v1742_v27 = vld [vmem:[%s6253_s3] sm:$0xff] }
 0x717   :  { %7268 = vrot.lane.b32.xlu2 %v7267_v29, %s7931_s8  ;;  %7273 = vrot.lane.b32.xlu1 %v7267_v29, %s7930_s7  ;;  %v1737_v29 = vld [vmem:[%s8538_s28 + $0x50] sm:$0xff] }
 0x771   :  { %v7269_v39 = vpop.permute.xlu2 %7268 }
 0x772   :  { %v7270_v12 = vunpack.i.l.bf16 %v7269_v39  ;;  %v7271_v51 = vunpack.i.h.bf16 %v7269_v39 }
 0x774   :  { %v1776_v49 = vsel %vm209_vm1, 0.0, %v7270_v12  ;;  %v1777_v42 = vsel %vm209_vm1, 0.0, %v7271_v51 }
 0x775   :  { %v1781_v52 = vsel %vm1778_vm3, %v1776_v49, 0.0  ;;  %v1782_v61 = vsel %vm1778_vm3, %v1777_v42, 0.0 }
 0x776   :  { %v1786_v56 = vsel %vm1783_vm4, %v1781_v52, 0.0  ;;  %v1787_v33 = vsel %vm1783_vm4, %v1782_v61, 0.0 }
 0x779   :  { %v7259_v25 = vpop.permute.xlu1 %7258  ;;  %v7264_v15 = vpop.permute.xlu0 %7263 }
 0x77a   :  { %v7261_v34 = vunpack.i.h.bf16 %v7259_v25  ;;  %v7260_v47 = vunpack.i.l.bf16 %v7259_v25  ;;  %v7266_v6 = vunpack.i.h.bf16 %v7264_v15  ;;  %v7265_v28 = vunpack.i.l.bf16 %v7264_v15  ;;  %v1736_v25 = vld [vmem:[%s8538_s28 + $0x48] sm:$0xff]  ;;  %s8673_s28 = sld [smem:[%s10814_s0 + %s7963_s5]]   ;;  %s7965_s5 = smov 6  }
 0x77b   :  { %s6239_s1 = sld [smem:[%s10814_s0 + %s7965_s5]]   ;;  %s7972_s5 = smov 23  }
 0x77c   :  { %v1775_v35 = vsel %vm209_vm1, 0.0, %v7261_v34  ;;  %v1774_v36 = vsel %vm209_vm1, 0.0, %v7260_v47 }
 0x77d   :  { %v1780_v37 = vsel %vm1778_vm3, %v1775_v35, 0.0  ;;  %v1779_v38 = vsel %vm1778_vm3, %v1774_v36, 0.0  ;;  %v1745_v36 = vld [vmem:[%s6253_s3 + $0x18] sm:$0x3f] }
 0x77e   :  { %v1785_v41 = vsel %vm1783_vm4, %v1780_v37, 0.0  ;;  %v1784_v44 = vsel %vm1783_vm4, %v1779_v38, 0.0 }
 0x77f   :  { %v1790_v45 = vsel %vm1788_vm5, %v1785_v41, %v7266_v6  ;;  %v1789_v0 = vsel %vm1788_vm5, %v1784_v44, %v7265_v28  ;;  %v1744_v6 = vld [vmem:[%s6253_s3 + $0x10] sm:$0xff]  ;;  %v1743_v28 = vld [vmem:[%s6253_s3 + $0x8] sm:$0xff]  ;;  %s6238_s3 = sld [smem:[%s10814_s0 + %s7964_s6]]  }
 0x780   :  { %v8469_v46 = vsel %vm801_vm14, %v1790_v45, 0.0  ;;  %v8472_v48 = vsel %vm801_vm14, %v1789_v0, 0.0 }
 0x781   :  { %v7292_v50 = vpack.i.bf16 %v8469_v46, %v8472_v48 }
 0x783   :  { %7293 = vrot.lane.b32.xlu1 %v7292_v50, %s7946_s23  ;;  %7283 = vrot.lane.b32.xlu0 %v7292_v50, %s7932_s9 }
 0x784   :  { %7278 = vrot.lane.b32.xlu2 %v7292_v50, %s7936_s13 }
 0x789   :  { %v7274_v53 = vpop.permute.xlu1 %7273 }
 0x78a   :  { %v7275_v54 = vunpack.i.l.bf16 %v7274_v53  ;;  %v7276_v62 = vunpack.i.h.bf16 %v7274_v53 }
 0x78b   :  { %7308 = vrot.lane.b32.xlu1 %v7292_v50, %s7948_s25  ;;  %7288 = vrot.lane.b32.xlu0 %v7292_v50, %s7941_s18 }
 0x78c   :  { %v1791_v57 = vsel %vm1788_vm5, %v1786_v56, %v7275_v54  ;;  %7298 = vrot.lane.b32.xlu2 %v7292_v50, %s7943_s20  ;;  %v1792_v63 = vsel %vm1788_vm5, %v1787_v33, %v7276_v62 }
 0x78d   :  { %v8488_v59 = vsel %vm801_vm14, %v1791_v57, 0.0  ;;  %v8499_v40 = vsel %vm801_vm14, %v1792_v63, 0.0 }
 0x78e   :  { %v7332_v31 = vpack.i.bf16 %v8472_v48, %v8488_v59  ;;  %v7347_v2 = vpack.i.bf16 %v8499_v40, %v8488_v59  ;;  %v7317_v3 = vpack.i.bf16 %v8488_v59, %v8469_v46  ;;  %v7357_v4 = vpack.i.bf16 %v8472_v48, %v8499_v40 }
 0x78f   :  { %v7367_v5 = vpack.i.bf16 %v8499_v40, %v8472_v48  ;;  %v7397_v7 = vpack.i.bf16 %v8469_v46, %v8499_v40  ;;  %v7452_v30 = vpack.i.bf16 %v8488_v59, %v8499_v40 }
 0x793   :  { %7333 = vrot.lane.b32.xlu1 %v7332_v31, %s7940_s17  ;;  %7303 = vrot.lane.b32.xlu0 %v7292_v50, %s7945_s22 }
 0x794   :  { %7313 = vrot.lane.b32.xlu2 %v7292_v50, %s7949_s26 }
 0x79b   :  { %7348 = vrot.lane.b32.xlu1 %v7347_v2, %s7941_s18  ;;  %7318 = vrot.lane.b32.xlu0 %v7317_v3, %s7942_s19 }
 0x79c   :  { %7323 = vrot.lane.b32.xlu2 %v7317_v3, %s7938_s15 }
 0x7a3   :  { %7358 = vrot.lane.b32.xlu1 %v7357_v4, %s7942_s19  ;;  %7328 = vrot.lane.b32.xlu0 %v7332_v31, %s7935_s12 }
 0x7a4   :  { %7338 = vrot.lane.b32.xlu2 %v7332_v31, %s7937_s14 }
 0x7ab   :  { %7368 = vrot.lane.b32.xlu1 %v7367_v5, %s7947_s24  ;;  %7343 = vrot.lane.b32.xlu0 %v7332_v31, %s7939_s16 }
 0x7ac   :  { %7353 = vrot.lane.b32.xlu2 %v7347_v2, %s7946_s23 }
 0x7b3   :  { %7388 = vrot.lane.b32.xlu1 %v7347_v2, %s7943_s20  ;;  %7363 = vrot.lane.b32.xlu0 %v7357_v4, %s7938_s15 }
 0x7b4   :  { %7373 = vrot.lane.b32.xlu2 %v7367_v5, %s7944_s21 }
 0x7bb   :  { %7398 = vrot.lane.b32.xlu1 %v7397_v7, %s7937_s14  ;;  %7383 = vrot.lane.b32.xlu0 %v7397_v7, %s7940_s17 }
 0x7bc   :  { %7378 = vrot.lane.b32.xlu2 %v7397_v7, %s7935_s12 }
 0x7c3   :  { %7418 = vrot.lane.b32.xlu1 %v7347_v2, %s7949_s26  ;;  %7413 = vrot.lane.b32.xlu0 %v7347_v2, %s7948_s25 }
 0x7c4   :  { %7393 = vrot.lane.b32.xlu2 %v7347_v2, %s7945_s22 }
 0x7cb   :  { %7433 = vrot.lane.b32.xlu1 %v7347_v2, %s7933_s10  ;;  %7423 = vrot.lane.b32.xlu0 %v7347_v2, %s7934_s11 }
 0x7cc   :  { %7403 = vrot.lane.b32.xlu2 %v7397_v7, %s7939_s16 }
 0x7d3   :  { %7438 = vrot.lane.b32.xlu1 %v7292_v50, %s7934_s11  ;;  %7428 = vrot.lane.b32.xlu0 %v7317_v3, %s7944_s21 }
 0x7d4   :  { %7408 = vrot.lane.b32.xlu2 %v7317_v3, %s7947_s24 }
 0x7db   :  { %7453 = vrot.lane.b32.xlu1 %v7452_v30, %s7932_s9  ;;  %7448 = vrot.lane.b32.xlu0 %v7452_v30, %s7936_s13 }
 0x7dc   :  { %7443 = vrot.lane.b32.xlu2 %v7292_v50, %s7933_s10 }
 0x7de   :  { %v7279_v1 = vpop.permute.xlu2 %7278 }
 0x7df   :  { %v7281_v19 = vunpack.i.h.bf16 %v7279_v1  ;;  %v7280_v24 = vunpack.i.l.bf16 %v7279_v1 }
 0x7e3   :  { %2206 = vperm.xlu1 %7065, %v1729_v8   ;;  %2201 = vperm.xlu0 %7064, %v1728_v9  }
 0x7e4   :  { %2196 = vperm.xlu2 %7066, %v1727_v11  }
 0x7e6   :  { %v8548_v13 = vpop.permute.xlu2 %7298 }
 0x7eb   :  { %2221 = vperm.xlu1 %7065, %v1732_v58   ;;  %2216 = vperm.xlu0 %7064, %v1731_v14  }
 0x7ec   :  { %2211 = vperm.xlu2 %7066, %v1730_v16  }
 0x7ee   :  { %v8553_v32 = vpop.permute.xlu2 %7313 }
 0x7f3   :  { %2236 = vperm.xlu1 %7065, %v1735_v60   ;;  %2231 = vperm.xlu0 %7064, %v1734_v17  }
 0x7f4   :  { %2226 = vperm.xlu2 %7066, %v1733_v55  }
 0x7f5   :  { %v7294_v10 = vpop.permute.xlu1 %7293  ;;  %v7284_v18 = vpop.permute.xlu0 %7283 }
 0x7f6   :  { %v7286_v20 = vunpack.i.h.bf16 %v7284_v18  ;;  %v7285_v22 = vunpack.i.l.bf16 %v7284_v18  ;;  %v7324_v43 = vpop.permute.xlu2 %7323  ;;  %v7296_v61 = vunpack.i.h.bf16 %v7294_v10  ;;  %v7295_v62 = vunpack.i.l.bf16 %v7294_v10 }
 0x7f7   :  { %v7326_v8 = vunpack.i.h.bf16 %v7324_v43  ;;  %v7325_v9 = vunpack.i.l.bf16 %v7324_v43 }
 0x7f8   :  { %v2038_v23 = vsel %vm1813_vm9, %v7280_v24, %v7285_v22  ;;  %v2039_v26 = vsel %vm1813_vm9, %v7281_v19, %v7286_v20  ;;  %v7301_v20 = vunpack.i.h.bf16 %v8548_v13  ;;  %v7300_v22 = vunpack.i.l.bf16 %v8548_v13 }
 0x7f9   :  { %v2190_v15 = vpack.c.bf16 %v2039_v26, %v2038_v23 }
 0x7fb   :  { %2615 = vperm.xlu1 %7065, %v1742_v27   ;;  %2246 = vperm.xlu0 %7064, %v1737_v29  }
 0x7fc   :  { %2241 = vperm.xlu2 %7066, %v1736_v25   ;;  %2393 = vmatpush.bf16.msrb.mxu2 %v2190_v15 }
 0x7fd   :  { %v8565_v34 = vpop.permute.xlu1 %7308  ;;  %v7289_v47 = vpop.permute.xlu0 %7288 }
 0x7fe   :  { %v8567_v35 = vpop.permute.xlu2 %7338  ;;  %v7291_v54 = vunpack.i.h.bf16 %v7289_v47  ;;  %v7290_v56 = vunpack.i.l.bf16 %v7289_v47 }
 0x800   :  { %v1899_v63 = vsel %vm1813_vm9, %v7291_v54, %v7296_v61  ;;  %v1898_v2 = vsel %vm1813_vm9, %v7290_v56, %v7295_v62 }
 0x801   :  { %v2095_v11 = vrot.slane %v1899_v63, 6  ;;  %v2094_v58 = vrot.slane %v1898_v2, 6 }
 0x803   :  { %2630 = vperm.xlu1 %7065, %v1745_v36   ;;  %2625 = vperm.xlu0 %7064, %v1744_v6   ;;  %v2096_v23 = vsel %vm309_vm8, %v2094_v58, %v2095_v11 }
 0x804   :  { %2620 = vperm.xlu2 %7066, %v1743_v28  }
 0x805   :  { %v8569_v37 = vpop.permute.xlu1 %7333  ;;  %v7304_v38 = vpop.permute.xlu0 %7303 }
 0x806   :  { %v7354_v39 = vpop.permute.xlu2 %7353  ;;  %v7306_v19 = vunpack.i.h.bf16 %v7304_v38  ;;  %v7305_v24 = vunpack.i.l.bf16 %v7304_v38 }
 0x807   :  { %v7356_v51 = vunpack.i.h.bf16 %v7354_v39  ;;  %v7355_v52 = vunpack.i.l.bf16 %v7354_v39 }
 0x808   :  { %v8602_v39 = vsel %vm1813_vm9, %v7300_v22, %v7305_v24  ;;  %v1871_v13 = vsel %vm1813_vm9, %v7301_v20, %v7306_v19 }
 0x80d   :  { %v7349_v41 = vpop.permute.xlu1 %7348  ;;  %v7319_v44 = vpop.permute.xlu0 %7318 }
 0x80e   :  { %v8571_v45 = vpop.permute.xlu2 %7373  ;;  %v7351_v0 = vunpack.i.h.bf16 %v7349_v41  ;;  %v7350_v12 = vunpack.i.l.bf16 %v7349_v41  ;;  %v7320_v3 = vunpack.i.l.bf16 %v7319_v44  ;;  %v7321_v7 = vunpack.i.h.bf16 %v7319_v44 }
 0x80f   :  { %v7375_v30 = vunpack.i.l.bf16 %v8571_v45 }
 0x810   :  { %v1900_v42 = vsel %vm1813_vm9, %v7350_v12, %v7355_v52  ;;  %v1901_v57 = vsel %vm1813_vm9, %v7351_v0, %v7356_v51  ;;  %v8592_v60 = vsel %vm1813_vm9, %v7320_v3, %v7325_v9  ;;  %v2012_v55 = vsel %vm1813_vm9, %v7321_v7, %v7326_v8 }
 0x811   :  { %v2097_v31 = vrot.slane %v1900_v42, 6  ;;  %v2099_v33 = vrot.slane %v1901_v57, 6  ;;  %v2142_v43 = vrot.slane %v8592_v60, 6  ;;  %v2144_v26 = vrot.slane %v2012_v55, 6 }
 0x812   :  { %v7316_v51 = vunpack.i.h.bf16 %v8553_v32  ;;  %v2078_v42 = vrot.slane %v8602_v39, 4  ;;  %v2079_v57 = vrot.slane %v1871_v13, 4  ;;  %v7315_v3 = vunpack.i.l.bf16 %v8553_v32 }
 0x813   :  { %v2100_v16 = vsel %vm309_vm8, %v2097_v31, %v2099_v33  ;;  %v2098_v18 = vsel %vm309_vm8, %v2095_v11, %v2097_v31  ;;  %v2145_v62 = vsel %vm309_vm8, %v2142_v43, %v2144_v26  ;;  %v7335_v9 = vunpack.i.l.bf16 %v8569_v37 }
 0x814   :  { %v2181_v47 = vpack.c.bf16 %v2098_v18, %v2096_v23  ;;  %v2080_v22 = vsel %vm307_vm7, %v2078_v42, %v2079_v57  ;;  %v7376_v39 = vunpack.i.h.bf16 %v8571_v45 }
 0x815   :  { %v8573_v50 = vpop.permute.xlu1 %7358  ;;  %v8575_v49 = vpop.permute.xlu0 %7328 }
 0x816   :  { %v8577_v53 = vpop.permute.xlu2 %7378  ;;  %v7360_v27 = vunpack.i.l.bf16 %v8573_v50  ;;  %v7361_v61 = vunpack.i.h.bf16 %v8573_v50  ;;  %v7330_v31 = vunpack.i.l.bf16 %v8575_v49  ;;  %v7311_v50 = vunpack.i.h.bf16 %v8565_v34 }
 0x817   :  { %v7381_v11 = vunpack.i.h.bf16 %v8577_v53  ;;  %v7331_v19 = vunpack.i.h.bf16 %v8575_v49  ;;  %v7341_v49 = vunpack.i.h.bf16 %v8567_v35 }
 0x818   :  { %v1984_v24 = vsel %vm1813_vm9, %v7330_v31, %v7335_v9 }
 0x81d   :  { %v8583_v4 = vpop.permute.xlu1 %7368  ;;  %v8585_v5 = vpop.permute.xlu0 %7343 }
 0x81e   :  { %v7370_v1 = vunpack.i.l.bf16 %v8583_v4  ;;  %v7394_v10 = vpop.permute.xlu2 %7393 }
 0x81f   :  { %v7396_v29 = vunpack.i.h.bf16 %v7394_v10  ;;  %v7395_v36 = vunpack.i.l.bf16 %v7394_v10 }
 0x820   :  { %v1926_v14 = vsel %vm1813_vm9, %v7370_v1, %v7375_v30 }
 0x821   :  { %v2182_v17 = vpack.c.bf16 %v1926_v14, %v2100_v16 }
 0x823   :  { %2355 = vmatpush.bf16.msrb.mxu1 %v2182_v17 }
 0x825   :  { %v7389_v25 = vpop.permute.xlu1 %7388  ;;  %v7364_v15 = vpop.permute.xlu0 %7363 }
 0x826   :  { %v7391_v6 = vunpack.i.h.bf16 %v7389_v25  ;;  %v7390_v28 = vunpack.i.l.bf16 %v7389_v25  ;;  %v7365_v38 = vunpack.i.l.bf16 %v7364_v15  ;;  %v7366_v0 = vunpack.i.h.bf16 %v7364_v15  ;;  %v7404_v30 = vpop.permute.xlu2 %7403 }
 0x827   :  { %2356 = vmatpush.bf16.msrb.mxu1 %v2181_v47  ;;  %v7405_v23 = vunpack.i.l.bf16 %v7404_v30  ;;  %v7406_v13 = vunpack.i.h.bf16 %v7404_v30 }
 0x828   :  { %v1872_v41 = vsel %vm1813_vm9, %v7390_v28, %v7395_v36  ;;  %v1873_v44 = vsel %vm1813_vm9, %v7391_v6, %v7396_v29  ;;  %v2013_v12 = vsel %vm1813_vm9, %v7360_v27, %v7365_v38  ;;  %v2010_v7 = vsel %vm1813_vm9, %v7361_v61, %v7366_v0 }
 0x829   :  { %v2081_v52 = vrot.slane %v1872_v41, 4  ;;  %v2083_v54 = vrot.slane %v1873_v44, 4  ;;  %v2146_v56 = vrot.slane %v2013_v12, 6  ;;  %v2141_v20 = vrot.slane %v2010_v7, 6 }
 0x82a   :  { %v7310_v29 = vunpack.i.l.bf16 %v8565_v34  ;;  %v7336_v36 = vunpack.i.h.bf16 %v8569_v37  ;;  %v2128_v6 = vrot.slane %v1984_v24, 4  ;;  %v7345_v38 = vunpack.i.l.bf16 %v8585_v5 }
 0x82b   :  { %v2084_v33 = vsel %vm307_vm7, %v2081_v52, %v2083_v54  ;;  %v2170_v63 = vsel %vm309_vm8, %v2083_v54, %v2094_v58  ;;  %v2147_v2 = vsel %vm309_vm8, %v2144_v26, %v2146_v56  ;;  %v2082_v17 = vsel %vm307_vm7, %v2079_v57, %v2081_v52 }
 0x82c   :  { %v2180_v1 = vpack.c.bf16 %v2170_v63, %v2084_v33  ;;  %v2189_v8 = vpack.c.bf16 %v2147_v2, %v2145_v62  ;;  %v7380_v58 = vunpack.i.l.bf16 %v8577_v53  ;;  %v2179_v53 = vpack.c.bf16 %v2082_v17, %v2080_v22 }
 0x82d   :  { %v7399_v14 = vpop.permute.xlu1 %7398  ;;  %v7384_v16 = vpop.permute.xlu0 %7383  ;;  %v2143_v41 = vsel %vm309_vm8, %v2141_v20, %v2142_v43  ;;  %v7340_v44 = vunpack.i.l.bf16 %v8567_v35  ;;  %v1982_v0 = vsel %vm1813_vm9, %v7331_v19, %v7336_v36  ;;  %v7346_v12 = vunpack.i.h.bf16 %v8585_v5 }
 0x82e   :  { %v7400_v55 = vunpack.i.l.bf16 %v7399_v14  ;;  %v7386_v10 = vunpack.i.h.bf16 %v7384_v16  ;;  %v7385_v18 = vunpack.i.l.bf16 %v7384_v16  ;;  %2357 = vmatpush.bf16.msrb.mxu1 %v2180_v1  ;;  %2394 = vmatpush.bf16.msrb.mxu2 %v2189_v8  ;;  %v7401_v25 = vunpack.i.h.bf16 %v7399_v14  ;;  %v8652_v30 = vpop.permute.xlu2 %7408 }
 0x82f   :  { %v1842_v35 = vsel %vm1813_vm9, %v7310_v29, %v7315_v3  ;;  %v1843_v5 = vsel %vm1813_vm9, %v7311_v50, %v7316_v51  ;;  %v2125_v63 = vrot.slane %v1982_v0, 4  ;;  %v1956_v2 = vsel %vm1813_vm9, %v7340_v44, %v7345_v38 }
 0x830   :  { %v1983_v26 = vsel %vm1813_vm9, %v7381_v11, %v7386_v10  ;;  %v1985_v27 = vsel %vm1813_vm9, %v7380_v58, %v7385_v18  ;;  %v1957_v28 = vsel %vm1813_vm9, %v7400_v55, %v7405_v23  ;;  %v1955_v52 = vsel %vm1813_vm9, %v7401_v25, %v7406_v13 }
 0x831   :  { %v2126_v15 = vrot.slane %v1983_v26, 4  ;;  %v2130_v47 = vrot.slane %v1985_v27, 4  ;;  %v2114_v54 = vrot.slane %v1957_v28, 2  ;;  %v2110_v7 = vrot.slane %v1955_v52, 2 }
 0x832   :  { %2358 = vmatpush.bf16.msrb.mxu1 %v2179_v53  ;;  %v1954_v32 = vsel %vm1813_vm9, %v7341_v49, %v7346_v12  ;;  %v2112_v51 = vrot.slane %v1956_v2, 2  ;;  %v2062_v50 = vrot.slane %v1842_v35, 2  ;;  %v2063_v17 = vrot.slane %v1843_v5, 2  ;;  %v6460_v5 = vld [vmem:[%s8673_s28] sm:$0xf] }
 0x833   :  { %v2173_v34 = vsel %vm309_vm8, %v2130_v47, %v2141_v20  ;;  %v2129_v61 = vsel %vm307_vm7, %v2126_v15, %v2128_v6  ;;  %v2131_v60 = vsel %vm307_vm7, %v2128_v6, %v2130_v47  ;;  %v2127_v16 = vsel %vm307_vm7, %v2125_v63, %v2126_v15 }
 0x834   :  { %v2188_v37 = vpack.c.bf16 %v2143_v41, %v2173_v34  ;;  %v2187_v9 = vpack.c.bf16 %v2131_v60, %v2129_v61  ;;  %v2172_v3 = vsel %vm307_vm7, %v2114_v54, %v2125_v63  ;;  %v2113_v19 = vsel %vm305_vm6, %v2110_v7, %v2112_v51  ;;  %v6930_v63 = vld [vmem:[%s8673_s28 + $0x8] sm:$0xf0] }
 0x835   :  { %v7419_v56 = vpop.permute.xlu1 %7418  ;;  %v7414_v57 = vpop.permute.xlu0 %7413  ;;  %v2186_v18 = vpack.c.bf16 %v2127_v16, %v2172_v3  ;;  %v2115_v24 = vsel %vm305_vm6, %v2112_v51, %v2114_v54  ;;  %v7371_v20 = vunpack.i.h.bf16 %v8583_v4  ;;  %v2109_v22 = vrot.slane %v1954_v32, 2  ;;  %v6929_v16 = vld [vmem:[%s8673_s28 + $0x4] sm:$0xf]  ;;  %v6462_v3 = vld [vmem:[%s8673_s28 + $0xc] sm:$0xf0] }
 0x836   :  { %v7421_v62 = vunpack.i.h.bf16 %v7419_v56  ;;  %v7420_v43 = vunpack.i.l.bf16 %v7419_v56  ;;  %v7416_v31 = vunpack.i.h.bf16 %v7414_v57  ;;  %v7415_v33 = vunpack.i.l.bf16 %v7414_v57  ;;  %2395 = vmatpush.bf16.msrb.mxu2 %v2188_v37  ;;  %v7444_v34 = vpop.permute.xlu2 %7443 }
 0x837   :  { %v2185_v47 = vpack.c.bf16 %v2115_v24, %v2113_v19  ;;  %v2111_v49 = vsel %vm305_vm6, %v2109_v22, %v2110_v7  ;;  %v1929_v44 = vsel %vm1813_vm9, %v7371_v20, %v7376_v39  ;;  %v7446_v54 = vunpack.i.h.bf16 %v7444_v34  ;;  %v6933_v39 = vld [vmem:[%s8673_s28 + $0x20] sm:$0xf0] }
 0x838   :  { %v1845_v1 = vsel %vm1813_vm9, %v7416_v31, %v7421_v62  ;;  %v1844_v8 = vsel %vm1813_vm9, %v7415_v33, %v7420_v43  ;;  %v2171_v0 = vsel %vm305_vm6, %v1929_v44, %v2109_v22  ;;  %v7445_v56 = vunpack.i.l.bf16 %v7444_v34 }
 0x839   :  { %v2067_v11 = vrot.slane %v1845_v1, 2  ;;  %v2065_v14 = vrot.slane %v1844_v8, 2  ;;  %v7411_v31 = vunpack.i.h.bf16 %v8652_v30  ;;  %v7410_v33 = vunpack.i.l.bf16 %v8652_v30 }
 0x83a   :  { %2396 = vmatpush.bf16.msrb.mxu2 %v2187_v9  ;;  %v6461_v51 = vor.u32 %v6930_v63, %v6460_v5 }
 0x83b   :  { %v2068_v58 = vsel %vm305_vm6, %v2065_v14, %v2067_v11  ;;  %v2169_v55 = vsel %vm307_vm7, %v2067_v11, %v2078_v42  ;;  %v2066_v27 = vsel %vm305_vm6, %v2063_v17, %v2065_v14  ;;  %v2064_v42 = vsel %vm305_vm6, %v2062_v50, %v2063_v17 }
 0x83c   :  { %v2178_v10 = vpack.c.bf16 %v2169_v55, %v2068_v58  ;;  %v2177_v36 = vpack.c.bf16 %v2066_v27, %v2064_v42  ;;  %v6465_v58 = vor.u32 %v6929_v16, %v6462_v3  ;;  %v6931_v27 = vld [vmem:[%s8673_s28 + $0x10] sm:$0xf0]  ;;  %v6932_v42 = vld [vmem:[%s8673_s28 + $0x1c] sm:$0xf]  ;;  %v1726_v16 = vld [vmem:[%s8673_s28 + $0x80] sm:$0xf] }
 0x83d   :  { %v7434_v23 = vpop.permute.xlu1 %7433  ;;  %v7424_v26 = vpop.permute.xlu0 %7423  ;;  %v2303_v3 = vunpack.c.l.b16 %v1726_v16 }
 0x83e   :  { %v7436_v53 = vunpack.i.h.bf16 %v7434_v23  ;;  %v7435_v29 = vunpack.i.l.bf16 %v7434_v23  ;;  %v7426_v25 = vunpack.i.h.bf16 %v7424_v26  ;;  %v7425_v15 = vunpack.i.l.bf16 %v7424_v26  ;;  %2359 = vmatpush.bf16.msrb.mxu1 %v2178_v10  ;;  %2397 = vmatpush.bf16.msrb.mxu2 %v2186_v18  ;;  %v6468_v26 = vld [vmem:[%s8673_s28 + $0x8] sm:$0xf] }
 0x840   :  { %v2056_v4 = vsel %vm1813_vm9, %v7425_v15, %v7435_v29  ;;  %v1817_v6 = vsel %vm1813_vm9, %v8499_v40, %v7426_v25  ;;  %v2057_v28 = vsel %vm1813_vm9, %v7426_v25, %v7436_v53  ;;  %v1816_v38 = vsel %vm1813_vm9, %v8488_v59, %v7425_v15  ;;  %v6472_v15 = vld [vmem:[%s8673_s28 + $0x18] sm:$0xf] }
 0x841   :  { %v2159_v45 = vrot.slane %v2056_v4, 2  ;;  %v2168_v13 = vsel %vm305_vm6, %v1817_v6, %v2062_v50  ;;  %v2161_v41 = vrot.slane %v2057_v28, 2  ;;  %v2184_v40 = vpack.c.bf16 %v2111_v49, %v2171_v0  ;;  %v6934_v6 = vld [vmem:[%s8673_s28 + $0x28] sm:$0xf0]  ;;  %v6492_v0 = vld [vmem:[%s8673_s28 + $0x38] sm:$0xf] }
 0x842   :  { %2360 = vmatpush.bf16.msrb.mxu1 %v2177_v36  ;;  %2398 = vmatpush.bf16.msrb.mxu2 %v2185_v47  ;;  %v2176_v37 = vpack.c.bf16 %v2168_v13, %v1816_v38  ;;  %v6469_v25 = vor.u32 %v6931_v27, %v6468_v26  ;;  %v6474_v47 = vld [vmem:[%s8673_s28 + $0x24] sm:$0xf0]  ;;  %v6473_v49 = vor.u32 %v6933_v39, %v6472_v15  ;;  %v6480_v36 = vld [vmem:[%s8673_s28 + $0x20] sm:$0xf]  ;;  %v6936_v38 = vld [vmem:[%s8673_s28 + $0x38] sm:$0xf0] }
 0x843   :  { %v2162_v12 = vsel %vm305_vm6, %v2159_v45, %v2161_v41  ;;  %v6477_v4 = vor.u32 %v6932_v42, %v6474_v47  ;;  %v6481_v28 = vor.u32 %v6934_v6, %v6480_v36  ;;  %v6935_v13 = vld [vmem:[%s8673_s28 + $0x34] sm:$0xf] }
 0x844   :  { %v2193_v52 = vpack.c.bf16 %v2161_v41, %v2162_v12  ;;  %v6486_v41 = vld [vmem:[%s8673_s28 + $0x3c] sm:$0xf0]  ;;  %v6937_v12 = vld [vmem:[%s8673_s28 + $0x40] sm:$0xf0] }
 0x845   :  { %v7439_v59 = vpop.permute.xlu1 %7438  ;;  %v7429_v57 = vpop.permute.xlu0 %7428  ;;  %v6489_v44 = vor.u32 %v6935_v13, %v6486_v41 }
 0x846   :  { %v7441_v61 = vunpack.i.h.bf16 %v7439_v59  ;;  %v7440_v60 = vunpack.i.l.bf16 %v7439_v59  ;;  %v7431_v62 = vunpack.i.h.bf16 %v7429_v57  ;;  %v7430_v43 = vunpack.i.l.bf16 %v7429_v57  ;;  %2361 = vmatpush.bf16.msrb.mxu1 %v2176_v37  ;;  %2399 = vmatpush.bf16.msrb.mxu2 %v2184_v40  ;;  %v6496_v40 = vld [vmem:[%s8673_s28 + $0x48] sm:$0xf] }
 0x847   :  { %v2353_v35 = vsel %vm305_vm6, %v2193_v52, 0  ;;  %v6493_v37 = vor.u32 %v6937_v12, %v6492_v0  ;;  %v6939_v52 = vld [vmem:[%s8673_s28 + $0x50] sm:$0xf0] }
 0x848   :  { %v2054_v2 = vsel %vm1813_vm9, %v7440_v60, %v7445_v56  ;;  %v2055_v7 = vsel %vm1813_vm9, %v7441_v61, %v7446_v54  ;;  %2436 = vmatpush.bf16.msrb.mxu0 %v2353_v35  ;;  %v1814_v1 = vsel %vm1813_vm9, %v8472_v48, %v7440_v60  ;;  %v1815_v8 = vsel %vm1813_vm9, %v8469_v46, %v7441_v61  ;;  %v6938_v54 = vld [vmem:[%s8673_s28 + $0x4c] sm:$0xf]  ;;  %v6498_v56 = vld [vmem:[%s8673_s28 + $0x54] sm:$0xf0]  ;;  %v6504_v61 = vld [vmem:[%s8673_s28 + $0x50] sm:$0xf] }
 0x849   :  { %v2156_v9 = vrot.slane %v2054_v2, 2  ;;  %v2157_v11 = vrot.slane %v2055_v7, 2  ;;  %v2175_v14 = vpack.c.bf16 %v1815_v8, %v1814_v1  ;;  %v1927_v30 = vsel %vm1813_vm9, %v7410_v33, %v7430_v43  ;;  %v6940_v60 = vld [vmem:[%s8673_s28 + $0x58] sm:$0xf0]  ;;  %v6508_v43 = vld [vmem:[%s8673_s28 + $0x60] sm:$0xf] }
 0x84a   :  { %v1928_v32 = vsel %vm1813_vm9, %v7411_v31, %v7431_v62  ;;  %v6497_v59 = vor.u32 %v6939_v52, %v6496_v40  ;;  %v6501_v57 = vor.u32 %v6938_v54, %v6498_v56  ;;  %v6505_v62 = vor.u32 %v6940_v60, %v6504_v61  ;;  %v6942_v31 = vld [vmem:[%s8673_s28 + $0x68] sm:$0xf0]  ;;  %v6941_v33 = vld [vmem:[%s8673_s28 + $0x64] sm:$0xf]  ;;  %v6510_v35 = vld [vmem:[%s8673_s28 + $0x6c] sm:$0xf0] }
 0x84b   :  { %2362 = vmatpush.bf16.msrb.mxu1 %v2175_v14  ;;  %v2183_v50 = vpack.c.bf16 %v1928_v32, %v1927_v30  ;;  %v2158_v17 = vsel %vm305_vm6, %v2156_v9, %v2157_v11  ;;  %v2160_v48 = vsel %vm305_vm6, %v2157_v11, %v2159_v45  ;;  %v6484_v45 = vld [vmem:[%s8673_s28 + $0x30] sm:$0xf]  ;;  %v6509_v5 = vor.u32 %v6942_v31, %v6508_v43  ;;  %v6516_v2 = vld [vmem:[%s8673_s28 + $0x68] sm:$0xf]  ;;  %v6943_v7 = vld [vmem:[%s8673_s28 + $0x70] sm:$0xf0] }
 0x84c   :  { %v2192_v46 = vpack.c.bf16 %v2160_v48, %v2158_v17  ;;  %v6485_v34 = vor.u32 %v6936_v38, %v6484_v45  ;;  %v6513_v63 = vor.u32 %v6941_v33, %v6510_v35  ;;  %v6517_v1 = vor.u32 %v6943_v7, %v6516_v2  ;;  %v1725_v8 = vld [vmem:[%s8673_s28 + $0x78] sm:$0xff]  ;;  %s7973_s28 = smov 26  }
 0x84d   :  { %2400 = vmatpush.bf16.msrb.mxu2 %v2183_v50  ;;  %v7454_v55 = vpop.permute.xlu1 %7453  ;;  %v7449_v10 = vpop.permute.xlu0 %7448  ;;  %v2302_v11 = vunpack.c.h.b16 %v1725_v8  ;;  %v2321_v32 = vpack.c.b16 %v2303_v3, %v2303_v3  ;;  %v6947_v50 = vld [vmem:[%s6239_s1] sm:$0xff]  ;;  %s7966_s1 = smov 19  }
 0x84e   :  { %v7456_v18 = vunpack.i.h.bf16 %v7454_v55  ;;  %v7455_v19 = vunpack.i.l.bf16 %v7454_v55  ;;  %v7451_v24 = vunpack.i.h.bf16 %v7449_v10  ;;  %v7450_v20 = vunpack.i.l.bf16 %v7449_v10  ;;  %2363 = vmatmul.bf16.vlgmr.msrb.gmra.mxu1 %v6461_v51  ;;  %2437 = vmatpush.bf16.msrb.mxu0 %v2192_v46  ;;  %v6946_v51 = vld [vmem:[%s6238_s3] sm:$0xff]  ;;  %v2197_v55 = vpop.permute.xlu2 %2196  ;;  %s6252_s29 = sld [smem:[%s10814_s0 + %s7966_s1]]  }
 0x84f   :  { %v2320_v30 = vpack.c.b16 %v2302_v11, %v2302_v11  ;;  %2521 = vmatpush.bf16.msra.mxu3 %v6946_v51  ;;  %2565 = vmatpush.bf16.msra.mxu1 %v6947_v50  ;;  %s6256_s1 = sld [smem:[%s10814_s0 + %s7972_s5]]   ;;  %s10831_s5 = smov 32  }
 0x850   :  { %2401 = vmatmul.bf16.vlgmr.msrb.gmra.mxu2 %v6465_v58  ;;  %v2040_v22 = vsel %vm1813_vm9, %v7451_v24, %v7456_v18  ;;  %v2041_v23 = vsel %vm1813_vm9, %v7450_v20, %v7455_v19 }
 0x851   :  { %v2174_v53 = vsel %vm305_vm6, %v2041_v23, %v2156_v9  ;;  %v2301_v9 = vunpack.c.l.b16 %v1725_v8 }
 0x852   :  { %v2191_v29 = vpack.c.bf16 %v2174_v53, %v2040_v22 }
 0x853   :  { %v2319_v14 = vpack.c.b16 %v2301_v9, %v2301_v9 }
 0x854   :  { %2438 = vmatpush.bf16.msrb.mxu0 %v2191_v29 }
 0x855   :  { %v2202_v19 = vpop.permute.xlu0 %2201 }
 0x856   :  { %v2212_v6 = vpop.permute.xlu2 %2211 }
 0x857   :  { %6518 = vmatmul.msk.bf16.vlgmr.msrb.gmra.mxu0 %vm1347_vm2, %v6469_v25 }
 0x85d   :  { %v2217_v56 = vpop.permute.xlu0 %2216 }
 0x85e   :  { %2368 = vmatmul.bf16.gmra.mxu1 %v6473_v49  ;;  %v2207_v49 = vpop.permute.xlu1 %2206  ;;  %v2227_v11 = vpop.permute.xlu2 %2226 }
 0x860   :  { %2406 = vmatmul.bf16.gmra.mxu2 %v6477_v4 }
 0x865   :  { %v2232_v16 = vpop.permute.xlu0 %2231 }
 0x866   :  { %v2222_v61 = vpop.permute.xlu1 %2221 }
 0x867   :  { %6519 = vmatmul.msk.bf16.gmra.mxu0 %vm1347_vm2, %v6481_v28 }
 0x86e   :  { %2373 = vmatmul.bf16.gmra.mxu1 %v6485_v34 }
 0x870   :  { %2411 = vmatmul.bf16.gmra.mxu2 %v6489_v44 }
 0x877   :  { %6520 = vmatmul.msk.bf16.gmra.mxu0 %vm1347_vm2, %v6493_v37 }
 0x87e   :  { %2378 = vmatmul.bf16.gmra.mxu1 %v6497_v59 }
 0x880   :  { %2416 = vmatmul.bf16.gmra.mxu2 %v6501_v57 }
 0x887   :  { %6521 = vmatmul.msk.bf16.gmra.mxu0 %vm1347_vm2, %v6505_v62 }
 0x88e   :  { %2383 = vmatmul.bf16.gmra.mxu1 %v6509_v5 }
 0x890   :  { %2421 = vmatmul.bf16.gmra.mxu2 %v6513_v63 }
 0x897   :  { %6522 = vmatmul.msk.bf16.gmra.mxu0 %vm1347_vm2, %v6517_v1 }
 0x89e   :  { %2388 = vmatmul.bf16.gmra.mxu1 %v2319_v14 }
 0x8a0   :  { %2426 = vmatmul.bf16.gmra.mxu2 %v2320_v30 }
 0x8a7   :  { %6523 = vmatmul.msk.bf16.gmra.mxu0 %vm1347_vm2, %v2321_v32 }
 0x8cb   :  { %v2364_v17 = vpop.f32.mrf.mxu1 }
 0x8cc   :  { %v2365_v10 = vadd.f32 %v2364_v17, %v2197_v55 }
 0x8d3   :  { %v2402_v48 = vpop.f32.mrf.mxu2  ;;  %v2366_v58 = vpop.f32.mrf.mxu1 }
 0x8d4   :  { %v2440_v46 = vpop.f32.mrf.mxu0  ;;  %v2403_v18 = vadd.f32 %v2402_v48, %v2365_v10  ;;  %v2367_v24 = vadd.f32 %v2366_v58, %v2202_v19 }
 0x8d6   :  { %v2441_v23 = vadd.f32 %v2440_v46, %v2403_v18 }
 0x8d8   :  { %v2469_v29 = vmax.f32 %v2441_v23, 0.0 }
 0x8db   :  { %v2404_v20 = vpop.f32.mrf.mxu2  ;;  %v2369_v22 = vpop.f32.mrf.mxu1 }
 0x8dc   :  { %v2405_v26 = vadd.f32 %v2404_v20, %v2367_v24  ;;  %v2442_v27 = vpop.f32.mrf.mxu0  ;;  %v2370_v4 = vadd.f32 %v2369_v22, %v2207_v49  ;;  %v2237_v20 = vpop.permute.xlu1 %2236 }
 0x8de   :  { %v2443_v53 = vadd.f32 %v2442_v27, %v2405_v26  ;;  %v2242_v26 = vpop.permute.xlu2 %2241 }
 0x8e0   :  { %v2470_v25 = vmax.f32 %v2443_v53, 0.0 }
 0x8e2   :  { %v2484_v15 = vpack.c.bf16 %v2470_v25, %v2469_v29 }
 0x8e3   :  { %v2407_v39 = vpop.f32.mrf.mxu2  ;;  %v2371_v42 = vpop.f32.mrf.mxu1 }
 0x8e4   :  { %6528 = vmatmul.msk.bf16.vlgmr.msra.gmra.mxu3 %vm826_vm15, %v2484_v15  ;;  %6538 = vmatmul.msk.bf16.vlgmr.msra.gmra.mxu1 %vm826_vm15, %v2484_v15  ;;  %v2445_v47 = vpop.f32.mrf.mxu0  ;;  %v2408_v36 = vadd.f32 %v2407_v39, %v2370_v4  ;;  %v2372_v28 = vadd.f32 %v2371_v42, %v2212_v6  ;;  %v2247_v4 = vpop.permute.xlu0 %2246 }
 0x8e6   :  { %v2446_v13 = vadd.f32 %v2445_v47, %v2408_v36 }
 0x8e8   :  { %v2471_v0 = vmax.f32 %v2446_v13, 0.0 }
 0x8eb   :  { %v2409_v45 = vpop.f32.mrf.mxu2  ;;  %v2374_v38 = vpop.f32.mrf.mxu1 }
 0x8ec   :  { %v2410_v41 = vadd.f32 %v2409_v45, %v2372_v28  ;;  %v2447_v34 = vpop.f32.mrf.mxu0  ;;  %v2375_v59 = vadd.f32 %v2374_v38, %v2217_v56 }
 0x8ee   :  { %v2448_v44 = vadd.f32 %v2447_v34, %v2410_v41 }
 0x8f0   :  { %v2472_v12 = vmax.f32 %v2448_v44, 0.0 }
 0x8f2   :  { %v2485_v37 = vpack.c.bf16 %v2472_v12, %v2471_v0 }
 0x8f3   :  { %v2412_v40 = vpop.f32.mrf.mxu2  ;;  %v2376_v52 = vpop.f32.mrf.mxu1 }
 0x8f4   :  { %6529 = vmatmul.msk.bf16.gmra.mxu3 %vm826_vm15, %v2485_v37  ;;  %6539 = vmatmul.msk.bf16.gmra.mxu1 %vm826_vm15, %v2485_v37  ;;  %v2450_v54 = vpop.f32.mrf.mxu0  ;;  %v2413_v57 = vadd.f32 %v2412_v40, %v2375_v59  ;;  %v2377_v60 = vadd.f32 %v2376_v52, %v2222_v61 }
 0x8f6   :  { %v2451_v31 = vadd.f32 %v2450_v54, %v2413_v57 }
 0x8f8   :  { %v2473_v63 = vmax.f32 %v2451_v31, 0.0 }
 0x8fb   :  { %v2414_v62 = vpop.f32.mrf.mxu2  ;;  %v2379_v43 = vpop.f32.mrf.mxu1 }
 0x8fc   :  { %v2415_v33 = vadd.f32 %v2414_v62, %v2377_v60  ;;  %v2452_v35 = vpop.f32.mrf.mxu0  ;;  %v2380_v14 = vadd.f32 %v2379_v43, %v2227_v11 }
 0x8fe   :  { %v2453_v5 = vadd.f32 %v2452_v35, %v2415_v33 }
 0x900   :  { %v2474_v2 = vmax.f32 %v2453_v5, 0.0 }
 0x902   :  { %v2486_v7 = vpack.c.bf16 %v2474_v2, %v2473_v63 }
 0x903   :  { %v2417_v1 = vpop.f32.mrf.mxu2  ;;  %v2381_v8 = vpop.f32.mrf.mxu1 }
 0x904   :  { %6530 = vmatmul.msk.bf16.gmra.mxu3 %vm826_vm15, %v2486_v7  ;;  %6540 = vmatmul.msk.bf16.gmra.mxu1 %vm826_vm15, %v2486_v7  ;;  %v2455_v9 = vpop.f32.mrf.mxu0  ;;  %v2418_v30 = vadd.f32 %v2417_v1, %v2380_v14  ;;  %v2382_v3 = vadd.f32 %v2381_v8, %v2232_v16 }
 0x906   :  { %v2456_v50 = vadd.f32 %v2455_v9, %v2418_v30 }
 0x908   :  { %v2475_v46 = vmax.f32 %v2456_v50, 0.0 }
 0x90b   :  { %v2419_v32 = vpop.f32.mrf.mxu2  ;;  %v2384_v51 = vpop.f32.mrf.mxu1 }
 0x90c   :  { %v2420_v17 = vadd.f32 %v2419_v32, %v2382_v3  ;;  %v2457_v48 = vpop.f32.mrf.mxu0  ;;  %v2385_v22 = vadd.f32 %v2384_v51, %v2237_v20 }
 0x90e   :  { %v2458_v58 = vadd.f32 %v2457_v48, %v2420_v17 }
 0x910   :  { %v2476_v55 = vmax.f32 %v2458_v58, 0.0 }
 0x912   :  { %v2487_v10 = vpack.c.bf16 %v2476_v55, %v2475_v46 }
 0x913   :  { %v2422_v18 = vpop.f32.mrf.mxu2  ;;  %v2386_v19 = vpop.f32.mrf.mxu1 }
 0x914   :  { %6531 = vmatmul.msk.bf16.gmra.mxu3 %vm826_vm15, %v2487_v10  ;;  %6541 = vmatmul.msk.bf16.gmra.mxu1 %vm826_vm15, %v2487_v10  ;;  %v2460_v24 = vpop.f32.mrf.mxu0  ;;  %v2423_v23 = vadd.f32 %v2422_v18, %v2385_v22  ;;  %v2387_v27 = vadd.f32 %v2386_v19, %v2242_v26 }
 0x916   :  { %v2461_v25 = vadd.f32 %v2460_v24, %v2423_v23 }
 0x918   :  { %v2477_v47 = vmax.f32 %v2461_v25, 0.0 }
 0x91b   :  { %v2424_v53 = vpop.f32.mrf.mxu2  ;;  %v2389_v29 = vpop.f32.mrf.mxu1 }
 0x91c   :  { %v2425_v15 = vadd.f32 %v2424_v53, %v2387_v27  ;;  %v2462_v39 = vpop.f32.mrf.mxu0  ;;  %v2390_v45 = vadd.f32 %v2389_v29, %v2247_v4  ;;  %v6944_v27 = vld [vmem:[%s6252_s29] sm:$0xff]  ;;  %v6550_v53 = vld [vmem:[%s6252_s29 + $0x8] sm:$0xf]  ;;  %v6945_v29 = vld [vmem:[%s6252_s29 + $0x8] sm:$0x70] }
 0x91d   :  { %v6551_v25 = vor.u32 %v6945_v29, %v6550_v53 }
 0x91e   :  { %v2463_v42 = vadd.f32 %v2462_v39, %v2425_v15  ;;  %v2616_v39 = vpop.permute.xlu1 %2615 }
 0x920   :  { %v2478_v49 = vmax.f32 %v2463_v42, 0.0 }
 0x922   :  { %v2488_v36 = vpack.c.bf16 %v2478_v49, %v2477_v47  ;;  %v2621_v47 = vpop.permute.xlu2 %2620 }
 0x923   :  { %v2427_v6 = vpop.f32.mrf.mxu2  ;;  %v2391_v28 = vpop.f32.mrf.mxu1 }
 0x924   :  { %6532 = vmatmul.msk.bf16.gmra.mxu3 %vm826_vm15, %v2488_v36  ;;  %6542 = vmatmul.msk.bf16.gmra.mxu1 %vm826_vm15, %v2488_v36  ;;  %v2465_v38 = vpop.f32.mrf.mxu0  ;;  %v2428_v13 = vadd.f32 %v2427_v6, %v2390_v45 }
 0x926   :  { %v2466_v41 = vadd.f32 %v2465_v38, %v2428_v13  ;;  %v2626_v38 = vpop.permute.xlu0 %2625 }
 0x928   :  { %v2479_v0 = vmax.f32 %v2466_v41, 0.0  ;;  %v2631_v41 = vpop.permute.xlu1 %2630 }
 0x92a   :  { %v2489_v12 = vpack.c.bf16 %v2479_v0, %v2479_v0 }
 0x92b   :  { %v2429_v34 = vpop.f32.mrf.mxu2 }
 0x92c   :  { %v2467_v44 = vpop.f32.mrf.mxu0 }
 0x934   :  { %6533 = vmatmul.msk.bf16.gmra.mxu3 %vm826_vm15, %v2489_v12  ;;  %6543 = vmatmul.msk.bf16.gmra.mxu1 %vm826_vm15, %v2489_v12 }
 0x961   :  { %v2567_v37 = vpop.f32.mrf.mxu1 }
 0x967   :  { %v2523_v40 = vpop.f32.mrf.mxu3 }
 0x968   :  { %v2596_v52 = vmax.f32 %v2523_v40, %v2567_v37 }
 0x969   :  { %v2569_v54 = vpop.f32.mrf.mxu1 }
 0x96f   :  { %v2525_v56 = vpop.f32.mrf.mxu3 }
 0x970   :  { %v2597_v22 = vmax.f32 %v2525_v56, %v2569_v54 }
 0x971   :  { %v2572_v59 = vpop.f32.mrf.mxu1 }
 0x972   :  { %v2607_v26 = vpack.c.bf16 %v2597_v22, %v2596_v52 }
 0x977   :  { %v2528_v57 = vpop.f32.mrf.mxu3 }
 0x978   :  { %v2598_v61 = vmax.f32 %v2528_v57, %v2572_v59 }
 0x979   :  { %v2574_v60 = vpop.f32.mrf.mxu1 }
 0x97f   :  { %v2530_v62 = vpop.f32.mrf.mxu3 }
 0x980   :  { %v2599_v24 = vmax.f32 %v2530_v62, %v2574_v60 }
 0x981   :  { %v2577_v43 = vpop.f32.mrf.mxu1 }
 0x982   :  { %v2608_v23 = vpack.c.bf16 %v2599_v24, %v2598_v61 }
 0x987   :  { %v2533_v31 = vpop.f32.mrf.mxu3 }
 0x988   :  { %v2600_v19 = vmax.f32 %v2533_v31, %v2577_v43 }
 0x989   :  { %v2579_v33 = vpop.f32.mrf.mxu1 }
 0x98f   :  { %v2535_v35 = vpop.f32.mrf.mxu3 }
 0x990   :  { %v2601_v10 = vmax.f32 %v2535_v35, %v2579_v33 }
 0x991   :  { %v2582_v5 = vpop.f32.mrf.mxu1 }
 0x992   :  { %v2609_v20 = vpack.c.bf16 %v2601_v10, %v2600_v19 }
 0x997   :  { %v2538_v63 = vpop.f32.mrf.mxu3 }
 0x998   :  { %v2602_v55 = vmax.f32 %v2538_v63, %v2582_v5 }
 0x999   :  { %v2584_v2 = vpop.f32.mrf.mxu1 }
 0x99f   :  { %v2540_v7 = vpop.f32.mrf.mxu3 }
 0x9a0   :  { %v2603_v48 = vmax.f32 %v2540_v7, %v2584_v2 }
 0x9a1   :  { %v2587_v1 = vpop.f32.mrf.mxu1 }
 0x9a2   :  { %v2610_v18 = vpack.c.bf16 %v2603_v48, %v2602_v55 }
 0x9a7   :  { %v2543_v8 = vpop.f32.mrf.mxu3 }
 0x9a8   :  { %v2604_v17 = vmax.f32 %v2543_v8, %v2587_v1 }
 0x9a9   :  { %v2589_v9 = vpop.f32.mrf.mxu1 }
 0x9af   :  { %v2545_v11 = vpop.f32.mrf.mxu3 }
 0x9b0   :  { %v2605_v51 = vmax.f32 %v2545_v11, %v2589_v9 }
 0x9b1   :  { %v2592_v14 = vpop.f32.mrf.mxu1 }
 0x9b2   :  { %v2611_v58 = vpack.c.bf16 %v2605_v51, %v2604_v17 }
 0x9b7   :  { %v2548_v30 = vpop.f32.mrf.mxu3 }
 0x9b8   :  { %v2606_v16 = vmax.f32 %v2548_v30, %v2592_v14 }
 0x9b9   :  { %v2594_v3 = vpop.f32.mrf.mxu1 }
 0x9ba   :  { %v2612_v32 = vpack.c.bf16 %v2606_v16, %v2606_v16 }
 0x9bc   :  { %v2650_v50 = vsel %vm307_vm7, %v2612_v32, 0 }
 0x9bd   :  { %2654 = vmatpush.bf16.msra.mxu2 %v2650_v50 }
 0x9bf   :  { %v2550_v46 = vpop.f32.mrf.mxu3 }
 0x9c1   :  { %2655 = vmatpush.bf16.msra.mxu2 %v2611_v58 }
 0x9c5   :  { %2656 = vmatpush.bf16.msra.mxu2 %v2610_v18 }
 0x9c9   :  { %2657 = vmatpush.bf16.msra.mxu2 %v2609_v20 }
 0x9cd   :  { %2658 = vmatpush.bf16.msra.mxu2 %v2608_v23 }
 0x9d1   :  { %2659 = vmatpush.bf16.msra.mxu2 %v2607_v26 }
 0x9d4   :  { %6552 = vmatmul.msk.bf16.vlgmr.msra.gmra.mxu2 %vm685_vm11, %v6944_v27 }
 0x9e4   :  { %6553 = vmatmul.msk.bf16.gmra.mxu2 %vm685_vm11, %v6551_v25 }
 0xa57   :  { %v2661_v15 = vpop.f32.mrf.mxu2 }
 0xa58   :  { %v2662_v42 = vadd.f32 %v2661_v15, %v2616_v39 }
 0xa5a   :  { %v2671_v36 = vmax.f32 %v2662_v42, 0.0 }
 0xa5f   :  { %v2663_v49 = vpop.f32.mrf.mxu2 }
 0xa60   :  { %v2664_v4 = vadd.f32 %v2663_v49, %v2621_v47 }
 0xa62   :  { %v2672_v6 = vmax.f32 %v2664_v4, 0.0 }
 0xa64   :  { %v7462_v28 = vpack.i.bf16 %v2672_v6, %v2671_v36 }
 0xa66   :  { %7463 = vrot.lane.b32.xlu1 %v7462_v28, %s7930_s7  ;;  %7458 = vrot.lane.b32.xlu2 %v7462_v28, %s7931_s8 }
 0xa67   :  { %v2666_v45 = vpop.f32.mrf.mxu2 }
 0xa68   :  { %v2667_v13 = vadd.f32 %v2666_v45, %v2626_v38 }
 0xa6a   :  { %v2673_v0 = vmax.f32 %v2667_v13, 0.0 }
 0xa6f   :  { %v2668_v34 = vpop.f32.mrf.mxu2 }
 0xa70   :  { %v2669_v44 = vadd.f32 %v2668_v34, %v2631_v41 }
 0xa72   :  { %v2674_v12 = vmax.f32 %v2669_v44, 0.0 }
 0xa74   :  { %v7472_v37 = vpack.i.bf16 %v2674_v12, %v2673_v0 }
 0xa76   :  { %7468 = vrot.lane.b32.xlu0 %v7472_v37, %s7931_s8  ;;  %7473 = vrot.lane.b32.xlu2 %v7472_v37, %s7930_s7  ;;  %s7967_s7 = smov 22   ;;  %s7974_s8 = smov 27  }
 0xac0   :  { %v7459_v40 = vpop.permute.xlu2 %7458 }
 0xac1   :  { %v7461_v52 = vunpack.i.h.bf16 %v7459_v40  ;;  %v7460_v54 = vunpack.i.l.bf16 %v7459_v40 }
 0xac3   :  { %v2745_v56 = vsel %vm209_vm1, 0.0, %v7461_v52  ;;  %v2744_v59 = vsel %vm209_vm1, 0.0, %v7460_v54 }
 0xac4   :  { %v2749_v57 = vsel %vm1813_vm9, %v2745_v56, 0.0  ;;  %v2748_v61 = vsel %vm1813_vm9, %v2744_v59, 0.0 }
 0xac5   :  { %v2754_v31 = vsel %vm2752_vm10, %v2749_v57, 0.0  ;;  %v2753_v33 = vsel %vm2752_vm10, %v2748_v61, 0.0 }
 0xad0   :  { %v7474_v8 = vpop.permute.xlu2 %7473 }
 0xad1   :  { %v7475_v16 = vunpack.i.l.bf16 %v7474_v8  ;;  %v7476_v58 = vunpack.i.h.bf16 %v7474_v8 }
 0xad8   :  { %v7464_v60 = vpop.permute.xlu1 %7463 }
 0xad9   :  { %v7466_v62 = vunpack.i.h.bf16 %v7464_v60  ;;  %v7465_v43 = vunpack.i.l.bf16 %v7464_v60 }
 0xadb   :  { %v2757_v35 = vsel %vm1783_vm4, %v2753_v33, %v7465_v43  ;;  %v2758_v5 = vsel %vm1783_vm4, %v2754_v31, %v7466_v62 }
 0xadc   :  { %v8776_v63 = vsel %vm1788_vm5, %v2757_v35, 0.0  ;;  %v8779_v2 = vsel %vm1788_vm5, %v2758_v5, 0.0 }
 0xadd   :  { %v7492_v7 = vpack.i.bf16 %v8779_v2, %v8776_v63 }
 0xadf   :  { %7493 = vrot.lane.b32.xlu2 %v7492_v7, %s7946_s23  ;;  %7483 = vrot.lane.b32.xlu1 %v7492_v7, %s7932_s9 }
 0xae0   :  { %7478 = vrot.lane.b32.xlu0 %v7492_v7, %s7936_s13 }
 0xae7   :  { %7513 = vrot.lane.b32.xlu2 %v7492_v7, %s7949_s26  ;;  %7488 = vrot.lane.b32.xlu1 %v7492_v7, %s7941_s18 }
 0xae8   :  { %7498 = vrot.lane.b32.xlu0 %v7492_v7, %s7943_s20  ;;  %v7469_v1 = vpop.permute.xlu0 %7468 }
 0xae9   :  { %v7471_v9 = vunpack.i.h.bf16 %v7469_v1  ;;  %v7470_v11 = vunpack.i.l.bf16 %v7469_v1 }
 0xaeb   :  { %v2747_v14 = vsel %vm209_vm1, 0.0, %v7471_v9  ;;  %v2746_v30 = vsel %vm209_vm1, 0.0, %v7470_v11 }
 0xaec   :  { %v2751_v3 = vsel %vm1813_vm9, %v2747_v14, 0.0  ;;  %v2750_v32 = vsel %vm1813_vm9, %v2746_v30, 0.0 }
 0xaed   :  { %v2755_v51 = vsel %vm2752_vm10, %v2750_v32, 0.0  ;;  %v2756_v17 = vsel %vm2752_vm10, %v2751_v3, 0.0 }
 0xaee   :  { %v2759_v50 = vsel %vm1783_vm4, %v2755_v51, %v7475_v16  ;;  %v2760_v10 = vsel %vm1783_vm4, %v2756_v17, %v7476_v58 }
 0xaef   :  { %v8797_v48 = vsel %vm1788_vm5, %v2759_v50, 0.0  ;;  %7503 = vrot.lane.b32.xlu1 %v7492_v7, %s7945_s22  ;;  %v8808_v18 = vsel %vm1788_vm5, %v2760_v10, 0.0 }
 0xaf0   :  { %v7532_v46 = vpack.i.bf16 %v8776_v63, %v8797_v48  ;;  %v7522_v55 = vpack.i.bf16 %v8797_v48, %v8779_v2  ;;  %v7547_v19 = vpack.i.bf16 %v8808_v18, %v8797_v48  ;;  %v7557_v24 = vpack.i.bf16 %v8776_v63, %v8808_v18 }
 0xaf1   :  { %v7567_v20 = vpack.i.bf16 %v8808_v18, %v8776_v63  ;;  %v7577_v22 = vpack.i.bf16 %v8779_v2, %v8808_v18  ;;  %v7647_v23 = vpack.i.bf16 %v8797_v48, %v8808_v18 }
 0xaf2   :  { %7533 = vrot.lane.b32.xlu2 %v7532_v46, %s7940_s17  ;;  %7523 = vrot.lane.b32.xlu0 %v7522_v55, %s7938_s15 }
 0xaf7   :  { %7508 = vrot.lane.b32.xlu1 %v7492_v7, %s7948_s25 }
 0xafa   :  { %7548 = vrot.lane.b32.xlu2 %v7547_v19, %s7941_s18  ;;  %7538 = vrot.lane.b32.xlu0 %v7532_v46, %s7937_s14 }
 0xaff   :  { %7518 = vrot.lane.b32.xlu1 %v7522_v55, %s7942_s19 }
 0xb02   :  { %7558 = vrot.lane.b32.xlu2 %v7557_v24, %s7942_s19  ;;  %7553 = vrot.lane.b32.xlu0 %v7547_v19, %s7946_s23  ;;  %s7970_s19 = smov 7  }
 0xb03   :  { %s6240_s23 = sld [smem:[%s10814_s0 + %s7970_s19]]  }
 0xb07   :  { %7528 = vrot.lane.b32.xlu1 %v7532_v46, %s7935_s12 }
 0xb0a   :  { %7568 = vrot.lane.b32.xlu2 %v7567_v20, %s7947_s24  ;;  %7573 = vrot.lane.b32.xlu0 %v7567_v20, %s7944_s21 }
 0xb0f   :  { %7543 = vrot.lane.b32.xlu1 %v7532_v46, %s7939_s16 }
 0xb12   :  { %7588 = vrot.lane.b32.xlu2 %v7547_v19, %s7943_s20  ;;  %7578 = vrot.lane.b32.xlu0 %v7577_v22, %s7935_s12 }
 0xb17   :  { %7563 = vrot.lane.b32.xlu1 %v7557_v24, %s7938_s15  ;;  %s7969_s15 = smov 21  }
 0xb18   :  { %s9010_s18 = sld [smem:[%s10814_s0 + %s7969_s15]]  }
 0xb1a   :  { %7598 = vrot.lane.b32.xlu2 %v7577_v22, %s7937_s14  ;;  %7593 = vrot.lane.b32.xlu0 %v7547_v19, %s7945_s22  ;;  %s8845_s14 = sld [smem:[%s10814_s0 + %s7967_s7]]  }
 0xb1b   :  { %s6259_s7 = sld [smem:[%s10814_s0 + %s7973_s28]]   ;;  %s7979_s28 = smov 29  }
 0xb1f   :  { %7583 = vrot.lane.b32.xlu1 %v7577_v22, %s7940_s17 }
 0xb20   :  { %v2698_v27 = vld [vmem:[%s8845_s14 + $0x8] sm:$0xff]  ;;  %v2699_v53 = vld [vmem:[%s8845_s14 + $0x10] sm:$0xff]  ;;  %v2697_v29 = vld [vmem:[%s8845_s14] sm:$0xff] }
 0xb21   :  { %v2701_v15 = vld [vmem:[%s8845_s14 + $0x20] sm:$0xff]  ;;  %v2702_v39 = vld [vmem:[%s8845_s14 + $0x28] sm:$0xff]  ;;  %v2700_v42 = vld [vmem:[%s8845_s14 + $0x18] sm:$0xff] }
 0xb22   :  { %7613 = vrot.lane.b32.xlu2 %v7547_v19, %s7949_s26  ;;  %7603 = vrot.lane.b32.xlu0 %v7577_v22, %s7939_s16  ;;  %v2704_v49 = vld [vmem:[%s8845_s14 + $0x38] sm:$0xff]  ;;  %v2705_v4 = vld [vmem:[%s8845_s14 + $0x40] sm:$0xff] }
 0xb23   :  { %v2703_v36 = vld [vmem:[%s8845_s14 + $0x30] sm:$0xff]  ;;  %v2706_v52 = vld [vmem:[%s8845_s14 + $0x48] sm:$0xff] }
 0xb24   :  { %v2707_v34 = vld [vmem:[%s8845_s14 + $0x50] sm:$0xff] }
 0xb27   :  { %7608 = vrot.lane.b32.xlu1 %v7547_v19, %s7948_s25 }
 0xb2a   :  { %7618 = vrot.lane.b32.xlu2 %v7547_v19, %s7934_s11  ;;  %7623 = vrot.lane.b32.xlu0 %v7547_v19, %s7933_s10 }
 0xb2f   :  { %7633 = vrot.lane.b32.xlu1 %v7492_v7, %s7933_s10  ;;  %s7975_s10 = smov 28  }
 0xb30   :  { %s9153_s15 = sld [smem:[%s10814_s0 + %s7975_s10]]   ;;  %s7981_s10 = smov 35  }
 0xb32   :  { %7638 = vrot.lane.b32.xlu2 %v7522_v55, %s7947_s24  ;;  %7628 = vrot.lane.b32.xlu0 %v7492_v7, %s7934_s11  ;;  %s7971_s24 = smov 8  }
 0xb33   :  { %s6241_s3 = sld [smem:[%s10814_s0 + %s7971_s24]]   ;;  %s7978_s24 = smov 31  }
 0xb37   :  { %7648 = vrot.lane.b32.xlu1 %v7647_v23, %s7936_s13 }
 0xb39   :  { %v8850_v26 = vpop.permute.xlu2 %7493 }
 0xb3a   :  { %7653 = vrot.lane.b32.xlu2 %v7647_v23, %s7932_s9  ;;  %7643 = vrot.lane.b32.xlu0 %v7522_v55, %s7944_s21  ;;  %s7968_s9 = smov 24   ;;  %v7496_v50 = vunpack.i.h.bf16 %v8850_v26  ;;  %v7495_v17 = vunpack.i.l.bf16 %v8850_v26 }
 0xb3b   :  { %s6257_s13 = sld [smem:[%s10814_s0 + %s7968_s9]]  }
 0xb3c   :  { %s9137_s9 = sld [smem:[%s10814_s0 + %s7974_s8]]   ;;  %s7980_s8 = smov 34  }
 0xb3f   :  { %3168 = vperm.xlu1 %7065, %v2698_v27  }
 0xb41   :  { %v8857_v25 = vpop.permute.xlu2 %7513  ;;  %v2714_v40 = vld [vmem:[%s6257_s13 + $0x10] sm:$0xff]  ;;  %v2712_v59 = vld [vmem:[%s6257_s13] sm:$0xff]  ;;  %v2713_v57 = vld [vmem:[%s6257_s13 + $0x8] sm:$0xff] }
 0xb42   :  { %3173 = vperm.xlu2 %7066, %v2699_v53   ;;  %3163 = vperm.xlu0 %7064, %v2697_v29   ;;  %v2715_v61 = vld [vmem:[%s6257_s13 + $0x18] sm:$0x3f] }
 0xb47   :  { %3183 = vperm.xlu1 %7065, %v2701_v15  }
 0xb4a   :  { %3188 = vperm.xlu2 %7066, %v2702_v39   ;;  %3178 = vperm.xlu0 %7064, %v2700_v42  }
 0xb4c   :  { %v8862_v47 = vpop.permute.xlu2 %7533 }
 0xb4f   :  { %3198 = vperm.xlu1 %7065, %v2704_v49  }
 0xb51   :  { %v7484_v6 = vpop.permute.xlu1 %7483 }
 0xb52   :  { %v7486_v28 = vunpack.i.h.bf16 %v7484_v6  ;;  %v7485_v45 = vunpack.i.l.bf16 %v7484_v6  ;;  %v7479_v38 = vpop.permute.xlu0 %7478  ;;  %3203 = vperm.xlu2 %7066, %v2705_v4   ;;  %3193 = vperm.xlu0 %7064, %v2703_v36  }
 0xb53   :  { %v7481_v13 = vunpack.i.h.bf16 %v7479_v38  ;;  %v7480_v41 = vunpack.i.l.bf16 %v7479_v38 }
 0xb54   :  { %v7549_v12 = vpop.permute.xlu2 %7548 }
 0xb55   :  { %v3006_v44 = vsel %vm209_vm1, %v7481_v13, %v7486_v28  ;;  %v3005_v0 = vsel %vm209_vm1, %v7480_v41, %v7485_v45  ;;  %v7551_v11 = vunpack.i.h.bf16 %v7549_v12  ;;  %v7550_v14 = vunpack.i.l.bf16 %v7549_v12 }
 0xb56   :  { %v3157_v37 = vpack.c.bf16 %v3006_v44, %v3005_v0 }
 0xb57   :  { %3213 = vperm.xlu1 %7065, %v2707_v34  }
 0xb58   :  { %3360 = vmatpush.bf16.msrb.mxu2 %v3157_v37 }
 0xb59   :  { %v7489_v54 = vpop.permute.xlu1 %7488 }
 0xb5a   :  { %3584 = vperm.xlu2 %7066, %v2714_v40   ;;  %3208 = vperm.xlu0 %7064, %v2706_v52   ;;  %v7499_v56 = vpop.permute.xlu0 %7498  ;;  %v7491_v30 = vunpack.i.h.bf16 %v7489_v54  ;;  %v7490_v16 = vunpack.i.l.bf16 %v7489_v54 }
 0xb5b   :  { %v7501_v4 = vunpack.i.h.bf16 %v7499_v56  ;;  %v7500_v36 = vunpack.i.l.bf16 %v7499_v56 }
 0xb5c   :  { %v8874_v60 = vpop.permute.xlu2 %7558  ;;  %v2866_v10 = vsel %vm209_vm1, %v7491_v30, %v7496_v50  ;;  %v8894_v19 = vsel %vm209_vm1, %v7490_v16, %v7495_v17 }
 0xb5d   :  { %v3062_v23 = vrot.slane %v2866_v10, 6  ;;  %v3061_v27 = vrot.slane %v8894_v19, 6 }
 0xb5f   :  { %3574 = vperm.xlu1 %7065, %v2712_v59   ;;  %v3063_v38 = vsel %vm309_vm8, %v3061_v27, %v3062_v23 }
 0xb61   :  { %v7504_v62 = vpop.permute.xlu1 %7503 }
 0xb62   :  { %3579 = vperm.xlu2 %7066, %v2713_v57   ;;  %3589 = vperm.xlu0 %7064, %v2715_v61   ;;  %v7506_v39 = vunpack.i.h.bf16 %v7504_v62  ;;  %v7505_v42 = vunpack.i.l.bf16 %v7504_v62  ;;  %v7516_v61 = vunpack.i.h.bf16 %v8857_v25  ;;  %v7515_v62 = vunpack.i.l.bf16 %v8857_v25 }
 0xb64   :  { %v7524_v43 = vpop.permute.xlu0 %7523  ;;  %v8878_v33 = vpop.permute.xlu2 %7568  ;;  %v8912_v41 = vsel %vm209_vm1, %v7500_v36, %v7505_v42  ;;  %v2838_v34 = vsel %vm209_vm1, %v7501_v4, %v7506_v39 }
 0xb65   :  { %v7570_v24 = vunpack.i.l.bf16 %v8878_v33  ;;  %v7526_v44 = vunpack.i.h.bf16 %v7524_v43  ;;  %v7525_v0 = vunpack.i.l.bf16 %v7524_v43  ;;  %v3045_v54 = vrot.slane %v8912_v41, 4 }
 0xb66   :  { %v3046_v56 = vrot.slane %v2838_v34, 4  ;;  %v7560_v43 = vunpack.i.l.bf16 %v8874_v60  ;;  %v7571_v41 = vunpack.i.h.bf16 %v8878_v33 }
 0xb69   :  { %v8876_v31 = vpop.permute.xlu1 %7508 }
 0xb6a   :  { %v7511_v12 = vunpack.i.h.bf16 %v8876_v31  ;;  %v7510_v59 = vunpack.i.l.bf16 %v8876_v31 }
 0xb6c   :  { %v8880_v35 = vpop.permute.xlu0 %7538  ;;  %v8882_v7 = vpop.permute.xlu2 %7588  ;;  %v8932_v30 = vsel %vm209_vm1, %v7511_v12, %v7516_v61  ;;  %v8936_v25 = vsel %vm209_vm1, %v7510_v59, %v7515_v62 }
 0xb6d   :  { %v7591_v17 = vunpack.i.h.bf16 %v8882_v7  ;;  %v3030_v10 = vrot.slane %v8932_v30, 2  ;;  %v7540_v42 = vunpack.i.l.bf16 %v8880_v35 }
 0xb71   :  { %v7519_v5 = vpop.permute.xlu1 %7518 }
 0xb72   :  { %v7521_v6 = vunpack.i.h.bf16 %v7519_v5  ;;  %v7520_v28 = vunpack.i.l.bf16 %v7519_v5 }
 0xb74   :  { %v7554_v1 = vpop.permute.xlu0 %7553  ;;  %v8897_v20 = vpop.permute.xlu2 %7598  ;;  %v8917_v37 = vsel %vm209_vm1, %v7520_v28, %v7525_v0  ;;  %v2979_v40 = vsel %vm209_vm1, %v7521_v6, %v7526_v44 }
 0xb75   :  { %v7556_v8 = vunpack.i.h.bf16 %v7554_v1  ;;  %v7555_v9 = vunpack.i.l.bf16 %v7554_v1  ;;  %v7536_v1 = vunpack.i.h.bf16 %v8862_v47  ;;  %v7601_v61 = vunpack.i.h.bf16 %v8897_v20 }
 0xb76   :  { %v7600_v62 = vunpack.i.l.bf16 %v8897_v20 }
 0xb77   :  { %v2868_v3 = vsel %vm209_vm1, %v7551_v11, %v7556_v8  ;;  %v2867_v32 = vsel %vm209_vm1, %v7550_v14, %v7555_v9  ;;  %v7535_v8 = vunpack.i.l.bf16 %v8862_v47  ;;  %v3109_v9 = vrot.slane %v8917_v37, 6 }
 0xb78   :  { %v3066_v58 = vrot.slane %v2868_v3, 6  ;;  %v3064_v46 = vrot.slane %v2867_v32, 6  ;;  %v3111_v11 = vrot.slane %v2979_v40, 6  ;;  %v7561_v14 = vunpack.i.h.bf16 %v8874_v60 }
 0xb79   :  { %v8886_v51 = vpop.permute.xlu1 %7528  ;;  %v3047_v47 = vsel %vm307_vm7, %v3045_v54, %v3046_v56  ;;  %v7590_v60 = vunpack.i.l.bf16 %v8882_v7 }
 0xb7a   :  { %v3067_v53 = vsel %vm309_vm8, %v3064_v46, %v3066_v58  ;;  %v3065_v49 = vsel %vm309_vm8, %v3062_v23, %v3064_v46  ;;  %v7531_v32 = vunpack.i.h.bf16 %v8886_v51 }
 0xb7b   :  { %v3148_v13 = vpack.c.bf16 %v3065_v49, %v3063_v38 }
 0xb7c   :  { %v8890_v55 = vpop.permute.xlu0 %7573  ;;  %v8920_v52 = vpop.permute.xlu2 %7613  ;;  %v8953_v7 = vsel %vm209_vm1, %v7531_v32, %v7536_v1 }
 0xb7d   :  { %v7575_v22 = vunpack.i.l.bf16 %v8890_v55  ;;  %v3092_v1 = vrot.slane %v8953_v7, 4 }
 0xb7f   :  { %v2893_v26 = vsel %vm209_vm1, %v7570_v24, %v7575_v22  ;;  %v7530_v24 = vunpack.i.l.bf16 %v8886_v51  ;;  %v3112_v22 = vsel %vm309_vm8, %v3109_v9, %v3111_v11 }
 0xb80   :  { %v3149_v15 = vpack.c.bf16 %v2893_v26, %v3067_v53 }
 0xb81   :  { %v8903_v29 = vpop.permute.xlu1 %7543  ;;  %v2951_v34 = vsel %vm209_vm1, %v7530_v24, %v7535_v8 }
 0xb82   :  { %3322 = vmatpush.bf16.msra.mxu0 %v3149_v15  ;;  %v3095_v8 = vrot.slane %v2951_v34, 4 }
 0xb84   :  { %v8906_v45 = vpop.permute.xlu0 %7578  ;;  %v8955_v51 = vpop.permute.xlu2 %7618 }
 0xb85   :  { %v7581_v6 = vunpack.i.h.bf16 %v8906_v45  ;;  %v7580_v28 = vunpack.i.l.bf16 %v8906_v45 }
 0xb86   :  { %3323 = vmatpush.bf16.msra.mxu0 %v3148_v13 }
 0xb89   :  { %v7564_v57 = vpop.permute.xlu1 %7563 }
 0xb8a   :  { %v7565_v5 = vunpack.i.l.bf16 %v7564_v57  ;;  %v7566_v31 = vunpack.i.h.bf16 %v7564_v57 }
 0xb8c   :  { %v2980_v16 = vsel %vm209_vm1, %v7560_v43, %v7565_v5  ;;  %v7594_v3 = vpop.permute.xlu0 %7593  ;;  %v2977_v26 = vsel %vm209_vm1, %v7561_v14, %v7566_v31 }
 0xb8d   :  { %v3113_v50 = vrot.slane %v2980_v16, 6  ;;  %v7596_v58 = vunpack.i.h.bf16 %v7594_v3  ;;  %v7595_v46 = vunpack.i.l.bf16 %v7594_v3  ;;  %v3108_v44 = vrot.slane %v2977_v26, 6 }
 0xb8f   :  { %v3114_v23 = vsel %vm309_vm8, %v3111_v11, %v3113_v50  ;;  %v2840_v53 = vsel %vm209_vm1, %v7591_v17, %v7596_v58  ;;  %v2839_v15 = vsel %vm209_vm1, %v7590_v60, %v7595_v46  ;;  %v3110_v31 = vsel %vm309_vm8, %v3108_v44, %v3109_v9 }
 0xb90   :  { %v3156_v39 = vpack.c.bf16 %v3114_v23, %v3112_v22  ;;  %v3050_v49 = vrot.slane %v2840_v53, 4  ;;  %v3048_v4 = vrot.slane %v2839_v15, 4  ;;  %v7616_v50 = vunpack.i.h.bf16 %v8920_v52 }
 0xb91   :  { %v7584_v36 = vpop.permute.xlu1 %7583  ;;  %v7615_v17 = vunpack.i.l.bf16 %v8920_v52  ;;  %v7621_v9 = vunpack.i.h.bf16 %v8955_v51  ;;  %v7541_v23 = vunpack.i.h.bf16 %v8880_v35  ;;  %v7620_v53 = vunpack.i.l.bf16 %v8955_v51  ;;  %v8984_v52 = vpop.permute.xlu2 %7638 }
 0xb92   :  { %v7586_v38 = vunpack.i.h.bf16 %v7584_v36  ;;  %v7585_v13 = vunpack.i.l.bf16 %v7584_v36  ;;  %3361 = vmatpush.bf16.msrb.mxu2 %v3156_v39  ;;  %v3051_v0 = vsel %vm307_vm7, %v3048_v4, %v3050_v49  ;;  %v3137_v12 = vsel %vm309_vm8, %v3050_v49, %v3061_v27 }
 0xb93   :  { %v3147_v57 = vpack.c.bf16 %v3137_v12, %v3051_v0  ;;  %v3049_v45 = vsel %vm307_vm7, %v3046_v56, %v3048_v4  ;;  %v7545_v27 = vunpack.i.l.bf16 %v8903_v29  ;;  %v3029_v35 = vrot.slane %v8936_v25, 2 }
 0xb94   :  { %v2950_v37 = vsel %vm209_vm1, %v7581_v6, %v7586_v38  ;;  %v2952_v40 = vsel %vm209_vm1, %v7580_v28, %v7585_v13  ;;  %v7604_v59 = vpop.permute.xlu0 %7603  ;;  %v3146_v14 = vpack.c.bf16 %v3049_v45, %v3047_v47  ;;  %v7546_v47 = vunpack.i.h.bf16 %v8903_v29 }
 0xb95   :  { %v3093_v43 = vrot.slane %v2950_v37, 4  ;;  %v3097_v5 = vrot.slane %v2952_v40, 4  ;;  %v7606_v19 = vunpack.i.h.bf16 %v7604_v59  ;;  %v7605_v11 = vunpack.i.l.bf16 %v7604_v59  ;;  %3324 = vmatpush.bf16.msra.mxu0 %v3147_v57 }
 0xb96   :  { %v2923_v26 = vsel %vm209_vm1, %v7540_v42, %v7545_v27  ;;  %v2921_v42 = vsel %vm209_vm1, %v7541_v23, %v7546_v47  ;;  %v2784_v13 = vsel %vm209_vm1, %v8808_v18, %v7621_v9  ;;  %v2783_v33 = vsel %vm209_vm1, %v8797_v48, %v7620_v53 }
 0xb97   :  { %v3140_v16 = vsel %vm309_vm8, %v3097_v5, %v3108_v44  ;;  %v2924_v56 = vsel %vm209_vm1, %v7600_v62, %v7605_v11  ;;  %v3096_v20 = vsel %vm307_vm7, %v3093_v43, %v3095_v8  ;;  %v3098_v32 = vsel %vm307_vm7, %v3095_v8, %v3097_v5 }
 0xb98   :  { %v3155_v3 = vpack.c.bf16 %v3110_v31, %v3140_v16  ;;  %v2922_v60 = vsel %vm209_vm1, %v7601_v61, %v7606_v19  ;;  %v3081_v58 = vrot.slane %v2924_v56, 2  ;;  %v3154_v15 = vpack.c.bf16 %v3098_v32, %v3096_v20 }
 0xb99   :  { %v7609_v46 = vpop.permute.xlu1 %7608  ;;  %3325 = vmatpush.bf16.msra.mxu0 %v3146_v14  ;;  %v3077_v39 = vrot.slane %v2922_v60, 2  ;;  %v3079_v51 = vrot.slane %v2923_v26, 2  ;;  %v3094_v12 = vsel %vm307_vm7, %v3092_v1, %v3093_v43  ;;  %v3076_v43 = vrot.slane %v2921_v42, 2  ;;  %v7654_v30 = vpop.permute.xlu2 %7653 }
 0xb9a   :  { %v7611_v24 = vunpack.i.h.bf16 %v7609_v46  ;;  %v7610_v22 = vunpack.i.l.bf16 %v7609_v46  ;;  %3362 = vmatpush.bf16.msrb.mxu2 %v3155_v3  ;;  %v3139_v4 = vsel %vm307_vm7, %v3081_v58, %v3092_v1  ;;  %v3031_v5 = vsel %vm305_vm6, %v3029_v35, %v3030_v10 }
 0xb9b   :  { %v3153_v25 = vpack.c.bf16 %v3094_v12, %v3139_v4  ;;  %v3080_v45 = vsel %vm305_vm6, %v3077_v39, %v3079_v51  ;;  %v3082_v61 = vsel %vm305_vm6, %v3079_v51, %v3081_v58  ;;  %v3078_v14 = vsel %vm305_vm6, %v3076_v43, %v3077_v39 }
 0xb9c   :  { %v2812_v7 = vsel %vm209_vm1, %v7611_v24, %v7616_v50  ;;  %v2811_v29 = vsel %vm209_vm1, %v7610_v22, %v7615_v17  ;;  %v7624_v49 = vpop.permute.xlu0 %7623  ;;  %v3152_v11 = vpack.c.bf16 %v3082_v61, %v3080_v45  ;;  %v7656_v47 = vunpack.i.h.bf16 %v7654_v30  ;;  %v6576_v61 = vld [vmem:[%s9010_s18 + $0x20] sm:$0xf] }
 0xb9d   :  { %v3034_v36 = vrot.slane %v2812_v7, 2  ;;  %v3032_v6 = vrot.slane %v2811_v29, 2  ;;  %v7626_v28 = vunpack.i.h.bf16 %v7624_v49  ;;  %v7625_v38 = vunpack.i.l.bf16 %v7624_v49  ;;  %v6556_v7 = vld [vmem:[%s9010_s18] sm:$0xf]  ;;  %v6949_v29 = vld [vmem:[%s9010_s18 + $0x8] sm:$0xf0] }
 0xb9e   :  { %3363 = vmatpush.bf16.msrb.mxu2 %v3154_v15  ;;  %v7641_v49 = vunpack.i.h.bf16 %v8984_v52  ;;  %v6557_v42 = vor.u32 %v6949_v29, %v6556_v7  ;;  %vm3836_vm8 = vcmask 1046528  }
 0xb9f   :  { %v3023_v34 = vsel %vm209_vm1, %v7620_v53, %v7625_v38  ;;  %v3035_v44 = vsel %vm305_vm6, %v3032_v6, %v3034_v36  ;;  %v3136_v0 = vsel %vm307_vm7, %v3034_v36, %v3045_v54  ;;  %v3024_v59 = vsel %vm209_vm1, %v7621_v9, %v7626_v28 }
 0xba0   :  { %v3126_v37 = vrot.slane %v3023_v34, 2  ;;  %v3145_v40 = vpack.c.bf16 %v3136_v0, %v3035_v44  ;;  %v3033_v18 = vsel %vm305_vm6, %v3030_v10, %v3032_v6  ;;  %v3128_v62 = vrot.slane %v3024_v59, 2  ;;  %v6950_v34 = vld [vmem:[%s9010_s18 + $0x10] sm:$0xf0]  ;;  %v6558_v0 = vld [vmem:[%s9010_s18 + $0xc] sm:$0xf0] }
 0xba1   :  { %v7634_v57 = vpop.permute.xlu1 %7633  ;;  %v7576_v54 = vunpack.i.h.bf16 %v8890_v55  ;;  %v3135_v55 = vsel %vm305_vm6, %v2784_v13, %v3029_v35  ;;  %v3144_v19 = vpack.c.bf16 %v3033_v18, %v3031_v5  ;;  %v7655_v9 = vunpack.i.l.bf16 %v7654_v30  ;;  %v6564_v13 = vld [vmem:[%s9010_s18 + $0x8] sm:$0xf]  ;;  %v6952_v18 = vld [vmem:[%s9010_s18 + $0x20] sm:$0xf0]  ;;  %v6600_v30 = vld [vmem:[%s9010_s18 + $0x50] sm:$0xf] }
 0xba2   :  { %3326 = vmatpush.bf16.msra.mxu0 %v3145_v40  ;;  %3364 = vmatpush.bf16.msrb.mxu2 %v3153_v25  ;;  %v3129_v1 = vsel %vm305_vm6, %v3126_v37, %v3128_v62  ;;  %v7636_v31 = vunpack.i.h.bf16 %v7634_v57  ;;  %v7635_v16 = vunpack.i.l.bf16 %v7634_v57  ;;  %v3143_v58 = vpack.c.bf16 %v3135_v55, %v2783_v33  ;;  %v6568_v57 = vld [vmem:[%s9010_s18 + $0x18] sm:$0xf]  ;;  %v6955_v33 = vld [vmem:[%s9010_s18 + $0x38] sm:$0xf0] }
 0xba3   :  { %v3160_v27 = vpack.c.bf16 %v3128_v62, %v3129_v1  ;;  %v2896_v20 = vsel %vm209_vm1, %v7571_v41, %v7576_v54  ;;  %v6565_v25 = vor.u32 %v6950_v34, %v6564_v13  ;;  %v6569_v45 = vor.u32 %v6952_v18, %v6568_v57  ;;  %v6953_v62 = vld [vmem:[%s9010_s18 + $0x28] sm:$0xf0]  ;;  %v6951_v41 = vld [vmem:[%s9010_s18 + $0x1c] sm:$0xf]  ;;  %v6570_v54 = vld [vmem:[%s9010_s18 + $0x24] sm:$0xf0] }
 0xba4   :  { %v7629_v8 = vpop.permute.xlu0 %7628  ;;  %v3138_v50 = vsel %vm305_vm6, %v2896_v20, %v3076_v43  ;;  %v6577_v43 = vor.u32 %v6953_v62, %v6576_v61  ;;  %v6573_v5 = vor.u32 %v6951_v41, %v6570_v54  ;;  %v6580_v1 = vld [vmem:[%s9010_s18 + $0x30] sm:$0xf]  ;;  %v6957_v20 = vld [vmem:[%s9010_s18 + $0x4c] sm:$0xf]  ;;  %v3174_v54 = vpop.permute.xlu2 %3173 }
 0xba5   :  { %v7631_v56 = vunpack.i.h.bf16 %v7629_v8  ;;  %v7630_v3 = vunpack.i.l.bf16 %v7629_v8  ;;  %v3320_v10 = vsel %vm305_vm6, %v3160_v27, 0  ;;  %v3151_v46 = vpack.c.bf16 %v3078_v14, %v3138_v50  ;;  %v6588_v8 = vld [vmem:[%s9010_s18 + $0x38] sm:$0xf]  ;;  %v6582_v27 = vld [vmem:[%s9010_s18 + $0x3c] sm:$0xf0] }
 0xba6   :  { %3327 = vmatpush.bf16.msra.mxu0 %v3144_v19  ;;  %3365 = vmatpush.bf16.msrb.mxu2 %v3152_v11  ;;  %v6581_v55 = vor.u32 %v6955_v33, %v6580_v1  ;;  %v6956_v19 = vld [vmem:[%s9010_s18 + $0x40] sm:$0xf0]  ;;  %v6954_v11 = vld [vmem:[%s9010_s18 + $0x34] sm:$0xf] }
 0xba7   :  { %v3022_v48 = vsel %vm209_vm1, %v7631_v56, %v7636_v31  ;;  %v3021_v32 = vsel %vm209_vm1, %v7630_v3, %v7635_v16  ;;  %3403 = vmatpush.bf16.msrb.mxu3 %v3320_v10  ;;  %v2781_v22 = vsel %vm209_vm1, %v8776_v63, %v7630_v3  ;;  %v2782_v23 = vsel %vm209_vm1, %v8779_v2, %v7631_v56  ;;  %v6592_v16 = vld [vmem:[%s9010_s18 + $0x48] sm:$0xf]  ;;  %v6958_v56 = vld [vmem:[%s9010_s18 + $0x50] sm:$0xf0]  ;;  %v6959_v10 = vld [vmem:[%s9010_s18 + $0x58] sm:$0xf0] }
 0xba8   :  { %v3124_v17 = vrot.slane %v3022_v48, 2  ;;  %v3123_v60 = vrot.slane %v3021_v32, 2  ;;  %v7640_v63 = vunpack.i.l.bf16 %v8984_v52  ;;  %v3142_v6 = vpack.c.bf16 %v2782_v23, %v2781_v22  ;;  %v6948_v52 = vld [vmem:[%s9010_s18 + $0x4] sm:$0xf]  ;;  %v6594_v48 = vld [vmem:[%s9010_s18 + $0x54] sm:$0xf0] }
 0xba9   :  { %v7649_v24 = vpop.permute.xlu1 %7648  ;;  %v6561_v59 = vor.u32 %v6948_v52, %v6558_v0  ;;  %v6589_v14 = vor.u32 %v6956_v19, %v6588_v8  ;;  %v6585_v31 = vor.u32 %v6954_v11, %v6582_v27  ;;  %v6593_v3 = vor.u32 %v6958_v56, %v6592_v16 }
 0xbaa   :  { %v7651_v26 = vunpack.i.h.bf16 %v7649_v24  ;;  %v7650_v53 = vunpack.i.l.bf16 %v7649_v24  ;;  %3328 = vmatpush.bf16.msra.mxu0 %v3143_v58  ;;  %3366 = vmatpush.bf16.msrb.mxu2 %v3151_v46  ;;  %v3125_v15 = vsel %vm305_vm6, %v3123_v60, %v3124_v17  ;;  %v3127_v39 = vsel %vm305_vm6, %v3124_v17, %v3126_v37  ;;  %v6604_v17 = vld [vmem:[%s9010_s18 + $0x60] sm:$0xf]  ;;  %v6612_v46 = vld [vmem:[%s9010_s18 + $0x68] sm:$0xf]  ;;  %v6606_v24 = vld [vmem:[%s9010_s18 + $0x6c] sm:$0xf0] }
 0xbab   :  { %v3159_v4 = vpack.c.bf16 %v3127_v39, %v3125_v15  ;;  %v6601_v32 = vor.u32 %v6959_v10, %v6600_v30  ;;  %v6597_v50 = vor.u32 %v6957_v20, %v6594_v48  ;;  %v2696_v15 = vld [vmem:[%s9010_s18 + $0x80] sm:$0xf] }
 0xbac   :  { %v3008_v2 = vsel %vm209_vm1, %v7650_v53, %v7655_v9  ;;  %v7644_v36 = vpop.permute.xlu0 %7643  ;;  %v3007_v28 = vsel %vm209_vm1, %v7651_v26, %v7656_v47  ;;  %v6962_v47 = vld [vmem:[%s9010_s18 + $0x70] sm:$0xf0]  ;;  %v6960_v9 = vld [vmem:[%s9010_s18 + $0x64] sm:$0xf]  ;;  %v2695_v26 = vld [vmem:[%s9010_s18 + $0x78] sm:$0xff]  ;;  %v3270_v39 = vunpack.c.l.b16 %v2696_v15 }
 0xbad   :  { %v7646_v38 = vunpack.i.h.bf16 %v7644_v36  ;;  %v7645_v35 = vunpack.i.l.bf16 %v7644_v36  ;;  %3404 = vmatpush.bf16.msrb.mxu3 %v3159_v4  ;;  %v3141_v51 = vsel %vm305_vm6, %v3008_v2, %v3123_v60  ;;  %v6961_v60 = vld [vmem:[%s9010_s18 + $0x68] sm:$0xf0]  ;;  %v6613_v22 = vor.u32 %v6962_v47, %v6612_v46  ;;  %v3448_v2 = vld [vmem:[%s6241_s3] sm:$0xf]  ;;  %s7977_s18 = smov 30   ;;  %s9512_s3 = sld [smem:[%s10814_s0 + %s7978_s24]]  }
 0xbae   :  { %3329 = vmatpush.bf16.msra.mxu0 %v3142_v6  ;;  %v3158_v44 = vpack.c.bf16 %v3141_v51, %v3007_v28  ;;  %v6605_v58 = vor.u32 %v6961_v60, %v6604_v17  ;;  %v6609_v23 = vor.u32 %v6960_v9, %v6606_v24  ;;  %v3268_v53 = vunpack.c.l.b16 %v2695_v26  ;;  %s9479_s22 = sld [smem:[%s10814_s0 + %s7977_s18]]   ;;  %s7983_s18 = smov 33  }
 0xbaf   :  { %v2894_v12 = vsel %vm209_vm1, %v7640_v63, %v7645_v35  ;;  %v2895_v37 = vsel %vm209_vm1, %v7641_v49, %v7646_v38  ;;  %v3269_v29 = vunpack.c.h.b16 %v2695_v26  ;;  %v3288_v49 = vpack.c.b16 %v3270_v39, %v3270_v39  ;;  %v3447_v63 = vld [vmem:[%s6240_s23] sm:$0xf]  ;;  %s10830_s23 = smov 2   ;;  %s7984_s24 = smov 38  }
 0xbb0   :  { %v3150_v40 = vpack.c.bf16 %v2895_v37, %v2894_v12  ;;  %v3286_v7 = vpack.c.b16 %v3268_v53, %v3268_v53  ;;  %v3474_v36 = vsel %vm307_vm7, %v3447_v63, 0  ;;  %v3515_v6 = vsel %vm307_vm7, %v3448_v2, 0 }
 0xbb1   :  { %3330 = vmatmul.bf16.vlgmr.msra.gmra.mxu0 %v6557_v42  ;;  %3405 = vmatpush.bf16.msrb.mxu3 %v3158_v44  ;;  %v3287_v4 = vpack.c.b16 %v3269_v29, %v3269_v29  ;;  %v3169_v44 = vpop.permute.xlu1 %3168  ;;  %vm3667_vm1 = vcmask 15360   ;;  %vm3662_vm6 = vcmask 7168  }
 0xbb2   :  { %3367 = vmatpush.bf16.msrb.mxu2 %v3150_v40  ;;  %3483 = vmatpush.bf16.msrb.mxu1 %v3474_v36 }
 0xbb3   :  { %3524 = vmatpush.bf16.msrb.mxu0 %v3515_v6 }
 0xbb4   :  { %6614 = vmatmul.msk.bf16.vlgmr.msrb.gmra.mxu3 %vm1347_vm2, %v6565_v25  ;;  %v3164_v51 = vpop.permute.xlu0 %3163 }
 0xbb5   :  { %3368 = vmatmul.bf16.vlgmr.msrb.gmra.mxu2 %v6561_v59 }
 0xbb9   :  { %v3184_v20 = vpop.permute.xlu1 %3183 }
 0xbbc   :  { %v3179_v1 = vpop.permute.xlu0 %3178 }
 0xbc1   :  { %3335 = vmatmul.bf16.gmra.mxu0 %v6569_v45 }
 0xbc4   :  { %6615 = vmatmul.msk.bf16.gmra.mxu3 %vm1347_vm2, %v6577_v43 }
 0xbc5   :  { %3373 = vmatmul.bf16.gmra.mxu2 %v6573_v5 }
 0xbd1   :  { %3340 = vmatmul.bf16.gmra.mxu0 %v6581_v55 }
 0xbd4   :  { %6616 = vmatmul.msk.bf16.gmra.mxu3 %vm1347_vm2, %v6589_v14 }
 0xbd5   :  { %3378 = vmatmul.bf16.gmra.mxu2 %v6585_v31 }
 0xbe1   :  { %3345 = vmatmul.bf16.gmra.mxu0 %v6593_v3 }
 0xbe4   :  { %6617 = vmatmul.msk.bf16.gmra.mxu3 %vm1347_vm2, %v6601_v32 }
 0xbe5   :  { %3383 = vmatmul.bf16.gmra.mxu2 %v6597_v50  ;;  %v3189_v50 = vpop.permute.xlu2 %3188 }
 0xbf1   :  { %3350 = vmatmul.bf16.gmra.mxu0 %v6605_v58 }
 0xbf4   :  { %6618 = vmatmul.msk.bf16.gmra.mxu3 %vm1347_vm2, %v6613_v22 }
 0xbf5   :  { %3388 = vmatmul.bf16.gmra.mxu2 %v6609_v23 }
 0xc01   :  { %3355 = vmatmul.bf16.gmra.mxu0 %v3286_v7  ;;  %v3194_v7 = vpop.permute.xlu0 %3193 }
 0xc04   :  { %6619 = vmatmul.msk.bf16.gmra.mxu3 %vm1347_vm2, %v3288_v49 }
 0xc05   :  { %3393 = vmatmul.bf16.gmra.mxu2 %v3287_v4  ;;  %v3199_v4 = vpop.permute.xlu1 %3198 }
 0xc2e   :  { %v3331_v28 = vpop.f32.mrf.mxu0 }
 0xc2f   :  { %v3332_v13 = vadd.f32 %v3331_v28, %v3164_v51 }
 0xc36   :  { %v3333_v38 = vpop.f32.mrf.mxu0 }
 0xc37   :  { %v3407_v35 = vpop.f32.mrf.mxu3  ;;  %v3334_v0 = vadd.f32 %v3333_v38, %v3169_v44 }
 0xc38   :  { %v3369_v42 = vpop.f32.mrf.mxu2 }
 0xc39   :  { %v3370_v34 = vadd.f32 %v3369_v42, %v3332_v13 }
 0xc3b   :  { %v3408_v40 = vadd.f32 %v3407_v35, %v3370_v34 }
 0xc3d   :  { %v3436_v57 = vmax.f32 %v3408_v40, 0.0  ;;  %v3209_v40 = vpop.permute.xlu0 %3208 }
 0xc3e   :  { %v3336_v52 = vpop.f32.mrf.mxu0 }
 0xc3f   :  { %v3409_v12 = vpop.f32.mrf.mxu3  ;;  %v3337_v43 = vadd.f32 %v3336_v52, %v3174_v54 }
 0xc40   :  { %v3371_v37 = vpop.f32.mrf.mxu2 }
 0xc41   :  { %v3372_v25 = vadd.f32 %v3371_v37, %v3334_v0  ;;  %v3204_v0 = vpop.permute.xlu2 %3203 }
 0xc43   :  { %v3410_v59 = vadd.f32 %v3409_v12, %v3372_v25 }
 0xc45   :  { %v3437_v18 = vmax.f32 %v3410_v59, 0.0 }
 0xc46   :  { %v3338_v45 = vpop.f32.mrf.mxu0 }
 0xc47   :  { %v3449_v61 = vpack.c.bf16 %v3437_v18, %v3436_v57  ;;  %v3412_v62 = vpop.f32.mrf.mxu3  ;;  %v3339_v55 = vadd.f32 %v3338_v45, %v3179_v1 }
 0xc48   :  { %v3374_v41 = vpop.f32.mrf.mxu2 }
 0xc49   :  { %6620 = vmatmul.msk.bf16.vlgmr.msrb.gmra.mxu1 %vm1813_vm9, %v3449_v61  ;;  %6626 = vmatmul.msk.bf16.vlgmr.msrb.gmra.mxu0 %vm1813_vm9, %v3449_v61  ;;  %v3375_v5 = vadd.f32 %v3374_v41, %v3337_v43 }
 0xc4b   :  { %v3413_v11 = vadd.f32 %v3412_v62, %v3375_v5 }
 0xc4d   :  { %v3438_v31 = vmax.f32 %v3413_v11, 0.0 }
 0xc4e   :  { %v3341_v33 = vpop.f32.mrf.mxu0 }
 0xc4f   :  { %v3414_v8 = vpop.f32.mrf.mxu3  ;;  %v3342_v48 = vadd.f32 %v3341_v33, %v3184_v20  ;;  %v3214_v33 = vpop.permute.xlu1 %3213 }
 0xc50   :  { %v3376_v19 = vpop.f32.mrf.mxu2 }
 0xc51   :  { %v3377_v27 = vadd.f32 %v3376_v19, %v3339_v55 }
 0xc53   :  { %v3415_v14 = vadd.f32 %v3414_v8, %v3377_v27 }
 0xc55   :  { %v3439_v16 = vmax.f32 %v3415_v14, 0.0 }
 0xc56   :  { %v3343_v56 = vpop.f32.mrf.mxu0 }
 0xc57   :  { %v3450_v3 = vpack.c.bf16 %v3439_v16, %v3438_v31  ;;  %v3417_v30 = vpop.f32.mrf.mxu3  ;;  %v3344_v60 = vadd.f32 %v3343_v56, %v3189_v50 }
 0xc58   :  { %v3379_v10 = vpop.f32.mrf.mxu2 }
 0xc59   :  { %6621 = vmatmul.msk.bf16.gmra.mxu1 %vm1813_vm9, %v3450_v3  ;;  %6627 = vmatmul.msk.bf16.gmra.mxu0 %vm1813_vm9, %v3450_v3  ;;  %v3380_v32 = vadd.f32 %v3379_v10, %v3342_v48 }
 0xc5b   :  { %v3418_v47 = vadd.f32 %v3417_v30, %v3380_v32 }
 0xc5d   :  { %v3440_v22 = vmax.f32 %v3418_v47, 0.0 }
 0xc5e   :  { %v3346_v17 = vpop.f32.mrf.mxu0 }
 0xc5f   :  { %v3419_v58 = vpop.f32.mrf.mxu3  ;;  %v3347_v29 = vadd.f32 %v3346_v17, %v3194_v7 }
 0xc60   :  { %v3381_v46 = vpop.f32.mrf.mxu2 }
 0xc61   :  { %v3382_v9 = vadd.f32 %v3381_v46, %v3344_v60 }
 0xc63   :  { %v3420_v24 = vadd.f32 %v3419_v58, %v3382_v9 }
 0xc65   :  { %v3441_v23 = vmax.f32 %v3420_v24, 0.0 }
 0xc66   :  { %v3348_v26 = vpop.f32.mrf.mxu0 }
 0xc67   :  { %v3451_v53 = vpack.c.bf16 %v3441_v23, %v3440_v22  ;;  %v3422_v15 = vpop.f32.mrf.mxu3  ;;  %v3349_v2 = vadd.f32 %v3348_v26, %v3199_v4 }
 0xc68   :  { %v3384_v39 = vpop.f32.mrf.mxu2 }
 0xc69   :  { %6622 = vmatmul.msk.bf16.gmra.mxu1 %vm1813_vm9, %v3451_v53  ;;  %6628 = vmatmul.msk.bf16.gmra.mxu0 %vm1813_vm9, %v3451_v53  ;;  %v3385_v49 = vadd.f32 %v3384_v39, %v3347_v29 }
 0xc6b   :  { %v3423_v28 = vadd.f32 %v3422_v15, %v3385_v49 }
 0xc6d   :  { %v3442_v42 = vmax.f32 %v3423_v28, 0.0 }
 0xc6e   :  { %v3351_v63 = vpop.f32.mrf.mxu0 }
 0xc6f   :  { %v3424_v36 = vpop.f32.mrf.mxu3  ;;  %v3352_v12 = vadd.f32 %v3351_v63, %v3204_v0 }
 0xc70   :  { %v3386_v6 = vpop.f32.mrf.mxu2 }
 0xc71   :  { %v3387_v38 = vadd.f32 %v3386_v6, %v3349_v2 }
 0xc73   :  { %v3425_v35 = vadd.f32 %v3424_v36, %v3387_v38 }
 0xc75   :  { %v3443_v51 = vmax.f32 %v3425_v35, 0.0 }
 0xc76   :  { %v3353_v13 = vpop.f32.mrf.mxu0 }
 0xc77   :  { %v3452_v34 = vpack.c.bf16 %v3443_v51, %v3442_v42  ;;  %v3427_v44 = vpop.f32.mrf.mxu3  ;;  %v3354_v59 = vadd.f32 %v3353_v13, %v3209_v40 }
 0xc78   :  { %v3389_v52 = vpop.f32.mrf.mxu2 }
 0xc79   :  { %6623 = vmatmul.msk.bf16.gmra.mxu1 %vm1813_vm9, %v3452_v34  ;;  %6629 = vmatmul.msk.bf16.gmra.mxu0 %vm1813_vm9, %v3452_v34  ;;  %v3390_v37 = vadd.f32 %v3389_v52, %v3352_v12 }
 0xc7b   :  { %v3428_v45 = vadd.f32 %v3427_v44, %v3390_v37 }
 0xc7d   :  { %v3444_v41 = vmax.f32 %v3428_v45, 0.0  ;;  %v9106_v45 = vld [vmem:[%s6259_s7] sm:$0xff] }
 0xc7e   :  { %v3356_v25 = vpop.f32.mrf.mxu0 }
 0xc7f   :  { %v3429_v57 = vpop.f32.mrf.mxu3  ;;  %v3357_v8 = vadd.f32 %v3356_v25, %v3214_v33  ;;  %v6963_v25 = vld [vmem:[%s6256_s1] sm:$0xff]  ;;  %v3575_v33 = vpop.permute.xlu1 %3574 }
 0xc80   :  { %v3391_v18 = vpop.f32.mrf.mxu2 }
 0xc81   :  { %v3392_v61 = vadd.f32 %v3391_v18, %v3354_v59  ;;  %v6638_v59 = vld [vmem:[%s6256_s1 + $0x8] sm:$0xf] }
 0xc83   :  { %v3430_v62 = vadd.f32 %v3429_v57, %v3392_v61  ;;  %v6964_v57 = vld [vmem:[%s6256_s1 + $0x8] sm:$0x70]  ;;  %s9519_s1 = sld [smem:[%s10814_s0 + %s10831_s5]]  }
 0xc84   :  { %v6639_v18 = vor.u32 %v6964_v57, %v6638_v59  ;;  %v9110_v61 = vld [vmem:[%s6259_s7 + $0x8] sm:$0xff] }
 0xc85   :  { %v3445_v54 = vmax.f32 %v3430_v62, 0.0  ;;  %v9114_v62 = vld [vmem:[%s6259_s7 + $0x10] sm:$0xff] }
 0xc86   :  { %v3358_v43 = vpop.f32.mrf.mxu0 }
 0xc87   :  { %v3453_v5 = vpack.c.bf16 %v3445_v54, %v3444_v41  ;;  %v3432_v1 = vpop.f32.mrf.mxu3  ;;  %v9118_v41 = vld [vmem:[%s6259_s7 + $0x18] sm:$0xff]  ;;  %v9122_v54 = vld [vmem:[%s6259_s7 + $0x20] sm:$0xff]  ;;  %v9126_v43 = vld [vmem:[%s6259_s7 + $0x28] sm:$0xff]  ;;  %s6262_s7 = sld [smem:[%s10814_s0 + %s7979_s28]]  }
 0xc88   :  { %v3394_v55 = vpop.f32.mrf.mxu2 }
 0xc89   :  { %6624 = vmatmul.msk.bf16.gmra.mxu1 %vm1813_vm9, %v3453_v5  ;;  %6630 = vmatmul.msk.bf16.gmra.mxu0 %vm1813_vm9, %v3453_v5  ;;  %v3395_v19 = vadd.f32 %v3394_v55, %v3357_v8  ;;  %v3585_v5 = vpop.permute.xlu2 %3584 }
 0xc8b   :  { %v3433_v11 = vadd.f32 %v3432_v1, %v3395_v19 }
 0xc8d   :  { %v3446_v31 = vmax.f32 %v3433_v11, 0.0 }
 0xc8f   :  { %v3434_v27 = vpop.f32.mrf.mxu3  ;;  %v3454_v16 = vpack.c.bf16 %v3446_v31, %v3446_v31 }
 0xc90   :  { %v3396_v14 = vpop.f32.mrf.mxu2 }
 0xc91   :  { %v3580_v8 = vpop.permute.xlu2 %3579 }
 0xc99   :  { %6625 = vmatmul.msk.bf16.gmra.mxu1 %vm1813_vm9, %v3454_v16  ;;  %6631 = vmatmul.msk.bf16.gmra.mxu0 %vm1813_vm9, %v3454_v16 }
 0xcc6   :  { %v3485_v56 = vpop.f32.mrf.mxu1  ;;  %v3526_v3 = vpop.f32.mrf.mxu0 }
 0xcc7   :  { %v3555_v30 = vmax.f32 %v3485_v56, %v3526_v3  ;;  %v3704_v56 = vld [vmem:[%s9137_s9 + $0x18] sm:$0xff] }
 0xcce   :  { %v3487_v10 = vpop.f32.mrf.mxu1  ;;  %v3528_v20 = vpop.f32.mrf.mxu0 }
 0xccf   :  { %v3556_v12 = vmax.f32 %v3487_v10, %v3528_v20 }
 0xcd1   :  { %v3566_v40 = vpack.c.bf16 %v3556_v12, %v3555_v30  ;;  %v3590_v30 = vpop.permute.xlu0 %3589 }
 0xcd6   :  { %v3490_v48 = vpop.f32.mrf.mxu1  ;;  %v3531_v32 = vpop.f32.mrf.mxu0 }
 0xcd7   :  { %v3557_v50 = vmax.f32 %v3490_v48, %v3531_v32 }
 0xcde   :  { %v3492_v17 = vpop.f32.mrf.mxu1  ;;  %v3533_v60 = vpop.f32.mrf.mxu0 }
 0xcdf   :  { %v3558_v52 = vmax.f32 %v3492_v17, %v3533_v60  ;;  %v3701_v17 = vld [vmem:[%s9137_s9] sm:$0xff]  ;;  %v3703_v60 = vld [vmem:[%s9137_s9 + $0x10] sm:$0xff] }
 0xce1   :  { %v3567_v37 = vpack.c.bf16 %v3558_v52, %v3557_v50 }
 0xce6   :  { %v3495_v58 = vpop.f32.mrf.mxu1  ;;  %v3536_v46 = vpop.f32.mrf.mxu0 }
 0xce7   :  { %v3559_v44 = vmax.f32 %v3495_v58, %v3536_v46  ;;  %v3714_v58 = vld [vmem:[%s9153_s15 + $0x8] sm:$0xff]  ;;  %v3716_v46 = vld [vmem:[%s9153_s15 + $0x18] sm:$0xff] }
 0xcee   :  { %v3497_v47 = vpop.f32.mrf.mxu1  ;;  %v3538_v9 = vpop.f32.mrf.mxu0 }
 0xcef   :  { %v3560_v13 = vmax.f32 %v3497_v47, %v3538_v9  ;;  %v3715_v47 = vld [vmem:[%s9153_s15 + $0x10] sm:$0xff] }
 0xcf0   :  { %v3719_v9 = vld [vmem:[%s9153_s15 + $0x30] sm:$0xff] }
 0xcf1   :  { %v3568_v0 = vpack.c.bf16 %v3560_v13, %v3559_v44 }
 0xcf6   :  { %v3500_v24 = vpop.f32.mrf.mxu1  ;;  %v3541_v22 = vpop.f32.mrf.mxu0 }
 0xcf7   :  { %v3561_v51 = vmax.f32 %v3500_v24, %v3541_v22  ;;  %v3713_v24 = vld [vmem:[%s9153_s15] sm:$0xff]  ;;  %v3702_v22 = vld [vmem:[%s9137_s9 + $0x8] sm:$0xff] }
 0xcfe   :  { %v3502_v23 = vpop.f32.mrf.mxu1  ;;  %v3543_v26 = vpop.f32.mrf.mxu0 }
 0xcff   :  { %v3562_v28 = vmax.f32 %v3502_v23, %v3543_v26  ;;  %v3706_v23 = vld [vmem:[%s9137_s9 + $0x28] sm:$0xff]  ;;  %v3708_v26 = vld [vmem:[%s9137_s9 + $0x38] sm:$0xff] }
 0xd01   :  { %v3569_v34 = vpack.c.bf16 %v3562_v28, %v3561_v51  ;;  %v3721_v28 = vld [vmem:[%s9153_s15 + $0x40] sm:$0xff] }
 0xd06   :  { %v3505_v53 = vpop.f32.mrf.mxu1  ;;  %v3546_v15 = vpop.f32.mrf.mxu0 }
 0xd07   :  { %v3563_v6 = vmax.f32 %v3505_v53, %v3546_v15  ;;  %v3707_v53 = vld [vmem:[%s9137_s9 + $0x30] sm:$0xff] }
 0xd08   :  { %v3723_v15 = vld [vmem:[%s9153_s15 + $0x50] sm:$0xff] }
 0xd0e   :  { %v3507_v39 = vpop.f32.mrf.mxu1  ;;  %v3548_v7 = vpop.f32.mrf.mxu0 }
 0xd0f   :  { %v3564_v2 = vmax.f32 %v3507_v39, %v3548_v7  ;;  %v3705_v39 = vld [vmem:[%s9137_s9 + $0x20] sm:$0xff]  ;;  %v3720_v7 = vld [vmem:[%s9153_s15 + $0x38] sm:$0xff] }
 0xd11   :  { %v3570_v38 = vpack.c.bf16 %v3564_v2, %v3563_v6  ;;  %v3711_v2 = vld [vmem:[%s9137_s9 + $0x50] sm:$0xff]  ;;  %v3722_v6 = vld [vmem:[%s9153_s15 + $0x48] sm:$0xff] }
 0xd16   :  { %v3510_v29 = vpop.f32.mrf.mxu1  ;;  %v3551_v49 = vpop.f32.mrf.mxu0 }
 0xd17   :  { %v3565_v4 = vmax.f32 %v3510_v29, %v3551_v49  ;;  %v3712_v29 = vld [vmem:[%s9137_s9 + $0x58] sm:$0xff]  ;;  %v3718_v49 = vld [vmem:[%s9153_s15 + $0x28] sm:$0xff] }
 0xd19   :  { %v3571_v63 = vpack.c.bf16 %v3565_v4, %v3565_v4  ;;  %v3717_v4 = vld [vmem:[%s9153_s15 + $0x20] sm:$0xff] }
 0xd1b   :  { %v3609_v36 = vsel %vm307_vm7, %v3571_v63, 0  ;;  %v3709_v63 = vld [vmem:[%s9137_s9 + $0x40] sm:$0xff]  ;;  %vm3672_vm7 = vcmask 23552  }
 0xd1c   :  { %3613 = vmatpush.bf16.msra.mxu2 %v3609_v36  ;;  %v3724_v36 = vld [vmem:[%s9153_s15 + $0x58] sm:$0xff]  ;;  %s10063_s15 = sld [smem:[%s10814_s0 + %s7981_s10]]  }
 0xd1e   :  { %v3512_v35 = vpop.f32.mrf.mxu1  ;;  %v3553_v42 = vpop.f32.mrf.mxu0 }
 0xd20   :  { %3614 = vmatpush.bf16.msra.mxu2 %v3570_v38  ;;  %v3710_v38 = vld [vmem:[%s9137_s9 + $0x48] sm:$0xff]  ;;  %s10030_s9 = sld [smem:[%s10814_s0 + %s7980_s8]]  }
 0xd24   :  { %3615 = vmatpush.bf16.msra.mxu2 %v3569_v34 }
 0xd28   :  { %3616 = vmatpush.bf16.msra.mxu2 %v3568_v0 }
 0xd2c   :  { %3617 = vmatpush.bf16.msra.mxu2 %v3567_v37 }
 0xd30   :  { %3618 = vmatpush.bf16.msra.mxu2 %v3566_v40 }
 0xd33   :  { %6640 = vmatmul.msk.bf16.vlgmr.msra.gmra.mxu2 %vm685_vm11, %v6963_v25 }
 0xd34   :  { %3994 = vmatpush.bf16.msrb.mxu2 %v7951_v21 }
 0xd43   :  { %6641 = vmatmul.msk.bf16.gmra.mxu2 %vm685_vm11, %v6639_v18  ;;  %vm3817_vm11 = vcmask 244736  }
 0xd53   :  { %6696 = vmatmul.msk.bf16.vlgmr.msrb.gmra.mxu2 %vm170_vm0, %v9106_v45 }
 0xd63   :  { %6697 = vmatmul.msk.bf16.gmra.mxu2 %vm170_vm0, %v9110_v61 }
 0xd73   :  { %6698 = vmatmul.msk.bf16.gmra.mxu2 %vm170_vm0, %v9114_v62 }
 0xd83   :  { %6699 = vmatmul.msk.bf16.gmra.mxu2 %vm170_vm0, %v9118_v41 }
 0xd93   :  { %6700 = vmatmul.msk.bf16.gmra.mxu2 %vm170_vm0, %v9122_v54 }
 0xda3   :  { %6701 = vmatmul.msk.bf16.gmra.mxu2 %vm170_vm0, %v9126_v43 }
 0xdb6   :  { %v3620_v1 = vpop.f32.mrf.mxu2 }
 0xdb7   :  { %v3621_v55 = vadd.f32 %v3620_v1, %v3575_v33 }
 0xdb9   :  { %v9130_v27 = vmax.f32 %v3621_v55, 0.0 }
 0xdbe   :  { %v3622_v19 = vpop.f32.mrf.mxu2 }
 0xdbf   :  { %v3623_v11 = vadd.f32 %v3622_v19, %v3580_v8 }
 0xdc1   :  { %v9132_v14 = vmax.f32 %v3623_v11, 0.0 }
 0xdc3   :  { %v7667_v31 = vpack.i.bf16 %v9132_v14, %v9130_v27 }
 0xdc5   :  { %7668 = vrot.lane.b32.xlu2 %v7667_v31, %s7948_s25 }
 0xdc6   :  { %v3625_v16 = vpop.f32.mrf.mxu2 }
 0xdc7   :  { %v3626_v3 = vadd.f32 %v3625_v16, %v3585_v5 }
 0xdc9   :  { %v9143_v48 = vmax.f32 %v3626_v3, 0.0 }
 0xdcd   :  { %3744 = vperm.xlu2 %7066, %v3704_v56  }
 0xdce   :  { %v3627_v10 = vpop.f32.mrf.mxu2 }
 0xdcf   :  { %v3628_v20 = vadd.f32 %v3627_v10, %v3590_v30 }
 0xdd1   :  { %v9145_v32 = vmax.f32 %v3628_v20, 0.0 }
 0xdd3   :  { %v7662_v50 = vpack.i.bf16 %v9145_v32, %v9143_v48 }
 0xdd5   :  { %7663 = vrot.lane.b32.xlu1 %v7662_v50, %s7955_s30  ;;  %7658 = vrot.lane.b32.xlu0 %v7662_v50, %s7948_s25  ;;  %s7976_s25 = smov 25  }
 0xdd6   :  { %3729 = vperm.xlu2 %7066, %v3701_v17   ;;  %s6258_s17 = sld [smem:[%s10814_s0 + %s7976_s25]]   ;;  %s7982_s25 = smov 36  }
 0xddc   :  { %v6965_v10 = vld [vmem:[%s6258_s17] sm:$0xff]  ;;  %v6966_v20 = vld [vmem:[%s6258_s17 + $0x8] sm:$0xff] }
 0xddd   :  { %3739 = vperm.xlu1 %7065, %v3703_v60   ;;  %7673 = vrot.lane.b32.xlu0 %v7667_v31, %s7955_s30  ;;  %v6969_v50 = vld [vmem:[%s6258_s17 + $0x20] sm:$0xff]  ;;  %v6970_v17 = vld [vmem:[%s6258_s17 + $0x28] sm:$0xff] }
 0xdde   :  { %3886 = vperm.xlu2 %7066, %v3714_v58  }
 0xde5   :  { %3896 = vperm.xlu1 %7065, %v3716_v46   ;;  %3891 = vperm.xlu0 %7064, %v3715_v47  }
 0xde6   :  { %3911 = vperm.xlu2 %7066, %v3719_v9  }
 0xded   :  { %3881 = vperm.xlu1 %7065, %v3713_v24   ;;  %3734 = vperm.xlu0 %7064, %v3702_v22  }
 0xdee   :  { %3754 = vperm.xlu2 %7066, %v3706_v23  }
 0xdf5   :  { %3764 = vperm.xlu1 %7065, %v3708_v26   ;;  %3759 = vperm.xlu0 %7064, %v3707_v53  }
 0xdf6   :  { %3931 = vperm.xlu2 %7066, %v3723_v15  }
 0xdfd   :  { %3749 = vperm.xlu1 %7065, %v3705_v39   ;;  %3916 = vperm.xlu0 %7064, %v3720_v7  }
 0xdfe   :  { %3784 = vperm.xlu2 %7066, %v3712_v29  }
 0xe05   :  { %3906 = vperm.xlu1 %7065, %v3718_v49   ;;  %3901 = vperm.xlu0 %7064, %v3717_v4  }
 0xe06   :  { %3769 = vperm.xlu2 %7066, %v3709_v63  }
 0xe0d   :  { %3779 = vperm.xlu1 %7065, %v3711_v2   ;;  %3936 = vperm.xlu0 %7064, %v3724_v36  }
 0xe15   :  { %3926 = vperm.xlu1 %7065, %v3722_v6   ;;  %3921 = vperm.xlu0 %7064, %v3721_v28  }
 0xe1d   :  { %3774 = vperm.xlu0 %7064, %v3710_v38  }
 0xe1f   :  { %v7669_v52 = vpop.permute.xlu2 %7668 }
 0xe20   :  { %v7671_v57 = vunpack.i.h.bf16 %v7669_v52  ;;  %v7670_v18 = vunpack.i.l.bf16 %v7669_v52 }
 0xe22   :  { %v3664_v19 = vsel %vm3662_vm6, %v9132_v14, %v7671_v57  ;;  %v3663_v11 = vsel %vm3662_vm6, %v9130_v27, %v7670_v18 }
 0xe27   :  { %v3745_v47 = vpop.permute.xlu2 %3744 }
 0xe30   :  { %v3730_v26 = vpop.permute.xlu2 %3729 }
 0xe38   :  { %v9216_v63 = vpop.permute.xlu2 %3886 }
 0xe47   :  { %v7664_v35 = vpop.permute.xlu1 %7663  ;;  %v7659_v42 = vpop.permute.xlu0 %7658 }
 0xe48   :  { %v7666_v51 = vunpack.i.h.bf16 %v7664_v35  ;;  %v7665_v13 = vunpack.i.l.bf16 %v7664_v35  ;;  %v7661_v34 = vunpack.i.h.bf16 %v7659_v42  ;;  %v7660_v44 = vunpack.i.l.bf16 %v7659_v42 }
 0xe4a   :  { %v3666_v0 = vsel %vm3662_vm6, %v9145_v32, %v7661_v34  ;;  %v3665_v12 = vsel %vm3662_vm6, %v9143_v48, %v7660_v44 }
 0xe4b   :  { %v3671_v37 = vsel %vm3667_vm1, %v3666_v0, %v7666_v51  ;;  %v3670_v40 = vsel %vm3667_vm1, %v3665_v12, %v7665_v13  ;;  %v9226_v13 = vpop.permute.xlu2 %3911 }
 0xe4c   :  { %v3675_v25 = vsel %vm3672_vm7, %v3670_v40, %v9143_v48  ;;  %v3676_v59 = vsel %vm3672_vm7, %v3671_v37, %v9145_v32  ;;  %v6967_v48 = vld [vmem:[%s6258_s17 + $0x10] sm:$0xff]  ;;  %v6968_v32 = vld [vmem:[%s6258_s17 + $0x18] sm:$0xff]  ;;  %s10070_s17 = sld [smem:[%s10814_s0 + %s7982_s25]]  }
 0xe4d   :  { %v3726_v5 = vpack.c.bf16 %v3676_v59, %v3675_v25 }
 0xe4f   :  { %v7674_v1 = vpop.permute.xlu0 %7673  ;;  %v3838_v33 = vsel %vm3836_vm8, %v3726_v5, 0 }
 0xe50   :  { %v7676_v55 = vunpack.i.h.bf16 %v7674_v1  ;;  %v7675_v8 = vunpack.i.l.bf16 %v7674_v1  ;;  %3846 = vmatpush.bf16.msra.mxu3 %v3838_v33 }
 0xe52   :  { %v3668_v31 = vsel %vm3667_vm1, %v3663_v11, %v7675_v8  ;;  %v3669_v16 = vsel %vm3667_vm1, %v3664_v19, %v7676_v55 }
 0xe53   :  { %v3673_v56 = vsel %vm3672_vm7, %v3668_v31, %v9130_v27  ;;  %v3674_v3 = vsel %vm3672_vm7, %v3669_v16, %v9132_v14  ;;  %v3996_v27 = vpop.f32.mrf.mxu2  ;;  %v3740_v14 = vpop.permute.xlu1 %3739 }
 0xe54   :  { %v3725_v30 = vpack.c.bf16 %v3674_v3, %v3673_v56  ;;  %v3755_v8 = vpop.permute.xlu2 %3754 }
 0xe56   :  { %3847 = vmatpush.bf16.msra.mxu3 %v3725_v30 }
 0xe57   :  { %v9204_v58 = vpop.permute.xlu0 %3891 }
 0xe59   :  { %6666 = vmatmul.msk.bf16.vlgmr.msra.gmra.mxu3 %vm3817_vm11, %v6965_v10 }
 0xe5a   :  { %4832 = vmatpush.bf16.msrb.mxu3 %v7951_v21 }
 0xe5b   :  { %v3998_v60 = vpop.f32.mrf.mxu2  ;;  %v9206_v9 = vpop.permute.xlu1 %3896 }
 0xe5c   :  { %v3999_v38 = vadd.f32 %v3998_v60, %v9216_v63 }
 0xe5f   :  { %v3735_v24 = vpop.permute.xlu0 %3734 }
 0xe63   :  { %v4001_v46 = vpop.f32.mrf.mxu2  ;;  %v9208_v53 = vpop.permute.xlu1 %3881 }
 0xe64   :  { %v3997_v29 = vadd.f32 %v3996_v27, %v9208_v53  ;;  %v4002_v12 = vadd.f32 %v4001_v46, %v9204_v58  ;;  %v9258_v46 = vpop.permute.xlu2 %3931 }
 0xe67   :  { %v9212_v7 = vpop.permute.xlu0 %3759 }
 0xe69   :  { %6667 = vmatmul.msk.bf16.gmra.mxu3 %vm3817_vm11, %v6966_v20 }
 0xe6b   :  { %v4003_v23 = vpop.f32.mrf.mxu2  ;;  %v9220_v28 = vpop.permute.xlu1 %3764 }
 0xe6c   :  { %v4004_v11 = vadd.f32 %v4003_v23, %v9206_v9 }
 0xe6f   :  { %v9223_v35 = vpop.permute.xlu0 %3916 }
 0xe73   :  { %v4006_v49 = vpop.f32.mrf.mxu2  ;;  %v3750_v37 = vpop.permute.xlu1 %3749 }
 0xe77   :  { %v9232_v25 = vpop.permute.xlu0 %3901 }
 0xe78   :  { %v4007_v5 = vadd.f32 %v4006_v49, %v9232_v25 }
 0xe79   :  { %6668 = vmatmul.msk.bf16.gmra.mxu3 %vm3817_vm11, %v6967_v48 }
 0xe7b   :  { %v4008_v51 = vpop.f32.mrf.mxu2  ;;  %v9245_v3 = vpop.permute.xlu1 %3906 }
 0xe7c   :  { %v4009_v48 = vadd.f32 %v4008_v51, %v9245_v3 }
 0xe83   :  { %v4011_v18 = vpop.f32.mrf.mxu2 }
 0xe89   :  { %6669 = vmatmul.msk.bf16.gmra.mxu3 %vm3817_vm11, %v6968_v32 }
 0xe8b   :  { %v4013_v27 = vpop.f32.mrf.mxu2 }
 0xe99   :  { %6670 = vmatmul.msk.bf16.gmra.mxu3 %vm3817_vm11, %v6969_v50 }
 0xea9   :  { %6671 = vmatmul.msk.bf16.gmra.mxu3 %vm3817_vm11, %v6970_v17 }
 0xedc   :  { %v3849_v22 = vpop.f32.mrf.mxu3 }
 0xedd   :  { %v9210_v39 = vadd.f32 %v3849_v22, %v3730_v26 }
 0xedf   :  { %v4026_v4 = vadd.f32 %v3997_v29, %v9210_v39  ;;  %v9266_v29 = vpop.permute.xlu0 %3936 }
 0xee1   :  { %v6702_v36 = vmul.f32 -1.442695, %v4026_v4  ;;  %v4012_v4 = vadd.f32 %v4011_v18, %v9226_v13 }
 0xee3   :  { %7677 = vpow2.f32 %v6702_v36 }
 0xee4   :  { %v3851_v15 = vpop.f32.mrf.mxu3 }
 0xee5   :  { %v9218_v6 = vadd.f32 %v3851_v15, %v3735_v24 }
 0xee7   :  { %v4027_v42 = vadd.f32 %v3999_v38, %v9218_v6 }
 0xee9   :  { %v6703_v44 = vmul.f32 -1.442695, %v4027_v42  ;;  %v7678_v0 = vpop.eup %7677 }
 0xeea   :  { %v9234_v59 = vadd.f32 1.0, %v7678_v0  ;;  %v9278_v0 = vpop.permute.xlu1 %3779 }
 0xeeb   :  { %7679 = vpow2.f32 %v6703_v44  ;;  %v4016_v44 = vpop.f32.mrf.mxu2 }
 0xeec   :  { %v3854_v2 = vpop.f32.mrf.mxu3  ;;  %7681 = vrcp.f32 %v9234_v59  ;;  %vm4051_vm13 = vweird.f32 %v9234_v59 }
 0xeed   :  { %v9228_v52 = vadd.f32 %v3854_v2, %v3740_v14 }
 0xeef   :  { %v4028_v40 = vadd.f32 %v4002_v12, %v9228_v52 }
 0xef1   :  { %v6704_v1 = vmul.f32 -1.442695, %v4028_v40  ;;  %v7680_v19 = vpop.eup %7679  ;;  %v9282_v40 = vpop.permute.xlu2 %3784 }
 0xef2   :  { %v9247_v30 = vadd.f32 1.0, %v7680_v19  ;;  %v9249_v10 = vpop.eup %7681  ;;  %v4014_v19 = vadd.f32 %v4013_v27, %v9223_v35 }
 0xef3   :  { %7683 = vpow2.f32 %v6704_v1  ;;  %v4047_v14 = vmul.f32 %v9249_v10, %v9234_v59  ;;  %vm4052_vm12 = vweird.f32 %v9249_v10 }
 0xef4   :  { %v3856_v34 = vpop.f32.mrf.mxu3  ;;  %vm4053_vm14 = vmor %vm4051_vm13, %vm4052_vm12  ;;  %vm4066_vm2 = vweird.f32 %v9247_v30 }
 0xef5   :  { %v9237_v33 = vadd.f32 %v3856_v34, %v3745_v47  ;;  %v4048_v26 = vsub.f32 1.0, %v4047_v14 }
 0xef7   :  { %v4029_v16 = vadd.f32 %v4004_v11, %v9237_v33  ;;  %v4049_v42 = vmul.f32 %v9249_v10, %v4048_v26 }
 0xef9   :  { %v6705_v32 = vmul.f32 -1.442695, %v4029_v16  ;;  %v7684_v17 = vpop.eup %7683 }
 0xefa   :  { %v9260_v22 = vadd.f32 1.0, %v7684_v17 }
 0xefc   :  { %v3859_v57 = vpop.f32.mrf.mxu3  ;;  %vm4081_vm7 = vweird.f32 %v9260_v22 }
 0xefd   :  { %v9239_v55 = vadd.f32 %v3859_v57, %v3750_v37 }
 0xeff   :  { %v4106_v31 = vadd.f32 %v4007_v5, %v9239_v55  ;;  %v4050_v5 = vadd.f32 %v9249_v10, %v4049_v42 }
 0xf01   :  { %v6706_v56 = vmul.f32 -1.442695, %v4106_v31  ;;  %v4057_v31 = vand.u32 2147483648, %v9234_v59  ;;  %v4054_v17 = vsel %vm4053_vm14, %v9249_v10, %v4050_v5 }
 0xf03   :  { %7685 = vpow2.f32 %v6706_v56  ;;  %v4058_v14 = vor.u32 1.1754944e-38, %v4057_v31 }
 0xf04   :  { %v3861_v20 = vpop.f32.mrf.mxu3  ;;  %7687 = vrcp.f32 %v9247_v30 }
 0xf05   :  { %v9252_v50 = vadd.f32 %v3861_v20, %v3755_v8  ;;  %7689 = vpow2.f32 %v6705_v32  ;;  %v4055_v20 = vand.u32 2147483647, %v9234_v59 }
 0xf07   :  { %v4107_v60 = vadd.f32 %v4009_v48, %v9252_v50  ;;  %v9302_v48 = vpop.permute.xlu0 %3921  ;;  %vm4056_vm15 = vcmp.eq.f32.partialorder %v4055_v20, 8.507059e+37 }
 0xf08   :  { %v4059_v10 = vsel %vm4056_vm15, %v4058_v14, %v4054_v17 }
 0xf09   :  { %v7686_v47 = vpop.eup %7685  ;;  %v6707_v24 = vmul.f32 -1.442695, %v4107_v60 }
 0xf0a   :  { %v9262_v23 = vadd.f32 1.0, %v7686_v47  ;;  %v9264_v15 = vpop.eup %7687  ;;  %v4017_v47 = vadd.f32 %v4016_v44, %v9302_v48 }
 0xf0b   :  { %7691 = vpow2.f32 %v6707_v24  ;;  %v7690_v36 = vpop.eup %7689  ;;  %v4062_v51 = vmul.f32 %v9264_v15, %v9247_v30  ;;  %vm4067_vm3 = vweird.f32 %v9264_v15 }
 0xf0c   :  { %7693 = vrcp.f32 %v9262_v23  ;;  %v3864_v49 = vpop.f32.mrf.mxu3  ;;  %vm4131_vm5 = vweird.f32 %v9262_v23  ;;  %vm9342_vm9 = vmor %vm4066_vm2, %vm4067_vm3 }
 0xf0d   :  { %v9271_v2 = vadd.f32 %v3864_v49, %v9212_v7  ;;  %7695 = vrcp.f32 %v9260_v22  ;;  %v9284_v7 = vadd.f32 1.0, %v7690_v36  ;;  %v4063_v1 = vsub.f32 1.0, %v4062_v51  ;;  %v4018_v36 = vpop.f32.mrf.mxu2 }
 0xf0f   :  { %v4108_v38 = vadd.f32 %v4012_v4, %v9271_v2  ;;  %v4064_v27 = vmul.f32 %v9264_v15, %v4063_v1  ;;  %v4070_v4 = vand.u32 2147483647, %v9247_v30  ;;  %v4072_v1 = vand.u32 2147483648, %v9247_v30 }
 0xf11   :  { %v7692_v34 = vpop.eup %7691  ;;  %v6708_v12 = vmul.f32 -1.442695, %v4108_v38  ;;  %v9321_v38 = vpop.permute.xlu1 %3926  ;;  %v4065_v51 = vadd.f32 %v9264_v15, %v4064_v27  ;;  %vm4071_vm6 = vcmp.eq.f32.partialorder %v4070_v4, 8.507059e+37 }
 0xf12   :  { %v9280_v37 = vpop.eup %7693  ;;  %v9286_v57 = vadd.f32 1.0, %v7692_v34  ;;  %v4019_v20 = vadd.f32 %v4018_v36, %v9321_v38 }
 0xf13   :  { %v4127_v18 = vmul.f32 %v9280_v37, %v9262_v23  ;;  %7697 = vpow2.f32 %v6708_v12  ;;  %v9292_v8 = vpop.eup %7695  ;;  %v3770_v12 = vpop.permute.xlu2 %3769  ;;  %vm4132_vm4 = vweird.f32 %v9280_v37 }
 0xf14   :  { %7699 = vrcp.f32 %v9286_v57  ;;  %v3866_v11 = vpop.f32.mrf.mxu3  ;;  %vm9346_vm10 = vmor %vm4131_vm5, %vm4132_vm4  ;;  %vm4082_vm11 = vweird.f32 %v9292_v8  ;;  %v4152_v17 = vand.u32 2147483648, %v9286_v57  ;;  %vm4146_vm14 = vweird.f32 %v9286_v57 }
 0xf15   :  { %v4128_v16 = vsub.f32 1.0, %v4127_v18  ;;  %v9298_v56 = vadd.f32 %v3866_v11, %v9220_v28  ;;  %7701 = vrcp.f32 %v9284_v7  ;;  %v4077_v28 = vmul.f32 %v9292_v8, %v9260_v22  ;;  %v4021_v27 = vpop.f32.mrf.mxu2  ;;  %vm9382_vm13 = vmor %vm4081_vm7, %vm4082_vm11 }
 0xf17   :  { %v4109_v32 = vadd.f32 %v4014_v19, %v9298_v56  ;;  %v4129_v60 = vmul.f32 %v9280_v37, %v4128_v16  ;;  %v4078_v34 = vsub.f32 1.0, %v4077_v28  ;;  %v4137_v19 = vand.u32 2147483648, %v9262_v23 }
 0xf18   :  { %v4186_v16 = vmul.f32 %v4059_v10, %v4017_v47 }
 0xf19   :  { %v7698_v59 = vpop.eup %7697  ;;  %v6709_v24 = vmul.f32 -1.442695, %v4109_v32  ;;  %v4130_v5 = vadd.f32 %v9280_v37, %v4129_v60  ;;  %v4135_v32 = vand.u32 2147483647, %v9262_v23  ;;  %v4069_v60 = vsel %vm9342_vm9, %v9264_v15, %v4065_v51 }
 0xf1a   :  { %v9315_v26 = vpop.eup %7699  ;;  %v9317_v49 = vadd.f32 1.0, %v7698_v59  ;;  %v4079_v23 = vmul.f32 %v9292_v8, %v4078_v34  ;;  %v4073_v59 = vor.u32 1.1754944e-38, %v4072_v1  ;;  %v4138_v10 = vor.u32 1.1754944e-38, %v4137_v19 }
 0xf1b   :  { %v4142_v42 = vmul.f32 %v9315_v26, %v9286_v57  ;;  %7703 = vpow2.f32 %v6709_v24  ;;  %v9326_v44 = vpop.eup %7701  ;;  %v4134_v30 = vsel %vm9346_vm10, %v9280_v37, %v4130_v5  ;;  %v4087_v15 = vand.u32 2147483648, %v9260_v22 }
 0xf1c   :  { %7705 = vrcp.f32 %v9317_v49  ;;  %v3869_v18 = vpop.f32.mrf.mxu3  ;;  %v4092_v14 = vmul.f32 %v9326_v44, %v9284_v7  ;;  %vm4136_vm8 = vcmp.eq.f32.partialorder %v4135_v32, 8.507059e+37  ;;  %v4074_v51 = vsel %vm4071_vm6, %v4073_v59, %v4069_v60 }
 0xf1d   :  { %v4143_v11 = vsub.f32 1.0, %v4142_v42  ;;  %v9333_v31 = vadd.f32 %v3869_v18, %v3770_v12  ;;  %v4139_v4 = vsel %vm4136_vm8, %v4138_v10, %v4134_v30  ;;  %v4080_v34 = vadd.f32 %v9292_v8, %v4079_v23  ;;  %v3775_v18 = vpop.permute.xlu0 %3774 }
 0xf1e   :  { %v4093_v12 = vsub.f32 1.0, %v4092_v14  ;;  %v4085_v1 = vand.u32 2147483647, %v9260_v22  ;;  %vm4147_vm12 = vweird.f32 %v9315_v26  ;;  %v4187_v32 = vmul.f32 %v4074_v51, %v4019_v20 }
 0xf1f   :  { %v4190_v28 = vadd.f32 %v4186_v16, %v9333_v31  ;;  %v4144_v47 = vmul.f32 %v9315_v26, %v4143_v11  ;;  %v4150_v23 = vand.u32 2147483647, %v9286_v57  ;;  %v4084_v20 = vsel %vm9382_vm13, %v9292_v8, %v4080_v34  ;;  %vm9395_vm15 = vmor %vm4146_vm14, %vm4147_vm12 }
 0xf20   :  { %v4088_v59 = vor.u32 1.1754944e-38, %v4087_v15  ;;  %v4206_v51 = vmul.f32 0.0, %v4139_v4  ;;  %vm4086_vm2 = vcmp.eq.f32.partialorder %v4085_v1, 8.507059e+37  ;;  %v4153_v8 = vor.u32 1.1754944e-38, %v4152_v17 }
 0xf21   :  { %v7704_v24 = vpop.eup %7703  ;;  %7707 = vtanh.f32 %v4190_v28  ;;  %v4145_v19 = vadd.f32 %v9315_v26, %v4144_v47  ;;  %v4198_v28 = vsub.f32 1.0, %v4139_v4  ;;  %v4094_v47 = vmul.f32 %v9326_v44, %v4093_v12 }
 0xf22   :  { %v9363_v36 = vpop.eup %7705  ;;  %v9365_v42 = vadd.f32 1.0, %v7704_v24  ;;  %v4089_v34 = vsel %vm4086_vm2, %v4088_v59, %v4084_v20  ;;  %v4102_v12 = vand.u32 2147483648, %v9284_v7  ;;  %vm4151_vm3 = vcmp.eq.f32.partialorder %v4150_v23, 8.507059e+37 }
 0xf23   :  { %v4157_v37 = vmul.f32 %v9363_v36, %v9317_v49  ;;  %v4149_v57 = vsel %vm9395_vm15, %v9315_v26, %v4145_v19  ;;  %vm4097_vm4 = vweird.f32 %v9326_v44  ;;  %vm4162_vm5 = vweird.f32 %v9363_v36 }
 0xf24   :  { %7709 = vrcp.f32 %v9365_v42  ;;  %v3871_v5 = vpop.f32.mrf.mxu3  ;;  %v4154_v26 = vsel %vm4151_vm3, %v4153_v8, %v4149_v57  ;;  %vm4096_vm9 = vweird.f32 %v9284_v7  ;;  %v4100_v19 = vand.u32 2147483647, %v9284_v7 }
 0xf25   :  { %v4158_v11 = vsub.f32 1.0, %v4157_v37  ;;  %v9375_v16 = vadd.f32 %v3871_v5, %v3775_v18  ;;  %v4022_v37 = vadd.f32 %v4021_v27, %v9258_v46  ;;  %vm4161_vm10 = vweird.f32 %v9317_v49  ;;  %vm9425_vm6 = vmor %vm4096_vm9, %vm4097_vm4 }
 0xf26   :  { %v4165_v60 = vand.u32 2147483647, %v9317_v49  ;;  %vm9429_vm7 = vmor %vm4161_vm10, %vm4162_vm5  ;;  %v4103_v59 = vor.u32 1.1754944e-38, %v4102_v12  ;;  %vm4101_vm8 = vcmp.eq.f32.partialorder %v4100_v19, 8.507059e+37  ;;  %vm4176_vm13 = vweird.f32 %v9365_v42 }
 0xf27   :  { %v7708_v14 = vpop.eup %7707  ;;  %v4191_v30 = vadd.f32 %v4187_v32, %v9375_v16  ;;  %v4159_v24 = vmul.f32 %v9363_v36, %v4158_v11  ;;  %v4095_v11 = vadd.f32 %v9326_v44, %v4094_v47  ;;  %v4167_v32 = vand.u32 2147483648, %v9317_v49  ;;  %v4023_v47 = vpop.f32.mrf.mxu2 }
 0xf28   :  { %v4202_v10 = vmul.f32 %v7708_v14, %v4198_v28  ;;  %v4188_v28 = vmul.f32 %v4089_v34, %v4022_v37  ;;  %v4199_v14 = vsub.f32 1.0, %v4154_v26  ;;  %vm4166_vm11 = vcmp.eq.f32.partialorder %v4165_v60, 8.507059e+37 }
 0xf29   :  { %7711 = vtanh.f32 %v4191_v30  ;;  %v4160_v1 = vadd.f32 %v9363_v36, %v4159_v24  ;;  %v4168_v57 = vor.u32 1.1754944e-38, %v4167_v32  ;;  %v4024_v8 = vadd.f32 %v4023_v47, %v9266_v29 }
 0xf2a   :  { %v9404_v15 = vpop.eup %7709  ;;  %v9407_v18 = vadd.f32 %v4206_v51, %v4202_v10  ;;  %v4207_v10 = vmul.f32 0.0, %v4154_v26 }
 0xf2b   :  { %v4172_v5 = vmul.f32 %v9404_v15, %v9365_v42  ;;  %v4164_v22 = vsel %vm9429_vm7, %v9363_v36, %v4160_v1  ;;  %vm4177_vm12 = vweird.f32 %v9404_v15  ;;  %v4182_v36 = vand.u32 2147483648, %v9365_v42 }
 0xf2c   :  { %v3874_v4 = vpop.f32.mrf.mxu3  ;;  %4214 = vst.msk [vmem:[#allocation2] sm:$0xff] %vm3667_vm1, %v9407_v18  ;;  %vm4178_vm14 = vmor %vm4176_vm13, %vm4177_vm12 }
 0xf2d   :  { %v4173_v17 = vsub.f32 1.0, %v4172_v5  ;;  %v9421_v27 = vadd.f32 %v3874_v4, %v9278_v0  ;;  %v4099_v0 = vsel %vm9425_vm6, %v9326_v44, %v4095_v11  ;;  %v4169_v44 = vsel %vm4166_vm11, %v4168_v57, %v4164_v22  ;;  %v6986_v57 = vld [vmem:[%s9479_s22 + $0x18] sm:$0xff] }
 0xf2e   :  { %v4104_v51 = vsel %vm4101_vm8, %v4103_v59, %v4099_v0  ;;  %v4200_v26 = vsub.f32 1.0, %v4169_v44  ;;  %v4180_v4 = vand.u32 2147483647, %v9365_v42  ;;  %v4183_v60 = vor.u32 1.1754944e-38, %v4182_v36 }
 0xf2f   :  { %v7712_v7 = vpop.eup %7711  ;;  %v4192_v20 = vadd.f32 %v4188_v28, %v9421_v27  ;;  %v4174_v49 = vmul.f32 %v9404_v15, %v4173_v17  ;;  %v4189_v11 = vmul.f32 %v4104_v51, %v4024_v8  ;;  %v4208_v28 = vmul.f32 0.0, %v4169_v44 }
 0xf30   :  { %v4203_v24 = vmul.f32 %v7712_v7, %v4199_v14  ;;  %vm4181_vm15 = vcmp.eq.f32.partialorder %v4180_v4, 8.507059e+37 }
 0xf31   :  { %7713 = vtanh.f32 %v4192_v20  ;;  %v4175_v12 = vadd.f32 %v9404_v15, %v4174_v49 }
 0xf32   :  { %v9441_v37 = vadd.f32 %v4207_v10, %v4203_v24  ;;  %v6985_v24 = vld [vmem:[%s9479_s22 + $0x10] sm:$0xff] }
 0xf33   :  { %v4179_v17 = vsel %vm4178_vm14, %v9404_v15, %v4175_v12 }
 0xf34   :  { %v3876_v34 = vpop.f32.mrf.mxu3  ;;  %4215 = vst.msk [vmem:[#allocation2 + $0x8] sm:$0xff] %vm3667_vm1, %v9441_v37  ;;  %v4218_v15 = vpack.c.bf16 %v9441_v37, %v9407_v18 }
 0xf35   :  { %v9450_v5 = vadd.f32 %v3876_v34, %v9282_v40  ;;  %v4184_v40 = vsel %vm4181_vm15, %v4183_v60, %v4179_v17  ;;  %v6987_v34 = vld [vmem:[%s9479_s22 + $0x20] sm:$0xff]  ;;  %v4557_v60 = vld [vmem:[%s9519_s1 + $0x8] sm:$0xff] }
 0xf36   :  { %v4201_v14 = vsub.f32 1.0, %v4184_v40  ;;  %v4209_v30 = vmul.f32 0.0, %v4184_v40  ;;  %v4544_v17 = vld [vmem:[%s9512_s3] sm:$0xff]  ;;  %v4562_v40 = vld [vmem:[%s9519_s1 + $0x30] sm:$0xff] }
 0xf37   :  { %v7714_v1 = vpop.eup %7713  ;;  %v4193_v19 = vadd.f32 %v4189_v11, %v9450_v5  ;;  %v4559_v11 = vld [vmem:[%s9519_s1 + $0x18] sm:$0xff] }
 0xf38   :  { %v4204_v32 = vmul.f32 %v7714_v1, %v4200_v26  ;;  %v4547_v1 = vld [vmem:[%s9512_s3 + $0x18] sm:$0xff] }
 0xf39   :  { %7715 = vtanh.f32 %v4193_v19  ;;  %v4548_v19 = vld [vmem:[%s9512_s3 + $0x20] sm:$0xff] }
 0xf3a   :  { %v9456_v23 = vadd.f32 %v4208_v28, %v4204_v32  ;;  %v4558_v32 = vld [vmem:[%s9519_s1 + $0x10] sm:$0xff]  ;;  %v4545_v28 = vld [vmem:[%s9512_s3 + $0x8] sm:$0xff] }
 0xf3c   :  { %4216 = vst.msk [vmem:[#allocation2 + $0x10] sm:$0xff] %vm3667_vm1, %v9456_v23 }
 0xf3f   :  { %v7716_v7 = vpop.eup %7715 }
 0xf40   :  { %v4205_v42 = vmul.f32 %v7716_v7, %v4201_v14  ;;  %v4565_v7 = vld [vmem:[%s9519_s1 + $0x48] sm:$0xff] }
 0xf42   :  { %v4213_v20 = vadd.f32 %v4209_v30, %v4205_v42  ;;  %v4563_v42 = vld [vmem:[%s9519_s1 + $0x38] sm:$0xff]  ;;  %v4549_v30 = vld [vmem:[%s9512_s3 + $0x28] sm:$0xff] }
 0xf44   :  { %4217 = vst.msk [vmem:[#allocation2 + $0x18] sm:$0xff] %vm3667_vm1, %v4213_v20  ;;  %v4219_v0 = vpack.c.bf16 %v4213_v20, %v9456_v23 }
 0xf46   :  { %4226 = vmatpush.bf16.msra.mxu1 %v4219_v0 }
 0xf4a   :  { %4227 = vmatpush.bf16.msra.mxu1 %v4218_v15 }
 0xf4d   :  { %6710 = vmatmul.msk.bf16.vlgmr.msra.gmra.mxu1 %vm170_vm0, %v9106_v45  ;;  %v6983_v45 = vld [vmem:[%s9479_s22] sm:$0xff] }
 0xf4e   :  { %6778 = vmatmul.msk.bf16.vlgmr.msrb.gmra.mxu3 %vm170_vm0, %v6983_v45  ;;  %v4560_v45 = vld [vmem:[%s9519_s1 + $0x20] sm:$0xff] }
 0xf5d   :  { %6711 = vmatmul.msk.bf16.gmra.mxu1 %vm170_vm0, %v9110_v61 }
 0xf6d   :  { %6712 = vmatmul.msk.bf16.gmra.mxu1 %vm170_vm0, %v9114_v62 }
 0xf7d   :  { %6713 = vmatmul.msk.bf16.gmra.mxu1 %vm170_vm0, %v9118_v41 }
 0xf8d   :  { %6714 = vmatmul.msk.bf16.gmra.mxu1 %vm170_vm0, %v9122_v54  ;;  %v6984_v54 = vld [vmem:[%s9479_s22 + $0x8] sm:$0xff] }
 0xf8e   :  { %6779 = vmatmul.msk.bf16.gmra.mxu3 %vm170_vm0, %v6984_v54 }
 0xf9d   :  { %6715 = vmatmul.msk.bf16.gmra.mxu1 %vm170_vm0, %v9126_v43 }
 0xf9e   :  { %6780 = vmatmul.msk.bf16.gmra.mxu3 %vm170_vm0, %v6985_v24 }
 0xfae   :  { %6781 = vmatmul.msk.bf16.gmra.mxu3 %vm170_vm0, %v6986_v57  ;;  %v4564_v57 = vld [vmem:[%s9519_s1 + $0x40] sm:$0xff] }
 0xfbe   :  { %6782 = vmatmul.msk.bf16.gmra.mxu3 %vm170_vm0, %v6987_v34 }
 0xfca   :  { %v4229_v61 = vpop.f32.mrf.mxu1 }
 0xfcb   :  { %v4230_v62 = vadd.f32 %v4229_v61, %v9208_v53  ;;  %v4566_v61 = vld [vmem:[%s9519_s1 + $0x50] sm:$0xff] }
 0xfcd   :  { %4263 = vrot.lane.b32.xlu0 %v4230_v62, %s10830_s23 }
 0xfd2   :  { %v4231_v41 = vpop.f32.mrf.mxu1 }
 0xfd3   :  { %v4232_v49 = vadd.f32 %v4231_v41, %v9216_v63 }
 0xfda   :  { %v4234_v43 = vpop.f32.mrf.mxu1 }
 0xfdb   :  { %v4235_v59 = vadd.f32 %v4234_v43, %v9204_v58 }
 0xfdd   :  { %4267 = vrot.lane.b32.xlu1 %v4235_v59, %s10830_s23 }
 0xfe2   :  { %v4236_v47 = vpop.f32.mrf.mxu1 }
 0xfe3   :  { %v4237_v22 = vadd.f32 %v4236_v47, %v9206_v9 }
 0xfe5   :  { %4269 = vrot.lane.b32.xlu2 %v4237_v22, %s10830_s23  ;;  %4265 = vrot.lane.b32.xlu1 %v4232_v49, %s10830_s23  ;;  %v4567_v49 = vld [vmem:[%s9519_s1 + $0x58] sm:$0xff] }
 0xfe6   :  { %v4555_v22 = vld [vmem:[%s9512_s3 + $0x58] sm:$0xff] }
 0xfea   :  { %v4239_v53 = vpop.f32.mrf.mxu1 }
 0xfeb   :  { %v4240_v10 = vadd.f32 %v4239_v53, %v9232_v25 }
 0xfed   :  { %4359 = vrot.lane.b32.xlu1 %v4240_v10, %s10830_s23 }
 0xff2   :  { %v4241_v58 = vpop.f32.mrf.mxu1 }
 0xff3   :  { %v4242_v8 = vadd.f32 %v4241_v58, %v9245_v3  ;;  %v4546_v3 = vld [vmem:[%s9512_s3 + $0x10] sm:$0xff] }
 0xffa   :  { %v4244_v63 = vpop.f32.mrf.mxu1 }
 0xffb   :  { %v4245_v9 = vadd.f32 %v4244_v63, %v9226_v13 }
 0xffd   :  { %4363 = vrot.lane.b32.xlu2 %v4245_v9, %s10830_s23 }
0x1002   :  { %v4246_v51 = vpop.f32.mrf.mxu1 }
0x1003   :  { %v4247_v44 = vadd.f32 %v4246_v51, %v9223_v35  ;;  %v4552_v51 = vld [vmem:[%s9512_s3 + $0x40] sm:$0xff] }
0x1005   :  { %4361 = vrot.lane.b32.xlu2 %v4242_v8, %s10830_s23  ;;  %4365 = vrot.lane.b32.xlu0 %v4247_v44, %s10830_s23 }
0x100a   :  { %v4249_v25 = vpop.f32.mrf.mxu1 }
0x100b   :  { %v4250_v12 = vadd.f32 %v4249_v25, %v9302_v48 }
0x100d   :  { %4455 = vrot.lane.b32.xlu2 %v4250_v12, %s10830_s23  ;;  %v4553_v12 = vld [vmem:[%s9512_s3 + $0x48] sm:$0xff] }
0x1012   :  { %v4251_v13 = vpop.f32.mrf.mxu1 }
0x1013   :  { %v4252_v4 = vadd.f32 %v4251_v13, %v9321_v38  ;;  %v4551_v38 = vld [vmem:[%s9512_s3 + $0x38] sm:$0xff] }
0x1015   :  { %4497 = vrot.lane.b32.xlu2 %v4213_v20, %s10830_s23 }
0x101a   :  { %v4254_v35 = vpop.f32.mrf.mxu1 }
0x101b   :  { %v4255_v48 = vadd.f32 %v4254_v35, %v9258_v46  ;;  %v4556_v46 = vld [vmem:[%s9519_s1] sm:$0xff] }
0x101d   :  { %4582 = vperm.xlu2 %7066, %v4546_v3   ;;  %4459 = vrot.lane.b32.xlu0 %v4255_v48, %s10830_s23 }
0x1022   :  { %v4256_v36 = vpop.f32.mrf.mxu1 }
0x1023   :  { %v4257_v26 = vadd.f32 %v4256_v36, %v9266_v29  ;;  %v6988_v29 = vld [vmem:[%s9479_s22 + $0x28] sm:$0xff] }
0x1024   :  { %6783 = vmatmul.msk.bf16.gmra.mxu3 %vm170_vm0, %v6988_v29 }
0x1025   :  { %4734 = vperm.xlu2 %7066, %v4559_v11   ;;  %4461 = vrot.lane.b32.xlu1 %v4257_v26, %s10830_s23 }
0x1026   :  { %4457 = vrot.lane.b32.xlu0 %v4252_v4, %s10830_s23 }
0x102d   :  { %4719 = vperm.xlu2 %7066, %v4556_v46   ;;  %4495 = vrot.lane.b32.xlu1 %v9456_v23, %s10830_s23  ;;  %v4554_v23 = vld [vmem:[%s9512_s3 + $0x50] sm:$0xff] }
0x102e   :  { %4491 = vrot.lane.b32.xlu0 %v9407_v18, %s10830_s23  ;;  %v4561_v18 = vld [vmem:[%s9519_s1 + $0x28] sm:$0xff]  ;;  %s7986_s1 = smov 39  }
0x102f   :  { %s6272_s29 = sld [smem:[%s10814_s0 + %s7986_s1]]  }
0x1035   :  { %4607 = vperm.xlu2 %7066, %v4551_v38   ;;  %4493 = vrot.lane.b32.xlu1 %v9441_v37, %s10830_s23  ;;  %v4550_v37 = vld [vmem:[%s9512_s3 + $0x30] sm:$0xff]  ;;  %s10609_s3 = sld [smem:[%s10814_s0 + %s7984_s24]]  }
0x1036   :  { %4587 = vperm.xlu0 %7064, %v4547_v1  }
0x103d   :  { %4592 = vperm.xlu2 %7066, %v4548_v19   ;;  %4729 = vperm.xlu1 %7065, %v4558_v32  }
0x103e   :  { %4572 = vperm.xlu0 %7064, %v4544_v17  }
0x103f   :  { %v4270_v20 = vpop.permute.xlu2 %4269  ;;  %v4264_v15 = vpop.permute.xlu0 %4263 }
0x1040   :  { %v4278_v0 = vadd.f32 %v4270_v20, %v9237_v33  ;;  %v4275_v41 = vadd.f32 %v4264_v15, %v9210_v39 }
0x1042   :  { %v6719_v54 = vmul.f32 -1.442695, %v4278_v0  ;;  %v6716_v59 = vmul.f32 -1.442695, %v4275_v41 }
0x1044   :  { %7717 = vpow2.f32 %v6719_v54 }
0x1045   :  { %4744 = vperm.xlu2 %7066, %v4561_v18   ;;  %4577 = vperm.xlu1 %7065, %v4545_v28   ;;  %7719 = vpow2.f32 %v6716_v59 }
0x1046   :  { %4724 = vperm.xlu0 %7064, %v4557_v60  }
0x104a   :  { %v7718_v39 = vpop.eup %7717 }
0x104b   :  { %v7720_v63 = vpop.eup %7719  ;;  %v9563_v9 = vadd.f32 1.0, %v7718_v39 }
0x104c   :  { %v9566_v25 = vadd.f32 1.0, %v7720_v63 }
0x104d   :  { %4622 = vperm.xlu2 %7066, %v4554_v23   ;;  %4602 = vperm.xlu1 %7065, %v4550_v37   ;;  %vm4345_vm2 = vweird.f32 %v9563_v9  ;;  %v4349_v39 = vand.u32 2147483647, %v9563_v9 }
0x104e   :  { %4749 = vperm.xlu0 %7064, %v4562_v40   ;;  %v4306_v54 = vand.u32 2147483648, %v9566_v25  ;;  %vm4300_vm9 = vweird.f32 %v9566_v25 }
0x104f   :  { %v4268_v14 = vpop.permute.xlu1 %4267  ;;  %vm4350_vm13 = vcmp.eq.f32.partialorder %v4349_v39, 8.507059e+37 }
0x1050   :  { %v4277_v43 = vadd.f32 %v4268_v14, %v9228_v52 }
0x1052   :  { %v6718_v47 = vmul.f32 -1.442695, %v4277_v43 }
0x1054   :  { %7721 = vpow2.f32 %v6718_v47  ;;  %v4304_v47 = vand.u32 2147483647, %v9566_v25 }
0x1055   :  { %4764 = vperm.xlu2 %7066, %v4565_v7   ;;  %4754 = vperm.xlu1 %7065, %v4563_v42  }
0x1056   :  { %4597 = vperm.xlu0 %7064, %v4549_v30   ;;  %vm4305_vm11 = vcmp.eq.f32.partialorder %v4304_v47, 8.507059e+37 }
0x1057   :  { %v4266_v62 = vpop.permute.xlu1 %4265  ;;  %v4364_v33 = vpop.permute.xlu2 %4363 }
0x1058   :  { %v4276_v24 = vadd.f32 %v4266_v62, %v9218_v6  ;;  %v4373_v10 = vadd.f32 %v4364_v33, %v9271_v2 }
0x105a   :  { %v6717_v58 = vmul.f32 -1.442695, %v4276_v24  ;;  %v7722_v8 = vpop.eup %7721  ;;  %v6722_v44 = vmul.f32 -1.442695, %v4373_v10 }
0x105b   :  { %v9569_v6 = vadd.f32 1.0, %v7722_v8 }
0x105c   :  { %7723 = vpow2.f32 %v6717_v58 }
0x105d   :  { %4739 = vperm.xlu1 %7065, %v4560_v45   ;;  %7725 = vrcp.f32 %v9563_v9  ;;  %v4351_v45 = vand.u32 2147483648, %v9563_v9  ;;  %vm4330_vm7 = vweird.f32 %v9569_v6 }
0x105e   :  { %4769 = vperm.xlu0 %7064, %v4566_v61   ;;  %7727 = vpow2.f32 %v6722_v44 }
0x105f   :  { %v4360_v53 = vpop.permute.xlu1 %4359 }
0x1060   :  { %v4371_v52 = vadd.f32 %v4360_v53, %v9239_v55  ;;  %v4362_v55 = vpop.permute.xlu2 %4361  ;;  %v4334_v53 = vand.u32 2147483647, %v9569_v6 }
0x1061   :  { %v4372_v2 = vadd.f32 %v4362_v55, %v9252_v50 }
0x1062   :  { %v6720_v34 = vmul.f32 -1.442695, %v4371_v52  ;;  %v7724_v13 = vpop.eup %7723  ;;  %vm4335_vm12 = vcmp.eq.f32.partialorder %v4334_v53, 8.507059e+37 }
0x1063   :  { %v9575_v35 = vpop.eup %7725  ;;  %v6721_v48 = vmul.f32 -1.442695, %v4372_v2  ;;  %v9577_v11 = vadd.f32 1.0, %v7724_v13 }
0x1064   :  { %7729 = vpow2.f32 %v6720_v34  ;;  %v7728_v3 = vpop.eup %7727  ;;  %vm4346_vm3 = vweird.f32 %v9575_v35 }
0x1065   :  { %4774 = vperm.xlu1 %7065, %v4567_v49   ;;  %7731 = vrcp.f32 %v9566_v25  ;;  %v9584_v50 = vadd.f32 1.0, %v7728_v3  ;;  %v4336_v49 = vand.u32 2147483648, %v9569_v6  ;;  %vm9632_vm10 = vmor %vm4345_vm2, %vm4346_vm3  ;;  %vm4315_vm14 = vweird.f32 %v9577_v11 }
0x1066   :  { %4627 = vperm.xlu0 %7064, %v4555_v22   ;;  %7733 = vrcp.f32 %v9569_v6 }
0x1067   :  { %7735 = vpow2.f32 %v6721_v48 }
0x1068   :  { %7737 = vrcp.f32 %v9577_v11  ;;  %v4456_v13 = vpop.permute.xlu2 %4455 }
0x106a   :  { %v7730_v36 = vpop.eup %7729 }
0x106b   :  { %v9579_v4 = vpop.eup %7731  ;;  %v9586_v38 = vadd.f32 1.0, %v7730_v36 }
0x106c   :  { %v9582_v29 = vpop.eup %7733  ;;  %v4296_v19 = vmul.f32 %v9579_v4, %v9566_v25  ;;  %vm4301_vm4 = vweird.f32 %v9579_v4  ;;  %v4337_v25 = vor.u32 1.1754944e-38, %v4336_v49 }
0x106d   :  { %4759 = vperm.xlu1 %7065, %v4564_v57   ;;  %v4326_v32 = vmul.f32 %v9582_v29, %v9569_v6  ;;  %v7736_v18 = vpop.eup %7735  ;;  %vm4331_vm5 = vweird.f32 %v9582_v29  ;;  %vm9636_vm6 = vmor %vm4300_vm9, %vm4301_vm4  ;;  %v4352_v6 = vor.u32 1.1754944e-38, %v4351_v45  ;;  %v6977_v45 = vld [vmem:[%s6262_s7] sm:$0xff] }
0x106e   :  { %4612 = vperm.xlu0 %7064, %v4552_v51   ;;  %v4297_v17 = vsub.f32 1.0, %v4296_v19  ;;  %v9597_v23 = vpop.eup %7737  ;;  %v9601_v14 = vadd.f32 1.0, %v7736_v18  ;;  %vm9648_vm8 = vmor %vm4330_vm7, %vm4331_vm5  ;;  %v4307_v51 = vor.u32 1.1754944e-38, %v4306_v54  ;;  %v4319_v19 = vand.u32 2147483647, %v9577_v11 }
0x106f   :  { %v4327_v28 = vsub.f32 1.0, %v4326_v32  ;;  %v4311_v15 = vmul.f32 %v9597_v23, %v9577_v11  ;;  %vm4316_vm15 = vweird.f32 %v9597_v23  ;;  %v4321_v32 = vand.u32 2147483648, %v9577_v11  ;;  %v6978_v11 = vld [vmem:[%s6262_s7 + $0x8] sm:$0xff] }
0x1070   :  { %v4298_v7 = vmul.f32 %v9579_v4, %v4297_v17  ;;  %v4402_v18 = vand.u32 2147483648, %v9586_v38  ;;  %vm9682_vm4 = vmor %vm4315_vm14, %vm4316_vm15  ;;  %vm4426_vm5 = vweird.f32 %v9584_v50  ;;  %vm9691_vm9 = vcmp.eq.f32.partialorder %v4319_v19, 8.507059e+37 }
0x1071   :  { %v4328_v20 = vmul.f32 %v9582_v29, %v4327_v28  ;;  %v4312_v33 = vsub.f32 1.0, %v4311_v15  ;;  %v4417_v57 = vand.u32 2147483648, %v9601_v14 }
0x1072   :  { %v4299_v62 = vadd.f32 %v9579_v4, %v4298_v7  ;;  %v4403_v54 = vor.u32 1.1754944e-38, %v4402_v18 }
0x1073   :  { %v4329_v43 = vadd.f32 %v9582_v29, %v4328_v20  ;;  %v4313_v55 = vmul.f32 %v9597_v23, %v4312_v33  ;;  %v4430_v20 = vand.u32 2147483647, %v9584_v50 }
0x1074   :  { %v4303_v58 = vsel %vm9636_vm6, %v9579_v4, %v4299_v62  ;;  %vm4396_vm6 = vweird.f32 %v9586_v38  ;;  %v4322_v62 = vor.u32 1.1754944e-38, %v4321_v32 }
0x1075   :  { %4617 = vperm.xlu1 %7065, %v4553_v12   ;;  %v4308_v2 = vsel %vm4305_vm11, %v4307_v51, %v4303_v58  ;;  %vm4431_vm14 = vcmp.eq.f32.partialorder %v4430_v20, 8.507059e+37 }
0x1077   :  { %v4366_v26 = vpop.permute.xlu0 %4365 }
0x1078   :  { %v4374_v46 = vadd.f32 %v4366_v26, %v9298_v56  ;;  %v4341_v56 = vmul.f32 %v9575_v35, %v9563_v9  ;;  %v4333_v9 = vsel %vm9648_vm8, %v9582_v29, %v4329_v43 }
0x1079   :  { %v4338_v48 = vsel %vm4335_vm12, %v4337_v25, %v4333_v9 }
0x107a   :  { %v6723_v1 = vmul.f32 -1.442695, %v4374_v46  ;;  %v4342_v60 = vsub.f32 1.0, %v4341_v56  ;;  %v4432_v46 = vand.u32 2147483648, %v9584_v50  ;;  %v4467_v56 = vmul.f32 %v4456_v13, %v4308_v2 }
0x107c   :  { %7739 = vpow2.f32 %v6723_v1  ;;  %v4343_v0 = vmul.f32 %v9575_v35, %v4342_v60  ;;  %v4314_v1 = vadd.f32 %v9597_v23, %v4313_v55 }
0x107d   :  { %7741 = vrcp.f32 %v9584_v50 }
0x107e   :  { %7743 = vrcp.f32 %v9586_v38  ;;  %v4344_v59 = vadd.f32 %v9575_v35, %v4343_v0  ;;  %v4433_v0 = vor.u32 1.1754944e-38, %v4432_v46 }
0x1080   :  { %v4348_v44 = vsel %vm9632_vm10, %v9575_v35, %v4344_v59 }
0x1081   :  { %v4353_v26 = vsel %vm4350_vm13, %v4352_v6, %v4348_v44 }
0x1082   :  { %v7740_v37 = vpop.eup %7739 }
0x1083   :  { %v9599_v40 = vpop.eup %7741  ;;  %v9604_v42 = vadd.f32 1.0, %v7740_v37 }
0x1084   :  { %v9606_v30 = vpop.eup %7743  ;;  %v4422_v61 = vmul.f32 %v9599_v40, %v9584_v50  ;;  %vm4427_vm2 = vweird.f32 %v9599_v40  ;;  %v4471_v50 = vadd.f32 %v4467_v56, %v9333_v31 }
0x1085   :  { %7745 = vrcp.f32 %v9604_v42  ;;  %v4392_v41 = vmul.f32 %v9606_v30, %v9586_v38  ;;  %vm4397_vm3 = vweird.f32 %v9606_v30  ;;  %vm9695_vm10 = vmor %vm4426_vm5, %vm4427_vm2  ;;  %vm4441_vm11 = vweird.f32 %v9604_v42 }
0x1086   :  { %7747 = vrcp.f32 %v9601_v14  ;;  %v4423_v10 = vsub.f32 1.0, %v4422_v61  ;;  %v4400_v61 = vand.u32 2147483647, %v9586_v38  ;;  %vm9705_vm7 = vmor %vm4396_vm6, %vm4397_vm3  ;;  %v4447_v38 = vand.u32 2147483648, %v9604_v42 }
0x1087   :  { %v4393_v63 = vsub.f32 1.0, %v4392_v41  ;;  %v4445_v33 = vand.u32 2147483647, %v9604_v42  ;;  %vm4411_vm3 = vweird.f32 %v9601_v14  ;;  %vm4511_vm5 = vcmask 31760  }
0x1088   :  { %v4424_v12 = vmul.f32 %v9599_v40, %v4423_v10  ;;  %vm4401_vm12 = vcmp.eq.f32.partialorder %v4400_v61, 8.507059e+37  ;;  %v6979_v61 = vld [vmem:[%s6262_s7 + $0x10] sm:$0xff] }
0x1089   :  { %v4394_v4 = vmul.f32 %v9606_v30, %v4393_v63  ;;  %v4448_v63 = vor.u32 1.1754944e-38, %v4447_v38  ;;  %vm4446_vm2 = vcmp.eq.f32.partialorder %v4445_v33, 8.507059e+37 }
0x108a   :  { %v4425_v17 = vadd.f32 %v9599_v40, %v4424_v12 }
0x108b   :  { %v9643_v52 = vpop.eup %7745  ;;  %v4395_v37 = vadd.f32 %v9606_v30, %v4394_v4  ;;  %v4498_v4 = vpop.permute.xlu2 %4497 }
0x108c   :  { %v4437_v8 = vmul.f32 %v9643_v52, %v9604_v42  ;;  %v9660_v34 = vpop.eup %7747  ;;  %v4429_v41 = vsel %vm9695_vm10, %v9599_v40, %v4425_v17  ;;  %vm4442_vm8 = vweird.f32 %v9643_v52 }
0x108d   :  { %v4407_v29 = vmul.f32 %v9660_v34, %v9601_v14  ;;  %v4399_v31 = vsel %vm9705_vm7, %v9606_v30, %v4395_v37  ;;  %vm9722_vm13 = vmor %vm4441_vm11, %vm4442_vm8  ;;  %v4434_v42 = vsel %vm4431_vm14, %v4433_v0, %v4429_v41  ;;  %vm4412_vm15 = vweird.f32 %v9660_v34  ;;  %v6982_v41 = vld [vmem:[%s6262_s7 + $0x28] sm:$0xff] }
0x108e   :  { %v4438_v3 = vsub.f32 1.0, %v4437_v8  ;;  %v4404_v39 = vsel %vm4401_vm12, %v4403_v54, %v4399_v31  ;;  %v4481_v44 = vsub.f32 1.0, %v4434_v42 }
0x108f   :  { %v4460_v36 = vpop.permute.xlu0 %4459  ;;  %v4408_v15 = vsub.f32 1.0, %v4407_v29 }
0x1090   :  { %v4469_v35 = vmul.f32 %v4460_v36, %v4338_v48  ;;  %v4439_v28 = vmul.f32 %v9643_v52, %v4438_v3  ;;  %v4418_v3 = vor.u32 1.1754944e-38, %v4417_v57 }
0x1091   :  { %v4409_v22 = vmul.f32 %v9660_v34, %v4408_v15 }
0x1092   :  { %v4473_v60 = vadd.f32 %v4469_v35, %v9421_v27  ;;  %v4318_v27 = vsel %vm9682_vm4, %v9597_v23, %v4314_v1  ;;  %v4440_v59 = vadd.f32 %v9643_v52, %v4439_v28  ;;  %vm9736_vm4 = vmor %vm4411_vm3, %vm4412_vm15  ;;  %v4834_v23 = vpop.f32.mrf.mxu3 }
0x1093   :  { %v4323_v40 = vsel %vm9691_vm9, %v4322_v62, %v4318_v27  ;;  %v4410_v51 = vadd.f32 %v9660_v34, %v4409_v22  ;;  %v6981_v62 = vld [vmem:[%s6262_s7 + $0x20] sm:$0xff] }
0x1094   :  { %7749 = vtanh.f32 %v4473_v60  ;;  %v4444_v10 = vsel %vm9722_vm13, %v9643_v52, %v4440_v59  ;;  %v4415_v52 = vand.u32 2147483647, %v9601_v14 }
0x1095   :  { %7751 = vtanh.f32 %v4471_v50  ;;  %v4449_v9 = vsel %vm4446_vm2, %v4448_v63, %v4444_v10  ;;  %v4414_v13 = vsel %vm9736_vm4, %v9660_v34, %v4410_v51  ;;  %v6980_v50 = vld [vmem:[%s6262_s7 + $0x18] sm:$0xff] }
0x1096   :  { %v4482_v48 = vsub.f32 1.0, %v4449_v9  ;;  %vm4416_vm9 = vcmp.eq.f32.partialorder %v4415_v52, 8.507059e+37  ;;  %v4506_v29 = vmul.f32 %v4498_v4, %v4449_v9 }
0x1097   :  { %v4462_v43 = vpop.permute.xlu1 %4461  ;;  %v4419_v19 = vsel %vm4416_vm9, %v4418_v3, %v4414_v13 }
0x1098   :  { %v4470_v47 = vmul.f32 %v4462_v43, %v4353_v26  ;;  %v4458_v49 = vpop.permute.xlu0 %4457  ;;  %v4480_v34 = vsub.f32 1.0, %v4419_v19 }
0x1099   :  { %v4468_v24 = vmul.f32 %v4458_v49, %v4323_v40 }
0x109a   :  { %v4474_v53 = vadd.f32 %v4470_v47, %v9450_v5  ;;  %v7750_v8 = vpop.eup %7749  ;;  %v4479_v5 = vsub.f32 1.0, %v4404_v39  ;;  %v4836_v54 = vpop.f32.mrf.mxu3 }
0x109b   :  { %v4472_v58 = vadd.f32 %v4468_v24, %v9375_v16  ;;  %v7752_v6 = vpop.eup %7751  ;;  %v4485_v55 = vmul.f32 %v7750_v8, %v4481_v44 }
0x109c   :  { %7753 = vtanh.f32 %v4474_v53  ;;  %v4483_v36 = vmul.f32 %v7752_v6, %v4479_v5 }
0x109d   :  { %7755 = vtanh.f32 %v4472_v58 }
0x109f   :  { %v4496_v16 = vpop.permute.xlu1 %4495 }
0x10a0   :  { %v4505_v2 = vmul.f32 %v4496_v16, %v4434_v42  ;;  %v4492_v12 = vpop.permute.xlu0 %4491 }
0x10a1   :  { %v4503_v26 = vmul.f32 %v4492_v12, %v4404_v39 }
0x10a2   :  { %v7754_v14 = vpop.eup %7753  ;;  %v4509_v35 = vadd.f32 %v4505_v2, %v4485_v55  ;;  %v4839_v59 = vpop.f32.mrf.mxu3 }
0x10a3   :  { %v4486_v46 = vmul.f32 %v7754_v14, %v4482_v48  ;;  %v4507_v1 = vadd.f32 %v4503_v26, %v4483_v36  ;;  %v7756_v32 = vpop.eup %7755 }
0x10a4   :  { %4514 = vst.msk [vmem:[#allocation2 + $0x10] sm:$0xff] %vm4511_vm5, %v4509_v35  ;;  %v4484_v18 = vmul.f32 %v7756_v32, %v4480_v34 }
0x10a5   :  { %v4510_v56 = vadd.f32 %v4506_v29, %v4486_v46  ;;  %4512 = vst.msk [vmem:[#allocation2] sm:$0xff] %vm4511_vm5, %v4507_v1 }
0x10a7   :  { %4515 = vst.msk [vmem:[#allocation2 + $0x18] sm:$0xff] %vm4511_vm5, %v4510_v56  ;;  %v4494_v17 = vpop.permute.xlu1 %4493 }
0x10a8   :  { %v4504_v28 = vmul.f32 %v4494_v17, %v4419_v19  ;;  %v4588_v31 = vpop.permute.xlu0 %4587 }
0x10aa   :  { %v4508_v60 = vadd.f32 %v4504_v28, %v4484_v18  ;;  %v4841_v49 = vpop.f32.mrf.mxu3 }
0x10ab   :  { %v4518_v37 = vld [vmem:[#allocation2 + $0x10] sm:$0xff] }
0x10ac   :  { %4513 = vst.msk [vmem:[#allocation2 + $0x8] sm:$0xff] %vm4511_vm5, %v4508_v60  ;;  %v4516_v0 = vld [vmem:[#allocation2] sm:$0xff] }
0x10ae   :  { %v4519_v7 = vld [vmem:[#allocation2 + $0x18] sm:$0xff] }
0x10af   :  { %v4569_v20 = vpack.c.bf16 %v4519_v7, %v4518_v37  ;;  %v9757_v43 = vpop.permute.xlu1 %4729 }
0x10b0   :  { %v4573_v22 = vpop.permute.xlu0 %4572  ;;  %v4840_v12 = vadd.f32 %v4839_v59, %v9757_v43 }
0x10b1   :  { %4684 = vmatpush.bf16.msra.mxu0 %v4569_v20 }
0x10b2   :  { %v4844_v10 = vpop.f32.mrf.mxu3 }
0x10b3   :  { %v4517_v15 = vld [vmem:[#allocation2 + $0x8] sm:$0xff] }
0x10b4   :  { %v4568_v27 = vpack.c.bf16 %v4517_v15, %v4516_v0 }
0x10b6   :  { %4685 = vmatpush.bf16.msra.mxu0 %v4568_v27 }
0x10b7   :  { %v4578_v47 = vpop.permute.xlu1 %4577 }
0x10b8   :  { %v9769_v42 = vpop.permute.xlu0 %4724 }
0x10b9   :  { %6748 = vmatmul.msk.bf16.vlgmr.msra.gmra.mxu0 %vm170_vm0, %v6977_v45  ;;  %v4837_v5 = vadd.f32 %v4836_v54, %v9769_v42 }
0x10ba   :  { %5669 = vmatpush.bf16.msrb.mxu0 %v7951_v21  ;;  %v4583_v21 = vpop.permute.xlu2 %4582  ;;  %v4846_v52 = vpop.f32.mrf.mxu3 }
0x10bf   :  { %v9765_v53 = vpop.permute.xlu1 %4602 }
0x10c0   :  { %v9779_v16 = vpop.permute.xlu0 %4749 }
0x10c2   :  { %v9759_v38 = vpop.permute.xlu2 %4734  ;;  %v4849_v14 = vpop.f32.mrf.mxu3 }
0x10c3   :  { %v4842_v32 = vadd.f32 %v4841_v49, %v9759_v38 }
0x10c7   :  { %v9776_v9 = vpop.permute.xlu1 %4754 }
0x10c8   :  { %v4598_v1 = vpop.permute.xlu0 %4597 }
0x10c9   :  { %6749 = vmatmul.msk.bf16.gmra.mxu0 %vm170_vm0, %v6978_v11 }
0x10ca   :  { %v9761_v33 = vpop.permute.xlu2 %4719  ;;  %v4851_v27 = vpop.f32.mrf.mxu3 }
0x10cb   :  { %v4835_v39 = vadd.f32 %v4834_v23, %v9761_v33 }
0x10cf   :  { %v9785_v48 = vpop.permute.xlu1 %4739 }
0x10d0   :  { %v4845_v4 = vadd.f32 %v4844_v10, %v9785_v48 }
0x10d2   :  { %v9773_v8 = vpop.permute.xlu2 %4607 }
0x10d7   :  { %v9819_v59 = vpop.permute.xlu1 %4774 }
0x10d9   :  { %6750 = vmatmul.msk.bf16.gmra.mxu0 %vm170_vm0, %v6979_v61  ;;  %v9811_v61 = vpop.permute.xlu0 %4769 }
0x10da   :  { %v4593_v13 = vpop.permute.xlu2 %4592 }
0x10e2   :  { %v9798_v18 = vpop.permute.xlu2 %4744 }
0x10e3   :  { %v4847_v7 = vadd.f32 %v4846_v52, %v9798_v18 }
0x10e9   :  { %6751 = vmatmul.msk.bf16.gmra.mxu0 %vm170_vm0, %v6980_v50 }
0x10f9   :  { %6752 = vmatmul.msk.bf16.gmra.mxu0 %vm170_vm0, %v6981_v62 }
0x1109   :  { %6753 = vmatmul.msk.bf16.gmra.mxu0 %vm170_vm0, %v6982_v41 }
0x1136   :  { %v4687_v40 = vpop.f32.mrf.mxu0 }
0x1137   :  { %v9763_v30 = vadd.f32 %v4687_v40, %v4573_v22 }
0x1139   :  { %v4864_v58 = vadd.f32 %v4835_v39, %v9763_v30 }
0x113b   :  { %v6784_v63 = vmul.f32 -1.442695, %v4864_v58  ;;  %v4854_v58 = vpop.f32.mrf.mxu3 }
0x113d   :  { %7757 = vpow2.f32 %v6784_v63 }
0x113e   :  { %v4689_v24 = vpop.f32.mrf.mxu0 }
0x113f   :  { %v9771_v51 = vadd.f32 %v4689_v24, %v4578_v47  ;;  %v4850_v47 = vadd.f32 %v4849_v14, %v9779_v16 }
0x1141   :  { %v4865_v44 = vadd.f32 %v4837_v5, %v9771_v51 }
0x1143   :  { %v6785_v6 = vmul.f32 -1.442695, %v4865_v44  ;;  %v7758_v2 = vpop.eup %7757  ;;  %v9835_v44 = vpop.permute.xlu0 %4627 }
0x1144   :  { %v9787_v36 = vadd.f32 1.0, %v7758_v2 }
0x1145   :  { %7759 = vpow2.f32 %v6785_v6 }
0x1146   :  { %v4692_v57 = vpop.f32.mrf.mxu0  ;;  %7761 = vrcp.f32 %v9787_v36  ;;  %vm4889_vm6 = vweird.f32 %v9787_v36 }
0x1147   :  { %v9781_v55 = vadd.f32 %v4692_v57, %v4583_v21  ;;  %v9831_v57 = vpop.permute.xlu2 %4622 }
0x1149   :  { %v4866_v3 = vadd.f32 %v4840_v12, %v9781_v55 }
0x114b   :  { %v6786_v35 = vmul.f32 -1.442695, %v4866_v3  ;;  %v7760_v19 = vpop.eup %7759 }
0x114c   :  { %v9800_v28 = vadd.f32 1.0, %v7760_v19  ;;  %v9802_v60 = vpop.eup %7761 }
0x114d   :  { %7763 = vpow2.f32 %v6786_v35  ;;  %v4885_v11 = vmul.f32 %v9802_v60, %v9787_v36  ;;  %vm4890_vm10 = vweird.f32 %v9802_v60  ;;  %v4893_v35 = vand.u32 2147483647, %v9787_v36 }
0x114e   :  { %v4694_v25 = vpop.f32.mrf.mxu0  ;;  %vm4891_vm7 = vmor %vm4889_vm6, %vm4890_vm10  ;;  %vm4904_vm11 = vweird.f32 %v9800_v28 }
0x114f   :  { %v9790_v46 = vadd.f32 %v4694_v25, %v4588_v31  ;;  %v4886_v54 = vsub.f32 1.0, %v4885_v11  ;;  %vm4894_vm8 = vcmp.eq.f32.partialorder %v4893_v35, 8.507059e+37  ;;  %v9874_v11 = vpop.permute.xlu2 %4764 }
0x1151   :  { %v4867_v34 = vadd.f32 %v4842_v32, %v9790_v46  ;;  %v4887_v24 = vmul.f32 %v9802_v60, %v4886_v54 }
0x1153   :  { %v6787_v20 = vmul.f32 -1.442695, %v4867_v34  ;;  %v7764_v15 = vpop.eup %7763  ;;  %v4888_v6 = vadd.f32 %v9802_v60, %v4887_v24  ;;  %v4910_v24 = vand.u32 2147483648, %v9800_v28 }
0x1154   :  { %v9813_v41 = vadd.f32 1.0, %v7764_v15 }
0x1155   :  { %v4892_v32 = vsel %vm4891_vm7, %v9802_v60, %v4888_v6 }
0x1156   :  { %v4697_v26 = vpop.f32.mrf.mxu0  ;;  %vm4919_vm4 = vweird.f32 %v9813_v41 }
0x1157   :  { %v9792_v29 = vadd.f32 %v4697_v26, %v4593_v13  ;;  %v4852_v13 = vadd.f32 %v4851_v27, %v9776_v9  ;;  %v4895_v26 = vand.u32 2147483648, %v9787_v36  ;;  %v4908_v27 = vand.u32 2147483647, %v9800_v28 }
0x1159   :  { %v4944_v56 = vadd.f32 %v4845_v4, %v9792_v29  ;;  %vm4909_vm3 = vcmp.eq.f32.partialorder %v4908_v27, 8.507059e+37 }
0x115b   :  { %v6788_v17 = vmul.f32 -1.442695, %v4944_v56 }
0x115d   :  { %7765 = vpow2.f32 %v6788_v17  ;;  %v4896_v17 = vor.u32 1.1754944e-38, %v4895_v26 }
0x115e   :  { %v4699_v37 = vpop.f32.mrf.mxu0  ;;  %7767 = vrcp.f32 %v9800_v28 }
0x115f   :  { %v9805_v0 = vadd.f32 %v4699_v37, %v4598_v1  ;;  %7769 = vpow2.f32 %v6787_v20  ;;  %v9855_v1 = vpop.permute.xlu1 %4759  ;;  %v4897_v60 = vsel %vm4894_vm8, %v4896_v17, %v4892_v32 }
0x1160   :  { %v4855_v37 = vadd.f32 %v4854_v58, %v9855_v1 }
0x1161   :  { %v4945_v45 = vadd.f32 %v4847_v7, %v9805_v0 }
0x1163   :  { %v7766_v50 = vpop.eup %7765  ;;  %v6789_v62 = vmul.f32 -1.442695, %v4945_v45  ;;  %v4856_v45 = vpop.f32.mrf.mxu3 }
0x1164   :  { %v9815_v23 = vadd.f32 1.0, %v7766_v50  ;;  %v9817_v21 = vpop.eup %7767 }
0x1165   :  { %7771 = vpow2.f32 %v6789_v62  ;;  %v7770_v49 = vpop.eup %7769  ;;  %v4900_v39 = vmul.f32 %v9817_v21, %v9800_v28  ;;  %vm4905_vm12 = vweird.f32 %v9817_v21 }
0x1166   :  { %7773 = vrcp.f32 %v9815_v23  ;;  %v4702_v31 = vpop.f32.mrf.mxu0  ;;  %vm4969_vm14 = vweird.f32 %v9815_v23  ;;  %v4973_v6 = vand.u32 2147483647, %v9815_v23  ;;  %vm9895_vm15 = vmor %vm4904_vm11, %vm4905_vm12 }
0x1167   :  { %v9824_v40 = vadd.f32 %v4702_v31, %v9765_v53  ;;  %7775 = vrcp.f32 %v9813_v41  ;;  %v9837_v53 = vadd.f32 1.0, %v7770_v49  ;;  %v4901_v2 = vsub.f32 1.0, %v4900_v39 }
0x1168   :  { %v4975_v39 = vand.u32 2147483648, %v9815_v23  ;;  %vm4974_vm9 = vcmp.eq.f32.partialorder %v4973_v6, 8.507059e+37 }
0x1169   :  { %v4946_v22 = vadd.f32 %v4850_v47, %v9824_v40  ;;  %v4902_v56 = vmul.f32 %v9817_v21, %v4901_v2  ;;  %v4613_v47 = vpop.permute.xlu0 %4612 }
0x116b   :  { %v7772_v10 = vpop.eup %7771  ;;  %v6790_v63 = vmul.f32 -1.442695, %v4946_v22  ;;  %v4903_v62 = vadd.f32 %v9817_v21, %v4902_v56  ;;  %v4976_v56 = vor.u32 1.1754944e-38, %v4975_v39 }
0x116c   :  { %v9833_v5 = vpop.eup %7773  ;;  %v9839_v52 = vadd.f32 1.0, %v7772_v10 }
0x116d   :  { %v4965_v25 = vmul.f32 %v9833_v5, %v9815_v23  ;;  %7777 = vpow2.f32 %v6790_v63  ;;  %v9845_v12 = vpop.eup %7775  ;;  %vm4970_vm13 = vweird.f32 %v9833_v5  ;;  %v5024_v63 = vmul.f32 %v4897_v60, %v4855_v37  ;;  %v4618_v60 = vpop.permute.xlu1 %4617 }
0x116e   :  { %7779 = vrcp.f32 %v9839_v52  ;;  %v4704_v3 = vpop.f32.mrf.mxu0  ;;  %vm9899_vm2 = vmor %vm4969_vm14, %vm4970_vm13  ;;  %v4907_v26 = vsel %vm9895_vm15, %v9817_v21, %v4903_v62  ;;  %v4925_v21 = vand.u32 2147483648, %v9813_v41  ;;  %vm4920_vm10 = vweird.f32 %v9845_v12 }
0x116f   :  { %v4966_v14 = vsub.f32 1.0, %v4965_v25  ;;  %v9851_v4 = vadd.f32 %v4704_v3, %v9773_v8  ;;  %7781 = vrcp.f32 %v9837_v53  ;;  %v4915_v8 = vmul.f32 %v9845_v12, %v9813_v41  ;;  %vm9937_vm8 = vmor %vm4919_vm4, %vm4920_vm10 }
0x1170   :  { %v4857_v25 = vadd.f32 %v4856_v45, %v9874_v11  ;;  %v4990_v62 = vand.u32 2147483648, %v9839_v52  ;;  %vm4984_vm7 = vweird.f32 %v9839_v52  ;;  %v4988_v39 = vand.u32 2147483647, %v9839_v52 }
0x1171   :  { %v4947_v19 = vadd.f32 %v4852_v13, %v9851_v4  ;;  %v4967_v34 = vmul.f32 %v9833_v5, %v4966_v14  ;;  %v4916_v54 = vsub.f32 1.0, %v4915_v8 }
0x1172   :  { %vm4989_vm13 = vcmp.eq.f32.partialorder %v4988_v39, 8.507059e+37 }
0x1173   :  { %v7778_v36 = vpop.eup %7777  ;;  %v6791_v7 = vmul.f32 -1.442695, %v4947_v19  ;;  %v4968_v22 = vadd.f32 %v9833_v5, %v4967_v34  ;;  %v4917_v23 = vmul.f32 %v9845_v12, %v4916_v54  ;;  %v4911_v19 = vor.u32 1.1754944e-38, %v4910_v24 }
0x1174   :  { %v9868_v20 = vpop.eup %7779  ;;  %v9870_v15 = vadd.f32 1.0, %v7778_v36 }
0x1175   :  { %v4980_v50 = vmul.f32 %v9868_v20, %v9839_v52  ;;  %7783 = vpow2.f32 %v6791_v7  ;;  %v9879_v31 = vpop.eup %7781  ;;  %v4972_v35 = vsel %vm9899_vm2, %v9833_v5, %v4968_v22  ;;  %v4912_v17 = vsel %vm4909_vm3, %v4911_v19, %v4907_v26  ;;  %v4859_v22 = vpop.f32.mrf.mxu3 }
0x1176   :  { %7785 = vrcp.f32 %v9870_v15  ;;  %v4707_v49 = vpop.f32.mrf.mxu0  ;;  %v4930_v14 = vmul.f32 %v9879_v31, %v9837_v53  ;;  %v4977_v36 = vsel %vm4974_vm9, %v4976_v56, %v4972_v35  ;;  %v4918_v37 = vadd.f32 %v9845_v12, %v4917_v23 }
0x1177   :  { %v4981_v10 = vsub.f32 1.0, %v4980_v50  ;;  %v9886_v58 = vadd.f32 %v4707_v49, %v4613_v47  ;;  %vm4985_vm6 = vweird.f32 %v9868_v20  ;;  %v4923_v50 = vand.u32 2147483647, %v9813_v41 }
0x1178   :  { %v4931_v7 = vsub.f32 1.0, %v4930_v14  ;;  %v5025_v49 = vmul.f32 %v4912_v17, %v4857_v25  ;;  %v5036_v24 = vsub.f32 1.0, %v4977_v36  ;;  %vm9941_vm11 = vmor %vm4984_vm7, %vm4985_vm6  ;;  %v4922_v2 = vsel %vm9937_vm8, %v9845_v12, %v4918_v37 }
0x1179   :  { %v5028_v3 = vadd.f32 %v5024_v63, %v9886_v58  ;;  %v4982_v28 = vmul.f32 %v9868_v20, %v4981_v10  ;;  %v4926_v52 = vor.u32 1.1754944e-38, %v4925_v21  ;;  %v5044_v23 = vmul.f32 0.0, %v4977_v36 }
0x117a   :  { %v4932_v13 = vmul.f32 %v9879_v31, %v4931_v7  ;;  %v4860_v14 = vadd.f32 %v4859_v22, %v9811_v61  ;;  %vm4924_vm12 = vcmp.eq.f32.partialorder %v4923_v50, 8.507059e+37  ;;  %v4940_v19 = vand.u32 2147483648, %v9837_v53 }
0x117b   :  { %v7784_v32 = vpop.eup %7783  ;;  %7787 = vtanh.f32 %v5028_v3  ;;  %v4983_v45 = vadd.f32 %v9868_v20, %v4982_v28  ;;  %v4991_v28 = vor.u32 1.1754944e-38, %v4990_v62  ;;  %v4927_v12 = vsel %vm4924_vm12, %v4926_v52, %v4922_v2  ;;  %v7919_v62 = vld [vmem:[%s9479_s22 + $0x10] sm:$0xff] }
0x117c   :  { %v9916_v8 = vpop.eup %7785  ;;  %v9918_v34 = vadd.f32 1.0, %v7784_v32  ;;  %vm4935_vm14 = vweird.f32 %v9879_v31  ;;  %vm4934_vm2 = vweird.f32 %v9837_v53  ;;  %v4938_v36 = vand.u32 2147483647, %v9837_v53 }
0x117d   :  { %v4995_v5 = vmul.f32 %v9916_v8, %v9870_v15  ;;  %v4987_v26 = vsel %vm9941_vm11, %v9868_v20, %v4983_v45  ;;  %v4933_v20 = vadd.f32 %v9879_v31, %v4932_v13  ;;  %vm5000_vm15 = vweird.f32 %v9916_v8  ;;  %vm9976_vm4 = vmor %vm4934_vm2, %vm4935_vm14 }
0x117e   :  { %7789 = vrcp.f32 %v9918_v34  ;;  %v4709_v27 = vpop.f32.mrf.mxu0  ;;  %v4992_v21 = vsel %vm4989_vm13, %v4991_v28, %v4987_v26  ;;  %v5005_v37 = vand.u32 2147483648, %v9870_v15  ;;  %vm4999_vm3 = vweird.f32 %v9870_v15 }
0x117f   :  { %v4996_v54 = vsub.f32 1.0, %v4995_v5  ;;  %v9929_v47 = vadd.f32 %v4709_v27, %v4618_v60  ;;  %v5026_v27 = vmul.f32 %v4927_v12, %v4860_v14  ;;  %v5037_v45 = vsub.f32 1.0, %v4992_v21  ;;  %vm9980_vm9 = vmor %vm4999_vm3, %vm5000_vm15 }
0x1180   :  { %v5003_v50 = vand.u32 2147483647, %v9870_v15  ;;  %v4941_v22 = vor.u32 1.1754944e-38, %v4940_v19  ;;  %v5006_v6 = vor.u32 1.1754944e-38, %v5005_v37  ;;  %vm4939_vm10 = vcmp.eq.f32.partialorder %v4938_v36, 8.507059e+37 }
0x1181   :  { %v7788_v63 = vpop.eup %7787  ;;  %v5029_v25 = vadd.f32 %v5025_v49, %v9929_v47  ;;  %v4997_v41 = vmul.f32 %v9916_v8, %v4996_v54  ;;  %vm5014_vm8 = vweird.f32 %v9918_v34  ;;  %v5018_v14 = vand.u32 2147483647, %v9918_v34  ;;  %v7921_v54 = vld [vmem:[%s9479_s22 + $0x20] sm:$0xff] }
0x1182   :  { %v5040_v3 = vmul.f32 %v7788_v63, %v5036_v24  ;;  %v4861_v24 = vpop.f32.mrf.mxu3  ;;  %v5045_v63 = vmul.f32 0.0, %v4992_v21  ;;  %vm5004_vm6 = vcmp.eq.f32.partialorder %v5003_v50, 8.507059e+37  ;;  %v7918_v50 = vld [vmem:[%s9479_s22 + $0x8] sm:$0xff] }
0x1183   :  { %7791 = vtanh.f32 %v5029_v25  ;;  %v4998_v5 = vadd.f32 %v9916_v8, %v4997_v41  ;;  %v4862_v52 = vadd.f32 %v4861_v24, %v9819_v59  ;;  %vm5019_vm12 = vcmp.eq.f32.partialorder %v5018_v14, 8.507059e+37  ;;  %v6995_v24 = vld [vmem:[%s10030_s9] sm:$0xff] }
0x1184   :  { %v9955_v35 = vpop.eup %7789  ;;  %v9958_v32 = vadd.f32 %v5044_v23, %v5040_v3  ;;  %6860 = vmatmul.msk.bf16.vlgmr.msrb.gmra.mxu0 %vm170_vm0, %v6995_v24 }
0x1185   :  { %v5010_v56 = vmul.f32 %v9955_v35, %v9918_v34  ;;  %v5002_v10 = vsel %vm9980_vm9, %v9916_v8, %v4998_v5  ;;  %vm5015_vm7 = vweird.f32 %v9955_v35  ;;  %v5020_v8 = vand.u32 2147483648, %v9918_v34 }
0x1186   :  { %v4712_v17 = vpop.f32.mrf.mxu0  ;;  %5052 = vst.msk [vmem:[#allocation3] sm:$0xff] %vm3667_vm1, %v9958_v32  ;;  %vm5016_vm11 = vmor %vm5014_vm8, %vm5015_vm7 }
0x1187   :  { %v5011_v7 = vsub.f32 1.0, %v5010_v56  ;;  %v9972_v60 = vadd.f32 %v4712_v17, %v9831_v57  ;;  %v4937_v57 = vsel %vm9976_vm4, %v9879_v31, %v4933_v20  ;;  %v5007_v31 = vsel %vm5004_vm6, %v5006_v6, %v5002_v10 }
0x1188   :  { %v4942_v25 = vsel %vm4939_vm10, %v4941_v22, %v4937_v57  ;;  %v5038_v23 = vsub.f32 1.0, %v5007_v31  ;;  %v5046_v21 = vmul.f32 0.0, %v5007_v31  ;;  %v5021_v20 = vor.u32 1.1754944e-38, %v5020_v8 }
0x1189   :  { %v7792_v53 = vpop.eup %7791  ;;  %v5030_v49 = vadd.f32 %v5026_v27, %v9972_v60  ;;  %v5012_v39 = vmul.f32 %v9955_v35, %v5011_v7  ;;  %v5027_v26 = vmul.f32 %v4942_v25, %v4862_v52 }
0x118a   :  { %v5041_v15 = vmul.f32 %v7792_v53, %v5037_v45  ;;  %v7917_v45 = vld [vmem:[%s9479_s22] sm:$0xff]  ;;  %v7920_v53 = vld [vmem:[%s9479_s22 + $0x18] sm:$0xff] }
0x118b   :  { %7793 = vtanh.f32 %v5030_v49  ;;  %v5013_v41 = vadd.f32 %v9955_v35, %v5012_v39  ;;  %v7922_v49 = vld [vmem:[%s9479_s22 + $0x28] sm:$0xff]  ;;  %s6266_s22 = sld [smem:[%s10814_s0 + %s7983_s18]]  }
0x118c   :  { %v9992_v2 = vadd.f32 %v5045_v63, %v5041_v15  ;;  %v6996_v63 = vld [vmem:[%s10030_s9 + $0x8] sm:$0xff] }
0x118d   :  { %v5017_v56 = vsel %vm5016_vm11, %v9955_v35, %v5013_v41 }
0x118e   :  { %v4714_v13 = vpop.f32.mrf.mxu0  ;;  %5053 = vst.msk [vmem:[#allocation3 + $0x8] sm:$0xff] %vm3667_vm1, %v9992_v2  ;;  %v5022_v17 = vsel %vm5019_vm12, %v5021_v20, %v5017_v56  ;;  %v5056_v27 = vpack.c.bf16 %v9992_v2, %v9958_v32  ;;  %v5396_v56 = vld [vmem:[%s10070_s17 + $0x18] sm:$0xff] }
0x118f   :  { %v10001_v3 = vadd.f32 %v4714_v13, %v9835_v44  ;;  %v5039_v34 = vsub.f32 1.0, %v5022_v17  ;;  %v5047_v37 = vmul.f32 0.0, %v5022_v17  ;;  %v5384_v17 = vld [vmem:[%s10063_s15 + $0x18] sm:$0xff] }
0x1191   :  { %v7794_v28 = vpop.eup %7793  ;;  %v5031_v12 = vadd.f32 %v5027_v26, %v10001_v3 }
0x1192   :  { %v5042_v19 = vmul.f32 %v7794_v28, %v5038_v23 }
0x1193   :  { %7795 = vtanh.f32 %v5031_v12  ;;  %v7000_v12 = vld [vmem:[%s10030_s9 + $0x28] sm:$0xff] }
0x1194   :  { %v10007_v44 = vadd.f32 %v5046_v21, %v5042_v19  ;;  %6861 = vmatmul.msk.bf16.gmra.mxu0 %vm170_vm0, %v6996_v63 }
0x1196   :  { %5054 = vst.msk [vmem:[#allocation3 + $0x10] sm:$0xff] %vm3667_vm1, %v10007_v44 }
0x1199   :  { %v7796_v5 = vpop.eup %7795 }
0x119a   :  { %v5043_v36 = vmul.f32 %v7796_v5, %v5039_v34  ;;  %v5395_v34 = vld [vmem:[%s10070_s17 + $0x10] sm:$0xff]  ;;  %v5381_v5 = vld [vmem:[%s10063_s15] sm:$0xff] }
0x119c   :  { %v5051_v35 = vadd.f32 %v5047_v37, %v5043_v36  ;;  %v5394_v36 = vld [vmem:[%s10070_s17 + $0x8] sm:$0xff]  ;;  %v5391_v37 = vld [vmem:[%s10063_s15 + $0x50] sm:$0xff] }
0x119e   :  { %v5057_v7 = vpack.c.bf16 %v5051_v35, %v10007_v44  ;;  %5055 = vst.msk [vmem:[#allocation3 + $0x18] sm:$0xff] %vm3667_vm1, %v5051_v35 }
0x11a0   :  { %5064 = vmatpush.bf16.msra.mxu2 %v5057_v7 }
0x11a4   :  { %5065 = vmatpush.bf16.msra.mxu2 %v5056_v27  ;;  %v5402_v27 = vld [vmem:[%s10070_s17 + $0x48] sm:$0xff] }
0x11a7   :  { %6792 = vmatmul.msk.bf16.vlgmr.msra.gmra.mxu2 %vm170_vm0, %v7917_v45  ;;  %v5400_v45 = vld [vmem:[%s10070_s17 + $0x38] sm:$0xff] }
0x11b7   :  { %6793 = vmatmul.msk.bf16.gmra.mxu2 %vm170_vm0, %v7918_v50  ;;  %v5386_v50 = vld [vmem:[%s10063_s15 + $0x28] sm:$0xff] }
0x11c7   :  { %6794 = vmatmul.msk.bf16.gmra.mxu2 %vm170_vm0, %v7919_v62 }
0x11d7   :  { %6795 = vmatmul.msk.bf16.gmra.mxu2 %vm170_vm0, %v7920_v53 }
0x11e7   :  { %6796 = vmatmul.msk.bf16.gmra.mxu2 %vm170_vm0, %v7921_v54 }
0x11f7   :  { %6797 = vmatmul.msk.bf16.gmra.mxu2 %vm170_vm0, %v7922_v49 }
0x122a   :  { %v5067_v57 = vpop.f32.mrf.mxu2 }
0x122b   :  { %v5068_v22 = vadd.f32 %v5067_v57, %v9761_v33  ;;  %v5397_v57 = vld [vmem:[%s10070_s17 + $0x20] sm:$0xff] }
0x122d   :  { %5101 = vrot.lane.b32.xlu1 %v5068_v22, %s10830_s23  ;;  %v5403_v22 = vld [vmem:[%s10070_s17 + $0x50] sm:$0xff] }
0x1232   :  { %v5069_v39 = vpop.f32.mrf.mxu2 }
0x1233   :  { %v5070_v25 = vadd.f32 %v5069_v39, %v9769_v42  ;;  %v6998_v42 = vld [vmem:[%s10030_s9 + $0x18] sm:$0xff] }
0x123a   :  { %v5072_v15 = vpop.f32.mrf.mxu2 }
0x123b   :  { %v5073_v10 = vadd.f32 %v5072_v15, %v9757_v43  ;;  %v6997_v43 = vld [vmem:[%s10030_s9 + $0x10] sm:$0xff] }
0x123c   :  { %6862 = vmatmul.msk.bf16.gmra.mxu0 %vm170_vm0, %v6997_v43 }
0x123d   :  { %5105 = vrot.lane.b32.xlu2 %v5073_v10, %s10830_s23 }
0x1242   :  { %v5074_v6 = vpop.f32.mrf.mxu2 }
0x1243   :  { %v5075_v33 = vadd.f32 %v5074_v6, %v9759_v38 }
0x1245   :  { %5107 = vrot.lane.b32.xlu0 %v5075_v33, %s10830_s23  ;;  %5103 = vrot.lane.b32.xlu2 %v5070_v25, %s10830_s23  ;;  %v5404_v33 = vld [vmem:[%s10070_s17 + $0x58] sm:$0xff] }
0x124a   :  { %v5077_v52 = vpop.f32.mrf.mxu2 }
0x124b   :  { %v5078_v31 = vadd.f32 %v5077_v52, %v9785_v48  ;;  %v6999_v48 = vld [vmem:[%s10030_s9 + $0x20] sm:$0xff] }
0x124c   :  { %6863 = vmatmul.msk.bf16.gmra.mxu0 %vm170_vm0, %v6998_v42 }
0x124d   :  { %5197 = vrot.lane.b32.xlu2 %v5078_v31, %s10830_s23 }
0x1252   :  { %v5079_v13 = vpop.f32.mrf.mxu2 }
0x1253   :  { %v5080_v26 = vadd.f32 %v5079_v13, %v9798_v18  ;;  %v5383_v18 = vld [vmem:[%s10063_s15 + $0x10] sm:$0xff] }
0x125a   :  { %v5082_v41 = vpop.f32.mrf.mxu2 }
0x125b   :  { %v5083_v8 = vadd.f32 %v5082_v41, %v9779_v16 }
0x125c   :  { %6864 = vmatmul.msk.bf16.gmra.mxu0 %vm170_vm0, %v6999_v48 }
0x125d   :  { %5201 = vrot.lane.b32.xlu0 %v5083_v8, %s10830_s23  ;;  %v5389_v8 = vld [vmem:[%s10063_s15 + $0x40] sm:$0xff] }
0x1262   :  { %v5084_v38 = vpop.f32.mrf.mxu2 }
0x1263   :  { %v5085_v23 = vadd.f32 %v5084_v38, %v9776_v9 }
0x1265   :  { %5199 = vrot.lane.b32.xlu0 %v5080_v26, %s10830_s23  ;;  %5203 = vrot.lane.b32.xlu1 %v5085_v23, %s10830_s23 }
0x126a   :  { %v5087_v14 = vpop.f32.mrf.mxu2 }
0x126b   :  { %v5088_v28 = vadd.f32 %v5087_v14, %v9855_v1 }
0x126c   :  { %6865 = vmatmul.msk.bf16.gmra.mxu0 %vm170_vm0, %v7000_v12 }
0x126d   :  { %5293 = vrot.lane.b32.xlu0 %v5088_v28, %s10830_s23  ;;  %v5390_v28 = vld [vmem:[%s10063_s15 + $0x48] sm:$0xff] }
0x1272   :  { %v5089_v16 = vpop.f32.mrf.mxu2 }
0x1273   :  { %v5090_v20 = vadd.f32 %v5089_v16, %v9874_v11  ;;  %v5385_v11 = vld [vmem:[%s10063_s15 + $0x20] sm:$0xff] }
0x1275   :  { %5335 = vrot.lane.b32.xlu0 %v5051_v35, %s10830_s23  ;;  %v5387_v35 = vld [vmem:[%s10063_s15 + $0x30] sm:$0xff] }
0x127a   :  { %v5092_v9 = vpop.f32.mrf.mxu2 }
0x127b   :  { %v5093_v1 = vadd.f32 %v5092_v9, %v9811_v61  ;;  %v5393_v61 = vld [vmem:[%s10070_s17] sm:$0xff] }
0x127d   :  { %5419 = vperm.xlu0 %7064, %v5383_v18   ;;  %5297 = vrot.lane.b32.xlu1 %v5093_v1, %s10830_s23 }
0x1282   :  { %v5094_v19 = vpop.f32.mrf.mxu2 }
0x1283   :  { %v5095_v21 = vadd.f32 %v5094_v19, %v9819_v59  ;;  %v5388_v59 = vld [vmem:[%s10063_s15 + $0x38] sm:$0xff] }
0x1285   :  { %5571 = vperm.xlu0 %7064, %v5396_v56   ;;  %5299 = vrot.lane.b32.xlu2 %v5095_v21, %s10830_s23 }
0x1286   :  { %5295 = vrot.lane.b32.xlu1 %v5090_v20, %s10830_s23 }
0x128d   :  { %5556 = vperm.xlu0 %7064, %v5393_v61   ;;  %5333 = vrot.lane.b32.xlu2 %v10007_v44, %s10830_s23  ;;  %v5382_v44 = vld [vmem:[%s10063_s15 + $0x8] sm:$0xff] }
0x128e   :  { %5329 = vrot.lane.b32.xlu1 %v9958_v32, %s10830_s23  ;;  %v5398_v32 = vld [vmem:[%s10070_s17 + $0x28] sm:$0xff] }
0x1295   :  { %5444 = vperm.xlu0 %7064, %v5388_v59   ;;  %5331 = vrot.lane.b32.xlu2 %v9992_v2, %s10830_s23  ;;  %v5399_v2 = vld [vmem:[%s10070_s17 + $0x30] sm:$0xff] }
0x1296   :  { %5424 = vperm.xlu1 %7065, %v5384_v17  }
0x1297   :  { %v5106_v7 = vpop.permute.xlu2 %5105 }
0x1298   :  { %v5115_v24 = vadd.f32 %v5106_v7, %v9781_v55 }
0x129a   :  { %v6800_v10 = vmul.f32 -1.442695, %v5115_v24 }
0x129d   :  { %5429 = vperm.xlu0 %7064, %v5385_v11   ;;  %5566 = vperm.xlu2 %7066, %v5395_v34  }
0x129e   :  { %5409 = vperm.xlu1 %7065, %v5381_v5  }
0x129f   :  { %v5104_v53 = vpop.permute.xlu2 %5103  ;;  %v5102_v49 = vpop.permute.xlu1 %5101 }
0x12a0   :  { %v5113_v39 = vadd.f32 %v5102_v49, %v9763_v30  ;;  %v5114_v63 = vadd.f32 %v5104_v53, %v9771_v51  ;;  %v5401_v51 = vld [vmem:[%s10070_s17 + $0x40] sm:$0xff] }
0x12a2   :  { %v6798_v6 = vmul.f32 -1.442695, %v5113_v39  ;;  %v6799_v52 = vmul.f32 -1.442695, %v5114_v63 }
0x12a5   :  { %5581 = vperm.xlu0 %7064, %v5398_v32   ;;  %5414 = vperm.xlu2 %7066, %v5382_v44  }
0x12a6   :  { %5561 = vperm.xlu1 %7065, %v5394_v36  }
0x12a7   :  { %v5198_v25 = vpop.permute.xlu2 %5197 }
0x12a8   :  { %v5209_v55 = vadd.f32 %v5198_v25, %v9792_v29 }
0x12aa   :  { %v6802_v31 = vmul.f32 -1.442695, %v5209_v55 }
0x12ad   :  { %5459 = vperm.xlu0 %7064, %v5391_v37   ;;  %5439 = vperm.xlu2 %7066, %v5387_v35  }
0x12ae   :  { %5586 = vperm.xlu1 %7065, %v5399_v2  }
0x12b5   :  { %5601 = vperm.xlu0 %7064, %v5402_v27   ;;  %5591 = vperm.xlu2 %7066, %v5400_v45  }
0x12b6   :  { %5434 = vperm.xlu1 %7065, %v5386_v50  }
0x12b7   :  { %v5108_v62 = vpop.permute.xlu0 %5107 }
0x12b8   :  { %v5116_v54 = vadd.f32 %v5108_v62, %v9790_v46  ;;  %v5392_v46 = vld [vmem:[%s10063_s15 + $0x58] sm:$0xff] }
0x12ba   :  { %v6801_v15 = vmul.f32 -1.442695, %v5116_v54 }
0x12bc   :  { %7797 = vpow2.f32 %v6801_v15 }
0x12bd   :  { %5576 = vperm.xlu2 %7066, %v5397_v57   ;;  %7799 = vpow2.f32 %v6800_v10 }
0x12be   :  { %5606 = vperm.xlu1 %7065, %v5403_v22   ;;  %7801 = vpow2.f32 %v6798_v6 }
0x12bf   :  { %7803 = vpow2.f32 %v6799_v52 }
0x12c0   :  { %7805 = vpow2.f32 %v6802_v31 }
0x12c2   :  { %v7798_v30 = vpop.eup %7797 }
0x12c3   :  { %v7800_v43 = vpop.eup %7799  ;;  %v10111_v13 = vadd.f32 1.0, %v7798_v30 }
0x12c4   :  { %v7802_v41 = vpop.eup %7801  ;;  %v10115_v42 = vadd.f32 1.0, %v7800_v43 }
0x12c5   :  { %5611 = vperm.xlu2 %7066, %v5404_v33   ;;  %v7804_v38 = vpop.eup %7803  ;;  %v10117_v26 = vadd.f32 1.0, %v7802_v41  ;;  %7807 = vrcp.f32 %v10111_v13  ;;  %v5189_v57 = vand.u32 2147483648, %v10111_v13  ;;  %vm5183_vm2 = vweird.f32 %v10111_v13 }
0x12c6   :  { %5464 = vperm.xlu1 %7065, %v5392_v46   ;;  %7809 = vrcp.f32 %v10115_v42  ;;  %v10122_v48 = vadd.f32 1.0, %v7804_v38  ;;  %v7806_v16 = vpop.eup %7805  ;;  %v5172_v35 = vand.u32 2147483647, %v10115_v42  ;;  %vm5168_vm13 = vweird.f32 %v10115_v42 }
0x12c7   :  { %7811 = vrcp.f32 %v10117_v26  ;;  %v10131_v1 = vadd.f32 1.0, %v7806_v16  ;;  %v5174_v39 = vand.u32 2147483648, %v10115_v42  ;;  %v5187_v10 = vand.u32 2147483647, %v10111_v13 }
0x12c8   :  { %vm10167_vm15 = vcmp.eq.f32.partialorder %v5172_v35, 8.507059e+37  ;;  %v5144_v55 = vand.u32 2147483648, %v10117_v26  ;;  %v5190_v30 = vor.u32 1.1754944e-38, %v5189_v57  ;;  %vm5138_vm10 = vweird.f32 %v10117_v26 }
0x12c9   :  { %vm5188_vm6 = vcmp.eq.f32.partialorder %v5187_v10, 8.507059e+37  ;;  %v5175_v16 = vor.u32 1.1754944e-38, %v5174_v39  ;;  %vm5153_vm12 = vweird.f32 %v10122_v48 }
0x12cb   :  { %v10126_v9 = vpop.eup %7807 }
0x12cc   :  { %v10129_v18 = vpop.eup %7809  ;;  %v5179_v19 = vmul.f32 %v10126_v9, %v10111_v13  ;;  %vm5184_vm14 = vweird.f32 %v10126_v9  ;;  %v5157_v13 = vand.u32 2147483647, %v10122_v48 }
0x12cd   :  { %5596 = vperm.xlu2 %7066, %v5401_v51   ;;  %v10135_v56 = vpop.eup %7811  ;;  %v5164_v11 = vmul.f32 %v10129_v18, %v10115_v42  ;;  %vm10178_vm4 = vmor %vm5183_vm2, %vm5184_vm14  ;;  %vm5169_vm9 = vweird.f32 %v10129_v18  ;;  %v5142_v51 = vand.u32 2147483647, %v10117_v26  ;;  %vm5234_vm2 = vweird.f32 %v10131_v1 }
0x12ce   :  { %5449 = vperm.xlu1 %7065, %v5389_v8   ;;  %v5134_v32 = vmul.f32 %v10135_v56, %v10117_v26  ;;  %v5180_v44 = vsub.f32 1.0, %v5179_v19  ;;  %vm5139_vm3 = vweird.f32 %v10135_v56  ;;  %vm10198_vm7 = vmor %vm5168_vm13, %vm5169_vm9  ;;  %v5159_v8 = vand.u32 2147483648, %v10122_v48 }
0x12cf   :  { %v5202_v29 = vpop.permute.xlu0 %5201  ;;  %vm10205_vm8 = vmor %vm5138_vm10, %vm5139_vm3  ;;  %vm5143_vm13 = vcmp.eq.f32.partialorder %v5142_v51, 8.507059e+37  ;;  %vm10237_vm3 = vcmp.eq.f32.partialorder %v5157_v13, 8.507059e+37 }
0x12d0   :  { %v5211_v23 = vadd.f32 %v5202_v29, %v9824_v40  ;;  %v5135_v36 = vsub.f32 1.0, %v5134_v32  ;;  %v5181_v37 = vmul.f32 %v10126_v9, %v5180_v44  ;;  %v5238_v32 = vand.u32 2147483647, %v10131_v1 }
0x12d2   :  { %v6804_v14 = vmul.f32 -1.442695, %v5211_v23  ;;  %v5136_v53 = vmul.f32 %v10135_v56, %v5135_v36  ;;  %v5182_v54 = vadd.f32 %v10126_v9, %v5181_v37 }
0x12d4   :  { %7813 = vpow2.f32 %v6804_v14  ;;  %v5137_v33 = vadd.f32 %v10135_v56, %v5136_v53  ;;  %v5186_v46 = vsel %vm10178_vm4, %v10126_v9, %v5182_v54 }
0x12d5   :  { %7815 = vrcp.f32 %v10122_v48  ;;  %5454 = vperm.xlu2 %7066, %v5390_v28   ;;  %v5191_v29 = vsel %vm5188_vm6, %v5190_v30, %v5186_v46 }
0x12d6   :  { %7817 = vrcp.f32 %v10131_v1  ;;  %v5141_v14 = vsel %vm10205_vm8, %v10135_v56, %v5137_v33  ;;  %v5160_v56 = vor.u32 1.1754944e-38, %v5159_v8 }
0x12d7   :  { %v5200_v40 = vpop.permute.xlu0 %5199  ;;  %v5204_v12 = vpop.permute.xlu1 %5203 }
0x12d8   :  { %v5210_v21 = vadd.f32 %v5200_v40, %v9805_v0  ;;  %v5212_v20 = vadd.f32 %v5204_v12, %v9851_v4  ;;  %v5165_v0 = vsub.f32 1.0, %v5164_v11  ;;  %v5145_v12 = vor.u32 1.1754944e-38, %v5144_v55 }
0x12da   :  { %v7814_v61 = vpop.eup %7813  ;;  %v6803_v59 = vmul.f32 -1.442695, %v5210_v21  ;;  %v6805_v17 = vmul.f32 -1.442695, %v5212_v20  ;;  %v5166_v27 = vmul.f32 %v10129_v18, %v5165_v0 }
0x12db   :  { %v10141_v34 = vpop.eup %7815  ;;  %v10144_v5 = vadd.f32 1.0, %v7814_v61 }
0x12dc   :  { %7819 = vpow2.f32 %v6803_v59  ;;  %v5149_v4 = vmul.f32 %v10141_v34, %v10122_v48  ;;  %v10153_v2 = vpop.eup %7817  ;;  %v5167_v6 = vadd.f32 %v10129_v18, %v5166_v27  ;;  %vm5154_vm11 = vweird.f32 %v10141_v34 }
0x12dd   :  { %7821 = vrcp.f32 %v10144_v5  ;;  %v5230_v52 = vmul.f32 %v10153_v2, %v10131_v1  ;;  %vm10227_vm14 = vmor %vm5153_vm12, %vm5154_vm11  ;;  %v5146_v59 = vsel %vm5143_vm13, %v5145_v12, %v5141_v14  ;;  %vm5264_vm9 = vweird.f32 %v10144_v5 }
0x12de   :  { %7823 = vpow2.f32 %v6805_v17  ;;  %v5150_v45 = vsub.f32 1.0, %v5149_v4  ;;  %v5171_v26 = vsel %vm10198_vm7, %v10129_v18, %v5167_v6  ;;  %v5270_v27 = vand.u32 2147483648, %v10144_v5 }
0x12df   :  { %v5300_v31 = vpop.permute.xlu2 %5299  ;;  %v5231_v9 = vsub.f32 1.0, %v5230_v52  ;;  %v5294_v40 = vpop.permute.xlu0 %5293  ;;  %v5176_v20 = vsel %vm10167_vm15, %v5175_v16, %v5171_v26  ;;  %vm5235_vm15 = vweird.f32 %v10153_v2  ;;  %v5268_v54 = vand.u32 2147483647, %v10144_v5 }
0x12e0   :  { %v5151_v25 = vmul.f32 %v10141_v34, %v5150_v45  ;;  %v5308_v28 = vmul.f32 %v5300_v31, %v5191_v29  ;;  %v5305_v44 = vmul.f32 %v5294_v40, %v5146_v59  ;;  %v5271_v63 = vor.u32 1.1754944e-38, %v5270_v27  ;;  %vm10269_vm13 = vmor %vm5234_vm2, %vm5235_vm15  ;;  %v6990_v27 = vld [vmem:[%s6266_s22 + $0x8] sm:$0xff] }
0x12e1   :  { %v5232_v4 = vmul.f32 %v10153_v2, %v5231_v9  ;;  %v5240_v6 = vand.u32 2147483648, %v10131_v1  ;;  %vm5269_vm12 = vcmp.eq.f32.partialorder %v5268_v54, 8.507059e+37  ;;  %v6994_v54 = vld [vmem:[%s6266_s22 + $0x28] sm:$0xff] }
0x12e2   :  { %v7820_v7 = vpop.eup %7819  ;;  %v10213_v23 = vadd.f32 %v10141_v34, %v5151_v25  ;;  %v5312_v0 = vadd.f32 %v5308_v28, %v10001_v3 }
0x12e3   :  { %v10157_v50 = vpop.eup %7821  ;;  %v10159_v62 = vadd.f32 1.0, %v7820_v7  ;;  %v5233_v24 = vadd.f32 %v10153_v2, %v5232_v4  ;;  %v5241_v8 = vor.u32 1.1754944e-38, %v5240_v6 }
0x12e4   :  { %v7824_v49 = vpop.eup %7823  ;;  %v5260_v22 = vmul.f32 %v10157_v50, %v10144_v5  ;;  %v5156_v48 = vsel %vm10227_vm14, %v10141_v34, %v10213_v23  ;;  %vm5265_vm4 = vweird.f32 %v10157_v50  ;;  %vm10273_vm14 = vcmp.eq.f32.partialorder %v5238_v32, 8.507059e+37 }
0x12e5   :  { %7825 = vrcp.f32 %v10159_v62  ;;  %v10173_v15 = vadd.f32 1.0, %v7824_v49  ;;  %v5309_v49 = vadd.f32 %v5305_v44, %v9886_v58  ;;  %vm10253_vm6 = vmor %vm5264_vm9, %vm5265_vm4  ;;  %v5161_v46 = vsel %vm10237_vm3, %v5160_v56, %v5156_v48 }
0x12e6   :  { %v5261_v43 = vsub.f32 1.0, %v5260_v22  ;;  %v5237_v52 = vsel %vm10269_vm13, %v10153_v2, %v5233_v24  ;;  %vm5249_vm15 = vweird.f32 %v10159_v62  ;;  %v5255_v51 = vand.u32 2147483648, %v10159_v62 }
0x12e7   :  { %7827 = vrcp.f32 %v10173_v15  ;;  %v5285_v7 = vand.u32 2147483648, %v10173_v15  ;;  %v5283_v3 = vand.u32 2147483647, %v10173_v15  ;;  %vm5279_vm7 = vweird.f32 %v10173_v15  ;;  %v5334_v13 = vpop.permute.xlu2 %5333 }
0x12e8   :  { %v5262_v19 = vmul.f32 %v10157_v50, %v5261_v43  ;;  %7829 = vtanh.f32 %v5312_v0  ;;  %v5336_v43 = vpop.permute.xlu0 %5335  ;;  %v5253_v2 = vand.u32 2147483647, %v10159_v62  ;;  %v5242_v28 = vsel %vm10273_vm14, %v5241_v8, %v5237_v52 }
0x12e9   :  { %v5286_v58 = vor.u32 1.1754944e-38, %v5285_v7  ;;  %vm5284_vm11 = vcmp.eq.f32.partialorder %v5283_v3, 8.507059e+37  ;;  %v6989_v7 = vld [vmem:[%s6266_s22] sm:$0xff] }
0x12ea   :  { %v5263_v37 = vadd.f32 %v10157_v50, %v5262_v19  ;;  %v5256_v19 = vor.u32 1.1754944e-38, %v5255_v51  ;;  %vm5254_vm4 = vcmp.eq.f32.partialorder %v5253_v2, 8.507059e+37  ;;  %v6993_v3 = vld [vmem:[%s6266_s22 + $0x20] sm:$0xff] }
0x12eb   :  { %v10216_v42 = vpop.eup %7825 }
0x12ec   :  { %v5245_v18 = vmul.f32 %v10216_v42, %v10159_v62  ;;  %v5267_v10 = vsel %vm10253_vm6, %v10157_v50, %v5263_v37  ;;  %vm5250_vm2 = vweird.f32 %v10216_v42 }
0x12ed   :  { %v7828_v21 = vpop.eup %7827  ;;  %v5272_v33 = vsel %vm5269_vm12, %v5271_v63, %v5267_v10  ;;  %vm5251_vm3 = vmor %vm5249_vm15, %vm5250_vm2 }
0x12ee   :  { %v5275_v17 = vmul.f32 %v7828_v21, %v10173_v15  ;;  %v5246_v35 = vsub.f32 1.0, %v5245_v18  ;;  %vm5280_vm10 = vweird.f32 %v7828_v21  ;;  %v7830_v31 = vpop.eup %7829  ;;  %v5319_v26 = vsub.f32 1.0, %v5272_v33 }
0x12ef   :  { %v5298_v34 = vpop.permute.xlu1 %5297  ;;  %vm5281_vm8 = vmor %vm5279_vm7, %vm5280_vm10  ;;  %v5343_v9 = vmul.f32 %v5334_v13, %v5272_v33  ;;  %v5332_v48 = vpop.permute.xlu2 %5331 }
0x12f0   :  { %v5276_v36 = vsub.f32 1.0, %v5275_v17  ;;  %v5307_v45 = vmul.f32 %v5298_v34, %v5176_v20  ;;  %v5247_v5 = vmul.f32 %v10216_v42, %v5246_v35  ;;  %v5317_v20 = vsub.f32 1.0, %v5242_v28 }
0x12f2   :  { %v5277_v53 = vmul.f32 %v7828_v21, %v5276_v36  ;;  %v5311_v22 = vadd.f32 %v5307_v45, %v9972_v60  ;;  %v5248_v1 = vadd.f32 %v10216_v42, %v5247_v5  ;;  %v6991_v45 = vld [vmem:[%s6266_s22 + $0x10] sm:$0xff] }
0x12f4   :  { %v5278_v39 = vadd.f32 %v7828_v21, %v5277_v53  ;;  %7831 = vtanh.f32 %v5311_v22  ;;  %v5252_v40 = vsel %vm5251_vm3, %v10216_v42, %v5248_v1  ;;  %v6992_v53 = vld [vmem:[%s6266_s22 + $0x18] sm:$0xff] }
0x12f5   :  { %7833 = vtanh.f32 %v5309_v49  ;;  %v5257_v62 = vsel %vm5254_vm4, %v5256_v19, %v5252_v40  ;;  %v5671_v49 = vpop.f32.mrf.mxu0 }
0x12f6   :  { %v5282_v25 = vsel %vm5281_vm8, %v7828_v21, %v5278_v39  ;;  %v5318_v59 = vsub.f32 1.0, %v5257_v62  ;;  %v5342_v42 = vmul.f32 %v5332_v48, %v5257_v62  ;;  %v5420_v39 = vpop.permute.xlu0 %5419 }
0x12f7   :  { %v5287_v15 = vsel %vm5284_vm11, %v5286_v58, %v5282_v25  ;;  %v10304_v5 = vpop.permute.xlu2 %5566 }
0x12f8   :  { %v5320_v55 = vsub.f32 1.0, %v5287_v15  ;;  %v5296_v30 = vpop.permute.xlu1 %5295  ;;  %v5344_v29 = vmul.f32 %v5336_v43, %v5287_v15 }
0x12f9   :  { %v5306_v41 = vmul.f32 %v5296_v30, %v5161_v46 }
0x12fa   :  { %v5324_v38 = vmul.f32 %v7830_v31, %v5320_v55  ;;  %v7832_v23 = vpop.eup %7831 }
0x12fb   :  { %v5310_v14 = vadd.f32 %v5306_v41, %v9929_v47  ;;  %v5323_v12 = vmul.f32 %v7832_v23, %v5319_v26  ;;  %v7834_v18 = vpop.eup %7833 }
0x12fc   :  { %v5348_v16 = vadd.f32 %v5344_v29, %v5324_v38  ;;  %v5321_v61 = vmul.f32 %v7834_v18, %v5317_v20 }
0x12fd   :  { %7835 = vtanh.f32 %v5310_v14  ;;  %v5347_v21 = vadd.f32 %v5343_v9, %v5323_v12  ;;  %v5673_v57 = vpop.f32.mrf.mxu0 }
0x12fe   :  { %5352 = vst.msk [vmem:[#allocation3 + $0x18] sm:$0xff] %vm4511_vm5, %v5348_v16  ;;  %v10306_v63 = vpop.permute.xlu0 %5571 }
0x12ff   :  { %5351 = vst.msk [vmem:[#allocation3 + $0x10] sm:$0xff] %vm4511_vm5, %v5347_v21  ;;  %v5415_v50 = vpop.permute.xlu2 %5414 }
0x1300   :  { %v5330_v47 = vpop.permute.xlu1 %5329 }
0x1301   :  { %v5341_v56 = vmul.f32 %v5330_v47, %v5242_v28 }
0x1303   :  { %v7836_v17 = vpop.eup %7835  ;;  %v5345_v11 = vadd.f32 %v5341_v56, %v5321_v61 }
0x1304   :  { %v5322_v32 = vmul.f32 %v7836_v17, %v5318_v59 }
0x1305   :  { %5349 = vst.msk [vmem:[#allocation3] sm:$0xff] %vm4511_vm5, %v5345_v11  ;;  %v5356_v4 = vld [vmem:[#allocation3 + $0x18] sm:$0xff]  ;;  %v5676_v22 = vpop.f32.mrf.mxu0 }
0x1306   :  { %v5346_v44 = vadd.f32 %v5342_v42, %v5322_v32  ;;  %v5355_v0 = vld [vmem:[#allocation3 + $0x10] sm:$0xff]  ;;  %v10308_v15 = vpop.permute.xlu0 %5556  ;;  %v5677_v29 = vadd.f32 %v5676_v22, %v10304_v5 }
0x1307   :  { %v5406_v36 = vpack.c.bf16 %v5356_v4, %v5355_v0  ;;  %v5440_v55 = vpop.permute.xlu2 %5439  ;;  %v5672_v41 = vadd.f32 %v5671_v49, %v10308_v15 }
0x1308   :  { %5350 = vst.msk [vmem:[#allocation3 + $0x8] sm:$0xff] %vm4511_vm5, %v5346_v44  ;;  %v5425_v6 = vpop.permute.xlu1 %5424 }
0x1309   :  { %5521 = vmatpush.bf16.msrb.mxu1 %v5406_v36 }
0x130c   :  { %v5353_v37 = vld [vmem:[#allocation3] sm:$0xff] }
0x130d   :  { %v5678_v24 = vpop.f32.mrf.mxu0 }
0x130e   :  { %v10310_v1 = vpop.permute.xlu0 %5444  ;;  %v5679_v28 = vadd.f32 %v5678_v24, %v10306_v63 }
0x130f   :  { %v5354_v35 = vld [vmem:[#allocation3 + $0x8] sm:$0xff]  ;;  %v10326_v23 = vpop.permute.xlu2 %5591 }
0x1310   :  { %v5405_v34 = vpack.c.bf16 %v5354_v35, %v5353_v37  ;;  %v5410_v33 = vpop.permute.xlu1 %5409 }
0x1312   :  { %5522 = vmatpush.bf16.msrb.mxu1 %v5405_v34 }
0x1315   :  { %6830 = vmatmul.msk.bf16.vlgmr.msrb.gmra.mxu1 %vm170_vm0, %v6989_v7  ;;  %v5681_v10 = vpop.f32.mrf.mxu0 }
0x1316   :  { %v5430_v9 = vpop.permute.xlu0 %5429 }
0x1317   :  { %v10336_v61 = vpop.permute.xlu2 %5576 }
0x1318   :  { %v10312_v30 = vpop.permute.xlu1 %5561  ;;  %v5682_v42 = vadd.f32 %v5681_v10, %v10336_v61 }
0x1319   :  { %v5674_v38 = vadd.f32 %v5673_v57, %v10312_v30 }
0x131d   :  { %v5683_v25 = vpop.f32.mrf.mxu0 }
0x131e   :  { %v10340_v17 = vpop.permute.xlu0 %5581 }
0x131f   :  { %v5684_v4 = vadd.f32 %v5683_v25, %v10340_v17 }
0x1320   :  { %v10331_v40 = vpop.permute.xlu1 %5586 }
0x1325   :  { %6831 = vmatmul.msk.bf16.gmra.mxu1 %vm170_vm0, %v6990_v27  ;;  %v5686_v46 = vpop.f32.mrf.mxu0 }
0x1328   :  { %v5435_v48 = vpop.permute.xlu1 %5434 }
0x132d   :  { %v5688_v51 = vpop.f32.mrf.mxu0 }
0x1335   :  { %6832 = vmatmul.msk.bf16.gmra.mxu1 %vm170_vm0, %v6991_v45  ;;  %v10334_v20 = vpop.f32.mrf.mxu0 }
0x133d   :  { %v5693_v34 = vpop.f32.mrf.mxu0 }
0x1345   :  { %6833 = vmatmul.msk.bf16.gmra.mxu1 %vm170_vm0, %v6992_v53 }
0x1355   :  { %6834 = vmatmul.msk.bf16.gmra.mxu1 %vm170_vm0, %v6993_v3 }
0x1365   :  { %6835 = vmatmul.msk.bf16.gmra.mxu1 %vm170_vm0, %v6994_v54  ;;  %v5687_v54 = vadd.f32 %v5686_v46, %v10331_v40 }
0x1392   :  { %v5524_v58 = vpop.f32.mrf.mxu1 }
0x1393   :  { %v10314_v31 = vadd.f32 %v5524_v58, %v5410_v33  ;;  %v10373_v33 = vpop.permute.xlu0 %5459 }
0x1395   :  { %v5701_v26 = vadd.f32 %v5672_v41, %v10314_v31 }
0x1397   :  { %v6866_v12 = vmul.f32 -1.442695, %v5701_v26 }
0x1399   :  { %7837 = vpow2.f32 %v6866_v12 }
0x139a   :  { %v5526_v60 = vpop.f32.mrf.mxu1 }
0x139b   :  { %v10316_v13 = vadd.f32 %v5526_v60, %v5415_v50  ;;  %v5689_v50 = vadd.f32 %v5688_v51, %v10326_v23 }
0x139d   :  { %v5702_v14 = vadd.f32 %v5674_v38, %v10316_v13 }
0x139f   :  { %v6867_v21 = vmul.f32 -1.442695, %v5702_v14  ;;  %v7838_v11 = vpop.eup %7837 }
0x13a0   :  { %v10347_v37 = vadd.f32 1.0, %v7838_v11  ;;  %v10403_v11 = vpop.permute.xlu0 %5601 }
0x13a1   :  { %7839 = vpow2.f32 %v6867_v21 }
0x13a2   :  { %v5529_v52 = vpop.f32.mrf.mxu1  ;;  %vm5726_vm9 = vweird.f32 %v10347_v37 }
0x13a3   :  { %v10319_v8 = vadd.f32 %v5529_v52, %v5420_v39 }
0x13a5   :  { %v5703_v16 = vadd.f32 %v5677_v29, %v10319_v8 }
0x13a7   :  { %v6868_v62 = vmul.f32 -1.442695, %v5703_v16  ;;  %v7840_v44 = vpop.eup %7839 }
0x13a8   :  { %v10349_v7 = vadd.f32 1.0, %v7840_v44 }
0x13a9   :  { %7841 = vpow2.f32 %v6868_v62 }
0x13aa   :  { %v5531_v43 = vpop.f32.mrf.mxu1  ;;  %vm5741_vm8 = vweird.f32 %v10349_v7 }
0x13ab   :  { %v10324_v2 = vadd.f32 %v5531_v43, %v5425_v6  ;;  %v10368_v6 = vpop.f32.mrf.mxu0 }
0x13ad   :  { %v5704_v19 = vadd.f32 %v5679_v28, %v10324_v2 }
0x13af   :  { %v6869_v47 = vmul.f32 -1.442695, %v5704_v19  ;;  %v7842_v0 = vpop.eup %7841 }
0x13b0   :  { %v10352_v45 = vadd.f32 1.0, %v7842_v0 }
0x13b1   :  { %7843 = vpow2.f32 %v6869_v47 }
0x13b2   :  { %v5534_v18 = vpop.f32.mrf.mxu1  ;;  %7845 = vrcp.f32 %v10347_v37  ;;  %vm5756_vm13 = vweird.f32 %v10352_v45 }
0x13b3   :  { %v10338_v56 = vadd.f32 %v5534_v18, %v5430_v9  ;;  %7847 = vrcp.f32 %v10349_v7  ;;  %v10391_v9 = vpop.permute.xlu1 %5606 }
0x13b4   :  { %7849 = vrcp.f32 %v10352_v45 }
0x13b5   :  { %v5781_v36 = vadd.f32 %v5682_v42, %v10338_v56  ;;  %v5730_v42 = vand.u32 2147483647, %v10347_v37 }
0x13b7   :  { %v7844_v35 = vpop.eup %7843  ;;  %v6870_v53 = vmul.f32 -1.442695, %v5781_v36  ;;  %vm10426_vm10 = vcmp.eq.f32.partialorder %v5730_v42, 8.507059e+37 }
0x13b8   :  { %v10356_v49 = vadd.f32 1.0, %v7844_v35  ;;  %v10364_v10 = vpop.eup %7845 }
0x13b9   :  { %7851 = vpow2.f32 %v6870_v53  ;;  %v10366_v58 = vpop.eup %7847  ;;  %v5722_v43 = vmul.f32 %v10364_v10, %v10347_v37  ;;  %vm5727_vm5 = vweird.f32 %v10364_v10 }
0x13ba   :  { %v5536_v59 = vpop.f32.mrf.mxu1  ;;  %7853 = vrcp.f32 %v10356_v49  ;;  %v10370_v60 = vpop.eup %7849  ;;  %v5737_v26 = vmul.f32 %v10366_v58, %v10349_v7  ;;  %vm5742_vm6 = vweird.f32 %v10366_v58  ;;  %vm10439_vm7 = vmor %vm5726_vm9, %vm5727_vm5  ;;  %vm5771_vm15 = vweird.f32 %v10356_v49 }
0x13bb   :  { %v10343_v32 = vadd.f32 %v5536_v59, %v5435_v48  ;;  %v5723_v16 = vsub.f32 1.0, %v5722_v43  ;;  %v5698_v59 = vpop.f32.mrf.mxu0  ;;  %v5747_v43 = vand.u32 2147483648, %v10349_v7  ;;  %vm5757_vm11 = vweird.f32 %v10370_v60  ;;  %vm10455_vm12 = vmor %vm5741_vm8, %vm5742_vm6 }
0x13bc   :  { %v5738_v62 = vsub.f32 1.0, %v5737_v26  ;;  %vm10468_vm2 = vmor %vm5756_vm13, %vm5757_vm11 }
0x13bd   :  { %v5782_v27 = vadd.f32 %v5684_v4, %v10343_v32  ;;  %v5724_v48 = vmul.f32 %v10364_v10, %v5723_v16  ;;  %v5745_v16 = vand.u32 2147483647, %v10349_v7 }
0x13be   :  { %v5739_v4 = vmul.f32 %v10366_v58, %v5738_v62 }
0x13bf   :  { %v6871_v22 = vmul.f32 -1.442695, %v5782_v27  ;;  %v7852_v52 = vpop.eup %7851  ;;  %v5732_v27 = vand.u32 2147483648, %v10347_v37  ;;  %vm5746_vm3 = vcmp.eq.f32.partialorder %v5745_v16, 8.507059e+37 }
0x13c0   :  { %v10382_v41 = vpop.eup %7853  ;;  %v10397_v18 = vadd.f32 1.0, %v7852_v52  ;;  %v5740_v52 = vadd.f32 %v10366_v58, %v5739_v4 }
0x13c1   :  { %7855 = vpow2.f32 %v6871_v22  ;;  %v5767_v19 = vmul.f32 %v10382_v41, %v10356_v49  ;;  %v5725_v22 = vadd.f32 %v10364_v10, %v5724_v48  ;;  %vm5772_vm14 = vweird.f32 %v10382_v41 }
0x13c2   :  { %v5539_v3 = vpop.f32.mrf.mxu1  ;;  %v5744_v7 = vsel %vm10455_vm12, %v10366_v58, %v5740_v52  ;;  %vm10486_vm4 = vmor %vm5771_vm15, %vm5772_vm14  ;;  %v5812_v42 = vand.u32 2147483648, %v10397_v18 }
0x13c3   :  { %v10358_v57 = vadd.f32 %v5539_v3, %v5440_v55  ;;  %v10378_v55 = vpop.permute.xlu2 %5611  ;;  %v5768_v44 = vsub.f32 1.0, %v5767_v19  ;;  %v5694_v3 = vadd.f32 %v5693_v34, %v10403_v11  ;;  %v5762_v19 = vand.u32 2147483648, %v10352_v45 }
0x13c4   :  { %v10412_v35 = vadd.f32 %v5698_v59, %v10378_v55 }
0x13c5   :  { %v5783_v24 = vadd.f32 %v5687_v54, %v10358_v57 }
0x13c7   :  { %v6872_v39 = vmul.f32 -1.442695, %v5783_v24  ;;  %v7856_v29 = vpop.eup %7855 }
0x13c8   :  { %v10393_v12 = vadd.f32 1.0, %v7856_v29  ;;  %v5733_v29 = vor.u32 1.1754944e-38, %v5732_v27 }
0x13c9   :  { %7857 = vpow2.f32 %v6872_v39 }
0x13ca   :  { %v5541_v25 = vpop.f32.mrf.mxu1 }
0x13cb   :  { %v10376_v46 = vadd.f32 %v5541_v25, %v10310_v1  ;;  %v5752_v1 = vmul.f32 %v10370_v60, %v10352_v45  ;;  %v10407_v0 = vpop.permute.xlu2 %5596  ;;  %v5697_v25 = vadd.f32 %v10368_v6, %v10391_v9 }
0x13cc   :  { %v5692_v39 = vadd.f32 %v10334_v20, %v10407_v0  ;;  %v10437_v20 = vpop.permute.xlu1 %5464 }
0x13cd   :  { %v5784_v38 = vadd.f32 %v5689_v50, %v10376_v46  ;;  %v5753_v47 = vsub.f32 1.0, %v5752_v1  ;;  %v5769_v50 = vmul.f32 %v10382_v41, %v5768_v44  ;;  %v5729_v1 = vsel %vm10439_vm7, %v10364_v10, %v5725_v22 }
0x13ce   :  { %v5748_v10 = vor.u32 1.1754944e-38, %v5747_v43  ;;  %v5777_v44 = vand.u32 2147483648, %v10356_v49  ;;  %v5763_v22 = vor.u32 1.1754944e-38, %v5762_v19  ;;  %vm5821_vm7 = vweird.f32 %v10393_v12 }
0x13cf   :  { %v7858_v51 = vpop.eup %7857  ;;  %v6873_v14 = vmul.f32 -1.442695, %v5784_v38  ;;  %v5754_v53 = vmul.f32 %v10370_v60, %v5753_v47  ;;  %v5760_v47 = vand.u32 2147483647, %v10352_v45  ;;  %v5770_v59 = vadd.f32 %v10382_v41, %v5769_v50 }
0x13d0   :  { %v10389_v28 = vadd.f32 1.0, %v7858_v51  ;;  %v5749_v52 = vsel %vm5746_vm3, %v5748_v10, %v5744_v7 }
0x13d1   :  { %7859 = vpow2.f32 %v6873_v14  ;;  %v5755_v26 = vadd.f32 %v10370_v60, %v5754_v53  ;;  %v5734_v53 = vsel %vm10426_vm10, %v5733_v29, %v5729_v1  ;;  %vm5761_vm5 = vcmp.eq.f32.partialorder %v5760_v47, 8.507059e+37 }
0x13d2   :  { %v10399_v21 = vpop.f32.mrf.mxu1  ;;  %7861 = vrcp.f32 %v10389_v28  ;;  %v5861_v47 = vmul.f32 %v5734_v53, %v5692_v39  ;;  %v5862_v7 = vmul.f32 %v5749_v52, %v5694_v3  ;;  %vm5806_vm10 = vweird.f32 %v10397_v18 }
0x13d3   :  { %7863 = vrcp.f32 %v10393_v12  ;;  %v5759_v4 = vsel %vm10468_vm2, %v10370_v60, %v5755_v26  ;;  %v5778_v26 = vor.u32 1.1754944e-38, %v5777_v44  ;;  %v5455_v19 = vpop.permute.xlu2 %5454  ;;  %vm5836_vm12 = vweird.f32 %v10389_v28 }
0x13d4   :  { %7865 = vrcp.f32 %v10397_v18  ;;  %v5764_v29 = vsel %vm5761_vm5, %v5763_v22, %v5759_v4 }
0x13d5   :  { %v5863_v6 = vmul.f32 %v5764_v29, %v5697_v25  ;;  %v7926_v29 = vld [vmem:[%s10030_s9 + $0x18] sm:$0xff] }
0x13d7   :  { %v7860_v36 = vpop.eup %7859 }
0x13d8   :  { %v10417_v54 = vadd.f32 1.0, %v7860_v36  ;;  %v10421_v24 = vpop.eup %7861  ;;  %v5775_v36 = vand.u32 2147483647, %v10356_v49  ;;  %v5774_v49 = vsel %vm10486_vm4, %v10382_v41, %v5770_v59  ;;  %v5450_v41 = vpop.permute.xlu1 %5449 }
0x13d9   :  { %v10435_v38 = vpop.eup %7863  ;;  %v5832_v14 = vmul.f32 %v10421_v24, %v10389_v28  ;;  %v10508_v44 = vadd.f32 %v10399_v21, %v5450_v41  ;;  %vm5837_vm8 = vweird.f32 %v10421_v24  ;;  %v5827_v21 = vand.u32 2147483648, %v10393_v12 }
0x13da   :  { %7867 = vrcp.f32 %v10417_v54  ;;  %v5546_v34 = vpop.f32.mrf.mxu1  ;;  %v10446_v51 = vpop.eup %7865  ;;  %v5817_v48 = vmul.f32 %v10435_v38, %v10393_v12  ;;  %vm5776_vm9 = vcmp.eq.f32.partialorder %v5775_v36, 8.507059e+37  ;;  %vm5822_vm11 = vweird.f32 %v10435_v38  ;;  %vm10529_vm14 = vmor %vm5836_vm12, %vm5837_vm8 }
0x13db   :  { %v5802_v45 = vmul.f32 %v10446_v51, %v10397_v18  ;;  %v5833_v58 = vsub.f32 1.0, %v5832_v14  ;;  %v5779_v10 = vsel %vm5776_vm9, %v5778_v26, %v5774_v49  ;;  %v10501_v59 = vadd.f32 %v5546_v34, %v5455_v19  ;;  %vm10546_vm15 = vmor %vm5821_vm7, %vm5822_vm11 }
0x13dc   :  { %v5818_v43 = vsub.f32 1.0, %v5817_v48  ;;  %v5810_v48 = vand.u32 2147483647, %v10397_v18  ;;  %vm5807_vm6 = vweird.f32 %v10446_v51  ;;  %v5864_v34 = vmul.f32 %v5779_v10, %v10412_v35 }
0x13dd   :  { %v5803_v14 = vsub.f32 1.0, %v5802_v45  ;;  %v5834_v62 = vmul.f32 %v10421_v24, %v5833_v58  ;;  %v5842_v36 = vand.u32 2147483648, %v10389_v28  ;;  %v5866_v58 = vadd.f32 %v5862_v7, %v10501_v59  ;;  %vm5808_vm5 = vmor %vm5806_vm10, %vm5807_vm6 }
0x13de   :  { %v5819_v3 = vmul.f32 %v10435_v38, %v5818_v43  ;;  %v5840_v35 = vand.u32 2147483647, %v10389_v28  ;;  %v5865_v53 = vadd.f32 %v5861_v47, %v10508_v44  ;;  %v5857_v52 = vand.u32 2147483648, %v10417_v54 }
0x13df   :  { %v5804_v45 = vmul.f32 %v10446_v51, %v5803_v14  ;;  %v5835_v4 = vadd.f32 %v10421_v24, %v5834_v62  ;;  %vm5851_vm2 = vweird.f32 %v10417_v54  ;;  %v5843_v26 = vor.u32 1.1754944e-38, %v5842_v36 }
0x13e0   :  { %v10480_v27 = vpop.eup %7867  ;;  %vm5841_vm4 = vcmp.eq.f32.partialorder %v5840_v35, 8.507059e+37  ;;  %v5858_v62 = vor.u32 1.1754944e-38, %v5857_v52  ;;  %v5813_v7 = vor.u32 1.1754944e-38, %v5812_v42  ;;  %vm5811_vm8 = vcmp.eq.f32.partialorder %v5810_v48, 8.507059e+37 }
0x13e1   :  { %v5847_v60 = vmul.f32 %v10480_v27, %v10417_v54  ;;  %vm5852_vm13 = vweird.f32 %v10480_v27  ;;  %v5805_v28 = vadd.f32 %v10446_v51, %v5804_v45  ;;  %v5839_v43 = vsel %vm10529_vm14, %v10421_v24, %v5835_v4 }
0x13e2   :  { %v5549_v37 = vpop.f32.mrf.mxu1  ;;  %vm10551_vm3 = vmor %vm5851_vm2, %vm5852_vm13  ;;  %v5844_v19 = vsel %vm5841_vm4, %v5843_v26, %v5839_v43  ;;  %v7924_v43 = vld [vmem:[%s10030_s9 + $0x8] sm:$0xff] }
0x13e3   :  { %v5848_v1 = vsub.f32 1.0, %v5847_v60  ;;  %v10498_v16 = vadd.f32 %v5549_v37, %v10373_v33  ;;  %v5820_v60 = vadd.f32 %v10435_v38, %v5819_v3  ;;  %v5855_v37 = vand.u32 2147483647, %v10417_v54  ;;  %v7928_v26 = vld [vmem:[%s10030_s9 + $0x28] sm:$0xff] }
0x13e4   :  { %v5809_v47 = vsel %vm5808_vm5, %v10446_v51, %v5805_v28  ;;  %v5883_v36 = vmul.f32 0.0, %v5844_v19  ;;  %v7923_v28 = vld [vmem:[%s10030_s9] sm:$0xff] }
0x13e5   :  { %v5849_v33 = vmul.f32 %v10480_v27, %v5848_v1  ;;  %v5867_v39 = vadd.f32 %v5863_v6, %v10498_v16  ;;  %v5828_v1 = vor.u32 1.1754944e-38, %v5827_v21  ;;  %vm5856_vm9 = vcmp.eq.f32.partialorder %v5855_v37, 8.507059e+37  ;;  %v7925_v37 = vld [vmem:[%s10030_s9 + $0x10] sm:$0xff] }
0x13e6   :  { %v5875_v6 = vsub.f32 1.0, %v5844_v19 }
0x13e7   :  { %v5850_v50 = vadd.f32 %v10480_v27, %v5849_v33  ;;  %7869 = vtanh.f32 %v5867_v39  ;;  %v5814_v33 = vsel %vm5811_vm8, %v5813_v7, %v5809_v47 }
0x13e8   :  { %7871 = vtanh.f32 %v5866_v58  ;;  %v5873_v4 = vsub.f32 1.0, %v5814_v33 }
0x13e9   :  { %7873 = vtanh.f32 %v5865_v53  ;;  %v5854_v54 = vsel %vm10551_vm3, %v10480_v27, %v5850_v50  ;;  %v5881_v50 = vmul.f32 0.0, %v5814_v33 }
0x13ea   :  { %v5551_v22 = vpop.f32.mrf.mxu1  ;;  %v5859_v41 = vsel %vm5856_vm9, %v5858_v62, %v5854_v54 }
0x13eb   :  { %v10534_v25 = vadd.f32 %v5551_v22, %v10437_v20  ;;  %v5825_v20 = vand.u32 2147483647, %v10393_v12  ;;  %v5824_v12 = vsel %vm10546_vm15, %v10435_v38, %v5820_v60  ;;  %v5884_v51 = vmul.f32 0.0, %v5859_v41 }
0x13ed   :  { %v5868_v24 = vadd.f32 %v5864_v34, %v10534_v25  ;;  %vm5826_vm7 = vcmp.eq.f32.partialorder %v5825_v20, 8.507059e+37  ;;  %v7870_v10 = vpop.eup %7869  ;;  %v5876_v34 = vsub.f32 1.0, %v5859_v41  ;;  %v7927_v20 = vld [vmem:[%s10030_s9 + $0x20] sm:$0xff] }
0x13ee   :  { %v5829_v27 = vsel %vm5826_vm7, %v5828_v1, %v5824_v12  ;;  %v7872_v18 = vpop.eup %7871  ;;  %v5879_v39 = vmul.f32 %v7870_v10, %v5875_v6 }
0x13ef   :  { %7875 = vtanh.f32 %v5868_v24  ;;  %v7874_v3 = vpop.eup %7873  ;;  %v5874_v45 = vsub.f32 1.0, %v5829_v27  ;;  %v5882_v53 = vmul.f32 0.0, %v5829_v27 }
0x13f0   :  { %v5887_v58 = vadd.f32 %v5883_v36, %v5879_v39  ;;  %v5877_v48 = vmul.f32 %v7874_v3, %v5873_v4 }
0x13f1   :  { %v5878_v42 = vmul.f32 %v7872_v18, %v5874_v45 }
0x13f2   :  { %v5885_v52 = vadd.f32 %v5881_v50, %v5877_v48 }
0x13f3   :  { %v5886_v60 = vadd.f32 %v5882_v53, %v5878_v42 }
0x13f5   :  { %v7876_v38 = vpop.eup %7875  ;;  %v5889_v49 = vpack.c.bf16 %v5886_v60, %v5885_v52 }
0x13f6   :  { %v5880_v21 = vmul.f32 %v7876_v38, %v5876_v34 }
0x13f8   :  { %v5888_v35 = vadd.f32 %v5884_v51, %v5880_v21 }
0x13fa   :  { %v5890_v22 = vpack.c.bf16 %v5888_v35, %v5887_v58 }
0x13fc   :  { %5897 = vmatpush.bf16.msra.mxu3 %v5890_v22 }
0x1400   :  { %5898 = vmatpush.bf16.msra.mxu3 %v5889_v49 }
0x1403   :  { %6874 = vmatmul.msk.bf16.vlgmr.msra.gmra.mxu3 %vm170_vm0, %v7923_v28 }
0x1413   :  { %6875 = vmatmul.msk.bf16.gmra.mxu3 %vm170_vm0, %v7924_v43 }
0x1423   :  { %6876 = vmatmul.msk.bf16.gmra.mxu3 %vm170_vm0, %v7925_v37 }
0x1433   :  { %6877 = vmatmul.msk.bf16.gmra.mxu3 %vm170_vm0, %v7926_v29 }
0x1443   :  { %6878 = vmatmul.msk.bf16.gmra.mxu3 %vm170_vm0, %v7927_v20 }
0x1453   :  { %6879 = vmatmul.msk.bf16.gmra.mxu3 %vm170_vm0, %v7928_v26 }
0x1486   :  { %v5900_v14 = vpop.f32.mrf.mxu3 }
0x1487   :  { %v5901_v24 = vadd.f32 %v5900_v14, %v10308_v15 }
0x1489   :  { %5934 = vrot.lane.b32.xlu2 %v5901_v24, %s10830_s23 }
0x148e   :  { %v5902_v1 = vpop.f32.mrf.mxu3 }
0x148f   :  { %v5903_v62 = vadd.f32 %v5902_v1, %v10312_v30 }
0x1496   :  { %v5905_v54 = vpop.f32.mrf.mxu3 }
0x1497   :  { %v5906_v12 = vadd.f32 %v5905_v54, %v10304_v5 }
0x1499   :  { %5938 = vrot.lane.b32.xlu0 %v5906_v12, %s10830_s23 }
0x149e   :  { %v5907_v19 = vpop.f32.mrf.mxu3 }
0x149f   :  { %v5908_v47 = vadd.f32 %v5907_v19, %v10306_v63 }
0x14a1   :  { %5940 = vrot.lane.b32.xlu1 %v5908_v47, %s10830_s23  ;;  %5936 = vrot.lane.b32.xlu0 %v5903_v62, %s10830_s23 }
0x14a6   :  { %v5910_v7 = vpop.f32.mrf.mxu3 }
0x14a7   :  { %v5911_v15 = vadd.f32 %v5910_v7, %v10336_v61 }
0x14a9   :  { %6030 = vrot.lane.b32.xlu0 %v5911_v15, %s10830_s23 }
0x14ae   :  { %v5912_v10 = vpop.f32.mrf.mxu3 }
0x14af   :  { %v5913_v30 = vadd.f32 %v5912_v10, %v10340_v17 }
0x14b6   :  { %v5915_v41 = vpop.f32.mrf.mxu3 }
0x14b7   :  { %v5916_v5 = vadd.f32 %v5915_v41, %v10331_v40 }
0x14b9   :  { %6034 = vrot.lane.b32.xlu1 %v5916_v5, %s10830_s23 }
0x14be   :  { %v5917_v27 = vpop.f32.mrf.mxu3 }
0x14bf   :  { %v5918_v63 = vadd.f32 %v5917_v27, %v10326_v23 }
0x14c1   :  { %6032 = vrot.lane.b32.xlu1 %v5913_v30, %s10830_s23  ;;  %6036 = vrot.lane.b32.xlu2 %v5918_v63, %s10830_s23 }
0x14c6   :  { %v5920_v6 = vpop.f32.mrf.mxu3 }
0x14c7   :  { %v5921_v61 = vadd.f32 %v5920_v6, %v10407_v0 }
0x14c9   :  { %6126 = vrot.lane.b32.xlu1 %v5921_v61, %s10830_s23 }
0x14ce   :  { %v5922_v33 = vpop.f32.mrf.mxu3 }
0x14cf   :  { %v5923_v23 = vadd.f32 %v5922_v33, %v10403_v11 }
0x14d1   :  { %6168 = vrot.lane.b32.xlu1 %v5888_v35, %s10830_s23 }
0x14d6   :  { %v5925_v40 = vpop.f32.mrf.mxu3 }
0x14d7   :  { %v5926_v18 = vadd.f32 %v5925_v40, %v10391_v9  ;;  %v6184_v9 = vld [vmem:[%s10609_s3] sm:$0xff] }
0x14d9   :  { %6130 = vrot.lane.b32.xlu2 %v5926_v18, %s10830_s23 }
0x14de   :  { %v5927_v17 = vpop.f32.mrf.mxu3 }
0x14df   :  { %v5928_v3 = vadd.f32 %v5927_v17, %v10378_v55 }
0x14e1   :  { %6132 = vrot.lane.b32.xlu0 %v5928_v3, %s10830_s23  ;;  %6128 = vrot.lane.b32.xlu2 %v5923_v23, %s10830_s23 }
0x14e3   :  { %v5935_v55 = vpop.permute.xlu2 %5934 }
0x14e4   :  { %v5946_v11 = vadd.f32 %v5935_v55, %v10314_v31 }
0x14e6   :  { %v6880_v39 = vmul.f32 -1.442695, %v5946_v11 }
0x14e8   :  { %7877 = vpow2.f32 %v6880_v39 }
0x14e9   :  { %6166 = vrot.lane.b32.xlu0 %v5887_v58, %s10830_s23  ;;  %6162 = vrot.lane.b32.xlu2 %v5885_v52, %s10830_s23 }
0x14ee   :  { %v7878_v4 = vpop.eup %7877 }
0x14ef   :  { %v10617_v42 = vadd.f32 1.0, %v7878_v4 }
0x14f1   :  { %6164 = vrot.lane.b32.xlu0 %v5886_v60, %s10830_s23  ;;  %v5977_v6 = vand.u32 2147483648, %v10617_v42  ;;  %vm5971_vm6 = vweird.f32 %v10617_v42  ;;  %v5975_v33 = vand.u32 2147483647, %v10617_v42  ;;  %s7985_s23 = smov 37  }
0x14f2   :  { %s6270_s27 = sld [smem:[%s10814_s0 + %s7985_s23]]  }
0x14f3   :  { %v5978_v55 = vor.u32 1.1754944e-38, %v5977_v6  ;;  %vm5976_vm12 = vcmp.eq.f32.partialorder %v5975_v33, 8.507059e+37 }
0x14f9   :  { %6190 = vperm.xlu0 %7064, %v6184_v9  }
0x150b   :  { %v5939_v0 = vpop.permute.xlu0 %5938 }
0x150c   :  { %v5948_v34 = vadd.f32 %v5939_v0, %v10319_v8 }
0x150e   :  { %v6882_v21 = vmul.f32 -1.442695, %v5948_v34 }
0x1510   :  { %7879 = vpow2.f32 %v6882_v21 }
0x1511   :  { %7881 = vrcp.f32 %v10617_v42 }
0x1513   :  { %v5941_v45 = vpop.permute.xlu1 %5940  ;;  %v5937_v38 = vpop.permute.xlu0 %5936 }
0x1514   :  { %v5949_v36 = vadd.f32 %v5941_v45, %v10324_v2  ;;  %v5947_v51 = vadd.f32 %v5937_v38, %v10316_v13 }
0x1516   :  { %v6883_v58 = vmul.f32 -1.442695, %v5949_v36  ;;  %v6881_v35 = vmul.f32 -1.442695, %v5947_v51  ;;  %v7880_v53 = vpop.eup %7879 }
0x1517   :  { %v7882_v60 = vpop.eup %7881  ;;  %v10623_v52 = vadd.f32 1.0, %v7880_v53 }
0x1518   :  { %7883 = vpow2.f32 %v6883_v58  ;;  %vm5972_vm10 = vweird.f32 %v7882_v60 }
0x1519   :  { %7885 = vpow2.f32 %v6881_v35  ;;  %vm5973_vm11 = vmor %vm5971_vm6, %vm5972_vm10  ;;  %v6005_v9 = vand.u32 2147483647, %v10623_v52  ;;  %v6007_v34 = vand.u32 2147483648, %v10623_v52  ;;  %vm6001_vm14 = vweird.f32 %v10623_v52 }
0x151b   :  { %v6037_v48 = vpop.permute.xlu2 %6036  ;;  %v6031_v31 = vpop.permute.xlu0 %6030  ;;  %vm10680_vm2 = vcmp.eq.f32.partialorder %v6005_v9, 8.507059e+37 }
0x151c   :  { %v6045_v8 = vadd.f32 %v6037_v48, %v10376_v46  ;;  %v6042_v22 = vadd.f32 %v6031_v31, %v10338_v56 }
0x151e   :  { %v6887_v13 = vmul.f32 -1.442695, %v6045_v8  ;;  %v7884_v28 = vpop.eup %7883  ;;  %v6884_v43 = vmul.f32 -1.442695, %v6042_v22 }
0x151f   :  { %v7886_v37 = vpop.eup %7885  ;;  %v10626_v46 = vadd.f32 1.0, %v7884_v28 }
0x1520   :  { %v10628_v29 = vadd.f32 1.0, %v7886_v37 }
0x1521   :  { %v6020_v35 = vand.u32 2147483647, %v10626_v46  ;;  %v6022_v8 = vand.u32 2147483648, %v10626_v46  ;;  %vm6016_vm3 = vweird.f32 %v10626_v46 }
0x1522   :  { %v5990_v48 = vand.u32 2147483647, %v10628_v29  ;;  %vm5986_vm5 = vweird.f32 %v10628_v29 }
0x1523   :  { %vm10706_vm7 = vcmp.eq.f32.partialorder %v6020_v35, 8.507059e+37 }
0x1524   :  { %vm10710_vm8 = vcmp.eq.f32.partialorder %v5990_v48, 8.507059e+37 }
0x152b   :  { %v6035_v50 = vpop.permute.xlu1 %6034 }
0x152c   :  { %v6044_v2 = vadd.f32 %v6035_v50, %v10358_v57  ;;  %v5967_v57 = vmul.f32 %v7882_v60, %v10617_v42  ;;  %v6008_v50 = vor.u32 1.1754944e-38, %v6007_v34 }
0x152e   :  { %v6886_v49 = vmul.f32 -1.442695, %v6044_v2  ;;  %v5968_v1 = vsub.f32 1.0, %v5967_v57  ;;  %v5992_v2 = vand.u32 2147483648, %v10628_v29  ;;  %v6023_v57 = vor.u32 1.1754944e-38, %v6022_v8 }
0x1530   :  { %7887 = vpow2.f32 %v6886_v49 }
0x1531   :  { %7889 = vpow2.f32 %v6887_v13 }
0x1532   :  { %7891 = vrcp.f32 %v10623_v52 }
0x1533   :  { %7893 = vpow2.f32 %v6884_v43  ;;  %v6033_v56 = vpop.permute.xlu1 %6032  ;;  %v6131_v42 = vpop.permute.xlu2 %6130 }
0x1534   :  { %v6043_v20 = vadd.f32 %v6033_v56, %v10343_v32  ;;  %7895 = vrcp.f32 %v10626_v46  ;;  %v5969_v32 = vmul.f32 %v7882_v60, %v5968_v1 }
0x1535   :  { %7897 = vrcp.f32 %v10628_v29 }
0x1536   :  { %v7888_v26 = vpop.eup %7887  ;;  %v6885_v14 = vmul.f32 -1.442695, %v6043_v20  ;;  %v5970_v30 = vadd.f32 %v7882_v60, %v5969_v32 }
0x1537   :  { %v7890_v24 = vpop.eup %7889  ;;  %v10636_v12 = vadd.f32 1.0, %v7888_v26 }
0x1538   :  { %v10634_v54 = vpop.eup %7891  ;;  %7899 = vpow2.f32 %v6885_v14  ;;  %v10638_v62 = vadd.f32 1.0, %v7890_v24  ;;  %v5974_v17 = vsel %vm5973_vm11, %v7882_v60, %v5970_v30  ;;  %v5993_v24 = vor.u32 1.1754944e-38, %v5992_v2 }
0x1539   :  { %v7894_v19 = vpop.eup %7893  ;;  %v5997_v47 = vmul.f32 %v10634_v54, %v10623_v52  ;;  %7901 = vrcp.f32 %v10636_v12  ;;  %v5979_v45 = vsel %vm5976_vm12, %v5978_v55, %v5974_v17  ;;  %vm6002_vm13 = vweird.f32 %v10634_v54 }
0x153a   :  { %v10642_v7 = vpop.eup %7895  ;;  %v10644_v15 = vadd.f32 1.0, %v7894_v19  ;;  %7903 = vrcp.f32 %v10638_v62  ;;  %vm10690_vm15 = vmor %vm6001_vm14, %vm6002_vm13  ;;  %vm6112_vm12 = vweird.f32 %v10638_v62  ;;  %v6116_v30 = vand.u32 2147483647, %v10638_v62 }
0x153b   :  { %v10647_v10 = vpop.eup %7897  ;;  %v5998_v27 = vsub.f32 1.0, %v5997_v47  ;;  %v6012_v63 = vmul.f32 %v10642_v7, %v10626_v46  ;;  %vm6017_vm4 = vweird.f32 %v10642_v7  ;;  %v6127_v14 = vpop.permute.xlu1 %6126 }
0x153c   :  { %7905 = vrcp.f32 %v10644_v15  ;;  %v5982_v61 = vmul.f32 %v10647_v10, %v10628_v29  ;;  %vm5987_vm9 = vweird.f32 %v10647_v10  ;;  %v6071_v29 = vand.u32 2147483647, %v10644_v15  ;;  %vm10720_vm10 = vmor %vm6016_vm3, %vm6017_vm4 }
0x153d   :  { %v5999_v18 = vmul.f32 %v10634_v54, %v5998_v27  ;;  %v6013_v23 = vsub.f32 1.0, %v6012_v63  ;;  %vm10724_vm6 = vmor %vm5986_vm5, %vm5987_vm9  ;;  %vm6067_vm11 = vweird.f32 %v10644_v15  ;;  %v6118_v63 = vand.u32 2147483648, %v10638_v62 }
0x153e   :  { %v7900_v41 = vpop.eup %7899  ;;  %v5983_v11 = vsub.f32 1.0, %v5982_v61  ;;  %v6138_v6 = vmul.f32 %v6127_v14, %v5979_v45 }
0x153f   :  { %v10650_v5 = vadd.f32 1.0, %v7900_v41  ;;  %v10661_v40 = vpop.eup %7901  ;;  %v6000_v4 = vadd.f32 %v10634_v54, %v5999_v18  ;;  %v6014_v36 = vmul.f32 %v10642_v7, %v6013_v23  ;;  %v6073_v41 = vand.u32 2147483648, %v10644_v15  ;;  %v6129_v18 = vpop.permute.xlu2 %6128 }
0x1540   :  { %v10664_v3 = vpop.eup %7903  ;;  %v6093_v0 = vmul.f32 %v10661_v40, %v10636_v12  ;;  %v5984_v58 = vmul.f32 %v10647_v10, %v5983_v11  ;;  %vm6098_vm13 = vweird.f32 %v10661_v40  ;;  %v6101_v11 = vand.u32 2147483647, %v10636_v12 }
0x1541   :  { %7907 = vrcp.f32 %v10650_v5  ;;  %v6108_v21 = vmul.f32 %v10664_v3, %v10638_v62  ;;  %v6004_v60 = vsel %vm10690_vm15, %v10634_v54, %v6000_v4  ;;  %v6015_v49 = vadd.f32 %v10642_v7, %v6014_v36 }
0x1542   :  { %v10669_v39 = vpop.eup %7905  ;;  %v6094_v53 = vsub.f32 1.0, %v6093_v0  ;;  %v5985_v28 = vadd.f32 %v10647_v10, %v5984_v58  ;;  %v6009_v26 = vsel %vm10680_vm2, %v6008_v50, %v6004_v60  ;;  %vm6113_vm14 = vweird.f32 %v10664_v3 }
0x1543   :  { %v6063_v31 = vmul.f32 %v10669_v39, %v10644_v15  ;;  %v6109_v52 = vsub.f32 1.0, %v6108_v21  ;;  %v6140_v19 = vmul.f32 %v6131_v42, %v6009_v26  ;;  %v6019_v46 = vsel %vm10720_vm10, %v10642_v7, %v6015_v49  ;;  %vm10770_vm4 = vmor %vm6112_vm12, %vm6113_vm14 }
0x1544   :  { %v6095_v20 = vmul.f32 %v10661_v40, %v6094_v53  ;;  %v5989_v27 = vsel %vm10724_vm6, %v10647_v10, %v5985_v28  ;;  %v6024_v7 = vsel %vm10706_vm7, %v6023_v57, %v6019_v46  ;;  %v6103_v10 = vand.u32 2147483648, %v10636_v12 }
0x1545   :  { %v6064_v56 = vsub.f32 1.0, %v6063_v31  ;;  %v6110_v32 = vmul.f32 %v10664_v3, %v6109_v52  ;;  %v6144_v23 = vadd.f32 %v6140_v19, %v10498_v16  ;;  %vm6097_vm2 = vweird.f32 %v10636_v12 }
0x1546   :  { %v6096_v33 = vadd.f32 %v10661_v40, %v6095_v20  ;;  %v5994_v0 = vsel %vm10710_vm8, %v5993_v24, %v5989_v27  ;;  %v6119_v34 = vor.u32 1.1754944e-38, %v6118_v63  ;;  %vm6068_vm15 = vweird.f32 %v10669_v39  ;;  %vm10757_vm3 = vmor %vm6097_vm2, %vm6098_vm13  ;;  %v6185_v63 = vld [vmem:[%s10609_s3 + $0x8] sm:$0xff] }
0x1547   :  { %v10672_v38 = vpop.eup %7907  ;;  %v6065_v61 = vmul.f32 %v10669_v39, %v6064_v56  ;;  %v6111_v9 = vadd.f32 %v10664_v3, %v6110_v32  ;;  %v6142_v16 = vadd.f32 %v6138_v6, %v10508_v44  ;;  %v6139_v21 = vmul.f32 %v6129_v18, %v5994_v0  ;;  %vm10785_vm7 = vmor %vm6067_vm11, %vm6068_vm15 }
0x1548   :  { %v6078_v13 = vmul.f32 %v10672_v38, %v10650_v5  ;;  %v6100_v12 = vsel %vm10757_vm3, %v10661_v40, %v6096_v33  ;;  %v6104_v58 = vor.u32 1.1754944e-38, %v6103_v10  ;;  %vm6083_vm5 = vweird.f32 %v10672_v38  ;;  %v7001_v33 = vld [vmem:[%s6270_s27] sm:$0xff] }
0x1549   :  { %v6066_v36 = vadd.f32 %v10669_v39, %v6065_v61  ;;  %7909 = vtanh.f32 %v6144_v23  ;;  %v6115_v40 = vsel %vm10770_vm4, %v10664_v3, %v6111_v9  ;;  %vm6102_vm9 = vcmp.eq.f32.partialorder %v6101_v11, 8.507059e+37 }
0x154a   :  { %v6079_v54 = vsub.f32 1.0, %v6078_v13  ;;  %v6088_v35 = vand.u32 2147483648, %v10650_v5  ;;  %vm6082_vm8 = vweird.f32 %v10650_v5  ;;  %v6086_v48 = vand.u32 2147483647, %v10650_v5 }
0x154b   :  { %v6143_v3 = vadd.f32 %v6139_v21, %v10501_v59  ;;  %vm6117_vm10 = vcmp.eq.f32.partialorder %v6116_v30, 8.507059e+37  ;;  %v6070_v31 = vsel %vm10785_vm7, %v10669_v39, %v6066_v36  ;;  %vm10795_vm6 = vmor %vm6082_vm8, %vm6083_vm5  ;;  %v6074_v53 = vor.u32 1.1754944e-38, %v6073_v41  ;;  %v6169_v59 = vpop.permute.xlu1 %6168 }
0x154c   :  { %v6080_v17 = vmul.f32 %v10672_v38, %v6079_v54  ;;  %v6120_v8 = vsel %vm6117_vm10, %v6119_v34, %v6115_v40  ;;  %vm6072_vm11 = vcmp.eq.f32.partialorder %v6071_v29, 8.507059e+37  ;;  %v6089_v2 = vor.u32 1.1754944e-38, %v6088_v35 }
0x154d   :  { %v6075_v13 = vsel %vm6072_vm11, %v6074_v53, %v6070_v31  ;;  %vm6087_vm12 = vcmp.eq.f32.partialorder %v6086_v48, 8.507059e+37  ;;  %v6153_v39 = vsub.f32 1.0, %v6120_v8  ;;  %v6177_v37 = vmul.f32 %v6169_v59, %v6120_v8 }
0x154e   :  { %v6081_v44 = vadd.f32 %v10672_v38, %v6080_v17  ;;  %v6150_v20 = vsub.f32 1.0, %v6075_v13 }
0x154f   :  { %v7910_v60 = vpop.eup %7909 }
0x1550   :  { %v6085_v22 = vsel %vm10795_vm6, %v10672_v38, %v6081_v44  ;;  %v6163_v38 = vpop.permute.xlu2 %6162 }
0x1551   :  { %v6090_v49 = vsel %vm6087_vm12, %v6089_v2, %v6085_v22  ;;  %v6174_v47 = vmul.f32 %v6163_v38, %v6075_v13 }
0x1552   :  { %v6151_v26 = vsub.f32 1.0, %v6090_v49 }
0x1553   :  { %v6133_v55 = vpop.permute.xlu0 %6132 }
0x1554   :  { %v6141_v45 = vmul.f32 %v6133_v55, %v6024_v7 }
0x1556   :  { %v6145_v42 = vadd.f32 %v6141_v45, %v10534_v25  ;;  %v6105_v25 = vsel %vm6102_vm9, %v6104_v58, %v6100_v12 }
0x1557   :  { %v6152_v5 = vsub.f32 1.0, %v6105_v25 }
0x1558   :  { %7911 = vtanh.f32 %v6145_v42 }
0x1559   :  { %7913 = vtanh.f32 %v6142_v16  ;;  %v6156_v56 = vmul.f32 %v7910_v60, %v6152_v5 }
0x155a   :  { %7915 = vtanh.f32 %v6143_v3 }
0x155b   :  { %v6167_v50 = vpop.permute.xlu0 %6166 }
0x155c   :  { %v6176_v52 = vmul.f32 %v6167_v50, %v6105_v25 }
0x155e   :  { %v7912_v28 = vpop.eup %7911  ;;  %v6180_v14 = vadd.f32 %v6176_v52, %v6156_v56 }
0x155f   :  { %v7914_v43 = vpop.eup %7913  ;;  %v6157_v57 = vmul.f32 %v7912_v28, %v6153_v39 }
0x1560   :  { %v6154_v29 = vmul.f32 %v7914_v43, %v6150_v20  ;;  %v7916_v1 = vpop.eup %7915 }
0x1561   :  { %v6181_v24 = vadd.f32 %v6177_v37, %v6157_v57  ;;  %v6155_v32 = vmul.f32 %v7916_v1, %v6151_v26 }
0x1562   :  { %v6178_v46 = vadd.f32 %v6174_v47, %v6154_v29 }
0x1563   :  { %v6187_v54 = vpack.c.bf16 %v6181_v24, %v6180_v14  ;;  %v6165_v19 = vpop.permute.xlu0 %6164 }
0x1564   :  { %v6175_v41 = vmul.f32 %v6165_v19, %v6090_v49 }
0x1565   :  { %6207 = vrot.lane.b32.xlu1 %v6187_v54, %s7943_s20 }
0x1566   :  { %v6179_v27 = vadd.f32 %v6175_v41, %v6155_v32 }
0x1568   :  { %v6186_v30 = vpack.c.bf16 %v6179_v27, %v6178_v46 }
0x156a   :  { %6205 = vrot.lane.b32.xlu2 %v6186_v30, %s7943_s20 }
0x156b   :  { %v6191_v18 = vpop.permute.xlu0 %6190 }
0x156d   :  { %6195 = vperm.xlu1 %7065, %v6185_v63  }
0x15c4   :  { %v6206_v61 = vpop.permute.xlu2 %6205 }
0x15d7   :  { %v6208_v6 = vpop.permute.xlu1 %6207 }
0x15d8   :  { %6220 = vmatpush.bf16.msrb.mxu2 %v6208_v6 }
0x15dc   :  { %6221 = vmatpush.bf16.msrb.mxu2 %v6206_v61 }
0x15df   :  { %6892 = vmatmul.msk.bf16.vlgmr.msrb.gmra.mxu2 %vm170_vm0, %v7001_v33  ;;  %v6196_v17 = vpop.permute.xlu1 %6195 }
0x1662   :  { %v6223_v7 = vpop.f32.mrf.mxu2 }
0x1663   :  { %v6224_v10 = vadd.f32 %v6223_v7, %v6191_v18 }
0x1665   :  { %6228 = vst.msk [vmem:[%s6272_s29] sm:$0xff] %vm3667_vm1, %v6224_v10 }
0x166a   :  { %v6225_v23 = vpop.f32.mrf.mxu2 }
0x166b   :  { %v6226_v9 = vadd.f32 %v6225_v23, %v6196_v17 }
0x166d   :  { %6229 = vst.msk [vmem:[%s6272_s29 + $0x8] sm:$0xff] %vm3667_vm1, %v6226_v9 }

</bundles_post_ra>
